<compile_context>
chip_gen: v7x
topology: tpu7x:2x2x1
jax: 0.10.0
libtpu: 0.0.40
codegen_flags: <defaults>
</compile_context>

<pallas_src>
import jax
import jax.numpy as jnp
from jax.experimental import pallas as pl
from jax.experimental.pallas import tpu as pltpu

# ----------------------------- configuration -----------------------------
B = 2                 # batch
C = 3                 # image channels
IMG = 32              # image H = W
PATCH = 8             # patch size
NUM_PATCHES = (IMG // PATCH) ** 2            # 16
PATCH_DIM = C * PATCH * PATCH                # 192 (pixel_values_per_patch)

ENC_DIM = 32
ENC_DEPTH = 2
ENC_HEADS = 4
ENC_DIM_HEAD = 8
ENC_MLP = 64
ENC_INNER = ENC_HEADS * ENC_DIM_HEAD         # 32
POOL = "cls"          # encoder.pool

DEC_DIM = 24          # != ENC_DIM -> enc_to_dec is a real Linear
DEC_DEPTH = 1
DEC_HEADS = 4
DEC_DIM_HEAD = 8
DEC_INNER = DEC_HEADS * DEC_DIM_HEAD         # 32

MASK_RATIO = 0.75
NUM_MASKED = int(MASK_RATIO * NUM_PATCHES)   # 12
NUM_UNMASKED = NUM_PATCHES - NUM_MASKED      # 4

PE_KEYS = ("ln1_g", "ln1_b", "w", "b", "ln2_g", "ln2_b")
TB_KEYS = ("ln1_g", "ln1_b", "w_qkv", "w_o", "b_o",
           "ln2_g", "ln2_b", "w1", "b1", "w2", "b2")


# ----------------------------- in-kernel math -----------------------------
def _layernorm(x, g, b, eps=1e-5):
    mu = jnp.mean(x, axis=-1, keepdims=True)
    var = jnp.mean((x - mu) ** 2, axis=-1, keepdims=True)
    return (x - mu) * jax.lax.rsqrt(var + eps) * g + b


def _softmax(x):
    m = jnp.max(x, axis=-1, keepdims=True)
    e = jnp.exp(x - m)
    return e / jnp.sum(e, axis=-1, keepdims=True)


def _erf(x):
    # Abramowitz & Stegun 7.1.26 rational approximation (max abs err 1.5e-7).
    # TODO(synk): polynomial erf instead of exact erf; difference < f32 eps.
    a1, a2, a3, a4, a5 = 0.254829592, -0.284496736, 1.421413741, -1.453152027, 1.061405429
    p = 0.3275911
    s = jnp.where(x >= 0.0, 1.0, -1.0)
    ax = jnp.abs(x)
    t = 1.0 / (1.0 + p * ax)
    y = 1.0 - (((((a5 * t + a4) * t) + a3) * t + a2) * t + a1) * t * jnp.exp(-ax * ax)
    return s * y


def _gelu(x):
    # erf-based GELU, matching torch.nn.GELU() default
    return 0.5 * x * (1.0 + _erf(x * 0.7071067811865476))


# ----------------------------- fused kernel pieces -----------------------------
def _transformer_layer(x2d, batch, n_tok, heads, dim_head, p, attn_scr):
    """PreNorm(Attention)+residual, PreNorm(FFN)+residual on (batch*n_tok, dim).

    Attention is batched over `batch` via einsum per head; per-head outputs are
    packed into `attn_scr` so the output projection is a single full-width
    (rows, inner) @ (inner, dim) matmul.
    """
    rows = batch * n_tok
    inner = heads * dim_head
    scale = dim_head ** -0.5

    # --- attention branch (PreNorm) ---
    h = _layernorm(x2d, p["ln1_g"][...], p["ln1_b"][...])
    qkv = jnp.dot(h, p["w_qkv"][...], preferred_element_type=jnp.float32)   # (rows, 3*inner)
    qkv3 = qkv.reshape(batch, n_tok, 3 * inner)
    for hd in range(heads):                                                  # static unroll
        q = qkv3[:, :, hd * dim_head:(hd + 1) * dim_head]
        k = qkv3[:, :, inner + hd * dim_head:inner + (hd + 1) * dim_head]
        v = qkv3[:, :, 2 * inner + hd * dim_head:2 * inner + (hd + 1) * dim_head]
        dots = jnp.einsum("bqd,bkd->bqk", q, k,
                          preferred_element_type=jnp.float32) * scale        # (B, N, N)
        attn = _softmax(dots)
        out_h = jnp.einsum("bqk,bkd->bqd", attn, v,
                           preferred_element_type=jnp.float32)               # (B, N, dh)
        attn_scr[0:rows, hd * dim_head:(hd + 1) * dim_head] = out_h.reshape(rows, dim_head)
    attn_flat = attn_scr[0:rows, 0:inner]                                    # (rows, inner)
    attn_out = jnp.dot(attn_flat, p["w_o"][...],
                       preferred_element_type=jnp.float32) + p["b_o"][...]
    x1 = x2d + attn_out

    # --- feed-forward branch (PreNorm) ---
    h2 = _layernorm(x1, p["ln2_g"][...], p["ln2_b"][...])
    ff = jnp.dot(h2, p["w1"][...], preferred_element_type=jnp.float32) + p["b1"][...]
    ff = _gelu(ff)
    ff = jnp.dot(ff, p["w2"][...], preferred_element_type=jnp.float32) + p["b2"][...]
    return x1 + ff


def _fused_mae_kernel(*refs):
    # ---- unpack positional refs (inputs, output, scratch) ----
    it = iter(refs)
    nxt = lambda: next(it)
    u_idx = nxt()                         # SMEM int32 (B, NUM_UNMASKED)
    m_idx = nxt()                         # SMEM int32 (B, NUM_MASKED)
    patches = nxt()                       # (B*NP, PATCH_DIM)
    pos = nxt()                           # (NP, ENC_DIM)
    pe = {k: nxt() for k in PE_KEYS}
    enc_layers = [{k: nxt() for k in TB_KEYS} for _ in range(ENC_DEPTH)]
    e2d_w = nxt(); e2d_b = nxt()
    mask_tok = nxt()                      # (1, DEC_DIM)
    dec_pos = nxt()                       # (NP, DEC_DIM)
    dec_layers = [{k: nxt() for k in TB_KEYS} for _ in range(DEC_DEPTH)]
    pix_w = nxt(); pix_b = nxt()
    o_ref = nxt()                         # (1, 1) loss output
    up_scr = nxt()                        # (B*NU, PATCH_DIM)   gathered unmasked patches
    upos_scr = nxt()                      # (B*NU, ENC_DIM)     gathered encoder pos rows
    mp_scr = nxt()                        # (B*NM, PATCH_DIM)   gathered masked patches
    attn_scr = nxt()                      # (B*NP, INNER)       per-head attention packing
    dec_scr = nxt()                       # (B*NP, DEC_DIM)     full decoder sequence
    mdec_scr = nxt()                      # (B*NM, DEC_DIM)     gathered masked dec tokens

    # ---- gather unmasked patch rows + their positional embedding rows ----
    for b in range(B):
        for j in range(NUM_UNMASKED):
            pi = u_idx[b, j]
            r = b * NUM_UNMASKED + j
            up_scr[pl.ds(r, 1), :] = patches[pl.ds(b * NUM_PATCHES + pi, 1), :]
            upos_scr[pl.ds(r, 1), :] = pos[pl.ds(pi, 1), :]

    # ---- patch embedding (LN -> Linear -> LN) on the unmasked rows only ----
    # (row-wise ops commute with the gather, so this matches embed-then-gather)
    xp = up_scr[...]
    h = _layernorm(xp, pe["ln1_g"][...], pe["ln1_b"][...])
    tok = jnp.dot(h, pe["w"][...], preferred_element_type=jnp.float32) + pe["b"][...]
    tok = _layernorm(tok, pe["ln2_g"][...], pe["ln2_b"][...])
    tok = tok + upos_scr[...]                                   # + encoder pos embedding

    # ---- encoder transformer (all layers inside the same kernel) ----
    x_enc = tok                                                 # (B*NU, ENC_DIM)
    for lp in enc_layers:
        x_enc = _transformer_layer(x_enc, B, NUM_UNMASKED, ENC_HEADS, ENC_DIM_HEAD,
                                   lp, attn_scr)

    # ---- enc_to_dec ----
    dec_tok = jnp.dot(x_enc, e2d_w[...], preferred_element_type=jnp.float32) + e2d_b[...]

    # ---- scatter unmasked decoder tokens and mask tokens into the full sequence ----
    mask_tok_v = mask_tok[...]                                  # hoisted (1, DEC_DIM)
    for b in range(B):
        for j in range(NUM_UNMASKED):
            pi = u_idx[b, j]
            r = b * NUM_UNMASKED + j
            dec_scr[pl.ds(b * NUM_PATCHES + pi, 1), :] = (
                dec_tok[r:r + 1, :] + dec_pos[pl.ds(pi, 1), :])
        for i in range(NUM_MASKED):
            pi = m_idx[b, i]
            dec_scr[pl.ds(b * NUM_PATCHES + pi, 1), :] = (
                mask_tok_v + dec_pos[pl.ds(pi, 1), :])
            # reconstruction target: raw masked patches
            mp_scr[pl.ds(b * NUM_MASKED + i, 1), :] = patches[pl.ds(b * NUM_PATCHES + pi, 1), :]

    # ---- decoder transformer ----
    x_dec = dec_scr[...]                                        # (B*NP, DEC_DIM)
    for lp in dec_layers:
        x_dec = _transformer_layer(x_dec, B, NUM_PATCHES, DEC_HEADS, DEC_DIM_HEAD,
                                   lp, attn_scr)

    # ---- gather masked decoder tokens ----
    dec_scr[...] = x_dec
    for b in range(B):
        for i in range(NUM_MASKED):
            pi = m_idx[b, i]
            mdec_scr[pl.ds(b * NUM_MASKED + i, 1), :] = dec_scr[pl.ds(b * NUM_PATCHES + pi, 1), :]

    # ---- to_pixels + MSE (lane-dense 192-wide slab, scalar reduction) ----
    pred = jnp.dot(mdec_scr[...], pix_w[...], preferred_element_type=jnp.float32) + pix_b[...]
    diff = pred - mp_scr[...]
    sq = diff * diff
    row = jnp.sum(sq, axis=1, keepdims=True)
    o_ref[...] = jnp.sum(row, axis=0, keepdims=True) * (1.0 / float(B * NUM_MASKED * PATCH_DIM))


# ----------------------------- parameters -----------------------------
def init_transformer_params(key, depth, dim, heads, dim_head, mlp_dim):
    inner = heads * dim_head
    layers = []
    for _ in range(depth):
        key, k1, k2, k3, k4 = jax.random.split(key, 5)
        layers.append(dict(
            ln1_g=jnp.ones((1, dim), jnp.float32),
            ln1_b=jnp.zeros((1, dim), jnp.float32),
            w_qkv=0.02 * jax.random.normal(k1, (dim, 3 * inner), jnp.float32),
            w_o=0.02 * jax.random.normal(k2, (inner, dim), jnp.float32),
            b_o=jnp.zeros((1, dim), jnp.float32),
            ln2_g=jnp.ones((1, dim), jnp.float32),
            ln2_b=jnp.zeros((1, dim), jnp.float32),
            w1=0.02 * jax.random.normal(k3, (dim, mlp_dim), jnp.float32),
            b1=jnp.zeros((1, mlp_dim), jnp.float32),
            w2=0.02 * jax.random.normal(k4, (mlp_dim, dim), jnp.float32),
            b2=jnp.zeros((1, dim), jnp.float32),
        ))
    return layers


def init_params(key):
    ks = jax.random.split(key, 8)
    return dict(
        pos_embedding=0.02 * jax.random.normal(
            ks[0], (1, NUM_PATCHES + 1, ENC_DIM), jnp.float32),
        patch_emb=dict(
            ln1_g=jnp.ones((1, PATCH_DIM), jnp.float32),
            ln1_b=jnp.zeros((1, PATCH_DIM), jnp.float32),
            w=0.02 * jax.random.normal(ks[1], (PATCH_DIM, ENC_DIM), jnp.float32),
            b=jnp.zeros((1, ENC_DIM), jnp.float32),
            ln2_g=jnp.ones((1, ENC_DIM), jnp.float32),
            ln2_b=jnp.zeros((1, ENC_DIM), jnp.float32),
        ),
        enc_layers=init_transformer_params(
            ks[2], ENC_DEPTH, ENC_DIM, ENC_HEADS, ENC_DIM_HEAD, ENC_MLP),
        enc_to_dec_w=0.02 * jax.random.normal(ks[3], (ENC_DIM, DEC_DIM), jnp.float32),
        enc_to_dec_b=jnp.zeros((1, DEC_DIM), jnp.float32),
        mask_token=jax.random.normal(ks[4], (1, DEC_DIM), jnp.float32),
        dec_layers=init_transformer_params(
            ks[5], DEC_DEPTH, DEC_DIM, DEC_HEADS, DEC_DIM_HEAD, DEC_DIM * 4),
        dec_pos_emb=0.02 * jax.random.normal(ks[6], (NUM_PATCHES, DEC_DIM), jnp.float32),
        to_pixels_w=0.02 * jax.random.normal(ks[7], (DEC_DIM, PATCH_DIM), jnp.float32),
        to_pixels_b=jnp.zeros((1, PATCH_DIM), jnp.float32),
    )


# ----------------------------- MAE forward -----------------------------
def mae_forward(img, params, mask_key):
    Bb = img.shape[0]

    # to_patch: 'b c (h p1) (w p2) -> b (h w) (p1 p2 c)'   (pure layout glue)
    x = img.reshape(Bb, C, IMG // PATCH, PATCH, IMG // PATCH, PATCH)
    x = x.transpose(0, 2, 4, 3, 5, 1)
    patches = x.reshape(Bb * NUM_PATCHES, PATCH_DIM)

    # random masking indices (glue: rand + argsort); fed to the kernel via SMEM
    rand = jax.random.uniform(mask_key, (Bb, NUM_PATCHES))
    rand_indices = jnp.argsort(rand, axis=-1).astype(jnp.int32)
    masked_indices = rand_indices[:, :NUM_MASKED]
    unmasked_indices = rand_indices[:, NUM_MASKED:]

    if POOL == "cls":
        pos = params["pos_embedding"][0, 1:NUM_PATCHES + 1]
    else:
        # TODO(synk): the reference 'mean' branch adds a (1, NP+1, dim) table to
        # (B, NP, dim) tokens (latent broadcast bug); use the first NP rows here.
        pos = params["pos_embedding"][0, :NUM_PATCHES]

    inputs = [unmasked_indices, masked_indices, patches, pos]
    inputs += [params["patch_emb"][k] for k in PE_KEYS]
    for layer in params["enc_layers"]:
        inputs += [layer[k] for k in TB_KEYS]
    inputs += [params["enc_to_dec_w"], params["enc_to_dec_b"],
               params["mask_token"], params["dec_pos_emb"]]
    for layer in params["dec_layers"]:
        inputs += [layer[k] for k in TB_KEYS]
    inputs += [params["to_pixels_w"], params["to_pixels_b"]]

    in_specs = ([pl.BlockSpec(memory_space=pltpu.MemorySpace.SMEM)] * 2
                + [pl.BlockSpec(memory_space=pltpu.MemorySpace.VMEM)] * (len(inputs) - 2))

    out = pl.pallas_call(
        _fused_mae_kernel,
        out_shape=jax.ShapeDtypeStruct((1, 1), jnp.float32),
        in_specs=in_specs,
        out_specs=pl.BlockSpec(memory_space=pltpu.MemorySpace.VMEM),
        scratch_shapes=[
            pltpu.VMEM((B * NUM_UNMASKED, PATCH_DIM), jnp.float32),   # up_scr
            pltpu.VMEM((B * NUM_UNMASKED, ENC_DIM), jnp.float32),     # upos_scr
            pltpu.VMEM((B * NUM_MASKED, PATCH_DIM), jnp.float32),     # mp_scr
            pltpu.VMEM((B * NUM_PATCHES, ENC_INNER), jnp.float32),    # attn_scr
            pltpu.VMEM((B * NUM_PATCHES, DEC_DIM), jnp.float32),      # dec_scr
            pltpu.VMEM((B * NUM_MASKED, DEC_DIM), jnp.float32),       # mdec_scr
        ],
        compiler_params=pltpu.CompilerParams(vmem_limit_bytes=32 * 1024 * 1024),
    )(*inputs)
    return out[0, 0]


# ----------------------------- main -----------------------------
if __name__ == "__main__":
    key = jax.random.PRNGKey(0)
    k_img, k_param, k_mask = jax.random.split(key, 3)

    img = jax.random.normal(k_img, (B, C, IMG, IMG), jnp.float32)
    params = init_params(k_param)

    loss = jax.jit(mae_forward)(img, params, k_mask)
    loss = jax.block_until_ready(loss)
    assert loss.shape == () and bool(jnp.isfinite(loss))
    print("KERNEL_OK")
</pallas_src>

<mosaic_0001>
module attributes {stable_mosaic.version = 11 : i64} {
  func.func @_fused_mae_kernel(%arg0: memref<2x4xi32, #tpu.memory_space<smem>>, %arg1: memref<2x12xi32, #tpu.memory_space<smem>>, %arg2: memref<32x192xf32, #tpu.memory_space<vmem>>, %arg3: memref<16x32xf32, #tpu.memory_space<vmem>>, %arg4: memref<1x192xf32, #tpu.memory_space<vmem>>, %arg5: memref<1x192xf32, #tpu.memory_space<vmem>>, %arg6: memref<192x32xf32, #tpu.memory_space<vmem>>, %arg7: memref<1x32xf32, #tpu.memory_space<vmem>>, %arg8: memref<1x32xf32, #tpu.memory_space<vmem>>, %arg9: memref<1x32xf32, #tpu.memory_space<vmem>>, %arg10: memref<1x32xf32, #tpu.memory_space<vmem>>, %arg11: memref<1x32xf32, #tpu.memory_space<vmem>>, %arg12: memref<32x96xf32, #tpu.memory_space<vmem>>, %arg13: memref<32x32xf32, #tpu.memory_space<vmem>>, %arg14: memref<1x32xf32, #tpu.memory_space<vmem>>, %arg15: memref<1x32xf32, #tpu.memory_space<vmem>>, %arg16: memref<1x32xf32, #tpu.memory_space<vmem>>, %arg17: memref<32x64xf32, #tpu.memory_space<vmem>>, %arg18: memref<1x64xf32, #tpu.memory_space<vmem>>, %arg19: memref<64x32xf32, #tpu.memory_space<vmem>>, %arg20: memref<1x32xf32, #tpu.memory_space<vmem>>, %arg21: memref<1x32xf32, #tpu.memory_space<vmem>>, %arg22: memref<1x32xf32, #tpu.memory_space<vmem>>, %arg23: memref<32x96xf32, #tpu.memory_space<vmem>>, %arg24: memref<32x32xf32, #tpu.memory_space<vmem>>, %arg25: memref<1x32xf32, #tpu.memory_space<vmem>>, %arg26: memref<1x32xf32, #tpu.memory_space<vmem>>, %arg27: memref<1x32xf32, #tpu.memory_space<vmem>>, %arg28: memref<32x64xf32, #tpu.memory_space<vmem>>, %arg29: memref<1x64xf32, #tpu.memory_space<vmem>>, %arg30: memref<64x32xf32, #tpu.memory_space<vmem>>, %arg31: memref<1x32xf32, #tpu.memory_space<vmem>>, %arg32: memref<32x24xf32, #tpu.memory_space<vmem>>, %arg33: memref<1x24xf32, #tpu.memory_space<vmem>>, %arg34: memref<1x24xf32, #tpu.memory_space<vmem>>, %arg35: memref<16x24xf32, #tpu.memory_space<vmem>>, %arg36: memref<1x24xf32, #tpu.memory_space<vmem>>, %arg37: memref<1x24xf32, #tpu.memory_space<vmem>>, %arg38: memref<24x96xf32, #tpu.memory_space<vmem>>, %arg39: memref<32x24xf32, #tpu.memory_space<vmem>>, %arg40: memref<1x24xf32, #tpu.memory_space<vmem>>, %arg41: memref<1x24xf32, #tpu.memory_space<vmem>>, %arg42: memref<1x24xf32, #tpu.memory_space<vmem>>, %arg43: memref<24x96xf32, #tpu.memory_space<vmem>>, %arg44: memref<1x96xf32, #tpu.memory_space<vmem>>, %arg45: memref<96x24xf32, #tpu.memory_space<vmem>>, %arg46: memref<1x24xf32, #tpu.memory_space<vmem>>, %arg47: memref<24x192xf32, #tpu.memory_space<vmem>>, %arg48: memref<1x192xf32, #tpu.memory_space<vmem>>, %arg49: memref<1x1xf32, #tpu.memory_space<vmem>>, %arg50: memref<8x192xf32, #tpu.memory_space<vmem>>, %arg51: memref<8x32xf32, #tpu.memory_space<vmem>>, %arg52: memref<24x192xf32, #tpu.memory_space<vmem>>, %arg53: memref<32x32xf32, #tpu.memory_space<vmem>>, %arg54: memref<32x24xf32, #tpu.memory_space<vmem>>, %arg55: memref<24x24xf32, #tpu.memory_space<vmem>>) attributes {dimension_semantics = [], scalar_prefetch = 0 : i64, scratch_operands = 6 : i64, tpu.core_type = #tpu.core_type<tc>} {
    %c0 = arith.constant 0 : index
    %c0_0 = arith.constant 0 : index
    %0 = memref.load %arg0[%c0, %c0_0] : memref<2x4xi32, #tpu.memory_space<smem>>
    %c0_i32 = arith.constant 0 : i32
    %1 = arith.addi %c0_i32, %0 : i32
    %2 = arith.index_cast %1 : i32 to index
    %c0_1 = arith.constant 0 : index
    %3 = vector.load %arg2[%2, %c0_1] : memref<32x192xf32, #tpu.memory_space<vmem>>, vector<1x192xf32>
    %c0_2 = arith.constant 0 : index
    %c0_3 = arith.constant 0 : index
    %4 = vector.load %arg50[%c0_2, %c0_3] : memref<8x192xf32, #tpu.memory_space<vmem>>, vector<1x192xf32>
    tpu.vector_store %arg50[%c0_2, %c0_3], %3 {strides = array<i32>} : memref<8x192xf32, #tpu.memory_space<vmem>>, vector<1x192xf32>,
    %5 = arith.index_cast %0 : i32 to index
    %c0_4 = arith.constant 0 : index
    %6 = vector.load %arg3[%5, %c0_4] : memref<16x32xf32, #tpu.memory_space<vmem>>, vector<1x32xf32>
    %c0_5 = arith.constant 0 : index
    %c0_6 = arith.constant 0 : index
    %7 = vector.load %arg51[%c0_5, %c0_6] : memref<8x32xf32, #tpu.memory_space<vmem>>, vector<1x32xf32>
    tpu.vector_store %arg51[%c0_5, %c0_6], %6 {strides = array<i32>} : memref<8x32xf32, #tpu.memory_space<vmem>>, vector<1x32xf32>,
    %c0_7 = arith.constant 0 : index
    %c1 = arith.constant 1 : index
    %8 = memref.load %arg0[%c0_7, %c1] : memref<2x4xi32, #tpu.memory_space<smem>>
    %c0_i32_8 = arith.constant 0 : i32
    %9 = arith.addi %c0_i32_8, %8 : i32
    %10 = arith.index_cast %9 : i32 to index
    %c0_9 = arith.constant 0 : index
    %11 = vector.load %arg2[%10, %c0_9] : memref<32x192xf32, #tpu.memory_space<vmem>>, vector<1x192xf32>
    %c1_10 = arith.constant 1 : index
    %c0_11 = arith.constant 0 : index
    %12 = vector.load %arg50[%c1_10, %c0_11] : memref<8x192xf32, #tpu.memory_space<vmem>>, vector<1x192xf32>
    tpu.vector_store %arg50[%c1_10, %c0_11], %11 {strides = array<i32>} : memref<8x192xf32, #tpu.memory_space<vmem>>, vector<1x192xf32>,
    %13 = arith.index_cast %8 : i32 to index
    %c0_12 = arith.constant 0 : index
    %14 = vector.load %arg3[%13, %c0_12] : memref<16x32xf32, #tpu.memory_space<vmem>>, vector<1x32xf32>
    %c1_13 = arith.constant 1 : index
    %c0_14 = arith.constant 0 : index
    %15 = vector.load %arg51[%c1_13, %c0_14] : memref<8x32xf32, #tpu.memory_space<vmem>>, vector<1x32xf32>
    tpu.vector_store %arg51[%c1_13, %c0_14], %14 {strides = array<i32>} : memref<8x32xf32, #tpu.memory_space<vmem>>, vector<1x32xf32>,
    %c0_15 = arith.constant 0 : index
    %c2 = arith.constant 2 : index
    %16 = memref.load %arg0[%c0_15, %c2] : memref<2x4xi32, #tpu.memory_space<smem>>
    %c0_i32_16 = arith.constant 0 : i32
    %17 = arith.addi %c0_i32_16, %16 : i32
    %18 = arith.index_cast %17 : i32 to index
    %c0_17 = arith.constant 0 : index
    %19 = vector.load %arg2[%18, %c0_17] : memref<32x192xf32, #tpu.memory_space<vmem>>, vector<1x192xf32>
    %c2_18 = arith.constant 2 : index
    %c0_19 = arith.constant 0 : index
    %20 = vector.load %arg50[%c2_18, %c0_19] : memref<8x192xf32, #tpu.memory_space<vmem>>, vector<1x192xf32>
    tpu.vector_store %arg50[%c2_18, %c0_19], %19 {strides = array<i32>} : memref<8x192xf32, #tpu.memory_space<vmem>>, vector<1x192xf32>,
    %21 = arith.index_cast %16 : i32 to index
    %c0_20 = arith.constant 0 : index
    %22 = vector.load %arg3[%21, %c0_20] : memref<16x32xf32, #tpu.memory_space<vmem>>, vector<1x32xf32>
    %c2_21 = arith.constant 2 : index
    %c0_22 = arith.constant 0 : index
    %23 = vector.load %arg51[%c2_21, %c0_22] : memref<8x32xf32, #tpu.memory_space<vmem>>, vector<1x32xf32>
    tpu.vector_store %arg51[%c2_21, %c0_22], %22 {strides = array<i32>} : memref<8x32xf32, #tpu.memory_space<vmem>>, vector<1x32xf32>,
    %c0_23 = arith.constant 0 : index
    %c3 = arith.constant 3 : index
    %24 = memref.load %arg0[%c0_23, %c3] : memref<2x4xi32, #tpu.memory_space<smem>>
    %c0_i32_24 = arith.constant 0 : i32
    %25 = arith.addi %c0_i32_24, %24 : i32
    %26 = arith.index_cast %25 : i32 to index
    %c0_25 = arith.constant 0 : index
    %27 = vector.load %arg2[%26, %c0_25] : memref<32x192xf32, #tpu.memory_space<vmem>>, vector<1x192xf32>
    %c3_26 = arith.constant 3 : index
    %c0_27 = arith.constant 0 : index
    %28 = vector.load %arg50[%c3_26, %c0_27] : memref<8x192xf32, #tpu.memory_space<vmem>>, vector<1x192xf32>
    tpu.vector_store %arg50[%c3_26, %c0_27], %27 {strides = array<i32>} : memref<8x192xf32, #tpu.memory_space<vmem>>, vector<1x192xf32>,
    %29 = arith.index_cast %24 : i32 to index
    %c0_28 = arith.constant 0 : index
    %30 = vector.load %arg3[%29, %c0_28] : memref<16x32xf32, #tpu.memory_space<vmem>>, vector<1x32xf32>
    %c3_29 = arith.constant 3 : index
    %c0_30 = arith.constant 0 : index
    %31 = vector.load %arg51[%c3_29, %c0_30] : memref<8x32xf32, #tpu.memory_space<vmem>>, vector<1x32xf32>
    tpu.vector_store %arg51[%c3_29, %c0_30], %30 {strides = array<i32>} : memref<8x32xf32, #tpu.memory_space<vmem>>, vector<1x32xf32>,
    %c1_31 = arith.constant 1 : index
    %c0_32 = arith.constant 0 : index
    %32 = memref.load %arg0[%c1_31, %c0_32] : memref<2x4xi32, #tpu.memory_space<smem>>
    %c16_i32 = arith.constant 16 : i32
    %33 = arith.addi %c16_i32, %32 : i32
    %34 = arith.index_cast %33 : i32 to index
    %c0_33 = arith.constant 0 : index
    %35 = vector.load %arg2[%34, %c0_33] : memref<32x192xf32, #tpu.memory_space<vmem>>, vector<1x192xf32>
    %c4 = arith.constant 4 : index
    %c0_34 = arith.constant 0 : index
    %36 = vector.load %arg50[%c4, %c0_34] : memref<8x192xf32, #tpu.memory_space<vmem>>, vector<1x192xf32>
    tpu.vector_store %arg50[%c4, %c0_34], %35 {strides = array<i32>} : memref<8x192xf32, #tpu.memory_space<vmem>>, vector<1x192xf32>,
    %37 = arith.index_cast %32 : i32 to index
    %c0_35 = arith.constant 0 : index
    %38 = vector.load %arg3[%37, %c0_35] : memref<16x32xf32, #tpu.memory_space<vmem>>, vector<1x32xf32>
    %c4_36 = arith.constant 4 : index
    %c0_37 = arith.constant 0 : index
    %39 = vector.load %arg51[%c4_36, %c0_37] : memref<8x32xf32, #tpu.memory_space<vmem>>, vector<1x32xf32>
    tpu.vector_store %arg51[%c4_36, %c0_37], %38 {strides = array<i32>} : memref<8x32xf32, #tpu.memory_space<vmem>>, vector<1x32xf32>,
    %c1_38 = arith.constant 1 : index
    %c1_39 = arith.constant 1 : index
    %40 = memref.load %arg0[%c1_38, %c1_39] : memref<2x4xi32, #tpu.memory_space<smem>>
    %c16_i32_40 = arith.constant 16 : i32
    %41 = arith.addi %c16_i32_40, %40 : i32
    %42 = arith.index_cast %41 : i32 to index
    %c0_41 = arith.constant 0 : index
    %43 = vector.load %arg2[%42, %c0_41] : memref<32x192xf32, #tpu.memory_space<vmem>>, vector<1x192xf32>
    %c5 = arith.constant 5 : index
    %c0_42 = arith.constant 0 : index
    %44 = vector.load %arg50[%c5, %c0_42] : memref<8x192xf32, #tpu.memory_space<vmem>>, vector<1x192xf32>
    tpu.vector_store %arg50[%c5, %c0_42], %43 {strides = array<i32>} : memref<8x192xf32, #tpu.memory_space<vmem>>, vector<1x192xf32>,
    %45 = arith.index_cast %40 : i32 to index
    %c0_43 = arith.constant 0 : index
    %46 = vector.load %arg3[%45, %c0_43] : memref<16x32xf32, #tpu.memory_space<vmem>>, vector<1x32xf32>
    %c5_44 = arith.constant 5 : index
    %c0_45 = arith.constant 0 : index
    %47 = vector.load %arg51[%c5_44, %c0_45] : memref<8x32xf32, #tpu.memory_space<vmem>>, vector<1x32xf32>
    tpu.vector_store %arg51[%c5_44, %c0_45], %46 {strides = array<i32>} : memref<8x32xf32, #tpu.memory_space<vmem>>, vector<1x32xf32>,
    %c1_46 = arith.constant 1 : index
    %c2_47 = arith.constant 2 : index
    %48 = memref.load %arg0[%c1_46, %c2_47] : memref<2x4xi32, #tpu.memory_space<smem>>
    %c16_i32_48 = arith.constant 16 : i32
    %49 = arith.addi %c16_i32_48, %48 : i32
    %50 = arith.index_cast %49 : i32 to index
    %c0_49 = arith.constant 0 : index
    %51 = vector.load %arg2[%50, %c0_49] : memref<32x192xf32, #tpu.memory_space<vmem>>, vector<1x192xf32>
    %c6 = arith.constant 6 : index
    %c0_50 = arith.constant 0 : index
    %52 = vector.load %arg50[%c6, %c0_50] : memref<8x192xf32, #tpu.memory_space<vmem>>, vector<1x192xf32>
    tpu.vector_store %arg50[%c6, %c0_50], %51 {strides = array<i32>} : memref<8x192xf32, #tpu.memory_space<vmem>>, vector<1x192xf32>,
    %53 = arith.index_cast %48 : i32 to index
    %c0_51 = arith.constant 0 : index
    %54 = vector.load %arg3[%53, %c0_51] : memref<16x32xf32, #tpu.memory_space<vmem>>, vector<1x32xf32>
    %c6_52 = arith.constant 6 : index
    %c0_53 = arith.constant 0 : index
    %55 = vector.load %arg51[%c6_52, %c0_53] : memref<8x32xf32, #tpu.memory_space<vmem>>, vector<1x32xf32>
    tpu.vector_store %arg51[%c6_52, %c0_53], %54 {strides = array<i32>} : memref<8x32xf32, #tpu.memory_space<vmem>>, vector<1x32xf32>,
    %c1_54 = arith.constant 1 : index
    %c3_55 = arith.constant 3 : index
    %56 = memref.load %arg0[%c1_54, %c3_55] : memref<2x4xi32, #tpu.memory_space<smem>>
    %c16_i32_56 = arith.constant 16 : i32
    %57 = arith.addi %c16_i32_56, %56 : i32
    %58 = arith.index_cast %57 : i32 to index
    %c0_57 = arith.constant 0 : index
    %59 = vector.load %arg2[%58, %c0_57] : memref<32x192xf32, #tpu.memory_space<vmem>>, vector<1x192xf32>
    %c7 = arith.constant 7 : index
    %c0_58 = arith.constant 0 : index
    %60 = vector.load %arg50[%c7, %c0_58] : memref<8x192xf32, #tpu.memory_space<vmem>>, vector<1x192xf32>
    tpu.vector_store %arg50[%c7, %c0_58], %59 {strides = array<i32>} : memref<8x192xf32, #tpu.memory_space<vmem>>, vector<1x192xf32>,
    %61 = arith.index_cast %56 : i32 to index
    %c0_59 = arith.constant 0 : index
    %62 = vector.load %arg3[%61, %c0_59] : memref<16x32xf32, #tpu.memory_space<vmem>>, vector<1x32xf32>
    %c7_60 = arith.constant 7 : index
    %c0_61 = arith.constant 0 : index
    %63 = vector.load %arg51[%c7_60, %c0_61] : memref<8x32xf32, #tpu.memory_space<vmem>>, vector<1x32xf32>
    tpu.vector_store %arg51[%c7_60, %c0_61], %62 {strides = array<i32>} : memref<8x32xf32, #tpu.memory_space<vmem>>, vector<1x32xf32>,
    %c0_62 = arith.constant 0 : index
    %c0_63 = arith.constant 0 : index
    %64 = vector.load %arg50[%c0_62, %c0_63] : memref<8x192xf32, #tpu.memory_space<vmem>>, vector<8x192xf32>
    %c0_64 = arith.constant 0 : index
    %c0_65 = arith.constant 0 : index
    %65 = vector.load %arg4[%c0_64, %c0_65] : memref<1x192xf32, #tpu.memory_space<vmem>>, vector<1x192xf32>
    %c0_66 = arith.constant 0 : index
    %c0_67 = arith.constant 0 : index
    %66 = vector.load %arg5[%c0_66, %c0_67] : memref<1x192xf32, #tpu.memory_space<vmem>>, vector<1x192xf32>
    %cst = arith.constant dense<0.000000e+00> : vector<8xf32>
    %67 = vector.multi_reduction <add>, %64, %cst [1] : vector<8x192xf32> to vector<8xf32>
    %68 = vector.shape_cast %67 : vector<8xf32> to vector<8x1xf32>
    %cst_68 = arith.constant 1.920000e+02 : f32
    %69 = vector.broadcast %cst_68 : f32 to vector<8x1xf32>
    %70 = arith.divf %68, %69 : vector<8x1xf32>
    %71 = vector.broadcast %70 : vector<8x1xf32> to vector<8x192xf32>
    %72 = arith.subf %64, %71 : vector<8x192xf32>
    %73 = arith.mulf %72, %72 : vector<8x192xf32>
    %cst_69 = arith.constant dense<0.000000e+00> : vector<8xf32>
    %74 = vector.multi_reduction <add>, %73, %cst_69 [1] : vector<8x192xf32> to vector<8xf32>
    %75 = vector.shape_cast %74 : vector<8xf32> to vector<8x1xf32>
    %cst_70 = arith.constant 1.920000e+02 : f32
    %76 = vector.broadcast %cst_70 : f32 to vector<8x1xf32>
    %77 = arith.divf %75, %76 : vector<8x1xf32>
    %78 = vector.broadcast %70 : vector<8x1xf32> to vector<8x192xf32>
    %79 = arith.subf %64, %78 : vector<8x192xf32>
    %cst_71 = arith.constant 9.99999974E-6 : f32
    %80 = vector.broadcast %cst_71 : f32 to vector<8x1xf32>
    %81 = arith.addf %77, %80 : vector<8x1xf32>
    %82 = math.rsqrt %81 : vector<8x1xf32>
    %83 = vector.broadcast %82 : vector<8x1xf32> to vector<8x192xf32>
    %84 = arith.mulf %79, %83 : vector<8x192xf32>
    %85 = vector.broadcast %65 : vector<1x192xf32> to vector<8x192xf32>
    %86 = arith.mulf %84, %85 : vector<8x192xf32>
    %87 = vector.broadcast %66 : vector<1x192xf32> to vector<8x192xf32>
    %88 = arith.addf %86, %87 : vector<8x192xf32>
    %c0_72 = arith.constant 0 : index
    %c0_73 = arith.constant 0 : index
    %89 = vector.load %arg6[%c0_72, %c0_73] : memref<192x32xf32, #tpu.memory_space<vmem>>, vector<192x32xf32>
    %cst_74 = arith.constant dense<0.000000e+00> : vector<8x32xf32>
    %90 = tpu.matmul %88, %89, %cst_74 {dimension_numbers = #tpu.dot_dimension_numbers<[1], [0], [0], [1], [0, 0, 1, 1], [], []>} : vector<8x192xf32>, vector<192x32xf32>, vector<8x32xf32> -> vector<8x32xf32>
    %c0_75 = arith.constant 0 : index
    %c0_76 = arith.constant 0 : index
    %91 = vector.load %arg7[%c0_75, %c0_76] : memref<1x32xf32, #tpu.memory_space<vmem>>, vector<1x32xf32>
    %92 = vector.broadcast %91 : vector<1x32xf32> to vector<8x32xf32>
    %93 = arith.addf %90, %92 : vector<8x32xf32>
    %c0_77 = arith.constant 0 : index
    %c0_78 = arith.constant 0 : index
    %94 = vector.load %arg8[%c0_77, %c0_78] : memref<1x32xf32, #tpu.memory_space<vmem>>, vector<1x32xf32>
    %c0_79 = arith.constant 0 : index
    %c0_80 = arith.constant 0 : index
    %95 = vector.load %arg9[%c0_79, %c0_80] : memref<1x32xf32, #tpu.memory_space<vmem>>, vector<1x32xf32>
    %cst_81 = arith.constant dense<0.000000e+00> : vector<8xf32>
    %96 = vector.multi_reduction <add>, %93, %cst_81 [1] : vector<8x32xf32> to vector<8xf32>
    %97 = vector.shape_cast %96 : vector<8xf32> to vector<8x1xf32>
    %cst_82 = arith.constant 3.200000e+01 : f32
    %98 = vector.broadcast %cst_82 : f32 to vector<8x1xf32>
    %99 = arith.divf %97, %98 : vector<8x1xf32>
    %100 = vector.broadcast %99 : vector<8x1xf32> to vector<8x32xf32>
    %101 = arith.subf %93, %100 : vector<8x32xf32>
    %102 = arith.mulf %101, %101 : vector<8x32xf32>
    %cst_83 = arith.constant dense<0.000000e+00> : vector<8xf32>
    %103 = vector.multi_reduction <add>, %102, %cst_83 [1] : vector<8x32xf32> to vector<8xf32>
    %104 = vector.shape_cast %103 : vector<8xf32> to vector<8x1xf32>
    %cst_84 = arith.constant 3.200000e+01 : f32
    %105 = vector.broadcast %cst_84 : f32 to vector<8x1xf32>
    %106 = arith.divf %104, %105 : vector<8x1xf32>
    %107 = vector.broadcast %99 : vector<8x1xf32> to vector<8x32xf32>
    %108 = arith.subf %93, %107 : vector<8x32xf32>
    %cst_85 = arith.constant 9.99999974E-6 : f32
    %109 = vector.broadcast %cst_85 : f32 to vector<8x1xf32>
    %110 = arith.addf %106, %109 : vector<8x1xf32>
    %111 = math.rsqrt %110 : vector<8x1xf32>
    %112 = vector.broadcast %111 : vector<8x1xf32> to vector<8x32xf32>
    %113 = arith.mulf %108, %112 : vector<8x32xf32>
    %114 = vector.broadcast %94 : vector<1x32xf32> to vector<8x32xf32>
    %115 = arith.mulf %113, %114 : vector<8x32xf32>
    %116 = vector.broadcast %95 : vector<1x32xf32> to vector<8x32xf32>
    %117 = arith.addf %115, %116 : vector<8x32xf32>
    %c0_86 = arith.constant 0 : index
    %c0_87 = arith.constant 0 : index
    %118 = vector.load %arg51[%c0_86, %c0_87] : memref<8x32xf32, #tpu.memory_space<vmem>>, vector<8x32xf32>
    %119 = arith.addf %117, %118 : vector<8x32xf32>
    %c0_88 = arith.constant 0 : index
    %c0_89 = arith.constant 0 : index
    %120 = vector.load %arg10[%c0_88, %c0_89] : memref<1x32xf32, #tpu.memory_space<vmem>>, vector<1x32xf32>
    %c0_90 = arith.constant 0 : index
    %c0_91 = arith.constant 0 : index
    %121 = vector.load %arg11[%c0_90, %c0_91] : memref<1x32xf32, #tpu.memory_space<vmem>>, vector<1x32xf32>
    %cst_92 = arith.constant dense<0.000000e+00> : vector<8xf32>
    %122 = vector.multi_reduction <add>, %119, %cst_92 [1] : vector<8x32xf32> to vector<8xf32>
    %123 = vector.shape_cast %122 : vector<8xf32> to vector<8x1xf32>
    %cst_93 = arith.constant 3.200000e+01 : f32
    %124 = vector.broadcast %cst_93 : f32 to vector<8x1xf32>
    %125 = arith.divf %123, %124 : vector<8x1xf32>
    %126 = vector.broadcast %125 : vector<8x1xf32> to vector<8x32xf32>
    %127 = arith.subf %119, %126 : vector<8x32xf32>
    %128 = arith.mulf %127, %127 : vector<8x32xf32>
    %cst_94 = arith.constant dense<0.000000e+00> : vector<8xf32>
    %129 = vector.multi_reduction <add>, %128, %cst_94 [1] : vector<8x32xf32> to vector<8xf32>
    %130 = vector.shape_cast %129 : vector<8xf32> to vector<8x1xf32>
    %cst_95 = arith.constant 3.200000e+01 : f32
    %131 = vector.broadcast %cst_95 : f32 to vector<8x1xf32>
    %132 = arith.divf %130, %131 : vector<8x1xf32>
    %133 = vector.broadcast %125 : vector<8x1xf32> to vector<8x32xf32>
    %134 = arith.subf %119, %133 : vector<8x32xf32>
    %cst_96 = arith.constant 9.99999974E-6 : f32
    %135 = vector.broadcast %cst_96 : f32 to vector<8x1xf32>
    %136 = arith.addf %132, %135 : vector<8x1xf32>
    %137 = math.rsqrt %136 : vector<8x1xf32>
    %138 = vector.broadcast %137 : vector<8x1xf32> to vector<8x32xf32>
    %139 = arith.mulf %134, %138 : vector<8x32xf32>
    %140 = vector.broadcast %120 : vector<1x32xf32> to vector<8x32xf32>
    %141 = arith.mulf %139, %140 : vector<8x32xf32>
    %142 = vector.broadcast %121 : vector<1x32xf32> to vector<8x32xf32>
    %143 = arith.addf %141, %142 : vector<8x32xf32>
    %c0_97 = arith.constant 0 : index
    %c0_98 = arith.constant 0 : index
    %144 = vector.load %arg12[%c0_97, %c0_98] : memref<32x96xf32, #tpu.memory_space<vmem>>, vector<32x96xf32>
    %cst_99 = arith.constant dense<0.000000e+00> : vector<8x96xf32>
    %145 = tpu.matmul %143, %144, %cst_99 {dimension_numbers = #tpu.dot_dimension_numbers<[1], [0], [0], [1], [0, 0, 1, 1], [], []>} : vector<8x32xf32>, vector<32x96xf32>, vector<8x96xf32> -> vector<8x96xf32>
    %146 = vector.shape_cast %145 : vector<8x96xf32> to vector<2x4x96xf32>
    %147 = vector.extract_strided_slice %146 {offsets = [0, 0, 0], sizes = [2, 4, 8], strides = [1, 1, 1]} : vector<2x4x96xf32> to vector<2x4x8xf32>
    %148 = vector.extract_strided_slice %146 {offsets = [0, 0, 32], sizes = [2, 4, 8], strides = [1, 1, 1]} : vector<2x4x96xf32> to vector<2x4x8xf32>
    %149 = vector.extract_strided_slice %146 {offsets = [0, 0, 64], sizes = [2, 4, 8], strides = [1, 1, 1]} : vector<2x4x96xf32> to vector<2x4x8xf32>
    "tpu.trace_start"() <{level = 10 : i32, message = "bqd,bkd->bqk"}> : () -> ()
    %cst_100 = arith.constant dense<0.000000e+00> : vector<2x4x4xf32>
    %150 = tpu.matmul %147, %148, %cst_100 {dimension_numbers = #tpu.dot_dimension_numbers<[2], [2], [1], [1], [0, 0, 0, 1, 1, 1], [0], [0]>} : vector<2x4x8xf32>, vector<2x4x8xf32>, vector<2x4x4xf32> -> vector<2x4x4xf32>
    "tpu.trace_stop"() : () -> ()
    %cst_101 = arith.constant 0.353553385 : f32
    %151 = vector.broadcast %cst_101 : f32 to vector<2x4x4xf32>
    %152 = arith.mulf %150, %151 : vector<2x4x4xf32>
    %cst_102 = arith.constant dense<0xFF800000> : vector<2x4xf32>
    %153 = vector.multi_reduction <maximumf>, %152, %cst_102 [2] : vector<2x4x4xf32> to vector<2x4xf32>
    %154 = vector.shape_cast %153 : vector<2x4xf32> to vector<2x4x1xf32>
    %155 = vector.broadcast %154 : vector<2x4x1xf32> to vector<2x4x4xf32>
    %156 = arith.subf %152, %155 : vector<2x4x4xf32>
    %157 = math.exp %156 : vector<2x4x4xf32>
    %cst_103 = arith.constant dense<0.000000e+00> : vector<2x4xf32>
    %158 = vector.multi_reduction <add>, %157, %cst_103 [2] : vector<2x4x4xf32> to vector<2x4xf32>
    %159 = vector.shape_cast %158 : vector<2x4xf32> to vector<2x4x1xf32>
    %160 = vector.broadcast %159 : vector<2x4x1xf32> to vector<2x4x4xf32>
    %161 = arith.divf %157, %160 : vector<2x4x4xf32>
    "tpu.trace_start"() <{level = 10 : i32, message = "bqk,bkd->bqd"}> : () -> ()
    %cst_104 = arith.constant dense<0.000000e+00> : vector<2x4x8xf32>
    %162 = tpu.matmul %161, %149, %cst_104 {dimension_numbers = #tpu.dot_dimension_numbers<[2], [1], [1], [2], [0, 0, 0, 1, 1, 2], [0], [0]>} : vector<2x4x4xf32>, vector<2x4x8xf32>, vector<2x4x8xf32> -> vector<2x4x8xf32>
    "tpu.trace_stop"() : () -> ()
    %163 = vector.shape_cast %162 : vector<2x4x8xf32> to vector<8x8xf32>
    %c0_105 = arith.constant 0 : index
    %c0_106 = arith.constant 0 : index
    %164 = vector.load %arg53[%c0_105, %c0_106] : memref<32x32xf32, #tpu.memory_space<vmem>>, vector<8x8xf32>
    tpu.vector_store %arg53[%c0_105, %c0_106], %163 {strides = array<i32>} : memref<32x32xf32, #tpu.memory_space<vmem>>, vector<8x8xf32>,
    %165 = vector.extract_strided_slice %146 {offsets = [0, 0, 8], sizes = [2, 4, 8], strides = [1, 1, 1]} : vector<2x4x96xf32> to vector<2x4x8xf32>
    %166 = vector.extract_strided_slice %146 {offsets = [0, 0, 40], sizes = [2, 4, 8], strides = [1, 1, 1]} : vector<2x4x96xf32> to vector<2x4x8xf32>
    %167 = vector.extract_strided_slice %146 {offsets = [0, 0, 72], sizes = [2, 4, 8], strides = [1, 1, 1]} : vector<2x4x96xf32> to vector<2x4x8xf32>
    "tpu.trace_start"() <{level = 10 : i32, message = "bqd,bkd->bqk"}> : () -> ()
    %cst_107 = arith.constant dense<0.000000e+00> : vector<2x4x4xf32>
    %168 = tpu.matmul %165, %166, %cst_107 {dimension_numbers = #tpu.dot_dimension_numbers<[2], [2], [1], [1], [0, 0, 0, 1, 1, 1], [0], [0]>} : vector<2x4x8xf32>, vector<2x4x8xf32>, vector<2x4x4xf32> -> vector<2x4x4xf32>
    "tpu.trace_stop"() : () -> ()
    %cst_108 = arith.constant 0.353553385 : f32
    %169 = vector.broadcast %cst_108 : f32 to vector<2x4x4xf32>
    %170 = arith.mulf %168, %169 : vector<2x4x4xf32>
    %cst_109 = arith.constant dense<0xFF800000> : vector<2x4xf32>
    %171 = vector.multi_reduction <maximumf>, %170, %cst_109 [2] : vector<2x4x4xf32> to vector<2x4xf32>
    %172 = vector.shape_cast %171 : vector<2x4xf32> to vector<2x4x1xf32>
    %173 = vector.broadcast %172 : vector<2x4x1xf32> to vector<2x4x4xf32>
    %174 = arith.subf %170, %173 : vector<2x4x4xf32>
    %175 = math.exp %174 : vector<2x4x4xf32>
    %cst_110 = arith.constant dense<0.000000e+00> : vector<2x4xf32>
    %176 = vector.multi_reduction <add>, %175, %cst_110 [2] : vector<2x4x4xf32> to vector<2x4xf32>
    %177 = vector.shape_cast %176 : vector<2x4xf32> to vector<2x4x1xf32>
    %178 = vector.broadcast %177 : vector<2x4x1xf32> to vector<2x4x4xf32>
    %179 = arith.divf %175, %178 : vector<2x4x4xf32>
    "tpu.trace_start"() <{level = 10 : i32, message = "bqk,bkd->bqd"}> : () -> ()
    %cst_111 = arith.constant dense<0.000000e+00> : vector<2x4x8xf32>
    %180 = tpu.matmul %179, %167, %cst_111 {dimension_numbers = #tpu.dot_dimension_numbers<[2], [1], [1], [2], [0, 0, 0, 1, 1, 2], [0], [0]>} : vector<2x4x4xf32>, vector<2x4x8xf32>, vector<2x4x8xf32> -> vector<2x4x8xf32>
    "tpu.trace_stop"() : () -> ()
    %181 = vector.shape_cast %180 : vector<2x4x8xf32> to vector<8x8xf32>
    %c0_112 = arith.constant 0 : index
    %c8 = arith.constant 8 : index
    %182 = vector.load %arg53[%c0_112, %c8] : memref<32x32xf32, #tpu.memory_space<vmem>>, vector<8x8xf32>
    tpu.vector_store %arg53[%c0_112, %c8], %181 {strides = array<i32>} : memref<32x32xf32, #tpu.memory_space<vmem>>, vector<8x8xf32>,
    %183 = vector.extract_strided_slice %146 {offsets = [0, 0, 16], sizes = [2, 4, 8], strides = [1, 1, 1]} : vector<2x4x96xf32> to vector<2x4x8xf32>
    %184 = vector.extract_strided_slice %146 {offsets = [0, 0, 48], sizes = [2, 4, 8], strides = [1, 1, 1]} : vector<2x4x96xf32> to vector<2x4x8xf32>
    %185 = vector.extract_strided_slice %146 {offsets = [0, 0, 80], sizes = [2, 4, 8], strides = [1, 1, 1]} : vector<2x4x96xf32> to vector<2x4x8xf32>
    "tpu.trace_start"() <{level = 10 : i32, message = "bqd,bkd->bqk"}> : () -> ()
    %cst_113 = arith.constant dense<0.000000e+00> : vector<2x4x4xf32>
    %186 = tpu.matmul %183, %184, %cst_113 {dimension_numbers = #tpu.dot_dimension_numbers<[2], [2], [1], [1], [0, 0, 0, 1, 1, 1], [0], [0]>} : vector<2x4x8xf32>, vector<2x4x8xf32>, vector<2x4x4xf32> -> vector<2x4x4xf32>
    "tpu.trace_stop"() : () -> ()
    %cst_114 = arith.constant 0.353553385 : f32
    %187 = vector.broadcast %cst_114 : f32 to vector<2x4x4xf32>
    %188 = arith.mulf %186, %187 : vector<2x4x4xf32>
    %cst_115 = arith.constant dense<0xFF800000> : vector<2x4xf32>
    %189 = vector.multi_reduction <maximumf>, %188, %cst_115 [2] : vector<2x4x4xf32> to vector<2x4xf32>
    %190 = vector.shape_cast %189 : vector<2x4xf32> to vector<2x4x1xf32>
    %191 = vector.broadcast %190 : vector<2x4x1xf32> to vector<2x4x4xf32>
    %192 = arith.subf %188, %191 : vector<2x4x4xf32>
    %193 = math.exp %192 : vector<2x4x4xf32>
    %cst_116 = arith.constant dense<0.000000e+00> : vector<2x4xf32>
    %194 = vector.multi_reduction <add>, %193, %cst_116 [2] : vector<2x4x4xf32> to vector<2x4xf32>
    %195 = vector.shape_cast %194 : vector<2x4xf32> to vector<2x4x1xf32>
    %196 = vector.broadcast %195 : vector<2x4x1xf32> to vector<2x4x4xf32>
    %197 = arith.divf %193, %196 : vector<2x4x4xf32>
    "tpu.trace_start"() <{level = 10 : i32, message = "bqk,bkd->bqd"}> : () -> ()
    %cst_117 = arith.constant dense<0.000000e+00> : vector<2x4x8xf32>
    %198 = tpu.matmul %197, %185, %cst_117 {dimension_numbers = #tpu.dot_dimension_numbers<[2], [1], [1], [2], [0, 0, 0, 1, 1, 2], [0], [0]>} : vector<2x4x4xf32>, vector<2x4x8xf32>, vector<2x4x8xf32> -> vector<2x4x8xf32>
    "tpu.trace_stop"() : () -> ()
    %199 = vector.shape_cast %198 : vector<2x4x8xf32> to vector<8x8xf32>
    %c0_118 = arith.constant 0 : index
    %c16 = arith.constant 16 : index
    %200 = vector.load %arg53[%c0_118, %c16] : memref<32x32xf32, #tpu.memory_space<vmem>>, vector<8x8xf32>
    tpu.vector_store %arg53[%c0_118, %c16], %199 {strides = array<i32>} : memref<32x32xf32, #tpu.memory_space<vmem>>, vector<8x8xf32>,
    %201 = vector.extract_strided_slice %146 {offsets = [0, 0, 24], sizes = [2, 4, 8], strides = [1, 1, 1]} : vector<2x4x96xf32> to vector<2x4x8xf32>
    %202 = vector.extract_strided_slice %146 {offsets = [0, 0, 56], sizes = [2, 4, 8], strides = [1, 1, 1]} : vector<2x4x96xf32> to vector<2x4x8xf32>
    %203 = vector.extract_strided_slice %146 {offsets = [0, 0, 88], sizes = [2, 4, 8], strides = [1, 1, 1]} : vector<2x4x96xf32> to vector<2x4x8xf32>
    "tpu.trace_start"() <{level = 10 : i32, message = "bqd,bkd->bqk"}> : () -> ()
    %cst_119 = arith.constant dense<0.000000e+00> : vector<2x4x4xf32>
    %204 = tpu.matmul %201, %202, %cst_119 {dimension_numbers = #tpu.dot_dimension_numbers<[2], [2], [1], [1], [0, 0, 0, 1, 1, 1], [0], [0]>} : vector<2x4x8xf32>, vector<2x4x8xf32>, vector<2x4x4xf32> -> vector<2x4x4xf32>
    "tpu.trace_stop"() : () -> ()
    %cst_120 = arith.constant 0.353553385 : f32
    %205 = vector.broadcast %cst_120 : f32 to vector<2x4x4xf32>
    %206 = arith.mulf %204, %205 : vector<2x4x4xf32>
    %cst_121 = arith.constant dense<0xFF800000> : vector<2x4xf32>
    %207 = vector.multi_reduction <maximumf>, %206, %cst_121 [2] : vector<2x4x4xf32> to vector<2x4xf32>
    %208 = vector.shape_cast %207 : vector<2x4xf32> to vector<2x4x1xf32>
    %209 = vector.broadcast %208 : vector<2x4x1xf32> to vector<2x4x4xf32>
    %210 = arith.subf %206, %209 : vector<2x4x4xf32>
    %211 = math.exp %210 : vector<2x4x4xf32>
    %cst_122 = arith.constant dense<0.000000e+00> : vector<2x4xf32>
    %212 = vector.multi_reduction <add>, %211, %cst_122 [2] : vector<2x4x4xf32> to vector<2x4xf32>
    %213 = vector.shape_cast %212 : vector<2x4xf32> to vector<2x4x1xf32>
    %214 = vector.broadcast %213 : vector<2x4x1xf32> to vector<2x4x4xf32>
    %215 = arith.divf %211, %214 : vector<2x4x4xf32>
    "tpu.trace_start"() <{level = 10 : i32, message = "bqk,bkd->bqd"}> : () -> ()
    %cst_123 = arith.constant dense<0.000000e+00> : vector<2x4x8xf32>
    %216 = tpu.matmul %215, %203, %cst_123 {dimension_numbers = #tpu.dot_dimension_numbers<[2], [1], [1], [2], [0, 0, 0, 1, 1, 2], [0], [0]>} : vector<2x4x4xf32>, vector<2x4x8xf32>, vector<2x4x8xf32> -> vector<2x4x8xf32>
    "tpu.trace_stop"() : () -> ()
    %217 = vector.shape_cast %216 : vector<2x4x8xf32> to vector<8x8xf32>
    %c0_124 = arith.constant 0 : index
    %c24 = arith.constant 24 : index
    %218 = vector.load %arg53[%c0_124, %c24] : memref<32x32xf32, #tpu.memory_space<vmem>>, vector<8x8xf32>
    tpu.vector_store %arg53[%c0_124, %c24], %217 {strides = array<i32>} : memref<32x32xf32, #tpu.memory_space<vmem>>, vector<8x8xf32>,
    %c0_125 = arith.constant 0 : index
    %c0_126 = arith.constant 0 : index
    %219 = vector.load %arg53[%c0_125, %c0_126] : memref<32x32xf32, #tpu.memory_space<vmem>>, vector<8x32xf32>
    %c0_127 = arith.constant 0 : index
    %c0_128 = arith.constant 0 : index
    %220 = vector.load %arg13[%c0_127, %c0_128] : memref<32x32xf32, #tpu.memory_space<vmem>>, vector<32x32xf32>
    %cst_129 = arith.constant dense<0.000000e+00> : vector<8x32xf32>
    %221 = tpu.matmul %219, %220, %cst_129 {dimension_numbers = #tpu.dot_dimension_numbers<[1], [0], [0], [1], [0, 0, 1, 1], [], []>} : vector<8x32xf32>, vector<32x32xf32>, vector<8x32xf32> -> vector<8x32xf32>
    %c0_130 = arith.constant 0 : index
    %c0_131 = arith.constant 0 : index
    %222 = vector.load %arg14[%c0_130, %c0_131] : memref<1x32xf32, #tpu.memory_space<vmem>>, vector<1x32xf32>
    %223 = vector.broadcast %222 : vector<1x32xf32> to vector<8x32xf32>
    %224 = arith.addf %221, %223 : vector<8x32xf32>
    %225 = arith.addf %119, %224 : vector<8x32xf32>
    %c0_132 = arith.constant 0 : index
    %c0_133 = arith.constant 0 : index
    %226 = vector.load %arg15[%c0_132, %c0_133] : memref<1x32xf32, #tpu.memory_space<vmem>>, vector<1x32xf32>
    %c0_134 = arith.constant 0 : index
    %c0_135 = arith.constant 0 : index
    %227 = vector.load %arg16[%c0_134, %c0_135] : memref<1x32xf32, #tpu.memory_space<vmem>>, vector<1x32xf32>
    %cst_136 = arith.constant dense<0.000000e+00> : vector<8xf32>
    %228 = vector.multi_reduction <add>, %225, %cst_136 [1] : vector<8x32xf32> to vector<8xf32>
    %229 = vector.shape_cast %228 : vector<8xf32> to vector<8x1xf32>
    %cst_137 = arith.constant 3.200000e+01 : f32
    %230 = vector.broadcast %cst_137 : f32 to vector<8x1xf32>
    %231 = arith.divf %229, %230 : vector<8x1xf32>
    %232 = vector.broadcast %231 : vector<8x1xf32> to vector<8x32xf32>
    %233 = arith.subf %225, %232 : vector<8x32xf32>
    %234 = arith.mulf %233, %233 : vector<8x32xf32>
    %cst_138 = arith.constant dense<0.000000e+00> : vector<8xf32>
    %235 = vector.multi_reduction <add>, %234, %cst_138 [1] : vector<8x32xf32> to vector<8xf32>
    %236 = vector.shape_cast %235 : vector<8xf32> to vector<8x1xf32>
    %cst_139 = arith.constant 3.200000e+01 : f32
    %237 = vector.broadcast %cst_139 : f32 to vector<8x1xf32>
    %238 = arith.divf %236, %237 : vector<8x1xf32>
    %239 = vector.broadcast %231 : vector<8x1xf32> to vector<8x32xf32>
    %240 = arith.subf %225, %239 : vector<8x32xf32>
    %cst_140 = arith.constant 9.99999974E-6 : f32
    %241 = vector.broadcast %cst_140 : f32 to vector<8x1xf32>
    %242 = arith.addf %238, %241 : vector<8x1xf32>
    %243 = math.rsqrt %242 : vector<8x1xf32>
    %244 = vector.broadcast %243 : vector<8x1xf32> to vector<8x32xf32>
    %245 = arith.mulf %240, %244 : vector<8x32xf32>
    %246 = vector.broadcast %226 : vector<1x32xf32> to vector<8x32xf32>
    %247 = arith.mulf %245, %246 : vector<8x32xf32>
    %248 = vector.broadcast %227 : vector<1x32xf32> to vector<8x32xf32>
    %249 = arith.addf %247, %248 : vector<8x32xf32>
    %c0_141 = arith.constant 0 : index
    %c0_142 = arith.constant 0 : index
    %250 = vector.load %arg17[%c0_141, %c0_142] : memref<32x64xf32, #tpu.memory_space<vmem>>, vector<32x64xf32>
    %cst_143 = arith.constant dense<0.000000e+00> : vector<8x64xf32>
    %251 = tpu.matmul %249, %250, %cst_143 {dimension_numbers = #tpu.dot_dimension_numbers<[1], [0], [0], [1], [0, 0, 1, 1], [], []>} : vector<8x32xf32>, vector<32x64xf32>, vector<8x64xf32> -> vector<8x64xf32>
    %c0_144 = arith.constant 0 : index
    %c0_145 = arith.constant 0 : index
    %252 = vector.load %arg18[%c0_144, %c0_145] : memref<1x64xf32, #tpu.memory_space<vmem>>, vector<1x64xf32>
    %253 = vector.broadcast %252 : vector<1x64xf32> to vector<8x64xf32>
    %254 = arith.addf %251, %253 : vector<8x64xf32>
    %cst_146 = arith.constant 5.000000e-01 : f32
    %255 = vector.broadcast %cst_146 : f32 to vector<8x64xf32>
    %256 = arith.mulf %255, %254 : vector<8x64xf32>
    %cst_147 = arith.constant 0.707106769 : f32
    %257 = vector.broadcast %cst_147 : f32 to vector<8x64xf32>
    %258 = arith.mulf %254, %257 : vector<8x64xf32>
    %cst_148 = arith.constant 0.000000e+00 : f32
    %259 = vector.broadcast %cst_148 : f32 to vector<8x64xf32>
    %260 = arith.cmpf oge, %258, %259 : vector<8x64xf32>
    %cst_149 = arith.constant 1.000000e+00 : f32
    %cst_150 = arith.constant -1.000000e+00 : f32
    %261 = vector.broadcast %cst_149 : f32 to vector<8x64xf32>
    %262 = vector.broadcast %cst_150 : f32 to vector<8x64xf32>
    %263 = arith.select %260, %261, %262 : vector<8x64xi1>, vector<8x64xf32>
    %264 = math.absf %258 : vector<8x64xf32>
    %cst_151 = arith.constant 0.327591091 : f32
    %265 = vector.broadcast %cst_151 : f32 to vector<8x64xf32>
    %266 = arith.mulf %265, %264 : vector<8x64xf32>
    %cst_152 = arith.constant 1.000000e+00 : f32
    %267 = vector.broadcast %cst_152 : f32 to vector<8x64xf32>
    %268 = arith.addf %267, %266 : vector<8x64xf32>
    %cst_153 = arith.constant 1.000000e+00 : f32
    %269 = vector.broadcast %cst_153 : f32 to vector<8x64xf32>
    %270 = arith.divf %269, %268 : vector<8x64xf32>
    %cst_154 = arith.constant 1.06140542 : f32
    %271 = vector.broadcast %cst_154 : f32 to vector<8x64xf32>
    %272 = arith.mulf %271, %270 : vector<8x64xf32>
    %cst_155 = arith.constant -1.45315206 : f32
    %273 = vector.broadcast %cst_155 : f32 to vector<8x64xf32>
    %274 = arith.addf %272, %273 : vector<8x64xf32>
    %275 = arith.mulf %274, %270 : vector<8x64xf32>
    %cst_156 = arith.constant 1.42141378 : f32
    %276 = vector.broadcast %cst_156 : f32 to vector<8x64xf32>
    %277 = arith.addf %275, %276 : vector<8x64xf32>
    %278 = arith.mulf %277, %270 : vector<8x64xf32>
    %cst_157 = arith.constant -0.284496725 : f32
    %279 = vector.broadcast %cst_157 : f32 to vector<8x64xf32>
    %280 = arith.addf %278, %279 : vector<8x64xf32>
    %281 = arith.mulf %280, %270 : vector<8x64xf32>
    %cst_158 = arith.constant 0.254829586 : f32
    %282 = vector.broadcast %cst_158 : f32 to vector<8x64xf32>
    %283 = arith.addf %281, %282 : vector<8x64xf32>
    %284 = arith.mulf %283, %270 : vector<8x64xf32>
    %cst_159 = arith.constant 0.000000e+00 : f32
    %285 = vector.broadcast %cst_159 : f32 to vector<8x64xf32>
    %286 = arith.subf %285, %264 : vector<8x64xf32>
    %287 = arith.mulf %286, %264 : vector<8x64xf32>
    %288 = math.exp %287 : vector<8x64xf32>
    %289 = arith.mulf %284, %288 : vector<8x64xf32>
    %cst_160 = arith.constant 1.000000e+00 : f32
    %290 = vector.broadcast %cst_160 : f32 to vector<8x64xf32>
    %291 = arith.subf %290, %289 : vector<8x64xf32>
    %292 = arith.mulf %263, %291 : vector<8x64xf32>
    %cst_161 = arith.constant 1.000000e+00 : f32
    %293 = vector.broadcast %cst_161 : f32 to vector<8x64xf32>
    %294 = arith.addf %293, %292 : vector<8x64xf32>
    %295 = arith.mulf %256, %294 : vector<8x64xf32>
    %c0_162 = arith.constant 0 : index
    %c0_163 = arith.constant 0 : index
    %296 = vector.load %arg19[%c0_162, %c0_163] : memref<64x32xf32, #tpu.memory_space<vmem>>, vector<64x32xf32>
    %cst_164 = arith.constant dense<0.000000e+00> : vector<8x32xf32>
    %297 = tpu.matmul %295, %296, %cst_164 {dimension_numbers = #tpu.dot_dimension_numbers<[1], [0], [0], [1], [0, 0, 1, 1], [], []>} : vector<8x64xf32>, vector<64x32xf32>, vector<8x32xf32> -> vector<8x32xf32>
    %c0_165 = arith.constant 0 : index
    %c0_166 = arith.constant 0 : index
    %298 = vector.load %arg20[%c0_165, %c0_166] : memref<1x32xf32, #tpu.memory_space<vmem>>, vector<1x32xf32>
    %299 = vector.broadcast %298 : vector<1x32xf32> to vector<8x32xf32>
    %300 = arith.addf %297, %299 : vector<8x32xf32>
    %301 = arith.addf %225, %300 : vector<8x32xf32>
    %c0_167 = arith.constant 0 : index
    %c0_168 = arith.constant 0 : index
    %302 = vector.load %arg21[%c0_167, %c0_168] : memref<1x32xf32, #tpu.memory_space<vmem>>, vector<1x32xf32>
    %c0_169 = arith.constant 0 : index
    %c0_170 = arith.constant 0 : index
    %303 = vector.load %arg22[%c0_169, %c0_170] : memref<1x32xf32, #tpu.memory_space<vmem>>, vector<1x32xf32>
    %cst_171 = arith.constant dense<0.000000e+00> : vector<8xf32>
    %304 = vector.multi_reduction <add>, %301, %cst_171 [1] : vector<8x32xf32> to vector<8xf32>
    %305 = vector.shape_cast %304 : vector<8xf32> to vector<8x1xf32>
    %cst_172 = arith.constant 3.200000e+01 : f32
    %306 = vector.broadcast %cst_172 : f32 to vector<8x1xf32>
    %307 = arith.divf %305, %306 : vector<8x1xf32>
    %308 = vector.broadcast %307 : vector<8x1xf32> to vector<8x32xf32>
    %309 = arith.subf %301, %308 : vector<8x32xf32>
    %310 = arith.mulf %309, %309 : vector<8x32xf32>
    %cst_173 = arith.constant dense<0.000000e+00> : vector<8xf32>
    %311 = vector.multi_reduction <add>, %310, %cst_173 [1] : vector<8x32xf32> to vector<8xf32>
    %312 = vector.shape_cast %311 : vector<8xf32> to vector<8x1xf32>
    %cst_174 = arith.constant 3.200000e+01 : f32
    %313 = vector.broadcast %cst_174 : f32 to vector<8x1xf32>
    %314 = arith.divf %312, %313 : vector<8x1xf32>
    %315 = vector.broadcast %307 : vector<8x1xf32> to vector<8x32xf32>
    %316 = arith.subf %301, %315 : vector<8x32xf32>
    %cst_175 = arith.constant 9.99999974E-6 : f32
    %317 = vector.broadcast %cst_175 : f32 to vector<8x1xf32>
    %318 = arith.addf %314, %317 : vector<8x1xf32>
    %319 = math.rsqrt %318 : vector<8x1xf32>
    %320 = vector.broadcast %319 : vector<8x1xf32> to vector<8x32xf32>
    %321 = arith.mulf %316, %320 : vector<8x32xf32>
    %322 = vector.broadcast %302 : vector<1x32xf32> to vector<8x32xf32>
    %323 = arith.mulf %321, %322 : vector<8x32xf32>
    %324 = vector.broadcast %303 : vector<1x32xf32> to vector<8x32xf32>
    %325 = arith.addf %323, %324 : vector<8x32xf32>
    %c0_176 = arith.constant 0 : index
    %c0_177 = arith.constant 0 : index
    %326 = vector.load %arg23[%c0_176, %c0_177] : memref<32x96xf32, #tpu.memory_space<vmem>>, vector<32x96xf32>
    %cst_178 = arith.constant dense<0.000000e+00> : vector<8x96xf32>
    %327 = tpu.matmul %325, %326, %cst_178 {dimension_numbers = #tpu.dot_dimension_numbers<[1], [0], [0], [1], [0, 0, 1, 1], [], []>} : vector<8x32xf32>, vector<32x96xf32>, vector<8x96xf32> -> vector<8x96xf32>
    %328 = vector.shape_cast %327 : vector<8x96xf32> to vector<2x4x96xf32>
    %329 = vector.extract_strided_slice %328 {offsets = [0, 0, 0], sizes = [2, 4, 8], strides = [1, 1, 1]} : vector<2x4x96xf32> to vector<2x4x8xf32>
    %330 = vector.extract_strided_slice %328 {offsets = [0, 0, 32], sizes = [2, 4, 8], strides = [1, 1, 1]} : vector<2x4x96xf32> to vector<2x4x8xf32>
    %331 = vector.extract_strided_slice %328 {offsets = [0, 0, 64], sizes = [2, 4, 8], strides = [1, 1, 1]} : vector<2x4x96xf32> to vector<2x4x8xf32>
    "tpu.trace_start"() <{level = 10 : i32, message = "bqd,bkd->bqk"}> : () -> ()
    %cst_179 = arith.constant dense<0.000000e+00> : vector<2x4x4xf32>
    %332 = tpu.matmul %329, %330, %cst_179 {dimension_numbers = #tpu.dot_dimension_numbers<[2], [2], [1], [1], [0, 0, 0, 1, 1, 1], [0], [0]>} : vector<2x4x8xf32>, vector<2x4x8xf32>, vector<2x4x4xf32> -> vector<2x4x4xf32>
    "tpu.trace_stop"() : () -> ()
    %cst_180 = arith.constant 0.353553385 : f32
    %333 = vector.broadcast %cst_180 : f32 to vector<2x4x4xf32>
    %334 = arith.mulf %332, %333 : vector<2x4x4xf32>
    %cst_181 = arith.constant dense<0xFF800000> : vector<2x4xf32>
    %335 = vector.multi_reduction <maximumf>, %334, %cst_181 [2] : vector<2x4x4xf32> to vector<2x4xf32>
    %336 = vector.shape_cast %335 : vector<2x4xf32> to vector<2x4x1xf32>
    %337 = vector.broadcast %336 : vector<2x4x1xf32> to vector<2x4x4xf32>
    %338 = arith.subf %334, %337 : vector<2x4x4xf32>
    %339 = math.exp %338 : vector<2x4x4xf32>
    %cst_182 = arith.constant dense<0.000000e+00> : vector<2x4xf32>
    %340 = vector.multi_reduction <add>, %339, %cst_182 [2] : vector<2x4x4xf32> to vector<2x4xf32>
    %341 = vector.shape_cast %340 : vector<2x4xf32> to vector<2x4x1xf32>
    %342 = vector.broadcast %341 : vector<2x4x1xf32> to vector<2x4x4xf32>
    %343 = arith.divf %339, %342 : vector<2x4x4xf32>
    "tpu.trace_start"() <{level = 10 : i32, message = "bqk,bkd->bqd"}> : () -> ()
    %cst_183 = arith.constant dense<0.000000e+00> : vector<2x4x8xf32>
    %344 = tpu.matmul %343, %331, %cst_183 {dimension_numbers = #tpu.dot_dimension_numbers<[2], [1], [1], [2], [0, 0, 0, 1, 1, 2], [0], [0]>} : vector<2x4x4xf32>, vector<2x4x8xf32>, vector<2x4x8xf32> -> vector<2x4x8xf32>
    "tpu.trace_stop"() : () -> ()
    %345 = vector.shape_cast %344 : vector<2x4x8xf32> to vector<8x8xf32>
    %c0_184 = arith.constant 0 : index
    %c0_185 = arith.constant 0 : index
    %346 = vector.load %arg53[%c0_184, %c0_185] : memref<32x32xf32, #tpu.memory_space<vmem>>, vector<8x8xf32>
    tpu.vector_store %arg53[%c0_184, %c0_185], %345 {strides = array<i32>} : memref<32x32xf32, #tpu.memory_space<vmem>>, vector<8x8xf32>,
    %347 = vector.extract_strided_slice %328 {offsets = [0, 0, 8], sizes = [2, 4, 8], strides = [1, 1, 1]} : vector<2x4x96xf32> to vector<2x4x8xf32>
    %348 = vector.extract_strided_slice %328 {offsets = [0, 0, 40], sizes = [2, 4, 8], strides = [1, 1, 1]} : vector<2x4x96xf32> to vector<2x4x8xf32>
    %349 = vector.extract_strided_slice %328 {offsets = [0, 0, 72], sizes = [2, 4, 8], strides = [1, 1, 1]} : vector<2x4x96xf32> to vector<2x4x8xf32>
    "tpu.trace_start"() <{level = 10 : i32, message = "bqd,bkd->bqk"}> : () -> ()
    %cst_186 = arith.constant dense<0.000000e+00> : vector<2x4x4xf32>
    %350 = tpu.matmul %347, %348, %cst_186 {dimension_numbers = #tpu.dot_dimension_numbers<[2], [2], [1], [1], [0, 0, 0, 1, 1, 1], [0], [0]>} : vector<2x4x8xf32>, vector<2x4x8xf32>, vector<2x4x4xf32> -> vector<2x4x4xf32>
    "tpu.trace_stop"() : () -> ()
    %cst_187 = arith.constant 0.353553385 : f32
    %351 = vector.broadcast %cst_187 : f32 to vector<2x4x4xf32>
    %352 = arith.mulf %350, %351 : vector<2x4x4xf32>
    %cst_188 = arith.constant dense<0xFF800000> : vector<2x4xf32>
    %353 = vector.multi_reduction <maximumf>, %352, %cst_188 [2] : vector<2x4x4xf32> to vector<2x4xf32>
    %354 = vector.shape_cast %353 : vector<2x4xf32> to vector<2x4x1xf32>
    %355 = vector.broadcast %354 : vector<2x4x1xf32> to vector<2x4x4xf32>
    %356 = arith.subf %352, %355 : vector<2x4x4xf32>
    %357 = math.exp %356 : vector<2x4x4xf32>
    %cst_189 = arith.constant dense<0.000000e+00> : vector<2x4xf32>
    %358 = vector.multi_reduction <add>, %357, %cst_189 [2] : vector<2x4x4xf32> to vector<2x4xf32>
    %359 = vector.shape_cast %358 : vector<2x4xf32> to vector<2x4x1xf32>
    %360 = vector.broadcast %359 : vector<2x4x1xf32> to vector<2x4x4xf32>
    %361 = arith.divf %357, %360 : vector<2x4x4xf32>
    "tpu.trace_start"() <{level = 10 : i32, message = "bqk,bkd->bqd"}> : () -> ()
    %cst_190 = arith.constant dense<0.000000e+00> : vector<2x4x8xf32>
    %362 = tpu.matmul %361, %349, %cst_190 {dimension_numbers = #tpu.dot_dimension_numbers<[2], [1], [1], [2], [0, 0, 0, 1, 1, 2], [0], [0]>} : vector<2x4x4xf32>, vector<2x4x8xf32>, vector<2x4x8xf32> -> vector<2x4x8xf32>
    "tpu.trace_stop"() : () -> ()
    %363 = vector.shape_cast %362 : vector<2x4x8xf32> to vector<8x8xf32>
    %c0_191 = arith.constant 0 : index
    %c8_192 = arith.constant 8 : index
    %364 = vector.load %arg53[%c0_191, %c8_192] : memref<32x32xf32, #tpu.memory_space<vmem>>, vector<8x8xf32>
    tpu.vector_store %arg53[%c0_191, %c8_192], %363 {strides = array<i32>} : memref<32x32xf32, #tpu.memory_space<vmem>>, vector<8x8xf32>,
    %365 = vector.extract_strided_slice %328 {offsets = [0, 0, 16], sizes = [2, 4, 8], strides = [1, 1, 1]} : vector<2x4x96xf32> to vector<2x4x8xf32>
    %366 = vector.extract_strided_slice %328 {offsets = [0, 0, 48], sizes = [2, 4, 8], strides = [1, 1, 1]} : vector<2x4x96xf32> to vector<2x4x8xf32>
    %367 = vector.extract_strided_slice %328 {offsets = [0, 0, 80], sizes = [2, 4, 8], strides = [1, 1, 1]} : vector<2x4x96xf32> to vector<2x4x8xf32>
    "tpu.trace_start"() <{level = 10 : i32, message = "bqd,bkd->bqk"}> : () -> ()
    %cst_193 = arith.constant dense<0.000000e+00> : vector<2x4x4xf32>
    %368 = tpu.matmul %365, %366, %cst_193 {dimension_numbers = #tpu.dot_dimension_numbers<[2], [2], [1], [1], [0, 0, 0, 1, 1, 1], [0], [0]>} : vector<2x4x8xf32>, vector<2x4x8xf32>, vector<2x4x4xf32> -> vector<2x4x4xf32>
    "tpu.trace_stop"() : () -> ()
    %cst_194 = arith.constant 0.353553385 : f32
    %369 = vector.broadcast %cst_194 : f32 to vector<2x4x4xf32>
    %370 = arith.mulf %368, %369 : vector<2x4x4xf32>
    %cst_195 = arith.constant dense<0xFF800000> : vector<2x4xf32>
    %371 = vector.multi_reduction <maximumf>, %370, %cst_195 [2] : vector<2x4x4xf32> to vector<2x4xf32>
    %372 = vector.shape_cast %371 : vector<2x4xf32> to vector<2x4x1xf32>
    %373 = vector.broadcast %372 : vector<2x4x1xf32> to vector<2x4x4xf32>
    %374 = arith.subf %370, %373 : vector<2x4x4xf32>
    %375 = math.exp %374 : vector<2x4x4xf32>
    %cst_196 = arith.constant dense<0.000000e+00> : vector<2x4xf32>
    %376 = vector.multi_reduction <add>, %375, %cst_196 [2] : vector<2x4x4xf32> to vector<2x4xf32>
    %377 = vector.shape_cast %376 : vector<2x4xf32> to vector<2x4x1xf32>
    %378 = vector.broadcast %377 : vector<2x4x1xf32> to vector<2x4x4xf32>
    %379 = arith.divf %375, %378 : vector<2x4x4xf32>
    "tpu.trace_start"() <{level = 10 : i32, message = "bqk,bkd->bqd"}> : () -> ()
    %cst_197 = arith.constant dense<0.000000e+00> : vector<2x4x8xf32>
    %380 = tpu.matmul %379, %367, %cst_197 {dimension_numbers = #tpu.dot_dimension_numbers<[2], [1], [1], [2], [0, 0, 0, 1, 1, 2], [0], [0]>} : vector<2x4x4xf32>, vector<2x4x8xf32>, vector<2x4x8xf32> -> vector<2x4x8xf32>
    "tpu.trace_stop"() : () -> ()
    %381 = vector.shape_cast %380 : vector<2x4x8xf32> to vector<8x8xf32>
    %c0_198 = arith.constant 0 : index
    %c16_199 = arith.constant 16 : index
    %382 = vector.load %arg53[%c0_198, %c16_199] : memref<32x32xf32, #tpu.memory_space<vmem>>, vector<8x8xf32>
    tpu.vector_store %arg53[%c0_198, %c16_199], %381 {strides = array<i32>} : memref<32x32xf32, #tpu.memory_space<vmem>>, vector<8x8xf32>,
    %383 = vector.extract_strided_slice %328 {offsets = [0, 0, 24], sizes = [2, 4, 8], strides = [1, 1, 1]} : vector<2x4x96xf32> to vector<2x4x8xf32>
    %384 = vector.extract_strided_slice %328 {offsets = [0, 0, 56], sizes = [2, 4, 8], strides = [1, 1, 1]} : vector<2x4x96xf32> to vector<2x4x8xf32>
    %385 = vector.extract_strided_slice %328 {offsets = [0, 0, 88], sizes = [2, 4, 8], strides = [1, 1, 1]} : vector<2x4x96xf32> to vector<2x4x8xf32>
    "tpu.trace_start"() <{level = 10 : i32, message = "bqd,bkd->bqk"}> : () -> ()
    %cst_200 = arith.constant dense<0.000000e+00> : vector<2x4x4xf32>
    %386 = tpu.matmul %383, %384, %cst_200 {dimension_numbers = #tpu.dot_dimension_numbers<[2], [2], [1], [1], [0, 0, 0, 1, 1, 1], [0], [0]>} : vector<2x4x8xf32>, vector<2x4x8xf32>, vector<2x4x4xf32> -> vector<2x4x4xf32>
    "tpu.trace_stop"() : () -> ()
    %cst_201 = arith.constant 0.353553385 : f32
    %387 = vector.broadcast %cst_201 : f32 to vector<2x4x4xf32>
    %388 = arith.mulf %386, %387 : vector<2x4x4xf32>
    %cst_202 = arith.constant dense<0xFF800000> : vector<2x4xf32>
    %389 = vector.multi_reduction <maximumf>, %388, %cst_202 [2] : vector<2x4x4xf32> to vector<2x4xf32>
    %390 = vector.shape_cast %389 : vector<2x4xf32> to vector<2x4x1xf32>
    %391 = vector.broadcast %390 : vector<2x4x1xf32> to vector<2x4x4xf32>
    %392 = arith.subf %388, %391 : vector<2x4x4xf32>
    %393 = math.exp %392 : vector<2x4x4xf32>
    %cst_203 = arith.constant dense<0.000000e+00> : vector<2x4xf32>
    %394 = vector.multi_reduction <add>, %393, %cst_203 [2] : vector<2x4x4xf32> to vector<2x4xf32>
    %395 = vector.shape_cast %394 : vector<2x4xf32> to vector<2x4x1xf32>
    %396 = vector.broadcast %395 : vector<2x4x1xf32> to vector<2x4x4xf32>
    %397 = arith.divf %393, %396 : vector<2x4x4xf32>
    "tpu.trace_start"() <{level = 10 : i32, message = "bqk,bkd->bqd"}> : () -> ()
    %cst_204 = arith.constant dense<0.000000e+00> : vector<2x4x8xf32>
    %398 = tpu.matmul %397, %385, %cst_204 {dimension_numbers = #tpu.dot_dimension_numbers<[2], [1], [1], [2], [0, 0, 0, 1, 1, 2], [0], [0]>} : vector<2x4x4xf32>, vector<2x4x8xf32>, vector<2x4x8xf32> -> vector<2x4x8xf32>
    "tpu.trace_stop"() : () -> ()
    %399 = vector.shape_cast %398 : vector<2x4x8xf32> to vector<8x8xf32>
    %c0_205 = arith.constant 0 : index
    %c24_206 = arith.constant 24 : index
    %400 = vector.load %arg53[%c0_205, %c24_206] : memref<32x32xf32, #tpu.memory_space<vmem>>, vector<8x8xf32>
    tpu.vector_store %arg53[%c0_205, %c24_206], %399 {strides = array<i32>} : memref<32x32xf32, #tpu.memory_space<vmem>>, vector<8x8xf32>,
    %c0_207 = arith.constant 0 : index
    %c0_208 = arith.constant 0 : index
    %401 = vector.load %arg53[%c0_207, %c0_208] : memref<32x32xf32, #tpu.memory_space<vmem>>, vector<8x32xf32>
    %c0_209 = arith.constant 0 : index
    %c0_210 = arith.constant 0 : index
    %402 = vector.load %arg24[%c0_209, %c0_210] : memref<32x32xf32, #tpu.memory_space<vmem>>, vector<32x32xf32>
    %cst_211 = arith.constant dense<0.000000e+00> : vector<8x32xf32>
    %403 = tpu.matmul %401, %402, %cst_211 {dimension_numbers = #tpu.dot_dimension_numbers<[1], [0], [0], [1], [0, 0, 1, 1], [], []>} : vector<8x32xf32>, vector<32x32xf32>, vector<8x32xf32> -> vector<8x32xf32>
    %c0_212 = arith.constant 0 : index
    %c0_213 = arith.constant 0 : index
    %404 = vector.load %arg25[%c0_212, %c0_213] : memref<1x32xf32, #tpu.memory_space<vmem>>, vector<1x32xf32>
    %405 = vector.broadcast %404 : vector<1x32xf32> to vector<8x32xf32>
    %406 = arith.addf %403, %405 : vector<8x32xf32>
    %407 = arith.addf %301, %406 : vector<8x32xf32>
    %c0_214 = arith.constant 0 : index
    %c0_215 = arith.constant 0 : index
    %408 = vector.load %arg26[%c0_214, %c0_215] : memref<1x32xf32, #tpu.memory_space<vmem>>, vector<1x32xf32>
    %c0_216 = arith.constant 0 : index
    %c0_217 = arith.constant 0 : index
    %409 = vector.load %arg27[%c0_216, %c0_217] : memref<1x32xf32, #tpu.memory_space<vmem>>, vector<1x32xf32>
    %cst_218 = arith.constant dense<0.000000e+00> : vector<8xf32>
    %410 = vector.multi_reduction <add>, %407, %cst_218 [1] : vector<8x32xf32> to vector<8xf32>
    %411 = vector.shape_cast %410 : vector<8xf32> to vector<8x1xf32>
    %cst_219 = arith.constant 3.200000e+01 : f32
    %412 = vector.broadcast %cst_219 : f32 to vector<8x1xf32>
    %413 = arith.divf %411, %412 : vector<8x1xf32>
    %414 = vector.broadcast %413 : vector<8x1xf32> to vector<8x32xf32>
    %415 = arith.subf %407, %414 : vector<8x32xf32>
    %416 = arith.mulf %415, %415 : vector<8x32xf32>
    %cst_220 = arith.constant dense<0.000000e+00> : vector<8xf32>
    %417 = vector.multi_reduction <add>, %416, %cst_220 [1] : vector<8x32xf32> to vector<8xf32>
    %418 = vector.shape_cast %417 : vector<8xf32> to vector<8x1xf32>
    %cst_221 = arith.constant 3.200000e+01 : f32
    %419 = vector.broadcast %cst_221 : f32 to vector<8x1xf32>
    %420 = arith.divf %418, %419 : vector<8x1xf32>
    %421 = vector.broadcast %413 : vector<8x1xf32> to vector<8x32xf32>
    %422 = arith.subf %407, %421 : vector<8x32xf32>
    %cst_222 = arith.constant 9.99999974E-6 : f32
    %423 = vector.broadcast %cst_222 : f32 to vector<8x1xf32>
    %424 = arith.addf %420, %423 : vector<8x1xf32>
    %425 = math.rsqrt %424 : vector<8x1xf32>
    %426 = vector.broadcast %425 : vector<8x1xf32> to vector<8x32xf32>
    %427 = arith.mulf %422, %426 : vector<8x32xf32>
    %428 = vector.broadcast %408 : vector<1x32xf32> to vector<8x32xf32>
    %429 = arith.mulf %427, %428 : vector<8x32xf32>
    %430 = vector.broadcast %409 : vector<1x32xf32> to vector<8x32xf32>
    %431 = arith.addf %429, %430 : vector<8x32xf32>
    %c0_223 = arith.constant 0 : index
    %c0_224 = arith.constant 0 : index
    %432 = vector.load %arg28[%c0_223, %c0_224] : memref<32x64xf32, #tpu.memory_space<vmem>>, vector<32x64xf32>
    %cst_225 = arith.constant dense<0.000000e+00> : vector<8x64xf32>
    %433 = tpu.matmul %431, %432, %cst_225 {dimension_numbers = #tpu.dot_dimension_numbers<[1], [0], [0], [1], [0, 0, 1, 1], [], []>} : vector<8x32xf32>, vector<32x64xf32>, vector<8x64xf32> -> vector<8x64xf32>
    %c0_226 = arith.constant 0 : index
    %c0_227 = arith.constant 0 : index
    %434 = vector.load %arg29[%c0_226, %c0_227] : memref<1x64xf32, #tpu.memory_space<vmem>>, vector<1x64xf32>
    %435 = vector.broadcast %434 : vector<1x64xf32> to vector<8x64xf32>
    %436 = arith.addf %433, %435 : vector<8x64xf32>
    %cst_228 = arith.constant 5.000000e-01 : f32
    %437 = vector.broadcast %cst_228 : f32 to vector<8x64xf32>
    %438 = arith.mulf %437, %436 : vector<8x64xf32>
    %cst_229 = arith.constant 0.707106769 : f32
    %439 = vector.broadcast %cst_229 : f32 to vector<8x64xf32>
    %440 = arith.mulf %436, %439 : vector<8x64xf32>
    %cst_230 = arith.constant 0.000000e+00 : f32
    %441 = vector.broadcast %cst_230 : f32 to vector<8x64xf32>
    %442 = arith.cmpf oge, %440, %441 : vector<8x64xf32>
    %cst_231 = arith.constant 1.000000e+00 : f32
    %cst_232 = arith.constant -1.000000e+00 : f32
    %443 = vector.broadcast %cst_231 : f32 to vector<8x64xf32>
    %444 = vector.broadcast %cst_232 : f32 to vector<8x64xf32>
    %445 = arith.select %442, %443, %444 : vector<8x64xi1>, vector<8x64xf32>
    %446 = math.absf %440 : vector<8x64xf32>
    %cst_233 = arith.constant 0.327591091 : f32
    %447 = vector.broadcast %cst_233 : f32 to vector<8x64xf32>
    %448 = arith.mulf %447, %446 : vector<8x64xf32>
    %cst_234 = arith.constant 1.000000e+00 : f32
    %449 = vector.broadcast %cst_234 : f32 to vector<8x64xf32>
    %450 = arith.addf %449, %448 : vector<8x64xf32>
    %cst_235 = arith.constant 1.000000e+00 : f32
    %451 = vector.broadcast %cst_235 : f32 to vector<8x64xf32>
    %452 = arith.divf %451, %450 : vector<8x64xf32>
    %cst_236 = arith.constant 1.06140542 : f32
    %453 = vector.broadcast %cst_236 : f32 to vector<8x64xf32>
    %454 = arith.mulf %453, %452 : vector<8x64xf32>
    %cst_237 = arith.constant -1.45315206 : f32
    %455 = vector.broadcast %cst_237 : f32 to vector<8x64xf32>
    %456 = arith.addf %454, %455 : vector<8x64xf32>
    %457 = arith.mulf %456, %452 : vector<8x64xf32>
    %cst_238 = arith.constant 1.42141378 : f32
    %458 = vector.broadcast %cst_238 : f32 to vector<8x64xf32>
    %459 = arith.addf %457, %458 : vector<8x64xf32>
    %460 = arith.mulf %459, %452 : vector<8x64xf32>
    %cst_239 = arith.constant -0.284496725 : f32
    %461 = vector.broadcast %cst_239 : f32 to vector<8x64xf32>
    %462 = arith.addf %460, %461 : vector<8x64xf32>
    %463 = arith.mulf %462, %452 : vector<8x64xf32>
    %cst_240 = arith.constant 0.254829586 : f32
    %464 = vector.broadcast %cst_240 : f32 to vector<8x64xf32>
    %465 = arith.addf %463, %464 : vector<8x64xf32>
    %466 = arith.mulf %465, %452 : vector<8x64xf32>
    %cst_241 = arith.constant 0.000000e+00 : f32
    %467 = vector.broadcast %cst_241 : f32 to vector<8x64xf32>
    %468 = arith.subf %467, %446 : vector<8x64xf32>
    %469 = arith.mulf %468, %446 : vector<8x64xf32>
    %470 = math.exp %469 : vector<8x64xf32>
    %471 = arith.mulf %466, %470 : vector<8x64xf32>
    %cst_242 = arith.constant 1.000000e+00 : f32
    %472 = vector.broadcast %cst_242 : f32 to vector<8x64xf32>
    %473 = arith.subf %472, %471 : vector<8x64xf32>
    %474 = arith.mulf %445, %473 : vector<8x64xf32>
    %cst_243 = arith.constant 1.000000e+00 : f32
    %475 = vector.broadcast %cst_243 : f32 to vector<8x64xf32>
    %476 = arith.addf %475, %474 : vector<8x64xf32>
    %477 = arith.mulf %438, %476 : vector<8x64xf32>
    %c0_244 = arith.constant 0 : index
    %c0_245 = arith.constant 0 : index
    %478 = vector.load %arg30[%c0_244, %c0_245] : memref<64x32xf32, #tpu.memory_space<vmem>>, vector<64x32xf32>
    %cst_246 = arith.constant dense<0.000000e+00> : vector<8x32xf32>
    %479 = tpu.matmul %477, %478, %cst_246 {dimension_numbers = #tpu.dot_dimension_numbers<[1], [0], [0], [1], [0, 0, 1, 1], [], []>} : vector<8x64xf32>, vector<64x32xf32>, vector<8x32xf32> -> vector<8x32xf32>
    %c0_247 = arith.constant 0 : index
    %c0_248 = arith.constant 0 : index
    %480 = vector.load %arg31[%c0_247, %c0_248] : memref<1x32xf32, #tpu.memory_space<vmem>>, vector<1x32xf32>
    %481 = vector.broadcast %480 : vector<1x32xf32> to vector<8x32xf32>
    %482 = arith.addf %479, %481 : vector<8x32xf32>
    %483 = arith.addf %407, %482 : vector<8x32xf32>
    %c0_249 = arith.constant 0 : index
    %c0_250 = arith.constant 0 : index
    %484 = vector.load %arg32[%c0_249, %c0_250] : memref<32x24xf32, #tpu.memory_space<vmem>>, vector<32x24xf32>
    %cst_251 = arith.constant dense<0.000000e+00> : vector<8x24xf32>
    %485 = tpu.matmul %483, %484, %cst_251 {dimension_numbers = #tpu.dot_dimension_numbers<[1], [0], [0], [1], [0, 0, 1, 1], [], []>} : vector<8x32xf32>, vector<32x24xf32>, vector<8x24xf32> -> vector<8x24xf32>
    %c0_252 = arith.constant 0 : index
    %c0_253 = arith.constant 0 : index
    %486 = vector.load %arg33[%c0_252, %c0_253] : memref<1x24xf32, #tpu.memory_space<vmem>>, vector<1x24xf32>
    %487 = vector.broadcast %486 : vector<1x24xf32> to vector<8x24xf32>
    %488 = arith.addf %485, %487 : vector<8x24xf32>
    %c0_254 = arith.constant 0 : index
    %c0_255 = arith.constant 0 : index
    %489 = vector.load %arg34[%c0_254, %c0_255] : memref<1x24xf32, #tpu.memory_space<vmem>>, vector<1x24xf32>
    %c0_256 = arith.constant 0 : index
    %c0_257 = arith.constant 0 : index
    %490 = memref.load %arg0[%c0_256, %c0_257] : memref<2x4xi32, #tpu.memory_space<smem>>
    %491 = vector.extract_strided_slice %488 {offsets = [0, 0], sizes = [1, 24], strides = [1, 1]} : vector<8x24xf32> to vector<1x24xf32>
    %492 = arith.index_cast %490 : i32 to index
    %c0_258 = arith.constant 0 : index
    %493 = vector.load %arg35[%492, %c0_258] : memref<16x24xf32, #tpu.memory_space<vmem>>, vector<1x24xf32>
    %494 = arith.addf %491, %493 : vector<1x24xf32>
    %c0_i32_259 = arith.constant 0 : i32
    %495 = arith.addi %c0_i32_259, %490 : i32
    %496 = arith.index_cast %495 : i32 to index
    %c0_260 = arith.constant 0 : index
    %497 = vector.load %arg54[%496, %c0_260] : memref<32x24xf32, #tpu.memory_space<vmem>>, vector<1x24xf32>
    tpu.vector_store %arg54[%496, %c0_260], %494 {strides = array<i32>} : memref<32x24xf32, #tpu.memory_space<vmem>>, vector<1x24xf32>,
    %c0_261 = arith.constant 0 : index
    %c1_262 = arith.constant 1 : index
    %498 = memref.load %arg0[%c0_261, %c1_262] : memref<2x4xi32, #tpu.memory_space<smem>>
    %499 = vector.extract_strided_slice %488 {offsets = [1, 0], sizes = [1, 24], strides = [1, 1]} : vector<8x24xf32> to vector<1x24xf32>
    %500 = arith.index_cast %498 : i32 to index
    %c0_263 = arith.constant 0 : index
    %501 = vector.load %arg35[%500, %c0_263] : memref<16x24xf32, #tpu.memory_space<vmem>>, vector<1x24xf32>
    %502 = arith.addf %499, %501 : vector<1x24xf32>
    %c0_i32_264 = arith.constant 0 : i32
    %503 = arith.addi %c0_i32_264, %498 : i32
    %504 = arith.index_cast %503 : i32 to index
    %c0_265 = arith.constant 0 : index
    %505 = vector.load %arg54[%504, %c0_265] : memref<32x24xf32, #tpu.memory_space<vmem>>, vector<1x24xf32>
    tpu.vector_store %arg54[%504, %c0_265], %502 {strides = array<i32>} : memref<32x24xf32, #tpu.memory_space<vmem>>, vector<1x24xf32>,
    %c0_266 = arith.constant 0 : index
    %c2_267 = arith.constant 2 : index
    %506 = memref.load %arg0[%c0_266, %c2_267] : memref<2x4xi32, #tpu.memory_space<smem>>
    %507 = vector.extract_strided_slice %488 {offsets = [2, 0], sizes = [1, 24], strides = [1, 1]} : vector<8x24xf32> to vector<1x24xf32>
    %508 = arith.index_cast %506 : i32 to index
    %c0_268 = arith.constant 0 : index
    %509 = vector.load %arg35[%508, %c0_268] : memref<16x24xf32, #tpu.memory_space<vmem>>, vector<1x24xf32>
    %510 = arith.addf %507, %509 : vector<1x24xf32>
    %c0_i32_269 = arith.constant 0 : i32
    %511 = arith.addi %c0_i32_269, %506 : i32
    %512 = arith.index_cast %511 : i32 to index
    %c0_270 = arith.constant 0 : index
    %513 = vector.load %arg54[%512, %c0_270] : memref<32x24xf32, #tpu.memory_space<vmem>>, vector<1x24xf32>
    tpu.vector_store %arg54[%512, %c0_270], %510 {strides = array<i32>} : memref<32x24xf32, #tpu.memory_space<vmem>>, vector<1x24xf32>,
    %c0_271 = arith.constant 0 : index
    %c3_272 = arith.constant 3 : index
    %514 = memref.load %arg0[%c0_271, %c3_272] : memref<2x4xi32, #tpu.memory_space<smem>>
    %515 = vector.extract_strided_slice %488 {offsets = [3, 0], sizes = [1, 24], strides = [1, 1]} : vector<8x24xf32> to vector<1x24xf32>
    %516 = arith.index_cast %514 : i32 to index
    %c0_273 = arith.constant 0 : index
    %517 = vector.load %arg35[%516, %c0_273] : memref<16x24xf32, #tpu.memory_space<vmem>>, vector<1x24xf32>
    %518 = arith.addf %515, %517 : vector<1x24xf32>
    %c0_i32_274 = arith.constant 0 : i32
    %519 = arith.addi %c0_i32_274, %514 : i32
    %520 = arith.index_cast %519 : i32 to index
    %c0_275 = arith.constant 0 : index
    %521 = vector.load %arg54[%520, %c0_275] : memref<32x24xf32, #tpu.memory_space<vmem>>, vector<1x24xf32>
    tpu.vector_store %arg54[%520, %c0_275], %518 {strides = array<i32>} : memref<32x24xf32, #tpu.memory_space<vmem>>, vector<1x24xf32>,
    %c0_276 = arith.constant 0 : index
    %c0_277 = arith.constant 0 : index
    %522 = memref.load %arg1[%c0_276, %c0_277] : memref<2x12xi32, #tpu.memory_space<smem>>
    %523 = arith.index_cast %522 : i32 to index
    %c0_278 = arith.constant 0 : index
    %524 = vector.load %arg35[%523, %c0_278] : memref<16x24xf32, #tpu.memory_space<vmem>>, vector<1x24xf32>
    %525 = arith.addf %489, %524 : vector<1x24xf32>
    %c0_i32_279 = arith.constant 0 : i32
    %526 = arith.addi %c0_i32_279, %522 : i32
    %527 = arith.index_cast %526 : i32 to index
    %c0_280 = arith.constant 0 : index
    %528 = vector.load %arg54[%527, %c0_280] : memref<32x24xf32, #tpu.memory_space<vmem>>, vector<1x24xf32>
    tpu.vector_store %arg54[%527, %c0_280], %525 {strides = array<i32>} : memref<32x24xf32, #tpu.memory_space<vmem>>, vector<1x24xf32>,
    %c0_i32_281 = arith.constant 0 : i32
    %529 = arith.addi %c0_i32_281, %522 : i32
    %530 = arith.index_cast %529 : i32 to index
    %c0_282 = arith.constant 0 : index
    %531 = vector.load %arg2[%530, %c0_282] : memref<32x192xf32, #tpu.memory_space<vmem>>, vector<1x192xf32>
    %c0_283 = arith.constant 0 : index
    %c0_284 = arith.constant 0 : index
    %532 = vector.load %arg52[%c0_283, %c0_284] : memref<24x192xf32, #tpu.memory_space<vmem>>, vector<1x192xf32>
    tpu.vector_store %arg52[%c0_283, %c0_284], %531 {strides = array<i32>} : memref<24x192xf32, #tpu.memory_space<vmem>>, vector<1x192xf32>,
    %c0_285 = arith.constant 0 : index
    %c1_286 = arith.constant 1 : index
    %533 = memref.load %arg1[%c0_285, %c1_286] : memref<2x12xi32, #tpu.memory_space<smem>>
    %534 = arith.index_cast %533 : i32 to index
    %c0_287 = arith.constant 0 : index
    %535 = vector.load %arg35[%534, %c0_287] : memref<16x24xf32, #tpu.memory_space<vmem>>, vector<1x24xf32>
    %536 = arith.addf %489, %535 : vector<1x24xf32>
    %c0_i32_288 = arith.constant 0 : i32
    %537 = arith.addi %c0_i32_288, %533 : i32
    %538 = arith.index_cast %537 : i32 to index
    %c0_289 = arith.constant 0 : index
    %539 = vector.load %arg54[%538, %c0_289] : memref<32x24xf32, #tpu.memory_space<vmem>>, vector<1x24xf32>
    tpu.vector_store %arg54[%538, %c0_289], %536 {strides = array<i32>} : memref<32x24xf32, #tpu.memory_space<vmem>>, vector<1x24xf32>,
    %c0_i32_290 = arith.constant 0 : i32
    %540 = arith.addi %c0_i32_290, %533 : i32
    %541 = arith.index_cast %540 : i32 to index
    %c0_291 = arith.constant 0 : index
    %542 = vector.load %arg2[%541, %c0_291] : memref<32x192xf32, #tpu.memory_space<vmem>>, vector<1x192xf32>
    %c1_292 = arith.constant 1 : index
    %c0_293 = arith.constant 0 : index
    %543 = vector.load %arg52[%c1_292, %c0_293] : memref<24x192xf32, #tpu.memory_space<vmem>>, vector<1x192xf32>
    tpu.vector_store %arg52[%c1_292, %c0_293], %542 {strides = array<i32>} : memref<24x192xf32, #tpu.memory_space<vmem>>, vector<1x192xf32>,
    %c0_294 = arith.constant 0 : index
    %c2_295 = arith.constant 2 : index
    %544 = memref.load %arg1[%c0_294, %c2_295] : memref<2x12xi32, #tpu.memory_space<smem>>
    %545 = arith.index_cast %544 : i32 to index
    %c0_296 = arith.constant 0 : index
    %546 = vector.load %arg35[%545, %c0_296] : memref<16x24xf32, #tpu.memory_space<vmem>>, vector<1x24xf32>
    %547 = arith.addf %489, %546 : vector<1x24xf32>
    %c0_i32_297 = arith.constant 0 : i32
    %548 = arith.addi %c0_i32_297, %544 : i32
    %549 = arith.index_cast %548 : i32 to index
    %c0_298 = arith.constant 0 : index
    %550 = vector.load %arg54[%549, %c0_298] : memref<32x24xf32, #tpu.memory_space<vmem>>, vector<1x24xf32>
    tpu.vector_store %arg54[%549, %c0_298], %547 {strides = array<i32>} : memref<32x24xf32, #tpu.memory_space<vmem>>, vector<1x24xf32>,
    %c0_i32_299 = arith.constant 0 : i32
    %551 = arith.addi %c0_i32_299, %544 : i32
    %552 = arith.index_cast %551 : i32 to index
    %c0_300 = arith.constant 0 : index
    %553 = vector.load %arg2[%552, %c0_300] : memref<32x192xf32, #tpu.memory_space<vmem>>, vector<1x192xf32>
    %c2_301 = arith.constant 2 : index
    %c0_302 = arith.constant 0 : index
    %554 = vector.load %arg52[%c2_301, %c0_302] : memref<24x192xf32, #tpu.memory_space<vmem>>, vector<1x192xf32>
    tpu.vector_store %arg52[%c2_301, %c0_302], %553 {strides = array<i32>} : memref<24x192xf32, #tpu.memory_space<vmem>>, vector<1x192xf32>,
    %c0_303 = arith.constant 0 : index
    %c3_304 = arith.constant 3 : index
    %555 = memref.load %arg1[%c0_303, %c3_304] : memref<2x12xi32, #tpu.memory_space<smem>>
    %556 = arith.index_cast %555 : i32 to index
    %c0_305 = arith.constant 0 : index
    %557 = vector.load %arg35[%556, %c0_305] : memref<16x24xf32, #tpu.memory_space<vmem>>, vector<1x24xf32>
    %558 = arith.addf %489, %557 : vector<1x24xf32>
    %c0_i32_306 = arith.constant 0 : i32
    %559 = arith.addi %c0_i32_306, %555 : i32
    %560 = arith.index_cast %559 : i32 to index
    %c0_307 = arith.constant 0 : index
    %561 = vector.load %arg54[%560, %c0_307] : memref<32x24xf32, #tpu.memory_space<vmem>>, vector<1x24xf32>
    tpu.vector_store %arg54[%560, %c0_307], %558 {strides = array<i32>} : memref<32x24xf32, #tpu.memory_space<vmem>>, vector<1x24xf32>,
    %c0_i32_308 = arith.constant 0 : i32
    %562 = arith.addi %c0_i32_308, %555 : i32
    %563 = arith.index_cast %562 : i32 to index
    %c0_309 = arith.constant 0 : index
    %564 = vector.load %arg2[%563, %c0_309] : memref<32x192xf32, #tpu.memory_space<vmem>>, vector<1x192xf32>
    %c3_310 = arith.constant 3 : index
    %c0_311 = arith.constant 0 : index
    %565 = vector.load %arg52[%c3_310, %c0_311] : memref<24x192xf32, #tpu.memory_space<vmem>>, vector<1x192xf32>
    tpu.vector_store %arg52[%c3_310, %c0_311], %564 {strides = array<i32>} : memref<24x192xf32, #tpu.memory_space<vmem>>, vector<1x192xf32>,
    %c0_312 = arith.constant 0 : index
    %c4_313 = arith.constant 4 : index
    %566 = memref.load %arg1[%c0_312, %c4_313] : memref<2x12xi32, #tpu.memory_space<smem>>
    %567 = arith.index_cast %566 : i32 to index
    %c0_314 = arith.constant 0 : index
    %568 = vector.load %arg35[%567, %c0_314] : memref<16x24xf32, #tpu.memory_space<vmem>>, vector<1x24xf32>
    %569 = arith.addf %489, %568 : vector<1x24xf32>
    %c0_i32_315 = arith.constant 0 : i32
    %570 = arith.addi %c0_i32_315, %566 : i32
    %571 = arith.index_cast %570 : i32 to index
    %c0_316 = arith.constant 0 : index
    %572 = vector.load %arg54[%571, %c0_316] : memref<32x24xf32, #tpu.memory_space<vmem>>, vector<1x24xf32>
    tpu.vector_store %arg54[%571, %c0_316], %569 {strides = array<i32>} : memref<32x24xf32, #tpu.memory_space<vmem>>, vector<1x24xf32>,
    %c0_i32_317 = arith.constant 0 : i32
    %573 = arith.addi %c0_i32_317, %566 : i32
    %574 = arith.index_cast %573 : i32 to index
    %c0_318 = arith.constant 0 : index
    %575 = vector.load %arg2[%574, %c0_318] : memref<32x192xf32, #tpu.memory_space<vmem>>, vector<1x192xf32>
    %c4_319 = arith.constant 4 : index
    %c0_320 = arith.constant 0 : index
    %576 = vector.load %arg52[%c4_319, %c0_320] : memref<24x192xf32, #tpu.memory_space<vmem>>, vector<1x192xf32>
    tpu.vector_store %arg52[%c4_319, %c0_320], %575 {strides = array<i32>} : memref<24x192xf32, #tpu.memory_space<vmem>>, vector<1x192xf32>,
    %c0_321 = arith.constant 0 : index
    %c5_322 = arith.constant 5 : index
    %577 = memref.load %arg1[%c0_321, %c5_322] : memref<2x12xi32, #tpu.memory_space<smem>>
    %578 = arith.index_cast %577 : i32 to index
    %c0_323 = arith.constant 0 : index
    %579 = vector.load %arg35[%578, %c0_323] : memref<16x24xf32, #tpu.memory_space<vmem>>, vector<1x24xf32>
    %580 = arith.addf %489, %579 : vector<1x24xf32>
    %c0_i32_324 = arith.constant 0 : i32
    %581 = arith.addi %c0_i32_324, %577 : i32
    %582 = arith.index_cast %581 : i32 to index
    %c0_325 = arith.constant 0 : index
    %583 = vector.load %arg54[%582, %c0_325] : memref<32x24xf32, #tpu.memory_space<vmem>>, vector<1x24xf32>
    tpu.vector_store %arg54[%582, %c0_325], %580 {strides = array<i32>} : memref<32x24xf32, #tpu.memory_space<vmem>>, vector<1x24xf32>,
    %c0_i32_326 = arith.constant 0 : i32
    %584 = arith.addi %c0_i32_326, %577 : i32
    %585 = arith.index_cast %584 : i32 to index
    %c0_327 = arith.constant 0 : index
    %586 = vector.load %arg2[%585, %c0_327] : memref<32x192xf32, #tpu.memory_space<vmem>>, vector<1x192xf32>
    %c5_328 = arith.constant 5 : index
    %c0_329 = arith.constant 0 : index
    %587 = vector.load %arg52[%c5_328, %c0_329] : memref<24x192xf32, #tpu.memory_space<vmem>>, vector<1x192xf32>
    tpu.vector_store %arg52[%c5_328, %c0_329], %586 {strides = array<i32>} : memref<24x192xf32, #tpu.memory_space<vmem>>, vector<1x192xf32>,
    %c0_330 = arith.constant 0 : index
    %c6_331 = arith.constant 6 : index
    %588 = memref.load %arg1[%c0_330, %c6_331] : memref<2x12xi32, #tpu.memory_space<smem>>
    %589 = arith.index_cast %588 : i32 to index
    %c0_332 = arith.constant 0 : index
    %590 = vector.load %arg35[%589, %c0_332] : memref<16x24xf32, #tpu.memory_space<vmem>>, vector<1x24xf32>
    %591 = arith.addf %489, %590 : vector<1x24xf32>
    %c0_i32_333 = arith.constant 0 : i32
    %592 = arith.addi %c0_i32_333, %588 : i32
    %593 = arith.index_cast %592 : i32 to index
    %c0_334 = arith.constant 0 : index
    %594 = vector.load %arg54[%593, %c0_334] : memref<32x24xf32, #tpu.memory_space<vmem>>, vector<1x24xf32>
    tpu.vector_store %arg54[%593, %c0_334], %591 {strides = array<i32>} : memref<32x24xf32, #tpu.memory_space<vmem>>, vector<1x24xf32>,
    %c0_i32_335 = arith.constant 0 : i32
    %595 = arith.addi %c0_i32_335, %588 : i32
    %596 = arith.index_cast %595 : i32 to index
    %c0_336 = arith.constant 0 : index
    %597 = vector.load %arg2[%596, %c0_336] : memref<32x192xf32, #tpu.memory_space<vmem>>, vector<1x192xf32>
    %c6_337 = arith.constant 6 : index
    %c0_338 = arith.constant 0 : index
    %598 = vector.load %arg52[%c6_337, %c0_338] : memref<24x192xf32, #tpu.memory_space<vmem>>, vector<1x192xf32>
    tpu.vector_store %arg52[%c6_337, %c0_338], %597 {strides = array<i32>} : memref<24x192xf32, #tpu.memory_space<vmem>>, vector<1x192xf32>,
    %c0_339 = arith.constant 0 : index
    %c7_340 = arith.constant 7 : index
    %599 = memref.load %arg1[%c0_339, %c7_340] : memref<2x12xi32, #tpu.memory_space<smem>>
    %600 = arith.index_cast %599 : i32 to index
    %c0_341 = arith.constant 0 : index
    %601 = vector.load %arg35[%600, %c0_341] : memref<16x24xf32, #tpu.memory_space<vmem>>, vector<1x24xf32>
    %602 = arith.addf %489, %601 : vector<1x24xf32>
    %c0_i32_342 = arith.constant 0 : i32
    %603 = arith.addi %c0_i32_342, %599 : i32
    %604 = arith.index_cast %603 : i32 to index
    %c0_343 = arith.constant 0 : index
    %605 = vector.load %arg54[%604, %c0_343] : memref<32x24xf32, #tpu.memory_space<vmem>>, vector<1x24xf32>
    tpu.vector_store %arg54[%604, %c0_343], %602 {strides = array<i32>} : memref<32x24xf32, #tpu.memory_space<vmem>>, vector<1x24xf32>,
    %c0_i32_344 = arith.constant 0 : i32
    %606 = arith.addi %c0_i32_344, %599 : i32
    %607 = arith.index_cast %606 : i32 to index
    %c0_345 = arith.constant 0 : index
    %608 = vector.load %arg2[%607, %c0_345] : memref<32x192xf32, #tpu.memory_space<vmem>>, vector<1x192xf32>
    %c7_346 = arith.constant 7 : index
    %c0_347 = arith.constant 0 : index
    %609 = vector.load %arg52[%c7_346, %c0_347] : memref<24x192xf32, #tpu.memory_space<vmem>>, vector<1x192xf32>
    tpu.vector_store %arg52[%c7_346, %c0_347], %608 {strides = array<i32>} : memref<24x192xf32, #tpu.memory_space<vmem>>, vector<1x192xf32>,
    %c0_348 = arith.constant 0 : index
    %c8_349 = arith.constant 8 : index
    %610 = memref.load %arg1[%c0_348, %c8_349] : memref<2x12xi32, #tpu.memory_space<smem>>
    %611 = arith.index_cast %610 : i32 to index
    %c0_350 = arith.constant 0 : index
    %612 = vector.load %arg35[%611, %c0_350] : memref<16x24xf32, #tpu.memory_space<vmem>>, vector<1x24xf32>
    %613 = arith.addf %489, %612 : vector<1x24xf32>
    %c0_i32_351 = arith.constant 0 : i32
    %614 = arith.addi %c0_i32_351, %610 : i32
    %615 = arith.index_cast %614 : i32 to index
    %c0_352 = arith.constant 0 : index
    %616 = vector.load %arg54[%615, %c0_352] : memref<32x24xf32, #tpu.memory_space<vmem>>, vector<1x24xf32>
    tpu.vector_store %arg54[%615, %c0_352], %613 {strides = array<i32>} : memref<32x24xf32, #tpu.memory_space<vmem>>, vector<1x24xf32>,
    %c0_i32_353 = arith.constant 0 : i32
    %617 = arith.addi %c0_i32_353, %610 : i32
    %618 = arith.index_cast %617 : i32 to index
    %c0_354 = arith.constant 0 : index
    %619 = vector.load %arg2[%618, %c0_354] : memref<32x192xf32, #tpu.memory_space<vmem>>, vector<1x192xf32>
    %c8_355 = arith.constant 8 : index
    %c0_356 = arith.constant 0 : index
    %620 = vector.load %arg52[%c8_355, %c0_356] : memref<24x192xf32, #tpu.memory_space<vmem>>, vector<1x192xf32>
    tpu.vector_store %arg52[%c8_355, %c0_356], %619 {strides = array<i32>} : memref<24x192xf32, #tpu.memory_space<vmem>>, vector<1x192xf32>,
    %c0_357 = arith.constant 0 : index
    %c9 = arith.constant 9 : index
    %621 = memref.load %arg1[%c0_357, %c9] : memref<2x12xi32, #tpu.memory_space<smem>>
    %622 = arith.index_cast %621 : i32 to index
    %c0_358 = arith.constant 0 : index
    %623 = vector.load %arg35[%622, %c0_358] : memref<16x24xf32, #tpu.memory_space<vmem>>, vector<1x24xf32>
    %624 = arith.addf %489, %623 : vector<1x24xf32>
    %c0_i32_359 = arith.constant 0 : i32
    %625 = arith.addi %c0_i32_359, %621 : i32
    %626 = arith.index_cast %625 : i32 to index
    %c0_360 = arith.constant 0 : index
    %627 = vector.load %arg54[%626, %c0_360] : memref<32x24xf32, #tpu.memory_space<vmem>>, vector<1x24xf32>
    tpu.vector_store %arg54[%626, %c0_360], %624 {strides = array<i32>} : memref<32x24xf32, #tpu.memory_space<vmem>>, vector<1x24xf32>,
    %c0_i32_361 = arith.constant 0 : i32
    %628 = arith.addi %c0_i32_361, %621 : i32
    %629 = arith.index_cast %628 : i32 to index
    %c0_362 = arith.constant 0 : index
    %630 = vector.load %arg2[%629, %c0_362] : memref<32x192xf32, #tpu.memory_space<vmem>>, vector<1x192xf32>
    %c9_363 = arith.constant 9 : index
    %c0_364 = arith.constant 0 : index
    %631 = vector.load %arg52[%c9_363, %c0_364] : memref<24x192xf32, #tpu.memory_space<vmem>>, vector<1x192xf32>
    tpu.vector_store %arg52[%c9_363, %c0_364], %630 {strides = array<i32>} : memref<24x192xf32, #tpu.memory_space<vmem>>, vector<1x192xf32>,
    %c0_365 = arith.constant 0 : index
    %c10 = arith.constant 10 : index
    %632 = memref.load %arg1[%c0_365, %c10] : memref<2x12xi32, #tpu.memory_space<smem>>
    %633 = arith.index_cast %632 : i32 to index
    %c0_366 = arith.constant 0 : index
    %634 = vector.load %arg35[%633, %c0_366] : memref<16x24xf32, #tpu.memory_space<vmem>>, vector<1x24xf32>
    %635 = arith.addf %489, %634 : vector<1x24xf32>
    %c0_i32_367 = arith.constant 0 : i32
    %636 = arith.addi %c0_i32_367, %632 : i32
    %637 = arith.index_cast %636 : i32 to index
    %c0_368 = arith.constant 0 : index
    %638 = vector.load %arg54[%637, %c0_368] : memref<32x24xf32, #tpu.memory_space<vmem>>, vector<1x24xf32>
    tpu.vector_store %arg54[%637, %c0_368], %635 {strides = array<i32>} : memref<32x24xf32, #tpu.memory_space<vmem>>, vector<1x24xf32>,
    %c0_i32_369 = arith.constant 0 : i32
    %639 = arith.addi %c0_i32_369, %632 : i32
    %640 = arith.index_cast %639 : i32 to index
    %c0_370 = arith.constant 0 : index
    %641 = vector.load %arg2[%640, %c0_370] : memref<32x192xf32, #tpu.memory_space<vmem>>, vector<1x192xf32>
    %c10_371 = arith.constant 10 : index
    %c0_372 = arith.constant 0 : index
    %642 = vector.load %arg52[%c10_371, %c0_372] : memref<24x192xf32, #tpu.memory_space<vmem>>, vector<1x192xf32>
    tpu.vector_store %arg52[%c10_371, %c0_372], %641 {strides = array<i32>} : memref<24x192xf32, #tpu.memory_space<vmem>>, vector<1x192xf32>,
    %c0_373 = arith.constant 0 : index
    %c11 = arith.constant 11 : index
    %643 = memref.load %arg1[%c0_373, %c11] : memref<2x12xi32, #tpu.memory_space<smem>>
    %644 = arith.index_cast %643 : i32 to index
    %c0_374 = arith.constant 0 : index
    %645 = vector.load %arg35[%644, %c0_374] : memref<16x24xf32, #tpu.memory_space<vmem>>, vector<1x24xf32>
    %646 = arith.addf %489, %645 : vector<1x24xf32>
    %c0_i32_375 = arith.constant 0 : i32
    %647 = arith.addi %c0_i32_375, %643 : i32
    %648 = arith.index_cast %647 : i32 to index
    %c0_376 = arith.constant 0 : index
    %649 = vector.load %arg54[%648, %c0_376] : memref<32x24xf32, #tpu.memory_space<vmem>>, vector<1x24xf32>
    tpu.vector_store %arg54[%648, %c0_376], %646 {strides = array<i32>} : memref<32x24xf32, #tpu.memory_space<vmem>>, vector<1x24xf32>,
    %c0_i32_377 = arith.constant 0 : i32
    %650 = arith.addi %c0_i32_377, %643 : i32
    %651 = arith.index_cast %650 : i32 to index
    %c0_378 = arith.constant 0 : index
    %652 = vector.load %arg2[%651, %c0_378] : memref<32x192xf32, #tpu.memory_space<vmem>>, vector<1x192xf32>
    %c11_379 = arith.constant 11 : index
    %c0_380 = arith.constant 0 : index
    %653 = vector.load %arg52[%c11_379, %c0_380] : memref<24x192xf32, #tpu.memory_space<vmem>>, vector<1x192xf32>
    tpu.vector_store %arg52[%c11_379, %c0_380], %652 {strides = array<i32>} : memref<24x192xf32, #tpu.memory_space<vmem>>, vector<1x192xf32>,
    %c1_381 = arith.constant 1 : index
    %c0_382 = arith.constant 0 : index
    %654 = memref.load %arg0[%c1_381, %c0_382] : memref<2x4xi32, #tpu.memory_space<smem>>
    %655 = vector.extract_strided_slice %488 {offsets = [4, 0], sizes = [1, 24], strides = [1, 1]} : vector<8x24xf32> to vector<1x24xf32>
    %656 = arith.index_cast %654 : i32 to index
    %c0_383 = arith.constant 0 : index
    %657 = vector.load %arg35[%656, %c0_383] : memref<16x24xf32, #tpu.memory_space<vmem>>, vector<1x24xf32>
    %658 = arith.addf %655, %657 : vector<1x24xf32>
    %c16_i32_384 = arith.constant 16 : i32
    %659 = arith.addi %c16_i32_384, %654 : i32
    %660 = arith.index_cast %659 : i32 to index
    %c0_385 = arith.constant 0 : index
    %661 = vector.load %arg54[%660, %c0_385] : memref<32x24xf32, #tpu.memory_space<vmem>>, vector<1x24xf32>
    tpu.vector_store %arg54[%660, %c0_385], %658 {strides = array<i32>} : memref<32x24xf32, #tpu.memory_space<vmem>>, vector<1x24xf32>,
    %c1_386 = arith.constant 1 : index
    %c1_387 = arith.constant 1 : index
    %662 = memref.load %arg0[%c1_386, %c1_387] : memref<2x4xi32, #tpu.memory_space<smem>>
    %663 = vector.extract_strided_slice %488 {offsets = [5, 0], sizes = [1, 24], strides = [1, 1]} : vector<8x24xf32> to vector<1x24xf32>
    %664 = arith.index_cast %662 : i32 to index
    %c0_388 = arith.constant 0 : index
    %665 = vector.load %arg35[%664, %c0_388] : memref<16x24xf32, #tpu.memory_space<vmem>>, vector<1x24xf32>
    %666 = arith.addf %663, %665 : vector<1x24xf32>
    %c16_i32_389 = arith.constant 16 : i32
    %667 = arith.addi %c16_i32_389, %662 : i32
    %668 = arith.index_cast %667 : i32 to index
    %c0_390 = arith.constant 0 : index
    %669 = vector.load %arg54[%668, %c0_390] : memref<32x24xf32, #tpu.memory_space<vmem>>, vector<1x24xf32>
    tpu.vector_store %arg54[%668, %c0_390], %666 {strides = array<i32>} : memref<32x24xf32, #tpu.memory_space<vmem>>, vector<1x24xf32>,
    %c1_391 = arith.constant 1 : index
    %c2_392 = arith.constant 2 : index
    %670 = memref.load %arg0[%c1_391, %c2_392] : memref<2x4xi32, #tpu.memory_space<smem>>
    %671 = vector.extract_strided_slice %488 {offsets = [6, 0], sizes = [1, 24], strides = [1, 1]} : vector<8x24xf32> to vector<1x24xf32>
    %672 = arith.index_cast %670 : i32 to index
    %c0_393 = arith.constant 0 : index
    %673 = vector.load %arg35[%672, %c0_393] : memref<16x24xf32, #tpu.memory_space<vmem>>, vector<1x24xf32>
    %674 = arith.addf %671, %673 : vector<1x24xf32>
    %c16_i32_394 = arith.constant 16 : i32
    %675 = arith.addi %c16_i32_394, %670 : i32
    %676 = arith.index_cast %675 : i32 to index
    %c0_395 = arith.constant 0 : index
    %677 = vector.load %arg54[%676, %c0_395] : memref<32x24xf32, #tpu.memory_space<vmem>>, vector<1x24xf32>
    tpu.vector_store %arg54[%676, %c0_395], %674 {strides = array<i32>} : memref<32x24xf32, #tpu.memory_space<vmem>>, vector<1x24xf32>,
    %c1_396 = arith.constant 1 : index
    %c3_397 = arith.constant 3 : index
    %678 = memref.load %arg0[%c1_396, %c3_397] : memref<2x4xi32, #tpu.memory_space<smem>>
    %679 = vector.extract_strided_slice %488 {offsets = [7, 0], sizes = [1, 24], strides = [1, 1]} : vector<8x24xf32> to vector<1x24xf32>
    %680 = arith.index_cast %678 : i32 to index
    %c0_398 = arith.constant 0 : index
    %681 = vector.load %arg35[%680, %c0_398] : memref<16x24xf32, #tpu.memory_space<vmem>>, vector<1x24xf32>
    %682 = arith.addf %679, %681 : vector<1x24xf32>
    %c16_i32_399 = arith.constant 16 : i32
    %683 = arith.addi %c16_i32_399, %678 : i32
    %684 = arith.index_cast %683 : i32 to index
    %c0_400 = arith.constant 0 : index
    %685 = vector.load %arg54[%684, %c0_400] : memref<32x24xf32, #tpu.memory_space<vmem>>, vector<1x24xf32>
    tpu.vector_store %arg54[%684, %c0_400], %682 {strides = array<i32>} : memref<32x24xf32, #tpu.memory_space<vmem>>, vector<1x24xf32>,
    %c1_401 = arith.constant 1 : index
    %c0_402 = arith.constant 0 : index
    %686 = memref.load %arg1[%c1_401, %c0_402] : memref<2x12xi32, #tpu.memory_space<smem>>
    %687 = arith.index_cast %686 : i32 to index
    %c0_403 = arith.constant 0 : index
    %688 = vector.load %arg35[%687, %c0_403] : memref<16x24xf32, #tpu.memory_space<vmem>>, vector<1x24xf32>
    %689 = arith.addf %489, %688 : vector<1x24xf32>
    %c16_i32_404 = arith.constant 16 : i32
    %690 = arith.addi %c16_i32_404, %686 : i32
    %691 = arith.index_cast %690 : i32 to index
    %c0_405 = arith.constant 0 : index
    %692 = vector.load %arg54[%691, %c0_405] : memref<32x24xf32, #tpu.memory_space<vmem>>, vector<1x24xf32>
    tpu.vector_store %arg54[%691, %c0_405], %689 {strides = array<i32>} : memref<32x24xf32, #tpu.memory_space<vmem>>, vector<1x24xf32>,
    %c16_i32_406 = arith.constant 16 : i32
    %693 = arith.addi %c16_i32_406, %686 : i32
    %694 = arith.index_cast %693 : i32 to index
    %c0_407 = arith.constant 0 : index
    %695 = vector.load %arg2[%694, %c0_407] : memref<32x192xf32, #tpu.memory_space<vmem>>, vector<1x192xf32>
    %c12 = arith.constant 12 : index
    %c0_408 = arith.constant 0 : index
    %696 = vector.load %arg52[%c12, %c0_408] : memref<24x192xf32, #tpu.memory_space<vmem>>, vector<1x192xf32>
    tpu.vector_store %arg52[%c12, %c0_408], %695 {strides = array<i32>} : memref<24x192xf32, #tpu.memory_space<vmem>>, vector<1x192xf32>,
    %c1_409 = arith.constant 1 : index
    %c1_410 = arith.constant 1 : index
    %697 = memref.load %arg1[%c1_409, %c1_410] : memref<2x12xi32, #tpu.memory_space<smem>>
    %698 = arith.index_cast %697 : i32 to index
    %c0_411 = arith.constant 0 : index
    %699 = vector.load %arg35[%698, %c0_411] : memref<16x24xf32, #tpu.memory_space<vmem>>, vector<1x24xf32>
    %700 = arith.addf %489, %699 : vector<1x24xf32>
    %c16_i32_412 = arith.constant 16 : i32
    %701 = arith.addi %c16_i32_412, %697 : i32
    %702 = arith.index_cast %701 : i32 to index
    %c0_413 = arith.constant 0 : index
    %703 = vector.load %arg54[%702, %c0_413] : memref<32x24xf32, #tpu.memory_space<vmem>>, vector<1x24xf32>
    tpu.vector_store %arg54[%702, %c0_413], %700 {strides = array<i32>} : memref<32x24xf32, #tpu.memory_space<vmem>>, vector<1x24xf32>,
    %c16_i32_414 = arith.constant 16 : i32
    %704 = arith.addi %c16_i32_414, %697 : i32
    %705 = arith.index_cast %704 : i32 to index
    %c0_415 = arith.constant 0 : index
    %706 = vector.load %arg2[%705, %c0_415] : memref<32x192xf32, #tpu.memory_space<vmem>>, vector<1x192xf32>
    %c13 = arith.constant 13 : index
    %c0_416 = arith.constant 0 : index
    %707 = vector.load %arg52[%c13, %c0_416] : memref<24x192xf32, #tpu.memory_space<vmem>>, vector<1x192xf32>
    tpu.vector_store %arg52[%c13, %c0_416], %706 {strides = array<i32>} : memref<24x192xf32, #tpu.memory_space<vmem>>, vector<1x192xf32>,
    %c1_417 = arith.constant 1 : index
    %c2_418 = arith.constant 2 : index
    %708 = memref.load %arg1[%c1_417, %c2_418] : memref<2x12xi32, #tpu.memory_space<smem>>
    %709 = arith.index_cast %708 : i32 to index
    %c0_419 = arith.constant 0 : index
    %710 = vector.load %arg35[%709, %c0_419] : memref<16x24xf32, #tpu.memory_space<vmem>>, vector<1x24xf32>
    %711 = arith.addf %489, %710 : vector<1x24xf32>
    %c16_i32_420 = arith.constant 16 : i32
    %712 = arith.addi %c16_i32_420, %708 : i32
    %713 = arith.index_cast %712 : i32 to index
    %c0_421 = arith.constant 0 : index
    %714 = vector.load %arg54[%713, %c0_421] : memref<32x24xf32, #tpu.memory_space<vmem>>, vector<1x24xf32>
    tpu.vector_store %arg54[%713, %c0_421], %711 {strides = array<i32>} : memref<32x24xf32, #tpu.memory_space<vmem>>, vector<1x24xf32>,
    %c16_i32_422 = arith.constant 16 : i32
    %715 = arith.addi %c16_i32_422, %708 : i32
    %716 = arith.index_cast %715 : i32 to index
    %c0_423 = arith.constant 0 : index
    %717 = vector.load %arg2[%716, %c0_423] : memref<32x192xf32, #tpu.memory_space<vmem>>, vector<1x192xf32>
    %c14 = arith.constant 14 : index
    %c0_424 = arith.constant 0 : index
    %718 = vector.load %arg52[%c14, %c0_424] : memref<24x192xf32, #tpu.memory_space<vmem>>, vector<1x192xf32>
    tpu.vector_store %arg52[%c14, %c0_424], %717 {strides = array<i32>} : memref<24x192xf32, #tpu.memory_space<vmem>>, vector<1x192xf32>,
    %c1_425 = arith.constant 1 : index
    %c3_426 = arith.constant 3 : index
    %719 = memref.load %arg1[%c1_425, %c3_426] : memref<2x12xi32, #tpu.memory_space<smem>>
    %720 = arith.index_cast %719 : i32 to index
    %c0_427 = arith.constant 0 : index
    %721 = vector.load %arg35[%720, %c0_427] : memref<16x24xf32, #tpu.memory_space<vmem>>, vector<1x24xf32>
    %722 = arith.addf %489, %721 : vector<1x24xf32>
    %c16_i32_428 = arith.constant 16 : i32
    %723 = arith.addi %c16_i32_428, %719 : i32
    %724 = arith.index_cast %723 : i32 to index
    %c0_429 = arith.constant 0 : index
    %725 = vector.load %arg54[%724, %c0_429] : memref<32x24xf32, #tpu.memory_space<vmem>>, vector<1x24xf32>
    tpu.vector_store %arg54[%724, %c0_429], %722 {strides = array<i32>} : memref<32x24xf32, #tpu.memory_space<vmem>>, vector<1x24xf32>,
    %c16_i32_430 = arith.constant 16 : i32
    %726 = arith.addi %c16_i32_430, %719 : i32
    %727 = arith.index_cast %726 : i32 to index
    %c0_431 = arith.constant 0 : index
    %728 = vector.load %arg2[%727, %c0_431] : memref<32x192xf32, #tpu.memory_space<vmem>>, vector<1x192xf32>
    %c15 = arith.constant 15 : index
    %c0_432 = arith.constant 0 : index
    %729 = vector.load %arg52[%c15, %c0_432] : memref<24x192xf32, #tpu.memory_space<vmem>>, vector<1x192xf32>
    tpu.vector_store %arg52[%c15, %c0_432], %728 {strides = array<i32>} : memref<24x192xf32, #tpu.memory_space<vmem>>, vector<1x192xf32>,
    %c1_433 = arith.constant 1 : index
    %c4_434 = arith.constant 4 : index
    %730 = memref.load %arg1[%c1_433, %c4_434] : memref<2x12xi32, #tpu.memory_space<smem>>
    %731 = arith.index_cast %730 : i32 to index
    %c0_435 = arith.constant 0 : index
    %732 = vector.load %arg35[%731, %c0_435] : memref<16x24xf32, #tpu.memory_space<vmem>>, vector<1x24xf32>
    %733 = arith.addf %489, %732 : vector<1x24xf32>
    %c16_i32_436 = arith.constant 16 : i32
    %734 = arith.addi %c16_i32_436, %730 : i32
    %735 = arith.index_cast %734 : i32 to index
    %c0_437 = arith.constant 0 : index
    %736 = vector.load %arg54[%735, %c0_437] : memref<32x24xf32, #tpu.memory_space<vmem>>, vector<1x24xf32>
    tpu.vector_store %arg54[%735, %c0_437], %733 {strides = array<i32>} : memref<32x24xf32, #tpu.memory_space<vmem>>, vector<1x24xf32>,
    %c16_i32_438 = arith.constant 16 : i32
    %737 = arith.addi %c16_i32_438, %730 : i32
    %738 = arith.index_cast %737 : i32 to index
    %c0_439 = arith.constant 0 : index
    %739 = vector.load %arg2[%738, %c0_439] : memref<32x192xf32, #tpu.memory_space<vmem>>, vector<1x192xf32>
    %c16_440 = arith.constant 16 : index
    %c0_441 = arith.constant 0 : index
    %740 = vector.load %arg52[%c16_440, %c0_441] : memref<24x192xf32, #tpu.memory_space<vmem>>, vector<1x192xf32>
    tpu.vector_store %arg52[%c16_440, %c0_441], %739 {strides = array<i32>} : memref<24x192xf32, #tpu.memory_space<vmem>>, vector<1x192xf32>,
    %c1_442 = arith.constant 1 : index
    %c5_443 = arith.constant 5 : index
    %741 = memref.load %arg1[%c1_442, %c5_443] : memref<2x12xi32, #tpu.memory_space<smem>>
    %742 = arith.index_cast %741 : i32 to index
    %c0_444 = arith.constant 0 : index
    %743 = vector.load %arg35[%742, %c0_444] : memref<16x24xf32, #tpu.memory_space<vmem>>, vector<1x24xf32>
    %744 = arith.addf %489, %743 : vector<1x24xf32>
    %c16_i32_445 = arith.constant 16 : i32
    %745 = arith.addi %c16_i32_445, %741 : i32
    %746 = arith.index_cast %745 : i32 to index
    %c0_446 = arith.constant 0 : index
    %747 = vector.load %arg54[%746, %c0_446] : memref<32x24xf32, #tpu.memory_space<vmem>>, vector<1x24xf32>
    tpu.vector_store %arg54[%746, %c0_446], %744 {strides = array<i32>} : memref<32x24xf32, #tpu.memory_space<vmem>>, vector<1x24xf32>,
    %c16_i32_447 = arith.constant 16 : i32
    %748 = arith.addi %c16_i32_447, %741 : i32
    %749 = arith.index_cast %748 : i32 to index
    %c0_448 = arith.constant 0 : index
    %750 = vector.load %arg2[%749, %c0_448] : memref<32x192xf32, #tpu.memory_space<vmem>>, vector<1x192xf32>
    %c17 = arith.constant 17 : index
    %c0_449 = arith.constant 0 : index
    %751 = vector.load %arg52[%c17, %c0_449] : memref<24x192xf32, #tpu.memory_space<vmem>>, vector<1x192xf32>
    tpu.vector_store %arg52[%c17, %c0_449], %750 {strides = array<i32>} : memref<24x192xf32, #tpu.memory_space<vmem>>, vector<1x192xf32>,
    %c1_450 = arith.constant 1 : index
    %c6_451 = arith.constant 6 : index
    %752 = memref.load %arg1[%c1_450, %c6_451] : memref<2x12xi32, #tpu.memory_space<smem>>
    %753 = arith.index_cast %752 : i32 to index
    %c0_452 = arith.constant 0 : index
    %754 = vector.load %arg35[%753, %c0_452] : memref<16x24xf32, #tpu.memory_space<vmem>>, vector<1x24xf32>
    %755 = arith.addf %489, %754 : vector<1x24xf32>
    %c16_i32_453 = arith.constant 16 : i32
    %756 = arith.addi %c16_i32_453, %752 : i32
    %757 = arith.index_cast %756 : i32 to index
    %c0_454 = arith.constant 0 : index
    %758 = vector.load %arg54[%757, %c0_454] : memref<32x24xf32, #tpu.memory_space<vmem>>, vector<1x24xf32>
    tpu.vector_store %arg54[%757, %c0_454], %755 {strides = array<i32>} : memref<32x24xf32, #tpu.memory_space<vmem>>, vector<1x24xf32>,
    %c16_i32_455 = arith.constant 16 : i32
    %759 = arith.addi %c16_i32_455, %752 : i32
    %760 = arith.index_cast %759 : i32 to index
    %c0_456 = arith.constant 0 : index
    %761 = vector.load %arg2[%760, %c0_456] : memref<32x192xf32, #tpu.memory_space<vmem>>, vector<1x192xf32>
    %c18 = arith.constant 18 : index
    %c0_457 = arith.constant 0 : index
    %762 = vector.load %arg52[%c18, %c0_457] : memref<24x192xf32, #tpu.memory_space<vmem>>, vector<1x192xf32>
    tpu.vector_store %arg52[%c18, %c0_457], %761 {strides = array<i32>} : memref<24x192xf32, #tpu.memory_space<vmem>>, vector<1x192xf32>,
    %c1_458 = arith.constant 1 : index
    %c7_459 = arith.constant 7 : index
    %763 = memref.load %arg1[%c1_458, %c7_459] : memref<2x12xi32, #tpu.memory_space<smem>>
    %764 = arith.index_cast %763 : i32 to index
    %c0_460 = arith.constant 0 : index
    %765 = vector.load %arg35[%764, %c0_460] : memref<16x24xf32, #tpu.memory_space<vmem>>, vector<1x24xf32>
    %766 = arith.addf %489, %765 : vector<1x24xf32>
    %c16_i32_461 = arith.constant 16 : i32
    %767 = arith.addi %c16_i32_461, %763 : i32
    %768 = arith.index_cast %767 : i32 to index
    %c0_462 = arith.constant 0 : index
    %769 = vector.load %arg54[%768, %c0_462] : memref<32x24xf32, #tpu.memory_space<vmem>>, vector<1x24xf32>
    tpu.vector_store %arg54[%768, %c0_462], %766 {strides = array<i32>} : memref<32x24xf32, #tpu.memory_space<vmem>>, vector<1x24xf32>,
    %c16_i32_463 = arith.constant 16 : i32
    %770 = arith.addi %c16_i32_463, %763 : i32
    %771 = arith.index_cast %770 : i32 to index
    %c0_464 = arith.constant 0 : index
    %772 = vector.load %arg2[%771, %c0_464] : memref<32x192xf32, #tpu.memory_space<vmem>>, vector<1x192xf32>
    %c19 = arith.constant 19 : index
    %c0_465 = arith.constant 0 : index
    %773 = vector.load %arg52[%c19, %c0_465] : memref<24x192xf32, #tpu.memory_space<vmem>>, vector<1x192xf32>
    tpu.vector_store %arg52[%c19, %c0_465], %772 {strides = array<i32>} : memref<24x192xf32, #tpu.memory_space<vmem>>, vector<1x192xf32>,
    %c1_466 = arith.constant 1 : index
    %c8_467 = arith.constant 8 : index
    %774 = memref.load %arg1[%c1_466, %c8_467] : memref<2x12xi32, #tpu.memory_space<smem>>
    %775 = arith.index_cast %774 : i32 to index
    %c0_468 = arith.constant 0 : index
    %776 = vector.load %arg35[%775, %c0_468] : memref<16x24xf32, #tpu.memory_space<vmem>>, vector<1x24xf32>
    %777 = arith.addf %489, %776 : vector<1x24xf32>
    %c16_i32_469 = arith.constant 16 : i32
    %778 = arith.addi %c16_i32_469, %774 : i32
    %779 = arith.index_cast %778 : i32 to index
    %c0_470 = arith.constant 0 : index
    %780 = vector.load %arg54[%779, %c0_470] : memref<32x24xf32, #tpu.memory_space<vmem>>, vector<1x24xf32>
    tpu.vector_store %arg54[%779, %c0_470], %777 {strides = array<i32>} : memref<32x24xf32, #tpu.memory_space<vmem>>, vector<1x24xf32>,
    %c16_i32_471 = arith.constant 16 : i32
    %781 = arith.addi %c16_i32_471, %774 : i32
    %782 = arith.index_cast %781 : i32 to index
    %c0_472 = arith.constant 0 : index
    %783 = vector.load %arg2[%782, %c0_472] : memref<32x192xf32, #tpu.memory_space<vmem>>, vector<1x192xf32>
    %c20 = arith.constant 20 : index
    %c0_473 = arith.constant 0 : index
    %784 = vector.load %arg52[%c20, %c0_473] : memref<24x192xf32, #tpu.memory_space<vmem>>, vector<1x192xf32>
    tpu.vector_store %arg52[%c20, %c0_473], %783 {strides = array<i32>} : memref<24x192xf32, #tpu.memory_space<vmem>>, vector<1x192xf32>,
    %c1_474 = arith.constant 1 : index
    %c9_475 = arith.constant 9 : index
    %785 = memref.load %arg1[%c1_474, %c9_475] : memref<2x12xi32, #tpu.memory_space<smem>>
    %786 = arith.index_cast %785 : i32 to index
    %c0_476 = arith.constant 0 : index
    %787 = vector.load %arg35[%786, %c0_476] : memref<16x24xf32, #tpu.memory_space<vmem>>, vector<1x24xf32>
    %788 = arith.addf %489, %787 : vector<1x24xf32>
    %c16_i32_477 = arith.constant 16 : i32
    %789 = arith.addi %c16_i32_477, %785 : i32
    %790 = arith.index_cast %789 : i32 to index
    %c0_478 = arith.constant 0 : index
    %791 = vector.load %arg54[%790, %c0_478] : memref<32x24xf32, #tpu.memory_space<vmem>>, vector<1x24xf32>
    tpu.vector_store %arg54[%790, %c0_478], %788 {strides = array<i32>} : memref<32x24xf32, #tpu.memory_space<vmem>>, vector<1x24xf32>,
    %c16_i32_479 = arith.constant 16 : i32
    %792 = arith.addi %c16_i32_479, %785 : i32
    %793 = arith.index_cast %792 : i32 to index
    %c0_480 = arith.constant 0 : index
    %794 = vector.load %arg2[%793, %c0_480] : memref<32x192xf32, #tpu.memory_space<vmem>>, vector<1x192xf32>
    %c21 = arith.constant 21 : index
    %c0_481 = arith.constant 0 : index
    %795 = vector.load %arg52[%c21, %c0_481] : memref<24x192xf32, #tpu.memory_space<vmem>>, vector<1x192xf32>
    tpu.vector_store %arg52[%c21, %c0_481], %794 {strides = array<i32>} : memref<24x192xf32, #tpu.memory_space<vmem>>, vector<1x192xf32>,
    %c1_482 = arith.constant 1 : index
    %c10_483 = arith.constant 10 : index
    %796 = memref.load %arg1[%c1_482, %c10_483] : memref<2x12xi32, #tpu.memory_space<smem>>
    %797 = arith.index_cast %796 : i32 to index
    %c0_484 = arith.constant 0 : index
    %798 = vector.load %arg35[%797, %c0_484] : memref<16x24xf32, #tpu.memory_space<vmem>>, vector<1x24xf32>
    %799 = arith.addf %489, %798 : vector<1x24xf32>
    %c16_i32_485 = arith.constant 16 : i32
    %800 = arith.addi %c16_i32_485, %796 : i32
    %801 = arith.index_cast %800 : i32 to index
    %c0_486 = arith.constant 0 : index
    %802 = vector.load %arg54[%801, %c0_486] : memref<32x24xf32, #tpu.memory_space<vmem>>, vector<1x24xf32>
    tpu.vector_store %arg54[%801, %c0_486], %799 {strides = array<i32>} : memref<32x24xf32, #tpu.memory_space<vmem>>, vector<1x24xf32>,
    %c16_i32_487 = arith.constant 16 : i32
    %803 = arith.addi %c16_i32_487, %796 : i32
    %804 = arith.index_cast %803 : i32 to index
    %c0_488 = arith.constant 0 : index
    %805 = vector.load %arg2[%804, %c0_488] : memref<32x192xf32, #tpu.memory_space<vmem>>, vector<1x192xf32>
    %c22 = arith.constant 22 : index
    %c0_489 = arith.constant 0 : index
    %806 = vector.load %arg52[%c22, %c0_489] : memref<24x192xf32, #tpu.memory_space<vmem>>, vector<1x192xf32>
    tpu.vector_store %arg52[%c22, %c0_489], %805 {strides = array<i32>} : memref<24x192xf32, #tpu.memory_space<vmem>>, vector<1x192xf32>,
    %c1_490 = arith.constant 1 : index
    %c11_491 = arith.constant 11 : index
    %807 = memref.load %arg1[%c1_490, %c11_491] : memref<2x12xi32, #tpu.memory_space<smem>>
    %808 = arith.index_cast %807 : i32 to index
    %c0_492 = arith.constant 0 : index
    %809 = vector.load %arg35[%808, %c0_492] : memref<16x24xf32, #tpu.memory_space<vmem>>, vector<1x24xf32>
    %810 = arith.addf %489, %809 : vector<1x24xf32>
    %c16_i32_493 = arith.constant 16 : i32
    %811 = arith.addi %c16_i32_493, %807 : i32
    %812 = arith.index_cast %811 : i32 to index
    %c0_494 = arith.constant 0 : index
    %813 = vector.load %arg54[%812, %c0_494] : memref<32x24xf32, #tpu.memory_space<vmem>>, vector<1x24xf32>
    tpu.vector_store %arg54[%812, %c0_494], %810 {strides = array<i32>} : memref<32x24xf32, #tpu.memory_space<vmem>>, vector<1x24xf32>,
    %c16_i32_495 = arith.constant 16 : i32
    %814 = arith.addi %c16_i32_495, %807 : i32
    %815 = arith.index_cast %814 : i32 to index
    %c0_496 = arith.constant 0 : index
    %816 = vector.load %arg2[%815, %c0_496] : memref<32x192xf32, #tpu.memory_space<vmem>>, vector<1x192xf32>
    %c23 = arith.constant 23 : index
    %c0_497 = arith.constant 0 : index
    %817 = vector.load %arg52[%c23, %c0_497] : memref<24x192xf32, #tpu.memory_space<vmem>>, vector<1x192xf32>
    tpu.vector_store %arg52[%c23, %c0_497], %816 {strides = array<i32>} : memref<24x192xf32, #tpu.memory_space<vmem>>, vector<1x192xf32>,
    %c0_498 = arith.constant 0 : index
    %c0_499 = arith.constant 0 : index
    %818 = vector.load %arg54[%c0_498, %c0_499] : memref<32x24xf32, #tpu.memory_space<vmem>>, vector<32x24xf32>
    %c0_500 = arith.constant 0 : index
    %c0_501 = arith.constant 0 : index
    %819 = vector.load %arg36[%c0_500, %c0_501] : memref<1x24xf32, #tpu.memory_space<vmem>>, vector<1x24xf32>
    %c0_502 = arith.constant 0 : index
    %c0_503 = arith.constant 0 : index
    %820 = vector.load %arg37[%c0_502, %c0_503] : memref<1x24xf32, #tpu.memory_space<vmem>>, vector<1x24xf32>
    %cst_504 = arith.constant dense<0.000000e+00> : vector<32xf32>
    %821 = vector.multi_reduction <add>, %818, %cst_504 [1] : vector<32x24xf32> to vector<32xf32>
    %822 = vector.shape_cast %821 : vector<32xf32> to vector<32x1xf32>
    %cst_505 = arith.constant 2.400000e+01 : f32
    %823 = vector.broadcast %cst_505 : f32 to vector<32x1xf32>
    %824 = arith.divf %822, %823 : vector<32x1xf32>
    %825 = vector.broadcast %824 : vector<32x1xf32> to vector<32x24xf32>
    %826 = arith.subf %818, %825 : vector<32x24xf32>
    %827 = arith.mulf %826, %826 : vector<32x24xf32>
    %cst_506 = arith.constant dense<0.000000e+00> : vector<32xf32>
    %828 = vector.multi_reduction <add>, %827, %cst_506 [1] : vector<32x24xf32> to vector<32xf32>
    %829 = vector.shape_cast %828 : vector<32xf32> to vector<32x1xf32>
    %cst_507 = arith.constant 2.400000e+01 : f32
    %830 = vector.broadcast %cst_507 : f32 to vector<32x1xf32>
    %831 = arith.divf %829, %830 : vector<32x1xf32>
    %832 = vector.broadcast %824 : vector<32x1xf32> to vector<32x24xf32>
    %833 = arith.subf %818, %832 : vector<32x24xf32>
    %cst_508 = arith.constant 9.99999974E-6 : f32
    %834 = vector.broadcast %cst_508 : f32 to vector<32x1xf32>
    %835 = arith.addf %831, %834 : vector<32x1xf32>
    %836 = math.rsqrt %835 : vector<32x1xf32>
    %837 = vector.broadcast %836 : vector<32x1xf32> to vector<32x24xf32>
    %838 = arith.mulf %833, %837 : vector<32x24xf32>
    %839 = vector.broadcast %819 : vector<1x24xf32> to vector<32x24xf32>
    %840 = arith.mulf %838, %839 : vector<32x24xf32>
    %841 = vector.broadcast %820 : vector<1x24xf32> to vector<32x24xf32>
    %842 = arith.addf %840, %841 : vector<32x24xf32>
    %c0_509 = arith.constant 0 : index
    %c0_510 = arith.constant 0 : index
    %843 = vector.load %arg38[%c0_509, %c0_510] : memref<24x96xf32, #tpu.memory_space<vmem>>, vector<24x96xf32>
    %cst_511 = arith.constant dense<0.000000e+00> : vector<32x96xf32>
    %844 = tpu.matmul %842, %843, %cst_511 {dimension_numbers = #tpu.dot_dimension_numbers<[1], [0], [0], [1], [0, 0, 1, 1], [], []>} : vector<32x24xf32>, vector<24x96xf32>, vector<32x96xf32> -> vector<32x96xf32>
    %845 = vector.shape_cast %844 : vector<32x96xf32> to vector<2x16x96xf32>
    %846 = vector.extract_strided_slice %845 {offsets = [0, 0, 0], sizes = [2, 16, 8], strides = [1, 1, 1]} : vector<2x16x96xf32> to vector<2x16x8xf32>
    %847 = vector.extract_strided_slice %845 {offsets = [0, 0, 32], sizes = [2, 16, 8], strides = [1, 1, 1]} : vector<2x16x96xf32> to vector<2x16x8xf32>
    %848 = vector.extract_strided_slice %845 {offsets = [0, 0, 64], sizes = [2, 16, 8], strides = [1, 1, 1]} : vector<2x16x96xf32> to vector<2x16x8xf32>
    "tpu.trace_start"() <{level = 10 : i32, message = "bqd,bkd->bqk"}> : () -> ()
    %cst_512 = arith.constant dense<0.000000e+00> : vector<2x16x16xf32>
    %849 = tpu.matmul %846, %847, %cst_512 {dimension_numbers = #tpu.dot_dimension_numbers<[2], [2], [1], [1], [0, 0, 0, 1, 1, 1], [0], [0]>} : vector<2x16x8xf32>, vector<2x16x8xf32>, vector<2x16x16xf32> -> vector<2x16x16xf32>
    "tpu.trace_stop"() : () -> ()
    %cst_513 = arith.constant 0.353553385 : f32
    %850 = vector.broadcast %cst_513 : f32 to vector<2x16x16xf32>
    %851 = arith.mulf %849, %850 : vector<2x16x16xf32>
    %cst_514 = arith.constant dense<0xFF800000> : vector<2x16xf32>
    %852 = vector.multi_reduction <maximumf>, %851, %cst_514 [2] : vector<2x16x16xf32> to vector<2x16xf32>
    %853 = vector.shape_cast %852 : vector<2x16xf32> to vector<2x16x1xf32>
    %854 = vector.broadcast %853 : vector<2x16x1xf32> to vector<2x16x16xf32>
    %855 = arith.subf %851, %854 : vector<2x16x16xf32>
    %856 = math.exp %855 : vector<2x16x16xf32>
    %cst_515 = arith.constant dense<0.000000e+00> : vector<2x16xf32>
    %857 = vector.multi_reduction <add>, %856, %cst_515 [2] : vector<2x16x16xf32> to vector<2x16xf32>
    %858 = vector.shape_cast %857 : vector<2x16xf32> to vector<2x16x1xf32>
    %859 = vector.broadcast %858 : vector<2x16x1xf32> to vector<2x16x16xf32>
    %860 = arith.divf %856, %859 : vector<2x16x16xf32>
    "tpu.trace_start"() <{level = 10 : i32, message = "bqk,bkd->bqd"}> : () -> ()
    %cst_516 = arith.constant dense<0.000000e+00> : vector<2x16x8xf32>
    %861 = tpu.matmul %860, %848, %cst_516 {dimension_numbers = #tpu.dot_dimension_numbers<[2], [1], [1], [2], [0, 0, 0, 1, 1, 2], [0], [0]>} : vector<2x16x16xf32>, vector<2x16x8xf32>, vector<2x16x8xf32> -> vector<2x16x8xf32>
    "tpu.trace_stop"() : () -> ()
    %862 = vector.shape_cast %861 : vector<2x16x8xf32> to vector<32x8xf32>
    %c0_517 = arith.constant 0 : index
    %c0_518 = arith.constant 0 : index
    %863 = vector.load %arg53[%c0_517, %c0_518] : memref<32x32xf32, #tpu.memory_space<vmem>>, vector<32x8xf32>
    tpu.vector_store %arg53[%c0_517, %c0_518], %862 {strides = array<i32>} : memref<32x32xf32, #tpu.memory_space<vmem>>, vector<32x8xf32>,
    %864 = vector.extract_strided_slice %845 {offsets = [0, 0, 8], sizes = [2, 16, 8], strides = [1, 1, 1]} : vector<2x16x96xf32> to vector<2x16x8xf32>
    %865 = vector.extract_strided_slice %845 {offsets = [0, 0, 40], sizes = [2, 16, 8], strides = [1, 1, 1]} : vector<2x16x96xf32> to vector<2x16x8xf32>
    %866 = vector.extract_strided_slice %845 {offsets = [0, 0, 72], sizes = [2, 16, 8], strides = [1, 1, 1]} : vector<2x16x96xf32> to vector<2x16x8xf32>
    "tpu.trace_start"() <{level = 10 : i32, message = "bqd,bkd->bqk"}> : () -> ()
    %cst_519 = arith.constant dense<0.000000e+00> : vector<2x16x16xf32>
    %867 = tpu.matmul %864, %865, %cst_519 {dimension_numbers = #tpu.dot_dimension_numbers<[2], [2], [1], [1], [0, 0, 0, 1, 1, 1], [0], [0]>} : vector<2x16x8xf32>, vector<2x16x8xf32>, vector<2x16x16xf32> -> vector<2x16x16xf32>
    "tpu.trace_stop"() : () -> ()
    %cst_520 = arith.constant 0.353553385 : f32
    %868 = vector.broadcast %cst_520 : f32 to vector<2x16x16xf32>
    %869 = arith.mulf %867, %868 : vector<2x16x16xf32>
    %cst_521 = arith.constant dense<0xFF800000> : vector<2x16xf32>
    %870 = vector.multi_reduction <maximumf>, %869, %cst_521 [2] : vector<2x16x16xf32> to vector<2x16xf32>
    %871 = vector.shape_cast %870 : vector<2x16xf32> to vector<2x16x1xf32>
    %872 = vector.broadcast %871 : vector<2x16x1xf32> to vector<2x16x16xf32>
    %873 = arith.subf %869, %872 : vector<2x16x16xf32>
    %874 = math.exp %873 : vector<2x16x16xf32>
    %cst_522 = arith.constant dense<0.000000e+00> : vector<2x16xf32>
    %875 = vector.multi_reduction <add>, %874, %cst_522 [2] : vector<2x16x16xf32> to vector<2x16xf32>
    %876 = vector.shape_cast %875 : vector<2x16xf32> to vector<2x16x1xf32>
    %877 = vector.broadcast %876 : vector<2x16x1xf32> to vector<2x16x16xf32>
    %878 = arith.divf %874, %877 : vector<2x16x16xf32>
    "tpu.trace_start"() <{level = 10 : i32, message = "bqk,bkd->bqd"}> : () -> ()
    %cst_523 = arith.constant dense<0.000000e+00> : vector<2x16x8xf32>
    %879 = tpu.matmul %878, %866, %cst_523 {dimension_numbers = #tpu.dot_dimension_numbers<[2], [1], [1], [2], [0, 0, 0, 1, 1, 2], [0], [0]>} : vector<2x16x16xf32>, vector<2x16x8xf32>, vector<2x16x8xf32> -> vector<2x16x8xf32>
    "tpu.trace_stop"() : () -> ()
    %880 = vector.shape_cast %879 : vector<2x16x8xf32> to vector<32x8xf32>
    %c0_524 = arith.constant 0 : index
    %c8_525 = arith.constant 8 : index
    %881 = vector.load %arg53[%c0_524, %c8_525] : memref<32x32xf32, #tpu.memory_space<vmem>>, vector<32x8xf32>
    tpu.vector_store %arg53[%c0_524, %c8_525], %880 {strides = array<i32>} : memref<32x32xf32, #tpu.memory_space<vmem>>, vector<32x8xf32>,
    %882 = vector.extract_strided_slice %845 {offsets = [0, 0, 16], sizes = [2, 16, 8], strides = [1, 1, 1]} : vector<2x16x96xf32> to vector<2x16x8xf32>
    %883 = vector.extract_strided_slice %845 {offsets = [0, 0, 48], sizes = [2, 16, 8], strides = [1, 1, 1]} : vector<2x16x96xf32> to vector<2x16x8xf32>
    %884 = vector.extract_strided_slice %845 {offsets = [0, 0, 80], sizes = [2, 16, 8], strides = [1, 1, 1]} : vector<2x16x96xf32> to vector<2x16x8xf32>
    "tpu.trace_start"() <{level = 10 : i32, message = "bqd,bkd->bqk"}> : () -> ()
    %cst_526 = arith.constant dense<0.000000e+00> : vector<2x16x16xf32>
    %885 = tpu.matmul %882, %883, %cst_526 {dimension_numbers = #tpu.dot_dimension_numbers<[2], [2], [1], [1], [0, 0, 0, 1, 1, 1], [0], [0]>} : vector<2x16x8xf32>, vector<2x16x8xf32>, vector<2x16x16xf32> -> vector<2x16x16xf32>
    "tpu.trace_stop"() : () -> ()
    %cst_527 = arith.constant 0.353553385 : f32
    %886 = vector.broadcast %cst_527 : f32 to vector<2x16x16xf32>
    %887 = arith.mulf %885, %886 : vector<2x16x16xf32>
    %cst_528 = arith.constant dense<0xFF800000> : vector<2x16xf32>
    %888 = vector.multi_reduction <maximumf>, %887, %cst_528 [2] : vector<2x16x16xf32> to vector<2x16xf32>
    %889 = vector.shape_cast %888 : vector<2x16xf32> to vector<2x16x1xf32>
    %890 = vector.broadcast %889 : vector<2x16x1xf32> to vector<2x16x16xf32>
    %891 = arith.subf %887, %890 : vector<2x16x16xf32>
    %892 = math.exp %891 : vector<2x16x16xf32>
    %cst_529 = arith.constant dense<0.000000e+00> : vector<2x16xf32>
    %893 = vector.multi_reduction <add>, %892, %cst_529 [2] : vector<2x16x16xf32> to vector<2x16xf32>
    %894 = vector.shape_cast %893 : vector<2x16xf32> to vector<2x16x1xf32>
    %895 = vector.broadcast %894 : vector<2x16x1xf32> to vector<2x16x16xf32>
    %896 = arith.divf %892, %895 : vector<2x16x16xf32>
    "tpu.trace_start"() <{level = 10 : i32, message = "bqk,bkd->bqd"}> : () -> ()
    %cst_530 = arith.constant dense<0.000000e+00> : vector<2x16x8xf32>
    %897 = tpu.matmul %896, %884, %cst_530 {dimension_numbers = #tpu.dot_dimension_numbers<[2], [1], [1], [2], [0, 0, 0, 1, 1, 2], [0], [0]>} : vector<2x16x16xf32>, vector<2x16x8xf32>, vector<2x16x8xf32> -> vector<2x16x8xf32>
    "tpu.trace_stop"() : () -> ()
    %898 = vector.shape_cast %897 : vector<2x16x8xf32> to vector<32x8xf32>
    %c0_531 = arith.constant 0 : index
    %c16_532 = arith.constant 16 : index
    %899 = vector.load %arg53[%c0_531, %c16_532] : memref<32x32xf32, #tpu.memory_space<vmem>>, vector<32x8xf32>
    tpu.vector_store %arg53[%c0_531, %c16_532], %898 {strides = array<i32>} : memref<32x32xf32, #tpu.memory_space<vmem>>, vector<32x8xf32>,
    %900 = vector.extract_strided_slice %845 {offsets = [0, 0, 24], sizes = [2, 16, 8], strides = [1, 1, 1]} : vector<2x16x96xf32> to vector<2x16x8xf32>
    %901 = vector.extract_strided_slice %845 {offsets = [0, 0, 56], sizes = [2, 16, 8], strides = [1, 1, 1]} : vector<2x16x96xf32> to vector<2x16x8xf32>
    %902 = vector.extract_strided_slice %845 {offsets = [0, 0, 88], sizes = [2, 16, 8], strides = [1, 1, 1]} : vector<2x16x96xf32> to vector<2x16x8xf32>
    "tpu.trace_start"() <{level = 10 : i32, message = "bqd,bkd->bqk"}> : () -> ()
    %cst_533 = arith.constant dense<0.000000e+00> : vector<2x16x16xf32>
    %903 = tpu.matmul %900, %901, %cst_533 {dimension_numbers = #tpu.dot_dimension_numbers<[2], [2], [1], [1], [0, 0, 0, 1, 1, 1], [0], [0]>} : vector<2x16x8xf32>, vector<2x16x8xf32>, vector<2x16x16xf32> -> vector<2x16x16xf32>
    "tpu.trace_stop"() : () -> ()
    %cst_534 = arith.constant 0.353553385 : f32
    %904 = vector.broadcast %cst_534 : f32 to vector<2x16x16xf32>
    %905 = arith.mulf %903, %904 : vector<2x16x16xf32>
    %cst_535 = arith.constant dense<0xFF800000> : vector<2x16xf32>
    %906 = vector.multi_reduction <maximumf>, %905, %cst_535 [2] : vector<2x16x16xf32> to vector<2x16xf32>
    %907 = vector.shape_cast %906 : vector<2x16xf32> to vector<2x16x1xf32>
    %908 = vector.broadcast %907 : vector<2x16x1xf32> to vector<2x16x16xf32>
    %909 = arith.subf %905, %908 : vector<2x16x16xf32>
    %910 = math.exp %909 : vector<2x16x16xf32>
    %cst_536 = arith.constant dense<0.000000e+00> : vector<2x16xf32>
    %911 = vector.multi_reduction <add>, %910, %cst_536 [2] : vector<2x16x16xf32> to vector<2x16xf32>
    %912 = vector.shape_cast %911 : vector<2x16xf32> to vector<2x16x1xf32>
    %913 = vector.broadcast %912 : vector<2x16x1xf32> to vector<2x16x16xf32>
    %914 = arith.divf %910, %913 : vector<2x16x16xf32>
    "tpu.trace_start"() <{level = 10 : i32, message = "bqk,bkd->bqd"}> : () -> ()
    %cst_537 = arith.constant dense<0.000000e+00> : vector<2x16x8xf32>
    %915 = tpu.matmul %914, %902, %cst_537 {dimension_numbers = #tpu.dot_dimension_numbers<[2], [1], [1], [2], [0, 0, 0, 1, 1, 2], [0], [0]>} : vector<2x16x16xf32>, vector<2x16x8xf32>, vector<2x16x8xf32> -> vector<2x16x8xf32>
    "tpu.trace_stop"() : () -> ()
    %916 = vector.shape_cast %915 : vector<2x16x8xf32> to vector<32x8xf32>
    %c0_538 = arith.constant 0 : index
    %c24_539 = arith.constant 24 : index
    %917 = vector.load %arg53[%c0_538, %c24_539] : memref<32x32xf32, #tpu.memory_space<vmem>>, vector<32x8xf32>
    tpu.vector_store %arg53[%c0_538, %c24_539], %916 {strides = array<i32>} : memref<32x32xf32, #tpu.memory_space<vmem>>, vector<32x8xf32>,
    %c0_540 = arith.constant 0 : index
    %c0_541 = arith.constant 0 : index
    %918 = vector.load %arg53[%c0_540, %c0_541] : memref<32x32xf32, #tpu.memory_space<vmem>>, vector<32x32xf32>
    %c0_542 = arith.constant 0 : index
    %c0_543 = arith.constant 0 : index
    %919 = vector.load %arg39[%c0_542, %c0_543] : memref<32x24xf32, #tpu.memory_space<vmem>>, vector<32x24xf32>
    %cst_544 = arith.constant dense<0.000000e+00> : vector<32x24xf32>
    %920 = tpu.matmul %918, %919, %cst_544 {dimension_numbers = #tpu.dot_dimension_numbers<[1], [0], [0], [1], [0, 0, 1, 1], [], []>} : vector<32x32xf32>, vector<32x24xf32>, vector<32x24xf32> -> vector<32x24xf32>
    %c0_545 = arith.constant 0 : index
    %c0_546 = arith.constant 0 : index
    %921 = vector.load %arg40[%c0_545, %c0_546] : memref<1x24xf32, #tpu.memory_space<vmem>>, vector<1x24xf32>
    %922 = vector.broadcast %921 : vector<1x24xf32> to vector<32x24xf32>
    %923 = arith.addf %920, %922 : vector<32x24xf32>
    %924 = arith.addf %818, %923 : vector<32x24xf32>
    %c0_547 = arith.constant 0 : index
    %c0_548 = arith.constant 0 : index
    %925 = vector.load %arg41[%c0_547, %c0_548] : memref<1x24xf32, #tpu.memory_space<vmem>>, vector<1x24xf32>
    %c0_549 = arith.constant 0 : index
    %c0_550 = arith.constant 0 : index
    %926 = vector.load %arg42[%c0_549, %c0_550] : memref<1x24xf32, #tpu.memory_space<vmem>>, vector<1x24xf32>
    %cst_551 = arith.constant dense<0.000000e+00> : vector<32xf32>
    %927 = vector.multi_reduction <add>, %924, %cst_551 [1] : vector<32x24xf32> to vector<32xf32>
    %928 = vector.shape_cast %927 : vector<32xf32> to vector<32x1xf32>
    %cst_552 = arith.constant 2.400000e+01 : f32
    %929 = vector.broadcast %cst_552 : f32 to vector<32x1xf32>
    %930 = arith.divf %928, %929 : vector<32x1xf32>
    %931 = vector.broadcast %930 : vector<32x1xf32> to vector<32x24xf32>
    %932 = arith.subf %924, %931 : vector<32x24xf32>
    %933 = arith.mulf %932, %932 : vector<32x24xf32>
    %cst_553 = arith.constant dense<0.000000e+00> : vector<32xf32>
    %934 = vector.multi_reduction <add>, %933, %cst_553 [1] : vector<32x24xf32> to vector<32xf32>
    %935 = vector.shape_cast %934 : vector<32xf32> to vector<32x1xf32>
    %cst_554 = arith.constant 2.400000e+01 : f32
    %936 = vector.broadcast %cst_554 : f32 to vector<32x1xf32>
    %937 = arith.divf %935, %936 : vector<32x1xf32>
    %938 = vector.broadcast %930 : vector<32x1xf32> to vector<32x24xf32>
    %939 = arith.subf %924, %938 : vector<32x24xf32>
    %cst_555 = arith.constant 9.99999974E-6 : f32
    %940 = vector.broadcast %cst_555 : f32 to vector<32x1xf32>
    %941 = arith.addf %937, %940 : vector<32x1xf32>
    %942 = math.rsqrt %941 : vector<32x1xf32>
    %943 = vector.broadcast %942 : vector<32x1xf32> to vector<32x24xf32>
    %944 = arith.mulf %939, %943 : vector<32x24xf32>
    %945 = vector.broadcast %925 : vector<1x24xf32> to vector<32x24xf32>
    %946 = arith.mulf %944, %945 : vector<32x24xf32>
    %947 = vector.broadcast %926 : vector<1x24xf32> to vector<32x24xf32>
    %948 = arith.addf %946, %947 : vector<32x24xf32>
    %c0_556 = arith.constant 0 : index
    %c0_557 = arith.constant 0 : index
    %949 = vector.load %arg43[%c0_556, %c0_557] : memref<24x96xf32, #tpu.memory_space<vmem>>, vector<24x96xf32>
    %cst_558 = arith.constant dense<0.000000e+00> : vector<32x96xf32>
    %950 = tpu.matmul %948, %949, %cst_558 {dimension_numbers = #tpu.dot_dimension_numbers<[1], [0], [0], [1], [0, 0, 1, 1], [], []>} : vector<32x24xf32>, vector<24x96xf32>, vector<32x96xf32> -> vector<32x96xf32>
    %c0_559 = arith.constant 0 : index
    %c0_560 = arith.constant 0 : index
    %951 = vector.load %arg44[%c0_559, %c0_560] : memref<1x96xf32, #tpu.memory_space<vmem>>, vector<1x96xf32>
    %952 = vector.broadcast %951 : vector<1x96xf32> to vector<32x96xf32>
    %953 = arith.addf %950, %952 : vector<32x96xf32>
    %cst_561 = arith.constant 5.000000e-01 : f32
    %954 = vector.broadcast %cst_561 : f32 to vector<32x96xf32>
    %955 = arith.mulf %954, %953 : vector<32x96xf32>
    %cst_562 = arith.constant 0.707106769 : f32
    %956 = vector.broadcast %cst_562 : f32 to vector<32x96xf32>
    %957 = arith.mulf %953, %956 : vector<32x96xf32>
    %cst_563 = arith.constant 0.000000e+00 : f32
    %958 = vector.broadcast %cst_563 : f32 to vector<32x96xf32>
    %959 = arith.cmpf oge, %957, %958 : vector<32x96xf32>
    %cst_564 = arith.constant 1.000000e+00 : f32
    %cst_565 = arith.constant -1.000000e+00 : f32
    %960 = vector.broadcast %cst_564 : f32 to vector<32x96xf32>
    %961 = vector.broadcast %cst_565 : f32 to vector<32x96xf32>
    %962 = arith.select %959, %960, %961 : vector<32x96xi1>, vector<32x96xf32>
    %963 = math.absf %957 : vector<32x96xf32>
    %cst_566 = arith.constant 0.327591091 : f32
    %964 = vector.broadcast %cst_566 : f32 to vector<32x96xf32>
    %965 = arith.mulf %964, %963 : vector<32x96xf32>
    %cst_567 = arith.constant 1.000000e+00 : f32
    %966 = vector.broadcast %cst_567 : f32 to vector<32x96xf32>
    %967 = arith.addf %966, %965 : vector<32x96xf32>
    %cst_568 = arith.constant 1.000000e+00 : f32
    %968 = vector.broadcast %cst_568 : f32 to vector<32x96xf32>
    %969 = arith.divf %968, %967 : vector<32x96xf32>
    %cst_569 = arith.constant 1.06140542 : f32
    %970 = vector.broadcast %cst_569 : f32 to vector<32x96xf32>
    %971 = arith.mulf %970, %969 : vector<32x96xf32>
    %cst_570 = arith.constant -1.45315206 : f32
    %972 = vector.broadcast %cst_570 : f32 to vector<32x96xf32>
    %973 = arith.addf %971, %972 : vector<32x96xf32>
    %974 = arith.mulf %973, %969 : vector<32x96xf32>
    %cst_571 = arith.constant 1.42141378 : f32
    %975 = vector.broadcast %cst_571 : f32 to vector<32x96xf32>
    %976 = arith.addf %974, %975 : vector<32x96xf32>
    %977 = arith.mulf %976, %969 : vector<32x96xf32>
    %cst_572 = arith.constant -0.284496725 : f32
    %978 = vector.broadcast %cst_572 : f32 to vector<32x96xf32>
    %979 = arith.addf %977, %978 : vector<32x96xf32>
    %980 = arith.mulf %979, %969 : vector<32x96xf32>
    %cst_573 = arith.constant 0.254829586 : f32
    %981 = vector.broadcast %cst_573 : f32 to vector<32x96xf32>
    %982 = arith.addf %980, %981 : vector<32x96xf32>
    %983 = arith.mulf %982, %969 : vector<32x96xf32>
    %cst_574 = arith.constant 0.000000e+00 : f32
    %984 = vector.broadcast %cst_574 : f32 to vector<32x96xf32>
    %985 = arith.subf %984, %963 : vector<32x96xf32>
    %986 = arith.mulf %985, %963 : vector<32x96xf32>
    %987 = math.exp %986 : vector<32x96xf32>
    %988 = arith.mulf %983, %987 : vector<32x96xf32>
    %cst_575 = arith.constant 1.000000e+00 : f32
    %989 = vector.broadcast %cst_575 : f32 to vector<32x96xf32>
    %990 = arith.subf %989, %988 : vector<32x96xf32>
    %991 = arith.mulf %962, %990 : vector<32x96xf32>
    %cst_576 = arith.constant 1.000000e+00 : f32
    %992 = vector.broadcast %cst_576 : f32 to vector<32x96xf32>
    %993 = arith.addf %992, %991 : vector<32x96xf32>
    %994 = arith.mulf %955, %993 : vector<32x96xf32>
    %c0_577 = arith.constant 0 : index
    %c0_578 = arith.constant 0 : index
    %995 = vector.load %arg45[%c0_577, %c0_578] : memref<96x24xf32, #tpu.memory_space<vmem>>, vector<96x24xf32>
    %cst_579 = arith.constant dense<0.000000e+00> : vector<32x24xf32>
    %996 = tpu.matmul %994, %995, %cst_579 {dimension_numbers = #tpu.dot_dimension_numbers<[1], [0], [0], [1], [0, 0, 1, 1], [], []>} : vector<32x96xf32>, vector<96x24xf32>, vector<32x24xf32> -> vector<32x24xf32>
    %c0_580 = arith.constant 0 : index
    %c0_581 = arith.constant 0 : index
    %997 = vector.load %arg46[%c0_580, %c0_581] : memref<1x24xf32, #tpu.memory_space<vmem>>, vector<1x24xf32>
    %998 = vector.broadcast %997 : vector<1x24xf32> to vector<32x24xf32>
    %999 = arith.addf %996, %998 : vector<32x24xf32>
    %1000 = arith.addf %924, %999 : vector<32x24xf32>
    %c0_582 = arith.constant 0 : index
    %c0_583 = arith.constant 0 : index
    %1001 = vector.load %arg54[%c0_582, %c0_583] : memref<32x24xf32, #tpu.memory_space<vmem>>, vector<32x24xf32>
    tpu.vector_store %arg54[%c0_582, %c0_583], %1000 {strides = array<i32>} : memref<32x24xf32, #tpu.memory_space<vmem>>, vector<32x24xf32>,
    %c0_584 = arith.constant 0 : index
    %c0_585 = arith.constant 0 : index
    %1002 = memref.load %arg1[%c0_584, %c0_585] : memref<2x12xi32, #tpu.memory_space<smem>>
    %c0_i32_586 = arith.constant 0 : i32
    %1003 = arith.addi %c0_i32_586, %1002 : i32
    %1004 = arith.index_cast %1003 : i32 to index
    %c0_587 = arith.constant 0 : index
    %1005 = vector.load %arg54[%1004, %c0_587] : memref<32x24xf32, #tpu.memory_space<vmem>>, vector<1x24xf32>
    %c0_588 = arith.constant 0 : index
    %c0_589 = arith.constant 0 : index
    %1006 = vector.load %arg55[%c0_588, %c0_589] : memref<24x24xf32, #tpu.memory_space<vmem>>, vector<1x24xf32>
    tpu.vector_store %arg55[%c0_588, %c0_589], %1005 {strides = array<i32>} : memref<24x24xf32, #tpu.memory_space<vmem>>, vector<1x24xf32>,
    %c0_590 = arith.constant 0 : index
    %c1_591 = arith.constant 1 : index
    %1007 = memref.load %arg1[%c0_590, %c1_591] : memref<2x12xi32, #tpu.memory_space<smem>>
    %c0_i32_592 = arith.constant 0 : i32
    %1008 = arith.addi %c0_i32_592, %1007 : i32
    %1009 = arith.index_cast %1008 : i32 to index
    %c0_593 = arith.constant 0 : index
    %1010 = vector.load %arg54[%1009, %c0_593] : memref<32x24xf32, #tpu.memory_space<vmem>>, vector<1x24xf32>
    %c1_594 = arith.constant 1 : index
    %c0_595 = arith.constant 0 : index
    %1011 = vector.load %arg55[%c1_594, %c0_595] : memref<24x24xf32, #tpu.memory_space<vmem>>, vector<1x24xf32>
    tpu.vector_store %arg55[%c1_594, %c0_595], %1010 {strides = array<i32>} : memref<24x24xf32, #tpu.memory_space<vmem>>, vector<1x24xf32>,
    %c0_596 = arith.constant 0 : index
    %c2_597 = arith.constant 2 : index
    %1012 = memref.load %arg1[%c0_596, %c2_597] : memref<2x12xi32, #tpu.memory_space<smem>>
    %c0_i32_598 = arith.constant 0 : i32
    %1013 = arith.addi %c0_i32_598, %1012 : i32
    %1014 = arith.index_cast %1013 : i32 to index
    %c0_599 = arith.constant 0 : index
    %1015 = vector.load %arg54[%1014, %c0_599] : memref<32x24xf32, #tpu.memory_space<vmem>>, vector<1x24xf32>
    %c2_600 = arith.constant 2 : index
    %c0_601 = arith.constant 0 : index
    %1016 = vector.load %arg55[%c2_600, %c0_601] : memref<24x24xf32, #tpu.memory_space<vmem>>, vector<1x24xf32>
    tpu.vector_store %arg55[%c2_600, %c0_601], %1015 {strides = array<i32>} : memref<24x24xf32, #tpu.memory_space<vmem>>, vector<1x24xf32>,
    %c0_602 = arith.constant 0 : index
    %c3_603 = arith.constant 3 : index
    %1017 = memref.load %arg1[%c0_602, %c3_603] : memref<2x12xi32, #tpu.memory_space<smem>>
    %c0_i32_604 = arith.constant 0 : i32
    %1018 = arith.addi %c0_i32_604, %1017 : i32
    %1019 = arith.index_cast %1018 : i32 to index
    %c0_605 = arith.constant 0 : index
    %1020 = vector.load %arg54[%1019, %c0_605] : memref<32x24xf32, #tpu.memory_space<vmem>>, vector<1x24xf32>
    %c3_606 = arith.constant 3 : index
    %c0_607 = arith.constant 0 : index
    %1021 = vector.load %arg55[%c3_606, %c0_607] : memref<24x24xf32, #tpu.memory_space<vmem>>, vector<1x24xf32>
    tpu.vector_store %arg55[%c3_606, %c0_607], %1020 {strides = array<i32>} : memref<24x24xf32, #tpu.memory_space<vmem>>, vector<1x24xf32>,
    %c0_608 = arith.constant 0 : index
    %c4_609 = arith.constant 4 : index
    %1022 = memref.load %arg1[%c0_608, %c4_609] : memref<2x12xi32, #tpu.memory_space<smem>>
    %c0_i32_610 = arith.constant 0 : i32
    %1023 = arith.addi %c0_i32_610, %1022 : i32
    %1024 = arith.index_cast %1023 : i32 to index
    %c0_611 = arith.constant 0 : index
    %1025 = vector.load %arg54[%1024, %c0_611] : memref<32x24xf32, #tpu.memory_space<vmem>>, vector<1x24xf32>
    %c4_612 = arith.constant 4 : index
    %c0_613 = arith.constant 0 : index
    %1026 = vector.load %arg55[%c4_612, %c0_613] : memref<24x24xf32, #tpu.memory_space<vmem>>, vector<1x24xf32>
    tpu.vector_store %arg55[%c4_612, %c0_613], %1025 {strides = array<i32>} : memref<24x24xf32, #tpu.memory_space<vmem>>, vector<1x24xf32>,
    %c0_614 = arith.constant 0 : index
    %c5_615 = arith.constant 5 : index
    %1027 = memref.load %arg1[%c0_614, %c5_615] : memref<2x12xi32, #tpu.memory_space<smem>>
    %c0_i32_616 = arith.constant 0 : i32
    %1028 = arith.addi %c0_i32_616, %1027 : i32
    %1029 = arith.index_cast %1028 : i32 to index
    %c0_617 = arith.constant 0 : index
    %1030 = vector.load %arg54[%1029, %c0_617] : memref<32x24xf32, #tpu.memory_space<vmem>>, vector<1x24xf32>
    %c5_618 = arith.constant 5 : index
    %c0_619 = arith.constant 0 : index
    %1031 = vector.load %arg55[%c5_618, %c0_619] : memref<24x24xf32, #tpu.memory_space<vmem>>, vector<1x24xf32>
    tpu.vector_store %arg55[%c5_618, %c0_619], %1030 {strides = array<i32>} : memref<24x24xf32, #tpu.memory_space<vmem>>, vector<1x24xf32>,
    %c0_620 = arith.constant 0 : index
    %c6_621 = arith.constant 6 : index
    %1032 = memref.load %arg1[%c0_620, %c6_621] : memref<2x12xi32, #tpu.memory_space<smem>>
    %c0_i32_622 = arith.constant 0 : i32
    %1033 = arith.addi %c0_i32_622, %1032 : i32
    %1034 = arith.index_cast %1033 : i32 to index
    %c0_623 = arith.constant 0 : index
    %1035 = vector.load %arg54[%1034, %c0_623] : memref<32x24xf32, #tpu.memory_space<vmem>>, vector<1x24xf32>
    %c6_624 = arith.constant 6 : index
    %c0_625 = arith.constant 0 : index
    %1036 = vector.load %arg55[%c6_624, %c0_625] : memref<24x24xf32, #tpu.memory_space<vmem>>, vector<1x24xf32>
    tpu.vector_store %arg55[%c6_624, %c0_625], %1035 {strides = array<i32>} : memref<24x24xf32, #tpu.memory_space<vmem>>, vector<1x24xf32>,
    %c0_626 = arith.constant 0 : index
    %c7_627 = arith.constant 7 : index
    %1037 = memref.load %arg1[%c0_626, %c7_627] : memref<2x12xi32, #tpu.memory_space<smem>>
    %c0_i32_628 = arith.constant 0 : i32
    %1038 = arith.addi %c0_i32_628, %1037 : i32
    %1039 = arith.index_cast %1038 : i32 to index
    %c0_629 = arith.constant 0 : index
    %1040 = vector.load %arg54[%1039, %c0_629] : memref<32x24xf32, #tpu.memory_space<vmem>>, vector<1x24xf32>
    %c7_630 = arith.constant 7 : index
    %c0_631 = arith.constant 0 : index
    %1041 = vector.load %arg55[%c7_630, %c0_631] : memref<24x24xf32, #tpu.memory_space<vmem>>, vector<1x24xf32>
    tpu.vector_store %arg55[%c7_630, %c0_631], %1040 {strides = array<i32>} : memref<24x24xf32, #tpu.memory_space<vmem>>, vector<1x24xf32>,
    %c0_632 = arith.constant 0 : index
    %c8_633 = arith.constant 8 : index
    %1042 = memref.load %arg1[%c0_632, %c8_633] : memref<2x12xi32, #tpu.memory_space<smem>>
    %c0_i32_634 = arith.constant 0 : i32
    %1043 = arith.addi %c0_i32_634, %1042 : i32
    %1044 = arith.index_cast %1043 : i32 to index
    %c0_635 = arith.constant 0 : index
    %1045 = vector.load %arg54[%1044, %c0_635] : memref<32x24xf32, #tpu.memory_space<vmem>>, vector<1x24xf32>
    %c8_636 = arith.constant 8 : index
    %c0_637 = arith.constant 0 : index
    %1046 = vector.load %arg55[%c8_636, %c0_637] : memref<24x24xf32, #tpu.memory_space<vmem>>, vector<1x24xf32>
    tpu.vector_store %arg55[%c8_636, %c0_637], %1045 {strides = array<i32>} : memref<24x24xf32, #tpu.memory_space<vmem>>, vector<1x24xf32>,
    %c0_638 = arith.constant 0 : index
    %c9_639 = arith.constant 9 : index
    %1047 = memref.load %arg1[%c0_638, %c9_639] : memref<2x12xi32, #tpu.memory_space<smem>>
    %c0_i32_640 = arith.constant 0 : i32
    %1048 = arith.addi %c0_i32_640, %1047 : i32
    %1049 = arith.index_cast %1048 : i32 to index
    %c0_641 = arith.constant 0 : index
    %1050 = vector.load %arg54[%1049, %c0_641] : memref<32x24xf32, #tpu.memory_space<vmem>>, vector<1x24xf32>
    %c9_642 = arith.constant 9 : index
    %c0_643 = arith.constant 0 : index
    %1051 = vector.load %arg55[%c9_642, %c0_643] : memref<24x24xf32, #tpu.memory_space<vmem>>, vector<1x24xf32>
    tpu.vector_store %arg55[%c9_642, %c0_643], %1050 {strides = array<i32>} : memref<24x24xf32, #tpu.memory_space<vmem>>, vector<1x24xf32>,
    %c0_644 = arith.constant 0 : index
    %c10_645 = arith.constant 10 : index
    %1052 = memref.load %arg1[%c0_644, %c10_645] : memref<2x12xi32, #tpu.memory_space<smem>>
    %c0_i32_646 = arith.constant 0 : i32
    %1053 = arith.addi %c0_i32_646, %1052 : i32
    %1054 = arith.index_cast %1053 : i32 to index
    %c0_647 = arith.constant 0 : index
    %1055 = vector.load %arg54[%1054, %c0_647] : memref<32x24xf32, #tpu.memory_space<vmem>>, vector<1x24xf32>
    %c10_648 = arith.constant 10 : index
    %c0_649 = arith.constant 0 : index
    %1056 = vector.load %arg55[%c10_648, %c0_649] : memref<24x24xf32, #tpu.memory_space<vmem>>, vector<1x24xf32>
    tpu.vector_store %arg55[%c10_648, %c0_649], %1055 {strides = array<i32>} : memref<24x24xf32, #tpu.memory_space<vmem>>, vector<1x24xf32>,
    %c0_650 = arith.constant 0 : index
    %c11_651 = arith.constant 11 : index
    %1057 = memref.load %arg1[%c0_650, %c11_651] : memref<2x12xi32, #tpu.memory_space<smem>>
    %c0_i32_652 = arith.constant 0 : i32
    %1058 = arith.addi %c0_i32_652, %1057 : i32
    %1059 = arith.index_cast %1058 : i32 to index
    %c0_653 = arith.constant 0 : index
    %1060 = vector.load %arg54[%1059, %c0_653] : memref<32x24xf32, #tpu.memory_space<vmem>>, vector<1x24xf32>
    %c11_654 = arith.constant 11 : index
    %c0_655 = arith.constant 0 : index
    %1061 = vector.load %arg55[%c11_654, %c0_655] : memref<24x24xf32, #tpu.memory_space<vmem>>, vector<1x24xf32>
    tpu.vector_store %arg55[%c11_654, %c0_655], %1060 {strides = array<i32>} : memref<24x24xf32, #tpu.memory_space<vmem>>, vector<1x24xf32>,
    %c1_656 = arith.constant 1 : index
    %c0_657 = arith.constant 0 : index
    %1062 = memref.load %arg1[%c1_656, %c0_657] : memref<2x12xi32, #tpu.memory_space<smem>>
    %c16_i32_658 = arith.constant 16 : i32
    %1063 = arith.addi %c16_i32_658, %1062 : i32
    %1064 = arith.index_cast %1063 : i32 to index
    %c0_659 = arith.constant 0 : index
    %1065 = vector.load %arg54[%1064, %c0_659] : memref<32x24xf32, #tpu.memory_space<vmem>>, vector<1x24xf32>
    %c12_660 = arith.constant 12 : index
    %c0_661 = arith.constant 0 : index
    %1066 = vector.load %arg55[%c12_660, %c0_661] : memref<24x24xf32, #tpu.memory_space<vmem>>, vector<1x24xf32>
    tpu.vector_store %arg55[%c12_660, %c0_661], %1065 {strides = array<i32>} : memref<24x24xf32, #tpu.memory_space<vmem>>, vector<1x24xf32>,
    %c1_662 = arith.constant 1 : index
    %c1_663 = arith.constant 1 : index
    %1067 = memref.load %arg1[%c1_662, %c1_663] : memref<2x12xi32, #tpu.memory_space<smem>>
    %c16_i32_664 = arith.constant 16 : i32
    %1068 = arith.addi %c16_i32_664, %1067 : i32
    %1069 = arith.index_cast %1068 : i32 to index
    %c0_665 = arith.constant 0 : index
    %1070 = vector.load %arg54[%1069, %c0_665] : memref<32x24xf32, #tpu.memory_space<vmem>>, vector<1x24xf32>
    %c13_666 = arith.constant 13 : index
    %c0_667 = arith.constant 0 : index
    %1071 = vector.load %arg55[%c13_666, %c0_667] : memref<24x24xf32, #tpu.memory_space<vmem>>, vector<1x24xf32>
    tpu.vector_store %arg55[%c13_666, %c0_667], %1070 {strides = array<i32>} : memref<24x24xf32, #tpu.memory_space<vmem>>, vector<1x24xf32>,
    %c1_668 = arith.constant 1 : index
    %c2_669 = arith.constant 2 : index
    %1072 = memref.load %arg1[%c1_668, %c2_669] : memref<2x12xi32, #tpu.memory_space<smem>>
    %c16_i32_670 = arith.constant 16 : i32
    %1073 = arith.addi %c16_i32_670, %1072 : i32
    %1074 = arith.index_cast %1073 : i32 to index
    %c0_671 = arith.constant 0 : index
    %1075 = vector.load %arg54[%1074, %c0_671] : memref<32x24xf32, #tpu.memory_space<vmem>>, vector<1x24xf32>
    %c14_672 = arith.constant 14 : index
    %c0_673 = arith.constant 0 : index
    %1076 = vector.load %arg55[%c14_672, %c0_673] : memref<24x24xf32, #tpu.memory_space<vmem>>, vector<1x24xf32>
    tpu.vector_store %arg55[%c14_672, %c0_673], %1075 {strides = array<i32>} : memref<24x24xf32, #tpu.memory_space<vmem>>, vector<1x24xf32>,
    %c1_674 = arith.constant 1 : index
    %c3_675 = arith.constant 3 : index
    %1077 = memref.load %arg1[%c1_674, %c3_675] : memref<2x12xi32, #tpu.memory_space<smem>>
    %c16_i32_676 = arith.constant 16 : i32
    %1078 = arith.addi %c16_i32_676, %1077 : i32
    %1079 = arith.index_cast %1078 : i32 to index
    %c0_677 = arith.constant 0 : index
    %1080 = vector.load %arg54[%1079, %c0_677] : memref<32x24xf32, #tpu.memory_space<vmem>>, vector<1x24xf32>
    %c15_678 = arith.constant 15 : index
    %c0_679 = arith.constant 0 : index
    %1081 = vector.load %arg55[%c15_678, %c0_679] : memref<24x24xf32, #tpu.memory_space<vmem>>, vector<1x24xf32>
    tpu.vector_store %arg55[%c15_678, %c0_679], %1080 {strides = array<i32>} : memref<24x24xf32, #tpu.memory_space<vmem>>, vector<1x24xf32>,
    %c1_680 = arith.constant 1 : index
    %c4_681 = arith.constant 4 : index
    %1082 = memref.load %arg1[%c1_680, %c4_681] : memref<2x12xi32, #tpu.memory_space<smem>>
    %c16_i32_682 = arith.constant 16 : i32
    %1083 = arith.addi %c16_i32_682, %1082 : i32
    %1084 = arith.index_cast %1083 : i32 to index
    %c0_683 = arith.constant 0 : index
    %1085 = vector.load %arg54[%1084, %c0_683] : memref<32x24xf32, #tpu.memory_space<vmem>>, vector<1x24xf32>
    %c16_684 = arith.constant 16 : index
    %c0_685 = arith.constant 0 : index
    %1086 = vector.load %arg55[%c16_684, %c0_685] : memref<24x24xf32, #tpu.memory_space<vmem>>, vector<1x24xf32>
    tpu.vector_store %arg55[%c16_684, %c0_685], %1085 {strides = array<i32>} : memref<24x24xf32, #tpu.memory_space<vmem>>, vector<1x24xf32>,
    %c1_686 = arith.constant 1 : index
    %c5_687 = arith.constant 5 : index
    %1087 = memref.load %arg1[%c1_686, %c5_687] : memref<2x12xi32, #tpu.memory_space<smem>>
    %c16_i32_688 = arith.constant 16 : i32
    %1088 = arith.addi %c16_i32_688, %1087 : i32
    %1089 = arith.index_cast %1088 : i32 to index
    %c0_689 = arith.constant 0 : index
    %1090 = vector.load %arg54[%1089, %c0_689] : memref<32x24xf32, #tpu.memory_space<vmem>>, vector<1x24xf32>
    %c17_690 = arith.constant 17 : index
    %c0_691 = arith.constant 0 : index
    %1091 = vector.load %arg55[%c17_690, %c0_691] : memref<24x24xf32, #tpu.memory_space<vmem>>, vector<1x24xf32>
    tpu.vector_store %arg55[%c17_690, %c0_691], %1090 {strides = array<i32>} : memref<24x24xf32, #tpu.memory_space<vmem>>, vector<1x24xf32>,
    %c1_692 = arith.constant 1 : index
    %c6_693 = arith.constant 6 : index
    %1092 = memref.load %arg1[%c1_692, %c6_693] : memref<2x12xi32, #tpu.memory_space<smem>>
    %c16_i32_694 = arith.constant 16 : i32
    %1093 = arith.addi %c16_i32_694, %1092 : i32
    %1094 = arith.index_cast %1093 : i32 to index
    %c0_695 = arith.constant 0 : index
    %1095 = vector.load %arg54[%1094, %c0_695] : memref<32x24xf32, #tpu.memory_space<vmem>>, vector<1x24xf32>
    %c18_696 = arith.constant 18 : index
    %c0_697 = arith.constant 0 : index
    %1096 = vector.load %arg55[%c18_696, %c0_697] : memref<24x24xf32, #tpu.memory_space<vmem>>, vector<1x24xf32>
    tpu.vector_store %arg55[%c18_696, %c0_697], %1095 {strides = array<i32>} : memref<24x24xf32, #tpu.memory_space<vmem>>, vector<1x24xf32>,
    %c1_698 = arith.constant 1 : index
    %c7_699 = arith.constant 7 : index
    %1097 = memref.load %arg1[%c1_698, %c7_699] : memref<2x12xi32, #tpu.memory_space<smem>>
    %c16_i32_700 = arith.constant 16 : i32
    %1098 = arith.addi %c16_i32_700, %1097 : i32
    %1099 = arith.index_cast %1098 : i32 to index
    %c0_701 = arith.constant 0 : index
    %1100 = vector.load %arg54[%1099, %c0_701] : memref<32x24xf32, #tpu.memory_space<vmem>>, vector<1x24xf32>
    %c19_702 = arith.constant 19 : index
    %c0_703 = arith.constant 0 : index
    %1101 = vector.load %arg55[%c19_702, %c0_703] : memref<24x24xf32, #tpu.memory_space<vmem>>, vector<1x24xf32>
    tpu.vector_store %arg55[%c19_702, %c0_703], %1100 {strides = array<i32>} : memref<24x24xf32, #tpu.memory_space<vmem>>, vector<1x24xf32>,
    %c1_704 = arith.constant 1 : index
    %c8_705 = arith.constant 8 : index
    %1102 = memref.load %arg1[%c1_704, %c8_705] : memref<2x12xi32, #tpu.memory_space<smem>>
    %c16_i32_706 = arith.constant 16 : i32
    %1103 = arith.addi %c16_i32_706, %1102 : i32
    %1104 = arith.index_cast %1103 : i32 to index
    %c0_707 = arith.constant 0 : index
    %1105 = vector.load %arg54[%1104, %c0_707] : memref<32x24xf32, #tpu.memory_space<vmem>>, vector<1x24xf32>
    %c20_708 = arith.constant 20 : index
    %c0_709 = arith.constant 0 : index
    %1106 = vector.load %arg55[%c20_708, %c0_709] : memref<24x24xf32, #tpu.memory_space<vmem>>, vector<1x24xf32>
    tpu.vector_store %arg55[%c20_708, %c0_709], %1105 {strides = array<i32>} : memref<24x24xf32, #tpu.memory_space<vmem>>, vector<1x24xf32>,
    %c1_710 = arith.constant 1 : index
    %c9_711 = arith.constant 9 : index
    %1107 = memref.load %arg1[%c1_710, %c9_711] : memref<2x12xi32, #tpu.memory_space<smem>>
    %c16_i32_712 = arith.constant 16 : i32
    %1108 = arith.addi %c16_i32_712, %1107 : i32
    %1109 = arith.index_cast %1108 : i32 to index
    %c0_713 = arith.constant 0 : index
    %1110 = vector.load %arg54[%1109, %c0_713] : memref<32x24xf32, #tpu.memory_space<vmem>>, vector<1x24xf32>
    %c21_714 = arith.constant 21 : index
    %c0_715 = arith.constant 0 : index
    %1111 = vector.load %arg55[%c21_714, %c0_715] : memref<24x24xf32, #tpu.memory_space<vmem>>, vector<1x24xf32>
    tpu.vector_store %arg55[%c21_714, %c0_715], %1110 {strides = array<i32>} : memref<24x24xf32, #tpu.memory_space<vmem>>, vector<1x24xf32>,
    %c1_716 = arith.constant 1 : index
    %c10_717 = arith.constant 10 : index
    %1112 = memref.load %arg1[%c1_716, %c10_717] : memref<2x12xi32, #tpu.memory_space<smem>>
    %c16_i32_718 = arith.constant 16 : i32
    %1113 = arith.addi %c16_i32_718, %1112 : i32
    %1114 = arith.index_cast %1113 : i32 to index
    %c0_719 = arith.constant 0 : index
    %1115 = vector.load %arg54[%1114, %c0_719] : memref<32x24xf32, #tpu.memory_space<vmem>>, vector<1x24xf32>
    %c22_720 = arith.constant 22 : index
    %c0_721 = arith.constant 0 : index
    %1116 = vector.load %arg55[%c22_720, %c0_721] : memref<24x24xf32, #tpu.memory_space<vmem>>, vector<1x24xf32>
    tpu.vector_store %arg55[%c22_720, %c0_721], %1115 {strides = array<i32>} : memref<24x24xf32, #tpu.memory_space<vmem>>, vector<1x24xf32>,
    %c1_722 = arith.constant 1 : index
    %c11_723 = arith.constant 11 : index
    %1117 = memref.load %arg1[%c1_722, %c11_723] : memref<2x12xi32, #tpu.memory_space<smem>>
    %c16_i32_724 = arith.constant 16 : i32
    %1118 = arith.addi %c16_i32_724, %1117 : i32
    %1119 = arith.index_cast %1118 : i32 to index
    %c0_725 = arith.constant 0 : index
    %1120 = vector.load %arg54[%1119, %c0_725] : memref<32x24xf32, #tpu.memory_space<vmem>>, vector<1x24xf32>
    %c23_726 = arith.constant 23 : index
    %c0_727 = arith.constant 0 : index
    %1121 = vector.load %arg55[%c23_726, %c0_727] : memref<24x24xf32, #tpu.memory_space<vmem>>, vector<1x24xf32>
    tpu.vector_store %arg55[%c23_726, %c0_727], %1120 {strides = array<i32>} : memref<24x24xf32, #tpu.memory_space<vmem>>, vector<1x24xf32>,
    %c0_728 = arith.constant 0 : index
    %c0_729 = arith.constant 0 : index
    %1122 = vector.load %arg55[%c0_728, %c0_729] : memref<24x24xf32, #tpu.memory_space<vmem>>, vector<24x24xf32>
    %c0_730 = arith.constant 0 : index
    %c0_731 = arith.constant 0 : index
    %1123 = vector.load %arg47[%c0_730, %c0_731] : memref<24x192xf32, #tpu.memory_space<vmem>>, vector<24x192xf32>
    %cst_732 = arith.constant dense<0.000000e+00> : vector<24x192xf32>
    %1124 = tpu.matmul %1122, %1123, %cst_732 {dimension_numbers = #tpu.dot_dimension_numbers<[1], [0], [0], [1], [0, 0, 1, 1], [], []>} : vector<24x24xf32>, vector<24x192xf32>, vector<24x192xf32> -> vector<24x192xf32>
    %c0_733 = arith.constant 0 : index
    %c0_734 = arith.constant 0 : index
    %1125 = vector.load %arg48[%c0_733, %c0_734] : memref<1x192xf32, #tpu.memory_space<vmem>>, vector<1x192xf32>
    %1126 = vector.broadcast %1125 : vector<1x192xf32> to vector<24x192xf32>
    %1127 = arith.addf %1124, %1126 : vector<24x192xf32>
    %c0_735 = arith.constant 0 : index
    %c0_736 = arith.constant 0 : index
    %1128 = vector.load %arg52[%c0_735, %c0_736] : memref<24x192xf32, #tpu.memory_space<vmem>>, vector<24x192xf32>
    %1129 = arith.subf %1127, %1128 : vector<24x192xf32>
    %1130 = arith.mulf %1129, %1129 : vector<24x192xf32>
    %cst_737 = arith.constant dense<0.000000e+00> : vector<24xf32>
    %1131 = vector.multi_reduction <add>, %1130, %cst_737 [1] : vector<24x192xf32> to vector<24xf32>
    %1132 = vector.shape_cast %1131 : vector<24xf32> to vector<24x1xf32>
    %cst_738 = arith.constant dense<0.000000e+00> : vector<1xf32>
    %1133 = vector.multi_reduction <add>, %1132, %cst_738 [0] : vector<24x1xf32> to vector<1xf32>
    %1134 = vector.shape_cast %1133 : vector<1xf32> to vector<1x1xf32>
    %cst_739 = arith.constant 2.17013891E-4 : f32
    %1135 = vector.broadcast %cst_739 : f32 to vector<1x1xf32>
    %1136 = arith.mulf %1134, %1135 : vector<1x1xf32>
    %c0_740 = arith.constant 0 : index
    %c0_741 = arith.constant 0 : index
    %1137 = vector.load %arg49[%c0_740, %c0_741] : memref<1x1xf32, #tpu.memory_space<vmem>>, vector<1x1xf32>
    tpu.vector_store %arg49[%c0_740, %c0_741], %1136 {strides = array<i32>} : memref<1x1xf32, #tpu.memory_space<vmem>>, vector<1x1xf32>,
    return
  }
}

</mosaic_0001>

<bundles_post_ra>
// kernel: mae_forward.1
= control target key start
LH: loop header
LB: loop body
LE: loop exit
PB: predicated region body
PF: predicated region fallthrough
CT: control target
= control target key end

     0   :  { %s9519_s6 = smov 1   ;;  %s9520_s10 = smov 2   ;;  %s11285_s0 = inlined_call_operand.smem [shape: u32[50], index: -1, kind: input, shape index: {}] }
   0x1   :  { %s9603_s5 = sld [smem:[%s11285_s0]]   ;;  %s9521_s14 = smov 3  }
   0x2   :  { %s9608_s9 = sld [smem:[%s11285_s0 + %s9519_s6]]   ;;  %s9522_s18 = smov 4  }
   0x3   :  { %s9613_s13 = sld [smem:[%s11285_s0 + %s9520_s10]]   ;;  %s9523_s22 = smov 5  }
   0x4   :  { %s9618_s17 = sld [smem:[%s11285_s0 + %s9521_s14]]   ;;  %s9524_s26 = smov 6  }
   0x5   :  { %s9623_s21 = sld [smem:[%s11285_s0 + %s9522_s18]]   ;;  %s9525_s30 = smov 7  }
   0x6   :  { %s9628_s25 = sld [smem:[%s11285_s0 + %s9523_s22]]   ;;  %s9526_s4 = smov 8  }
   0x7   :  { %s9633_s29 = sld [smem:[%s11285_s0 + %s9524_s26]]   ;;  %s9527_s10 = smov 9  }
   0x8   :  { %s9638_s3 = sld [smem:[%s11285_s0 + %s9525_s30]]   ;;  %s9528_s15 = smov 10  }
   0x9   :  { %11361 = sst [smem:[#allocation31_spill]] %s9613_s13  ;;  %s9529_s20 = smov 11  }
   0xa   :  { %s9643_s8 = sld [smem:[%s11285_s0 + %s9526_s4]]   ;;  %s9530_s26 = smov 12  }
   0xb   :  { %s9648_s14 = sld [smem:[%s11285_s0 + %s9527_s10]]   ;;  %s9531_s1 = smov 13  }
   0xc   :  { %s9653_s19 = sld [smem:[%s11285_s0 + %s9528_s15]]   ;;  %s9532_s7 = smov 14  }
   0xd   :  { %s9658_s24 = sld [smem:[%s11285_s0 + %s9529_s20]]   ;;  %s9533_s15 = smov 15  }
   0xe   :  { %s9663_s30 = sld [smem:[%s11285_s0 + %s9530_s26]]   ;;  %s9534_s22 = smov 16  }
   0xf   :  { %s9668_s6 = sld [smem:[%s11285_s0 + %s9531_s1]]   ;;  %s9535_s28 = smov 17  }
  0x10   :  { %s9673_s12 = sld [smem:[%s11285_s0 + %s9532_s7]]   ;;  %s9536_s7 = smov 18  }
  0x11   :  { %11362 = sst [smem:[#allocation32_spill]] %s9648_s14 }
  0x12   :  { %11363 = sst [smem:[#allocation33_spill]] %s9653_s19 }
  0x13   :  { %11364 = sst [smem:[#allocation34_spill]] %s9658_s24 }
  0x14   :  { %11365 = sst [smem:[#allocation35_spill]] %s9663_s30 }
  0x15   :  { %11366 = sst [smem:[#allocation36_spill]] %s9668_s6 }
  0x16   :  { %11367 = sst [smem:[#allocation37_spill]] %s9673_s12 }
  0x17   :  { %s9678_s20 = sld [smem:[%s11285_s0 + %s9533_s15]]   ;;  %s9537_s15 = smov 19  }
  0x18   :  { %s9683_s27 = sld [smem:[%s11285_s0 + %s9534_s22]]   ;;  %s9538_s22 = smov 20  }
  0x19   :  { %s9688_s4 = sld [smem:[%s11285_s0 + %s9535_s28]]   ;;  %s9539_s28 = smov 21  }
  0x1a   :  { %s9693_s12 = sld [smem:[%s11285_s0 + %s9536_s7]]   ;;  %s9540_s7 = smov 22  }
  0x1d   :  { %11368 = sst [smem:[#allocation38_spill]] %s9678_s20 }
  0x1e   :  { %11369 = sst [smem:[#allocation39_spill]] %s9683_s27 }
  0x1f   :  { %11370 = sst [smem:[#allocation40_spill]] %s9688_s4 }
  0x20   :  { %11371 = sst [smem:[#allocation41_spill]] %s9693_s12 }
  0x21   :  { %s9698_s20 = sld [smem:[%s11285_s0 + %s9537_s15]]   ;;  %s9541_s15 = smov 23  }
  0x22   :  { %s9703_s27 = sld [smem:[%s11285_s0 + %s9538_s22]]   ;;  %s9542_s22 = smov 24  }
  0x23   :  { %s9708_s4 = sld [smem:[%s11285_s0 + %s9539_s28]]   ;;  %s9543_s28 = smov 25  }
  0x24   :  { %s9713_s12 = sld [smem:[%s11285_s0 + %s9540_s7]]   ;;  %s9544_s7 = smov 26  }
  0x27   :  { %11372 = sst [smem:[#allocation42_spill]] %s9698_s20 }
  0x28   :  { %11373 = sst [smem:[#allocation43_spill]] %s9703_s27 }
  0x29   :  { %11374 = sst [smem:[#allocation44_spill]] %s9708_s4 }
  0x2a   :  { %11375 = sst [smem:[#allocation45_spill]] %s9713_s12 }
  0x2b   :  { %s9718_s20 = sld [smem:[%s11285_s0 + %s9541_s15]]   ;;  %s9545_s15 = smov 27  }
  0x2c   :  { %s9723_s27 = sld [smem:[%s11285_s0 + %s9542_s22]]   ;;  %s9546_s22 = smov 28  }
  0x2d   :  { %s9728_s4 = sld [smem:[%s11285_s0 + %s9543_s28]]   ;;  %s9547_s28 = smov 29  }
  0x2e   :  { %s9733_s12 = sld [smem:[%s11285_s0 + %s9544_s7]]   ;;  %s9548_s7 = smov 30  }
  0x31   :  { %11376 = sst [smem:[#allocation46_spill]] %s9718_s20 }
  0x32   :  { %11377 = sst [smem:[#allocation47_spill]] %s9723_s27 }
  0x33   :  { %11378 = sst [smem:[#allocation48_spill]] %s9728_s4 }
  0x34   :  { %11379 = sst [smem:[#allocation49_spill]] %s9733_s12 }
  0x35   :  { %s9738_s20 = sld [smem:[%s11285_s0 + %s9545_s15]]   ;;  %s9549_s15 = smov 31  }
  0x36   :  { %s9743_s27 = sld [smem:[%s11285_s0 + %s9546_s22]]   ;;  %s9550_s22 = smov 32  }
  0x37   :  { %s9748_s4 = sld [smem:[%s11285_s0 + %s9547_s28]]   ;;  %s9551_s28 = smov 33  }
  0x38   :  { %s9753_s12 = sld [smem:[%s11285_s0 + %s9548_s7]]   ;;  %s9552_s7 = smov 34  }
  0x3b   :  { %11380 = sst [smem:[#allocation50_spill]] %s9738_s20 }
  0x3c   :  { %11381 = sst [smem:[#allocation51_spill]] %s9743_s27 }
  0x3d   :  { %11382 = sst [smem:[#allocation52_spill]] %s9748_s4 }
  0x3e   :  { %11383 = sst [smem:[#allocation53_spill]] %s9753_s12 }
  0x3f   :  { %s9758_s20 = sld [smem:[%s11285_s0 + %s9549_s15]]   ;;  %s9553_s15 = smov 35  }
  0x40   :  { %s9763_s27 = sld [smem:[%s11285_s0 + %s9550_s22]]   ;;  %s9554_s22 = smov 36  }
  0x41   :  { %s9768_s4 = sld [smem:[%s11285_s0 + %s9551_s28]]   ;;  %s9555_s28 = smov 37  }
  0x42   :  { %s9773_s12 = sld [smem:[%s11285_s0 + %s9552_s7]]   ;;  %s9556_s7 = smov 38  }
  0x45   :  { %11384 = sst [smem:[#allocation54_spill]] %s9758_s20 }
  0x46   :  { %11385 = sst [smem:[#allocation55_spill]] %s9763_s27 }
  0x47   :  { %11386 = sst [smem:[#allocation56_spill]] %s9768_s4 }
  0x48   :  { %11387 = sst [smem:[#allocation57_spill]] %s9773_s12 }
  0x49   :  { %s9778_s20 = sld [smem:[%s11285_s0 + %s9553_s15]]   ;;  %s9557_s15 = smov 39  }
  0x4a   :  { %s9783_s27 = sld [smem:[%s11285_s0 + %s9554_s22]]   ;;  %s9558_s22 = smov 40  }
  0x4b   :  { %s9788_s4 = sld [smem:[%s11285_s0 + %s9555_s28]]   ;;  %s9559_s28 = smov 41  }
  0x4c   :  { %s9793_s12 = sld [smem:[%s11285_s0 + %s9556_s7]]   ;;  %s9560_s7 = smov 42  }
  0x4d   :  { %s9808_s6 = sld [smem:[%s11285_s0 + %s9559_s28]]   ;;  %s9563_s28 = smov 45  }
  0x4e   :  { %s9828_s19 = sld [smem:[%s11285_s0 + %s9563_s28]]   ;;  %s9567_s28 = smov 49  }
  0x4f   :  { %11388 = sst [smem:[#allocation58_spill]] %s9778_s20 }
  0x50   :  { %11389 = sst [smem:[#allocation59_spill]] %s9783_s27 }
  0x51   :  { %s9798_s20 = sld [smem:[%s11285_s0 + %s9557_s15]]   ;;  %s9561_s15 = smov 43  }
  0x52   :  { %11390 = sst [smem:[#allocation60_spill]] %s9793_s12 }
  0x53   :  { %s9803_s27 = sld [smem:[%s11285_s0 + %s9558_s22]]   ;;  %s9562_s22 = smov 44  }
  0x54   :  { %s9813_s12 = sld [smem:[%s11285_s0 + %s9560_s7]]   ;;  %s9564_s7 = smov 46  }
  0x55   :  { %s9823_s24 = sld [smem:[%s11285_s0 + %s9562_s22]]   ;;  %s9566_s22 = smov 48  }
  0x56   :  { %11393 = sst [smem:[#allocation63_spill]] %s9828_s19 }
  0x57   :  { %11391 = sst [smem:[#allocation61_spill]] %s9798_s20 }
  0x58   :  { %s9818_s20 = sld [smem:[%s11285_s0 + %s9561_s15]]   ;;  %s9565_s15 = smov 47  }
  0x59   :  { %s9833_s30 = sld [smem:[%s11285_s0 + %s9564_s7]]  }
  0x5a   :  { %s9843_s14 = sld [smem:[%s11285_s0 + %s9566_s22]]  }
  0x5b   :  { %s9848_s19 = sld [smem:[%s11285_s0 + %s9567_s28]]  }
  0x5e   :  { %11392 = sst [smem:[#allocation62_spill]] %s9818_s20 }
  0x5f   :  { %s9838_s20 = sld [smem:[%s11285_s0 + %s9565_s15]]  }
  0x60   :  { %11394 = sst [smem:[#allocation64_spill]] %s9843_s14 }
  0x61   :  { %11395 = sst [smem:[#allocation65_spill]] %s9848_s19 }
  0x62   :  { %104 = vsyncpa [#allocation11], 0 }
  0x63   :  { %105 = vsyncpa [#allocation13], 0 }
  0x64   :  { %106 = vsyncpa [#allocation9], 0 }
  0x65   :  { %107 = vsyncpa [#allocation16], 0 }
  0x66   :  { %108 = vsyncpa [#allocation19], 0 }
  0x67   :  { %109 = vsyncpa [#allocation22], 0 }
  0x68   :  { %110 = vsyncpa [#allocation10], 0  ;;  %s9568_s7 = smov [#allocation15]   ;;  %s9569_s11 = smov [#allocation18]  }
  0x69   :  { %s221_s10 = sshll.u32 %s9568_s7, 4  ;;  %s241_s15 = sshll.u32 %s9569_s11, 4  ;;  %s222_s10 = int_to_ptr.vmem [resolvable:$true] %s221_s10  ;;  %s242_s15 = int_to_ptr.vmem [resolvable:$true] %s241_s15 }
  0x6a   :  { %s9327_s16 = scalar_lea.hbm %s9803_s27, 16 }
  0x6b   :  { %p9328_p0 = scmp.ne.s32.totalorder %s9803_s27, %s9327_s16  ;;  %p9331_p1 = scmp.lt.u32.totalorder %s9327_s16, %s9803_s27 }
  0x6d   :  { %p9333_p2 = pnand %p9331_p1, %p9328_p0 }
  0x6f   :  { %9336 = shalt.err (!%p9333_p2)
}
  0x70   :  { %s9337_s0 = scalar_lea.vmem %s222_s10, 16  ;;  %s9341_s18 = scalar_lea.vmem %s222_s10, 32 }
  0x71   :  { %p9338_p3 = scmp.ne.s32.totalorder %s222_s10, %s9337_s0  ;;  %p9342_p4 = scmp.lt.s32.totalorder %s222_s10, %s222_s10 }
  0x72   :  { %p9343_p5 = scmp.lt.s32.totalorder %s9341_s18, %s9337_s0 }
  0x74   :  { %p9344_p6 = por %p9343_p5, %p9342_p4 }
  0x76   :  { %p9345_p7 = pnand %p9344_p6, %p9338_p3 }
  0x78   :  { %9348 = shalt.err (!%p9345_p7)
}
  0x79   :  { %224 = dma.hbm_to_vmem [thread:$0]  %s9803_s27, 16, %s222_s10, [#allocation16]  }
  0x7a   :  { %s9349_s22 = scalar_lea.hbm %s9813_s12, 16 }
  0x7b   :  { %p9350_p8 = scmp.ne.s32.totalorder %s9813_s12, %s9349_s22  ;;  %p9353_p9 = scmp.lt.u32.totalorder %s9349_s22, %s9813_s12 }
  0x7d   :  { %p9355_p10 = pnand %p9353_p9, %p9350_p8 }
  0x7f   :  { %9358 = shalt.err (!%p9355_p10)
}
  0x80   :  { %s9359_s23 = scalar_lea.vmem %s242_s15, 16  ;;  %s9363_s26 = scalar_lea.vmem %s242_s15, 32 }
  0x81   :  { %p9360_p11 = scmp.ne.s32.totalorder %s242_s15, %s9359_s23  ;;  %p9364_p12 = scmp.lt.s32.totalorder %s242_s15, %s242_s15 }
  0x82   :  { %p9365_p13 = scmp.lt.s32.totalorder %s9363_s26, %s9359_s23 }
  0x84   :  { %p9366_p0 = por %p9365_p13, %p9364_p12 }
  0x86   :  { %p9367_p1 = pnand %p9366_p0, %p9360_p11 }
  0x88   :  { %9370 = shalt.err (!%p9367_p1)
}
  0x89   :  { %244 = dma.hbm_to_vmem [thread:$0]  %s9813_s12, 16, %s242_s15, [#allocation19]  }
  0x8a   :  { %s117_s28 = sshll.u32 %s9603_s5, 4  ;;  %s127_s27 = sshll.u32 %s9608_s9, 4  ;;  %s118_s28 = int_to_ptr.vmem [resolvable:$true] %s117_s28  ;;  %s128_s27 = int_to_ptr.vmem [resolvable:$true] %s127_s27 }
  0x8b   :  { %s9371_s1 = scalar_lea.vmem %s118_s28, 32  ;;  %p9376_p3 = scmp.lt.s32.totalorder %s118_s28, %s118_s28 }
  0x8c   :  { %p9372_p2 = scmp.ne.s32.totalorder %s118_s28, %s9371_s1  ;;  %p9377_p4 = scmp.lt.s32.totalorder %s9371_s1, %s9371_s1 }
  0x8e   :  { %p9378_p5 = por %p9377_p4, %p9376_p3 }
  0x90   :  { %p9379_p6 = pnand %p9378_p5, %p9372_p2 }
  0x92   :  { %9382 = shalt.err (!%p9379_p6)
}
  0x93   :  { %s9570_s2 = smov [#allocation8]   ;;  %s9383_s7 = scalar_lea.vmem %s128_s27, 32 }
  0x94   :  { %120 = dma.vmem_to_smem %s118_s28, 32, %s9570_s2, [#allocation11]  }
  0x95   :  { %p9384_p7 = scmp.ne.s32.totalorder %s128_s27, %s9383_s7  ;;  %p9388_p8 = scmp.lt.s32.totalorder %s128_s27, %s128_s27 }
  0x96   :  { %p9389_p9 = scmp.lt.s32.totalorder %s9383_s7, %s9383_s7 }
  0x98   :  { %p9390_p10 = por %p9389_p9, %p9388_p8 }
  0x9a   :  { %p9391_p11 = pnand %p9390_p10, %p9384_p7 }
  0x9c   :  { %9394 = shalt.err (!%p9391_p11)
}
  0x9d   :  { %s9571_s5 = smov [#allocation12]   ;;  %s9572_s9 = smov [#allocation14]  }
  0x9e   :  { %130 = dma.vmem_to_smem %s128_s27, 32, %s9571_s5, [#allocation13]  }
  0x9f   :  { %s207_s12 = sshll.u32 %s9572_s9, 4  ;;  %s9573_s10 = smov [#allocation17]   ;;  %s208_s12 = int_to_ptr.vmem [resolvable:$true] %s207_s12 }
  0xa0   :  { %s231_s11 = sshll.u32 %s9573_s10, 4  ;;  %s9395_s15 = scalar_lea.hbm %s9788_s4, 16  ;;  %s232_s11 = int_to_ptr.vmem [resolvable:$true] %s231_s11 }
  0xa1   :  { %p9396_p12 = scmp.ne.s32.totalorder %s9788_s4, %s9395_s15  ;;  %p9399_p13 = scmp.lt.u32.totalorder %s9395_s15, %s9788_s4 }
  0xa3   :  { %p9401_p0 = pnand %p9399_p13, %p9396_p12 }
  0xa5   :  { %9404 = shalt.err (!%p9401_p0)
}
  0xa6   :  { %s9405_s16 = scalar_lea.vmem %s208_s12, 16  ;;  %s9409_s0 = scalar_lea.vmem %s208_s12, 32 }
  0xa7   :  { %p9406_p1 = scmp.ne.s32.totalorder %s208_s12, %s9405_s16  ;;  %p9410_p2 = scmp.lt.s32.totalorder %s208_s12, %s208_s12 }
  0xa8   :  { %p9411_p3 = scmp.lt.s32.totalorder %s9409_s0, %s9405_s16 }
  0xaa   :  { %p9412_p4 = por %p9411_p3, %p9410_p2 }
  0xac   :  { %p9413_p5 = pnand %p9412_p4, %p9406_p1 }
  0xae   :  { %9416 = shalt.err (!%p9413_p5)
}
  0xaf   :  { %210 = dma.hbm_to_vmem [thread:$0]  %s9788_s4, 16, %s208_s12, [#allocation9]  }
  0xb0   :  { %s9417_s18 = scalar_lea.hbm %s9808_s6, 16 }
  0xb1   :  { %p9418_p6 = scmp.ne.s32.totalorder %s9808_s6, %s9417_s18  ;;  %p9421_p7 = scmp.lt.u32.totalorder %s9417_s18, %s9808_s6 }
  0xb3   :  { %p9423_p8 = pnand %p9421_p7, %p9418_p6 }
  0xb5   :  { %9426 = shalt.err (!%p9423_p8)
}
  0xb6   :  { %s9427_s22 = scalar_lea.vmem %s232_s11, 16  ;;  %s9431_s23 = scalar_lea.vmem %s232_s11, 32 }
  0xb7   :  { %p9428_p9 = scmp.ne.s32.totalorder %s232_s11, %s9427_s22  ;;  %p9432_p10 = scmp.lt.s32.totalorder %s232_s11, %s232_s11 }
  0xb8   :  { %p9433_p11 = scmp.lt.s32.totalorder %s9431_s23, %s9427_s22 }
  0xba   :  { %p9434_p12 = por %p9433_p11, %p9432_p10 }
  0xbc   :  { %p9435_p13 = pnand %p9434_p12, %p9428_p9 }
  0xbe   :  { %9438 = shalt.err (!%p9435_p13)
}
  0xbf   :  { %234 = dma.hbm_to_vmem [thread:$0]  %s9808_s6, 16, %s232_s11, [#allocation16]  }
  0xc0   :  { %s9574_s26 = smov [#allocation20]   ;;  %s9575_s28 = smov [#allocation21]  }
  0xc1   :  { %s253_s4 = sshll.u32 %s9574_s26, 4  ;;  %s265_s27 = sshll.u32 %s9575_s28, 4  ;;  %s254_s4 = int_to_ptr.vmem [resolvable:$true] %s253_s4  ;;  %s266_s27 = int_to_ptr.vmem [resolvable:$true] %s265_s27 }
  0xc2   :  { %s9439_s1 = scalar_lea.hbm %s9823_s24, 16 }
  0xc3   :  { %p9440_p0 = scmp.ne.s32.totalorder %s9823_s24, %s9439_s1  ;;  %p9443_p1 = scmp.lt.u32.totalorder %s9439_s1, %s9823_s24 }
  0xc5   :  { %p9445_p2 = pnand %p9443_p1, %p9440_p0 }
  0xc7   :  { %9448 = shalt.err (!%p9445_p2)
}
  0xc8   :  { %s9449_s2 = scalar_lea.vmem %s254_s4, 16  ;;  %s9453_s7 = scalar_lea.vmem %s254_s4, 32 }
  0xc9   :  { %p9450_p3 = scmp.ne.s32.totalorder %s254_s4, %s9449_s2  ;;  %p9454_p4 = scmp.lt.s32.totalorder %s254_s4, %s254_s4 }
  0xca   :  { %p9455_p5 = scmp.lt.s32.totalorder %s9453_s7, %s9449_s2 }
  0xcc   :  { %p9456_p6 = por %p9455_p5, %p9454_p4 }
  0xce   :  { %p9457_p7 = pnand %p9456_p6, %p9450_p3 }
  0xd0   :  { %9460 = shalt.err (!%p9457_p7)
}
  0xd1   :  { %256 = dma.hbm_to_vmem [thread:$0]  %s9823_s24, 16, %s254_s4, [#allocation19]  }
  0xd2   :  { %s9461_s6 = scalar_lea.hbm %s9833_s30, 16 }
  0xd3   :  { %p9462_p8 = scmp.ne.s32.totalorder %s9833_s30, %s9461_s6  ;;  %p9465_p9 = scmp.lt.u32.totalorder %s9461_s6, %s9833_s30 }
  0xd5   :  { %p9467_p10 = pnand %p9465_p9, %p9462_p8 }
  0xd7   :  { %9470 = shalt.err (!%p9467_p10)
}
  0xd8   :  { %s9471_s5 = scalar_lea.vmem %s266_s27, 16  ;;  %s9475_s9 = scalar_lea.vmem %s266_s27, 32 }
  0xd9   :  { %p9472_p11 = scmp.ne.s32.totalorder %s266_s27, %s9471_s5  ;;  %p9476_p12 = scmp.lt.s32.totalorder %s266_s27, %s266_s27 }
  0xda   :  { %p9477_p13 = scmp.lt.s32.totalorder %s9475_s9, %s9471_s5 }
  0xdc   :  { %p9478_p0 = por %p9477_p13, %p9476_p12 }
  0xde   :  { %p9479_p1 = pnand %p9478_p0, %p9472_p11 }
  0xe0   :  { %9482 = shalt.err (!%p9479_p1)
}
  0xe1   :  { %268 = dma.hbm_to_vmem [thread:$0]  %s9833_s30, 16, %s266_s27, [#allocation22]  }
  0xe2   :  { %9505 = dma.done.wait [#allocation11], 32  }
  0xe3   :  { %9506 = vsyncadd [#allocation11], 4294967264 }
  0xe4   :  { %9507 = dma.done.wait [#allocation13], 32  }
  0xe5   :  { %9508 = vsyncadd [#allocation13], 4294967264 }
  0xe6   :  { %9509 = dma.done.wait [#allocation9], 16  }
  0xe7   :  { %9510 = vsyncadd [#allocation9], 4294967280 }
  0xe8   :  { %9511 = dma.done.wait [#allocation16], 32  }
  0xe9   :  { %9512 = vsyncadd [#allocation16], 4294967264 }
  0xea   :  { %9513 = dma.done.wait [#allocation19], 32  }
  0xeb   :  { %9514 = vsyncadd [#allocation19], 4294967264 }
  0xec   :  { %9515 = dma.done.wait [#allocation22], 16  }
  0xed   :  { %9516 = vsyncadd [#allocation22], 4294967280 }
  0xee   :  { %297 = sfence }
  0xef   :  { %s9876_s24 = sld [smem:[#allocation8]]  ;;  %s9878_s12 = sld [smem:[#allocation8 + $0x1]]  ;;  %v308_v0 = vlaneseq  ;;  %vm438_vm1 = vcmask 523264   ;;  %v484_v14 = vld [vmem:[%s9633_s29] sm:$0xff]  ;;  %v485_v15 = vld [vmem:[%s9633_s29 + $0x8] sm:$0xff]  ;;  %v486_v16 = vld [vmem:[%s9633_s29 + $0x10] sm:$0xff] }
  0xf0   :  { %s9880_s30 = sld [smem:[#allocation8 + $0x2]]  ;;  %s9882_s10 = sld [smem:[#allocation8 + $0x3]]  ;;  %v9576_v17 = vmov 0.0|0.0   ;;  %v8762_v18 = vpack.c.bf16 %v485_v15, %v484_v14  ;;  %v487_v19 = vld [vmem:[%s9633_s29 + $0x18] sm:$0xff]  ;;  %v488_v21 = vld [vmem:[%s9633_s29 + $0x20] sm:$0xff]  ;;  %v489_v22 = vld [vmem:[%s9633_s29 + $0x28] sm:$0xff] }
  0xf1   :  { %s9884_s11 = sld [smem:[#allocation8 + $0x80]]  ;;  %s9886_s15 = sld [smem:[#allocation8 + $0x81]]  ;;  %vm9896_vm0 = vcmp.lt.s32.totalorder %v308_v0, 192  ;;  %8761 = vmatprep.subr.bf16.mxu0 %v9576_v17  ;;  %8797 = vmatprep.subr.bf16.mxu1 %v9576_v17  ;;  %v8765_v20 = vpack.c.bf16 %v487_v19, %v486_v16  ;;  %v8768_v23 = vpack.c.bf16 %v489_v22, %v488_v21  ;;  %v490_v24 = vld [vmem:[%s9633_s29 + $0x30] sm:$0xff]  ;;  %v491_v25 = vld [vmem:[%s9633_s29 + $0x38] sm:$0xff]  ;;  %v492_v27 = vld [vmem:[%s9633_s29 + $0x40] sm:$0xff] }
  0xf2   :  { %s9888_s16 = sld [smem:[#allocation8 + $0x82]]  ;;  %s9890_s0 = sld [smem:[#allocation8 + $0x83]]  ;;  %8763 = vmatpush1.bf16.msra.mxu0 %v8762_v18  ;;  %v8771_v26 = vpack.c.bf16 %v491_v25, %v490_v24  ;;  %v493_v28 = vld [vmem:[%s9633_s29 + $0x48] sm:$0xff]  ;;  %v494_v30 = vld [vmem:[%s9633_s29 + $0x50] sm:$0xff]  ;;  %v495_v31 = vld [vmem:[%s9633_s29 + $0x58] sm:$0xff]  ;;  %v460_v62 = vshrl.u32 %v308_v0, 7 }
  0xf3   :  { %8764 = vmatprep.subr.bf16.mxu0 %v9576_v17  ;;  %v8774_v29 = vpack.c.bf16 %v493_v28, %v492_v27  ;;  %v8777_v32 = vpack.c.bf16 %v495_v31, %v494_v30  ;;  %v496_v33 = vld [vmem:[%s9633_s29 + $0x60] sm:$0xff]  ;;  %v497_v34 = vld [vmem:[%s9633_s29 + $0x68] sm:$0xff]  ;;  %v498_v44 = vld [vmem:[%s9633_s29 + $0x70] sm:$0xff]  ;;  %vm590_vm2 = vcmask 261120   ;;  %vm316_vm3 = vcmask 253952   ;;  %s10593_s14 = sld [smem:[#allocation12 + $0x83]] }
  0xf4   :  { %v8780_v35 = vpack.c.bf16 %v497_v34, %v496_v33  ;;  %v499_v45 = vld [vmem:[%s9633_s29 + $0x78] sm:$0xff]  ;;  %v500_v47 = vld [vmem:[%s9633_s29 + $0x80] sm:$0xff]  ;;  %v501_v48 = vld [vmem:[%s9633_s29 + $0x88] sm:$0xff]  ;;  %v9973_v63 = vsub.s32 0, %v460_v62  ;;  %vm9577_vm4 = vmmov 0   ;;  %vm731_vm5 = vcmask 64512  }
  0xf5   :  { %s299_s18 = sshra.s32 %s9876_s24, 3  ;;  %s302_s22 = sand.u32 7, %s9876_s24  ;;  %v8783_v46 = vpack.c.bf16 %v499_v45, %v498_v44  ;;  %v502_v49 = vld [vmem:[%s9633_s29 + $0x90] sm:$0xff]  ;;  %v8786_v50 = vpack.c.bf16 %v501_v48, %v500_v47  ;;  %v503_v51 = vld [vmem:[%s9633_s29 + $0x98] sm:$0xff]  ;;  %v504_v53 = vld [vmem:[%s9633_s29 + $0xa0] sm:$0xff]  ;;  %vm884_vm6 = vcmask 27648  }
  0xf6   :  { %s8055_s23 = sshll.u32 %s299_s18, 4  ;;  %s319_s26 = sshra.s32 %s9878_s12, 3  ;;  %8766 = vmatpush1.bf16.msra.mxu0 %v8765_v20  ;;  %v8789_v52 = vpack.c.bf16 %v503_v51, %v502_v49  ;;  %v505_v54 = vld [vmem:[%s9633_s29 + $0xa8] sm:$0xff]  ;;  %v506_v56 = vld [vmem:[%s9633_s29 + $0xb0] sm:$0xff]  ;;  %v507_v57 = vld [vmem:[%s9633_s29 + $0xb8] sm:$0xff]  ;;  %vm913_vm7 = vcmask 1043456  }
  0xf7   :  { %s305_s4 = sadd.s32 %s8055_s23, %s302_s22  ;;  %s322_s28 = sand.u32 7, %s9878_s12  ;;  %8767 = vmatprep.subr.bf16.mxu0 %v9576_v17  ;;  %v8792_v55 = vpack.c.bf16 %v505_v54, %v504_v53  ;;  %v8795_v58 = vpack.c.bf16 %v507_v57, %v506_v56  ;;  %v7760_v15 = vld [vmem:[%s9638_s3] ss:$0 sm:$0xff]  ;;  %v9578_v56 = vmov 0.0   ;;  %vm909_vm8 = vcmask 31744  }
  0xf8   :  { %s306_s27 = scalar_lea.vmem %s9613_s13, %s305_s4  ;;  %s8056_s1 = sshll.u32 %s319_s26, 4  ;;  %8314 = vmatprep.mubr.msk.f32.mxu1 %vm9577_vm4, %v9578_v56  ;;  %vm1408_vm9 = vcmask 130112   ;;  %vm1750_vm10 = vcmask 195712   ;;  %vm2092_vm11 = vcmask 261312   ;;  %vm4280_vm14 = vcmask 188416  }
  0xf9   :  { %v307_v2 = vld [vmem:[%s306_s27] ss:$8 sm:$0x3]  ;;  %s325_s2 = sadd.s32 %s8056_s1, %s322_s28  ;;  %s335_s7 = sshra.s32 %s9880_s30, 3  ;;  %vm4290_vm15 = vcmask 189441  }
  0xfa   :  { %312 = vst.msk [vmem:[#allocation2] ss:$8 sm:$0x3] %vm9896_vm0, %v307_v2  ;;  %s326_s6 = scalar_lea.vmem %s9613_s13, %s325_s2  ;;  %s338_s5 = sand.u32 7, %s9880_s30  ;;  %8769 = vmatpush1.bf16.msra.mxu0 %v8768_v23  ;;  %v9975_v2 = vsub.s32 1, %v460_v62 }
  0xfb   :  { %v327_v3 = vld [vmem:[%s326_s6] ss:$8 sm:$0x3]  ;;  %s8057_s9 = sshll.u32 %s335_s7, 4  ;;  %s351_s18 = sshra.s32 %s9882_s10, 3  ;;  %8770 = vmatprep.subr.bf16.mxu0 %v9576_v17 }
  0xfc   :  { %329 = vst.msk [vmem:[#allocation2 + $0x1] ss:$8 sm:$0x3] %vm9896_vm0, %v327_v3  ;;  %s341_s22 = sadd.s32 %s8057_s9, %s338_s5  ;;  %s354_s23 = sand.u32 7, %s9882_s10  ;;  %v436_v3 = vld [vmem:[%s9623_s21] sm:$0x3] }
  0xfd   :  { %s342_s26 = scalar_lea.vmem %s9613_s13, %s341_s22  ;;  %s8058_s4 = sshll.u32 %s351_s18, 4 }
  0xfe   :  { %v343_v4 = vld [vmem:[%s342_s26] ss:$8 sm:$0x3]  ;;  %s357_s28 = sadd.s32 %s8058_s4, %s354_s23  ;;  %s367_s27 = sadd.s32 16, %s9884_s11  ;;  %8772 = vmatpush1.bf16.msra.mxu0 %v8771_v26 }
  0xff   :  { %345 = vst.msk [vmem:[#allocation2 + $0x2] ss:$8 sm:$0x3] %vm9896_vm0, %v343_v4  ;;  %s358_s1 = scalar_lea.vmem %s9613_s13, %s357_s28  ;;  %s368_s2 = sshra.s32 %s367_s27, 3  ;;  %8773 = vmatprep.subr.bf16.mxu0 %v9576_v17  ;;  %v437_v4 = vld [vmem:[%s9628_s25] sm:$0x3] }
 0x100   :  { %v359_v5 = vld [vmem:[%s358_s1] ss:$8 sm:$0x3]  ;;  %s371_s7 = sand.u32 7, %s367_s27  ;;  %s8059_s6 = sshll.u32 %s368_s2, 4 }
 0x101   :  { %361 = vst.msk [vmem:[#allocation2 + $0x3] ss:$8 sm:$0x3] %vm9896_vm0, %v359_v5  ;;  %s374_s5 = sadd.s32 %s8059_s6, %s371_s7  ;;  %s384_s9 = sadd.s32 16, %s9886_s15  ;;  %v462_v5 = vrot.slane %v436_v3, %v9973_v63 }
 0x102   :  { %s375_s18 = scalar_lea.vmem %s9613_s13, %s374_s5  ;;  %s385_s22 = sshra.s32 %s384_s9, 3  ;;  %8775 = vmatpush1.bf16.msra.mxu0 %v8774_v29 }
 0x103   :  { %v376_v6 = vld [vmem:[%s375_s18] ss:$8 sm:$0x3]  ;;  %s388_s23 = sand.u32 7, %s384_s9  ;;  %s8060_s26 = sshll.u32 %s385_s22, 4  ;;  %8776 = vmatprep.subr.bf16.mxu0 %v9576_v17 }
 0x104   :  { %378 = vst.msk [vmem:[#allocation2 + $0x4] ss:$8 sm:$0x3] %vm9896_vm0, %v376_v6  ;;  %s391_s4 = sadd.s32 %s8060_s26, %s388_s23  ;;  %s401_s28 = sadd.s32 16, %s9888_s16  ;;  %v466_v6 = vrot.slane %v436_v3, %v9975_v2 }
 0x105   :  { %s392_s27 = scalar_lea.vmem %s9613_s13, %s391_s4  ;;  %s402_s1 = sshra.s32 %s401_s28, 3 }
 0x106   :  { %v393_v7 = vld [vmem:[%s392_s27] ss:$8 sm:$0x3]  ;;  %s405_s2 = sand.u32 7, %s401_s28  ;;  %s8061_s19 = sshll.u32 %s402_s1, 4  ;;  %8778 = vmatpush1.bf16.msra.mxu0 %v8777_v32 }
 0x107   :  { %395 = vst.msk [vmem:[#allocation2 + $0x5] ss:$8 sm:$0x3] %vm9896_vm0, %v393_v7  ;;  %s408_s7 = sadd.s32 %s8061_s19, %s405_s2  ;;  %s418_s6 = sadd.s32 16, %s9890_s0  ;;  %8779 = vmatprep.subr.bf16.mxu0 %v9576_v17 }
 0x108   :  { %s409_s5 = scalar_lea.vmem %s9613_s13, %s408_s7  ;;  %s419_s9 = sshra.s32 %s418_s6, 3 }
 0x109   :  { %v410_v8 = vld [vmem:[%s409_s5] ss:$8 sm:$0x3]  ;;  %s422_s18 = sand.u32 7, %s418_s6  ;;  %s8062_s22 = sshll.u32 %s419_s9, 4 }
 0x10a   :  { %412 = vst.msk [vmem:[#allocation2 + $0x6] ss:$8 sm:$0x3] %vm9896_vm0, %v410_v8  ;;  %s425_s23 = sadd.s32 %s8062_s22, %s422_s18  ;;  %8781 = vmatpush1.bf16.msra.mxu0 %v8780_v35  ;;  %s314_s21 = scalar_lea.vmem %s9618_s17, %s9876_s24 }
 0x10b   :  { %s426_s26 = scalar_lea.vmem %s9613_s13, %s425_s23  ;;  %8782 = vmatprep.subr.bf16.mxu0 %v9576_v17  ;;  %s331_s25 = scalar_lea.vmem %s9618_s17, %s9878_s12  ;;  %v315_v26 = vld [vmem:[%s314_s21] sm:$0x1] }
 0x10c   :  { %v427_v9 = vld [vmem:[%s426_s26] ss:$8 sm:$0x3]  ;;  %s347_s29 = scalar_lea.vmem %s9618_s17, %s9880_s30  ;;  %s363_s3 = scalar_lea.vmem %s9618_s17, %s9882_s10  ;;  %317 = vst.msk [vmem:[#allocation3] sm:$0x1] %vm316_vm3, %v315_v26 }
 0x10d   :  { %429 = vst.msk [vmem:[#allocation2 + $0x7] ss:$8 sm:$0x3] %vm9896_vm0, %v427_v9  ;;  %v475_v9 = vrot.slane %v437_v4, %v9973_v63  ;;  %v332_v27 = vld [vmem:[%s331_s25] sm:$0x1]  ;;  %s380_s19 = scalar_lea.vmem %s9618_s17, %s9884_s11  ;;  %s397_s4 = scalar_lea.vmem %s9618_s17, %s9886_s15 }
 0x10e   :  { %8784 = vmatpush1.bf16.msra.mxu0 %v8783_v46  ;;  %333 = vst.msk [vmem:[#allocation3 + $0x1] sm:$0x1] %vm316_vm3, %v332_v27  ;;  %v348_v28 = vld [vmem:[%s347_s29] sm:$0x1]  ;;  %s11398_s24 = sld [smem:[#allocation32_spill]]  ;;  %s414_s12 = scalar_lea.vmem %s9618_s17, %s9888_s16 }
 0x10f   :  { %8785 = vmatprep.subr.bf16.mxu0 %v9576_v17  ;;  %v364_v29 = vld [vmem:[%s363_s3] sm:$0x1]  ;;  %349 = vst.msk [vmem:[#allocation3 + $0x2] sm:$0x1] %vm316_vm3, %v348_v28  ;;  %s431_s28 = scalar_lea.vmem %s9618_s17, %s9890_s0  ;;  %s11399_s30 = sld [smem:[#allocation35_spill]] }
 0x110   :  { %365 = vst.msk [vmem:[#allocation3 + $0x3] sm:$0x1] %vm316_vm3, %v364_v29  ;;  %v381_v30 = vld [vmem:[%s380_s19] sm:$0x1]  ;;  %s11400_s17 = sld [smem:[#allocation33_spill]]  ;;  %s11327_s10 = smov 96  }
 0x111   :  { %v398_v31 = vld [vmem:[%s397_s4] sm:$0x1]  ;;  %382 = vst.msk [vmem:[#allocation3 + $0x4] sm:$0x1] %vm316_vm3, %v381_v30  ;;  %s11325_s11 = smov 64   ;;  %s11323_s15 = smov 88  }
 0x112   :  { %8787 = vmatpush1.bf16.msra.mxu0 %v8786_v50  ;;  %399 = vst.msk [vmem:[#allocation3 + $0x5] sm:$0x1] %vm316_vm3, %v398_v31  ;;  %v415_v32 = vld [vmem:[%s414_s12] sm:$0x1]  ;;  %s11321_s16 = smov 120   ;;  %s11319_s0 = smov 56  }
 0x113   :  { %8788 = vmatprep.subr.bf16.mxu0 %v9576_v17  ;;  %v432_v33 = vld [vmem:[%s431_s28] sm:$0x1]  ;;  %416 = vst.msk [vmem:[#allocation3 + $0x6] sm:$0x1] %vm316_vm3, %v415_v32  ;;  %s11317_s27 = smov 80   ;;  %s11315_s1 = smov 112  }
 0x114   :  { %v434_v10 = vld [vmem:[#allocation2] sm:$0xff]  ;;  %v435_v11 = vld [vmem:[#allocation2 + $0x8] sm:$0xff]  ;;  %433 = vst.msk [vmem:[#allocation3 + $0x7] sm:$0x1] %vm316_vm3, %v432_v33  ;;  %s11313_s2 = smov 48   ;;  %s11311_s7 = smov 72  }
 0x115   :  { %v439_v12 = vsel %vm438_vm1, %v435_v11, 0.0  ;;  %v650_v51 = vld [vmem:[%s11399_s30] sm:$0xff]  ;;  %v652_v53 = vld [vmem:[%s11399_s30 + $0x10] sm:$0xff]  ;;  %s11309_s6 = smov 104   ;;  %s11307_s5 = smov 40   ;;  %vm4300_vm3 = vcmask 190466  }
 0x116   :  { %v440_v13 = vadd.f32 %v439_v12, %v434_v10  ;;  %8790 = vmatpush1.bf16.msra.mxu0 %v8789_v52  ;;  %v651_v52 = vld [vmem:[%s11399_s30 + $0x8] sm:$0xff]  ;;  %v7764_v62 = vld [vmem:[%s11400_s17] ss:$0 sm:$0xff]  ;;  %s11305_s9 = smov 8   ;;  %s11303_s18 = smov 16  }
 0x117   :  { %8791 = vmatprep.subr.bf16.mxu0 %v9576_v17  ;;  %v8798_v54 = vpack.c.bf16 %v651_v52, %v650_v51  ;;  %s11402_s22 = sld [smem:[#allocation36_spill]]  ;;  %s11403_s23 = sld [smem:[#allocation37_spill]] }
 0x118   :  { %441 = vadd.xlane.f32.xlu0 %v440_v13  ;;  %s11301_s26 = smov 24   ;;  %s11404_s21 = sld [smem:[#allocation40_spill]] }
 0x119   :  { %8799 = vmatpush3.bf16.msra.mxu1 %v8798_v54  ;;  %s11405_s25 = sld [smem:[#allocation38_spill]]  ;;  %s11406_s29 = sld [smem:[#allocation39_spill]] }
 0x11a   :  { %8793 = vmatpush1.bf16.msra.mxu0 %v8792_v55  ;;  %v653_v55 = vld [vmem:[%s11399_s30 + $0x18] sm:$0xff]  ;;  %8800 = vmatprep.subr.bf16.mxu1 %v9576_v17  ;;  %s11407_s3 = sld [smem:[#allocation42_spill]]  ;;  %s11408_s19 = sld [smem:[#allocation41_spill]] }
 0x11b   :  { %8794 = vmatprep.subr.bf16.mxu0 %v9576_v17  ;;  %v8801_v57 = vpack.c.bf16 %v653_v55, %v652_v53  ;;  %s11409_s4 = sld [smem:[#allocation43_spill]]  ;;  %s11411_s12 = sld [smem:[#allocation44_spill]] }
 0x11c   :  { %s11412_s28 = sld [smem:[#allocation45_spill]]  ;;  %s11413_s30 = sld [smem:[#allocation47_spill]] }
 0x11d   :  { %8802 = vmatpush3.bf16.msra.mxu1 %v8801_v57  ;;  %s11414_s17 = sld [smem:[#allocation48_spill]]  ;;  %11437 = sst [smem:[#allocation77_spill]] %s10593_s14 }
 0x11e   :  { %8796 = vmatpush1.bf16.msra.mxu0 %v8795_v58  ;;  %8317 = vmatprep.subr.mxu1 %v9578_v56 }
 0x11f   :  { %8377 = vmatprep.subr.mxu0 %v9578_v56 }
 0x1a5   :  { %v442_v36 = vpop.xlane.xlu0 %441 }
 0x1a6   :  { %v444_v37 = vmul.f32 0.0052083335, %v442_v36 }
 0x1a8   :  { %v445_v38 = vsub.f32 %v434_v10, %v444_v37  ;;  %v446_v39 = vsub.f32 %v435_v11, %v444_v37  ;;  %v479_v10 = vrot.slane %v437_v4, %v9975_v2 }
 0x1aa   :  { %v447_v40 = vmul.f32 %v445_v38, %v445_v38  ;;  %v448_v41 = vmul.f32 %v446_v39, %v446_v39 }
 0x1ac   :  { %v449_v42 = vsel %vm438_vm1, %v448_v41, 0.0 }
 0x1ad   :  { %v450_v43 = vadd.f32 %v449_v42, %v447_v40  ;;  %v7763_v40 = vld [vmem:[%s11398_s24] ss:$0 sm:$0xff]  ;;  %v619_v42 = vld [vmem:[#allocation3] sm:$0xff]  ;;  %s11410_s24 = sld [smem:[#allocation46_spill]] }
 0x1af   :  { %451 = vadd.xlane.f32.xlu0 %v450_v43 }
 0x23c   :  { %v452_v59 = vpop.xlane.xlu0 %451 }
 0x23d   :  { %v453_v60 = vmul.f32 0.0052083335, %v452_v59 }
 0x23f   :  { %v454_v61 = vadd.f32 1e-05, %v453_v60 }
 0x241   :  { %9143 = vrsqrt.f32 %v454_v61 }
 0x24b   :  { %v9144_v7 = vpop.eup %9143 }
 0x24c   :  { %v457_v8 = vmul.f32 %v9144_v7, %v446_v39  ;;  %v456_v11 = vmul.f32 %v9144_v7, %v445_v38  ;;  %v7762_v38 = vld [vmem:[%s9643_s8] ss:$0 sm:$0xff]  ;;  %s11401_s8 = sld [smem:[#allocation34_spill]] }
 0x24e   :  { %v470_v12 = vmul.f32 %v466_v6, %v457_v8  ;;  %v469_v0 = vmul.f32 %v462_v5, %v456_v11 }
 0x250   :  { %v483_v13 = vadd.f32 %v479_v10, %v470_v12  ;;  %v482_v14 = vadd.f32 %v475_v9, %v469_v0 }
 0x252   :  { %7761 = vmatprep.mubr.msk.f32.mxu0 %vm438_vm1, %v483_v13  ;;  %v7765_v4 = vld [vmem:[%s11401_s8] ss:$0 sm:$0xff]  ;;  %s11415_s8 = sld [smem:[#allocation51_spill]] }
 0x253   :  { %583 = vmatmul.mubr.f32.vlgmr.msra.gmra.mrb[0].mxu0 %v482_v14 }
 0x254   :  { %8379 = vmatprep.mubr.msk.f32.mxu0 %vm9577_vm4, %v9578_v56 }
 0x326   :  { %v584_v16 = vpop.f32.mrb[0].mxu0 }
 0x327   :  { %v585_v18 = vadd.f32 %v7760_v15, %v584_v16  ;;  %v586_v19 = vpop.f32.mrb[1].mxu0 }
 0x329   :  { %v591_v20 = vsel %vm590_vm2, %v585_v18, 0.0 }
 0x32a   :  { %592 = vadd.xlane.f32.xlu1 %v591_v20 }
 0x3b7   :  { %v593_v21 = vpop.xlane.xlu1 %592 }
 0x3b8   :  { %v595_v22 = vmul.f32 0.03125, %v593_v21 }
 0x3ba   :  { %v596_v23 = vsub.f32 %v585_v18, %v595_v22 }
 0x3bc   :  { %v597_v24 = vmul.f32 %v596_v23, %v596_v23 }
 0x3be   :  { %v598_v25 = vsel %vm590_vm2, %v597_v24, 0.0 }
 0x3bf   :  { %599 = vadd.xlane.f32.xlu1 %v598_v25 }
 0x44c   :  { %v600_v34 = vpop.xlane.xlu1 %599 }
 0x44d   :  { %v601_v35 = vmul.f32 0.03125, %v600_v34 }
 0x44f   :  { %v602_v36 = vadd.f32 1e-05, %v601_v35 }
 0x451   :  { %9145 = vrsqrt.f32 %v602_v36 }
 0x45b   :  { %v9146_v37 = vpop.eup %9145 }
 0x45c   :  { %v604_v39 = vmul.f32 %v9146_v37, %v596_v23 }
 0x45e   :  { %v611_v41 = vmul.f32 %v7762_v38, %v604_v39 }
 0x460   :  { %v618_v43 = vadd.f32 %v7763_v40, %v611_v41 }
 0x462   :  { %v10013_v44 = vadd.f32 %v619_v42, %v618_v43 }
 0x464   :  { %v623_v45 = vsel %vm590_vm2, %v10013_v44, 0.0 }
 0x465   :  { %624 = vadd.xlane.f32.xlu0 %v623_v45 }
 0x4f2   :  { %v625_v46 = vpop.xlane.xlu0 %624 }
 0x4f3   :  { %v626_v47 = vmul.f32 0.03125, %v625_v46 }
 0x4f5   :  { %v627_v48 = vsub.f32 %v10013_v44, %v626_v47 }
 0x4f7   :  { %v628_v49 = vmul.f32 %v627_v48, %v627_v48 }
 0x4f9   :  { %v629_v50 = vsel %vm590_vm2, %v628_v49, 0.0 }
 0x4fa   :  { %630 = vadd.xlane.f32.xlu1 %v629_v50 }
 0x587   :  { %v631_v58 = vpop.xlane.xlu1 %630 }
 0x588   :  { %v632_v59 = vmul.f32 0.03125, %v631_v58 }
 0x58a   :  { %v633_v60 = vadd.f32 1e-05, %v632_v59 }
 0x58c   :  { %9147 = vrsqrt.f32 %v633_v60 }
 0x596   :  { %v9148_v61 = vpop.eup %9147 }
 0x597   :  { %v635_v3 = vmul.f32 %v9148_v61, %v627_v48 }
 0x599   :  { %v642_v5 = vmul.f32 %v7764_v62, %v635_v3 }
 0x59b   :  { %v649_v6 = vadd.f32 %v7765_v4, %v642_v5 }
 0x59d   :  { %8315 = vmatmul.mubr.msk.f32.vlgmr.msra.gmra.mrb[0].mxu1 %vm590_vm2, %v649_v6 }
 0x59e   :  { %8319 = vmatprep.mubr.msk.f32.mxu1 %vm9577_vm4, %v9578_v56 }
 0x670   :  { %v10035_v7 = vpop.f32.mrb[0].mxu1 }
 0x671   :  { %v10039_v8 = vcombine.high %v10035_v7, %v10035_v7  ;;  %729 = vrot.lane.b32.xlu0 %v10035_v7, %s11327_s10  ;;  %v8316_v9 = vpop.f32.mrb[1].mxu1 }
 0x673   :  { %806 = vrot.lane.b32.xlu1 %v10039_v8, %s11327_s10 }
 0x6e3   :  { %v730_v10 = vpop.permute.xlu0 %729 }
 0x6e4   :  { %8318 = vmatpush3.xpose.msk.msra.mxu1 %vm731_vm5, %v730_v10 }
 0x6e5   :  { %8322 = vmatprep.subr.mxu1 %v9578_v56  ;;  %v807_v11 = vpop.permute.xlu1 %806 }
 0x6e7   :  { %8320 = vmatmul.mubr.msk.f32.vlgmr.msra.gmra.mrb[2].mxu1 %vm731_vm5, %v10035_v7 }
 0x6e8   :  { %8323 = vmatpush3.xpose.msk.msra.mxu1 %vm731_vm5, %v807_v11  ;;  %8324 = vmatprep.mubr.msk.f32.mxu1 %vm9577_vm4, %v9578_v56 }
 0x6e9   :  { %8327 = vmatprep.subr.mxu1 %v9578_v56 }
 0x6eb   :  { %8325 = vmatmul.mubr.msk.f32.vlgmr.msra.gmra.mrb[4].mxu1 %vm731_vm5, %v10039_v8 }
 0x6ec   :  { %8329 = vmatprep.mubr.msk.f32.mxu1 %vm9577_vm4, %v9578_v56 }
 0x7ba   :  { %v802_v12 = vpop.f32.mrb[2].mxu1 }
 0x7bb   :  { %v882_v0 = vmul.f32 0.35355338, %v802_v12  ;;  %v8321_v13 = vpop.f32.mrb[3].mxu1 }
 0x7bd   :  { %v885_v14 = vsel %vm884_vm6, %v882_v0, -inf }
 0x7be   :  { %886 = vmax.xlane.f32.xlu1 %v885_v14  ;;  %v878_v15 = vpop.f32.mrb[4].mxu1 }
 0x7bf   :  { %v883_v16 = vmul.f32 0.35355338, %v878_v15  ;;  %v8326_v18 = vpop.f32.mrb[5].mxu1 }
 0x7c1   :  { %v888_v19 = vsel %vm884_vm6, %v883_v16, -inf }
 0x7c2   :  { %889 = vmax.xlane.f32.xlu0 %v888_v19 }
 0x7cf   :  { %986 = vrot.lane.b32.xlu1 %v10039_v8, %s11325_s11 }
 0x7d3   :  { %1070 = vrot.lane.b32.xlu1 %v10035_v7, %s11323_s15 }
 0x84b   :  { %v887_v20 = vpop.xlane.xlu1 %886 }
 0x84c   :  { %v891_v21 = vsub.f32 %v882_v0, %v887_v20 }
 0x84e   :  { %v893_v22 = vmul.f32 1.442695, %v891_v21 }
 0x84f   :  { %v890_v23 = vpop.xlane.xlu0 %889  ;;  %v987_v30 = vpop.permute.xlu1 %986 }
 0x850   :  { %9149 = vpow2.f32 %v893_v22  ;;  %v892_v24 = vsub.f32 %v883_v16, %v890_v23 }
 0x852   :  { %v895_v25 = vmul.f32 1.442695, %v892_v24 }
 0x853   :  { %v1071_v31 = vpop.permute.xlu1 %1070 }
 0x854   :  { %9151 = vpow2.f32 %v895_v25 }
 0x85a   :  { %v9150_v26 = vpop.eup %9149 }
 0x85b   :  { %v897_v27 = vsel %vm884_vm6, %v9150_v26, 0.0 }
 0x85c   :  { %898 = vadd.xlane.f32.xlu0 %v897_v27 }
 0x85e   :  { %v9152_v28 = vpop.eup %9151 }
 0x85f   :  { %v900_v29 = vsel %vm884_vm6, %v9152_v28, 0.0 }
 0x860   :  { %901 = vadd.xlane.f32.xlu1 %v900_v29 }
 0x871   :  { %1068 = vrot.lane.b32.xlu1 %v10035_v7, %s11321_s16 }
 0x872   :  { %907 = vrot.lane.b32.xlu0 %v10035_v7, %s11325_s11 }
 0x875   :  { %1146 = vrot.lane.b32.xlu1 %v10039_v8, %s11321_s16 }
 0x876   :  { %1148 = vrot.lane.b32.xlu0 %v10039_v8, %s11323_s15 }
 0x8e9   :  { %v899_v32 = vpop.xlane.xlu0 %898 }
 0x8ea   :  { %9153 = vrcp.f32 %v899_v32 }
 0x8ed   :  { %v902_v33 = vpop.xlane.xlu1 %901  ;;  %v908_v34 = vpop.permute.xlu0 %907 }
 0x8ee   :  { %9155 = vrcp.f32 %v902_v33  ;;  %8328 = vmatpush3.msk.msra.mxu1 %vm913_vm7, %v908_v34 }
 0x8ef   :  { %8332 = vmatprep.subr.mxu1 %v9578_v56 }
 0x8f1   :  { %v1069_v39 = vpop.permute.xlu1 %1068  ;;  %v1149_v40 = vpop.permute.xlu0 %1148 }
 0x8f4   :  { %v9154_v35 = vpop.eup %9153 }
 0x8f5   :  { %v904_v36 = vmul.f32 %v9154_v35, %v9150_v26  ;;  %v1147_v41 = vpop.permute.xlu1 %1146 }
 0x8f7   :  { %8330 = vmatmul.mubr.msk.f32.vlgmr.msra.gmra.mrb[6].mxu1 %vm909_vm8, %v904_v36 }
 0x8f8   :  { %v9156_v37 = vpop.eup %9155  ;;  %8333 = vmatpush3.msk.msra.mxu1 %vm913_vm7, %v987_v30  ;;  %8334 = vmatprep.mubr.msk.f32.mxu1 %vm9577_vm4, %v9578_v56 }
 0x8f9   :  { %v906_v38 = vmul.f32 %v9156_v37, %v9152_v28  ;;  %8337 = vmatprep.subr.mxu1 %v9578_v56 }
 0x8fb   :  { %8335 = vmatmul.mubr.msk.f32.vlgmr.msra.gmra.mrb[8].mxu1 %vm909_vm8, %v906_v38 }
 0x8fc   :  { %8339 = vmatprep.mubr.msk.f32.mxu1 %vm9577_vm4, %v9578_v56 }
 0x8ff   :  { %8338 = vmatpush3.xpose.msk.msra.mxu1 %vm731_vm5, %v1071_v31 }
 0x900   :  { %8342 = vmatprep.subr.mxu1 %v9578_v56 }
 0x902   :  { %8340 = vmatmul.mubr.msk.f32.vlgmr.msra.gmra.mrb[10].mxu1 %vm731_vm5, %v1069_v39 }
 0x903   :  { %8343 = vmatpush3.xpose.msk.msra.mxu1 %vm731_vm5, %v1149_v40  ;;  %8344 = vmatprep.mubr.msk.f32.mxu1 %vm9577_vm4, %v9578_v56 }
 0x904   :  { %8347 = vmatprep.subr.mxu1 %v9578_v56 }
 0x906   :  { %8345 = vmatmul.mubr.msk.f32.vlgmr.msra.gmra.mrb[12].mxu1 %vm731_vm5, %v1147_v41 }
 0x907   :  { %8349 = vmatprep.mubr.msk.f32.mxu1 %vm9577_vm4, %v9578_v56 }
 0x9ca   :  { %v982_v42 = vpop.f32.mrb[6].mxu1 }
 0x9cb   :  { %v8331_v43 = vpop.f32.mrb[7].mxu1 }
 0x9ce   :  { %v1059_v45 = vpop.f32.mrb[8].mxu1 }
 0x9cf   :  { %v1065_v46 = vcombine.low %v982_v42, %v1059_v45  ;;  %v8336_v47 = vpop.f32.mrb[9].mxu1 }
 0x9d1   :  { %1067 = vst.msk [vmem:[#allocation5] sm:$0xff] %vm731_vm5, %v1065_v46 }
 0x9d5   :  { %v1142_v48 = vpop.f32.mrb[10].mxu1 }
 0x9d6   :  { %v1224_v49 = vmul.f32 0.35355338, %v1142_v48  ;;  %v8341_v50 = vpop.f32.mrb[11].mxu1 }
 0x9d8   :  { %v1226_v51 = vsel %vm884_vm6, %v1224_v49, -inf }
 0x9d9   :  { %1227 = vmax.xlane.f32.xlu0 %v1226_v51  ;;  %v1220_v52 = vpop.f32.mrb[12].mxu1 }
 0x9da   :  { %v1225_v53 = vmul.f32 0.35355338, %v1220_v52  ;;  %v8346_v54 = vpop.f32.mrb[13].mxu1 }
 0x9dc   :  { %v1229_v55 = vsel %vm884_vm6, %v1225_v53, -inf }
 0x9dd   :  { %1230 = vmax.xlane.f32.xlu1 %v1229_v55 }
 0x9ee   :  { %1325 = vrot.lane.b32.xlu1 %v10039_v8, %s11319_s0 }
 0x9f2   :  { %1412 = vrot.lane.b32.xlu1 %v10035_v7, %s11317_s27 }
 0x9f6   :  { %1410 = vrot.lane.b32.xlu1 %v10035_v7, %s11315_s1 }
 0x9fa   :  { %1488 = vrot.lane.b32.xlu1 %v10039_v8, %s11315_s1 }
 0xa66   :  { %v1228_v57 = vpop.xlane.xlu0 %1227 }
 0xa67   :  { %v1232_v58 = vsub.f32 %v1224_v49, %v1228_v57 }
 0xa69   :  { %v1234_v59 = vmul.f32 1.442695, %v1232_v58 }
 0xa6a   :  { %v1231_v60 = vpop.xlane.xlu1 %1230 }
 0xa6b   :  { %9157 = vpow2.f32 %v1234_v59  ;;  %v1233_v61 = vsub.f32 %v1225_v53, %v1231_v60 }
 0xa6d   :  { %v1236_v62 = vmul.f32 1.442695, %v1233_v61 }
 0xa6e   :  { %v1326_v12 = vpop.permute.xlu1 %1325 }
 0xa6f   :  { %9159 = vpow2.f32 %v1236_v62 }
 0xa72   :  { %v1413_v15 = vpop.permute.xlu1 %1412 }
 0xa75   :  { %v9158_v3 = vpop.eup %9157 }
 0xa76   :  { %v1238_v4 = vsel %vm884_vm6, %v9158_v3, 0.0  ;;  %v1411_v18 = vpop.permute.xlu1 %1410 }
 0xa77   :  { %1239 = vadd.xlane.f32.xlu0 %v1238_v4 }
 0xa79   :  { %v9160_v5 = vpop.eup %9159 }
 0xa7a   :  { %v1241_v6 = vsel %vm884_vm6, %v9160_v5, 0.0  ;;  %v1489_v20 = vpop.permute.xlu1 %1488 }
 0xa7b   :  { %1242 = vadd.xlane.f32.xlu0 %v1241_v6 }
 0xa91   :  { %1248 = vrot.lane.b32.xlu0 %v10035_v7, %s11319_s0 }
 0xa95   :  { %1490 = vrot.lane.b32.xlu0 %v10039_v8, %s11317_s27 }
 0xb04   :  { %v1240_v9 = vpop.xlane.xlu0 %1239 }
 0xb05   :  { %9161 = vrcp.f32 %v1240_v9 }
 0xb08   :  { %v1243_v10 = vpop.xlane.xlu0 %1242 }
 0xb09   :  { %9163 = vrcp.f32 %v1243_v10 }
 0xb0c   :  { %v1249_v11 = vpop.permute.xlu0 %1248 }
 0xb0d   :  { %8348 = vmatpush3.msk.msra.mxu1 %vm913_vm7, %v1249_v11 }
 0xb0e   :  { %8352 = vmatprep.subr.mxu1 %v9578_v56 }
 0xb0f   :  { %v9162_v0 = vpop.eup %9161 }
 0xb10   :  { %v1245_v13 = vmul.f32 %v9162_v0, %v9158_v3  ;;  %v1491_v19 = vpop.permute.xlu0 %1490 }
 0xb12   :  { %8350 = vmatmul.mubr.msk.f32.vlgmr.msra.gmra.mrb[14].mxu1 %vm909_vm8, %v1245_v13 }
 0xb13   :  { %v9164_v14 = vpop.eup %9163  ;;  %8353 = vmatpush3.msk.msra.mxu1 %vm913_vm7, %v1326_v12  ;;  %8354 = vmatprep.mubr.msk.f32.mxu1 %vm9577_vm4, %v9578_v56 }
 0xb14   :  { %v1247_v16 = vmul.f32 %v9164_v14, %v9160_v5  ;;  %8357 = vmatprep.subr.mxu1 %v9578_v56 }
 0xb16   :  { %8355 = vmatmul.mubr.msk.f32.vlgmr.msra.gmra.mrb[16].mxu1 %vm909_vm8, %v1247_v16 }
 0xb17   :  { %8359 = vmatprep.mubr.msk.f32.mxu1 %vm9577_vm4, %v9578_v56 }
 0xb1a   :  { %8358 = vmatpush3.xpose.msk.msra.mxu1 %vm731_vm5, %v1413_v15 }
 0xb1b   :  { %8362 = vmatprep.subr.mxu1 %v9578_v56 }
 0xb1d   :  { %8360 = vmatmul.mubr.msk.f32.vlgmr.msra.gmra.mrb[18].mxu1 %vm731_vm5, %v1411_v18 }
 0xb1e   :  { %8363 = vmatpush3.xpose.msk.msra.mxu1 %vm731_vm5, %v1491_v19  ;;  %8364 = vmatprep.mubr.msk.f32.mxu1 %vm9577_vm4, %v9578_v56 }
 0xb1f   :  { %8367 = vmatprep.subr.mxu1 %v9578_v56 }
 0xb21   :  { %8365 = vmatmul.mubr.msk.f32.vlgmr.msra.gmra.mrb[20].mxu1 %vm731_vm5, %v1489_v20 }
 0xb22   :  { %8369 = vmatprep.mubr.msk.f32.mxu1 %vm9577_vm4, %v9578_v56 }
 0xbe5   :  { %v10130_v21 = vpop.f32.mrb[14].mxu1 }
 0xbe6   :  { %v8351_v22 = vpop.f32.mrb[15].mxu1 }
 0xbe9   :  { %v10132_v23 = vpop.f32.mrb[16].mxu1 }
 0xbea   :  { %v1404_v24 = vcombine.low %v10130_v21, %v10132_v23  ;;  %v8356_v25 = vpop.f32.mrb[17].mxu1 }
 0xbf0   :  { %v1484_v26 = vpop.f32.mrb[18].mxu1 }
 0xbf1   :  { %v1566_v27 = vmul.f32 0.35355338, %v1484_v26  ;;  %v8361_v28 = vpop.f32.mrb[19].mxu1 }
 0xbf3   :  { %v1568_v29 = vsel %vm884_vm6, %v1566_v27, -inf }
 0xbf4   :  { %1569 = vmax.xlane.f32.xlu0 %v1568_v29  ;;  %v1562_v30 = vpop.f32.mrb[20].mxu1 }
 0xbf5   :  { %v1567_v31 = vmul.f32 0.35355338, %v1562_v30  ;;  %v8366_v32 = vpop.f32.mrb[21].mxu1 }
 0xbf6   :  { %v2096_v32 = vld [vmem:[%s11402_s22 + $0x8] sm:$0xff] }
 0xbf7   :  { %v1571_v33 = vsel %vm884_vm6, %v1567_v31, -inf }
 0xbf8   :  { %1572 = vmax.xlane.f32.xlu1 %v1571_v33 }
 0xc09   :  { %1667 = vrot.lane.b32.xlu1 %v10039_v8, %s11313_s2 }
 0xc0d   :  { %1754 = vrot.lane.b32.xlu1 %v10035_v7, %s11311_s7 }
 0xc11   :  { %1832 = vrot.lane.b32.xlu1 %v10039_v8, %s11311_s7 }
 0xc15   :  { %1830 = vrot.lane.b32.xlu1 %v10039_v8, %s11309_s6 }
 0xc81   :  { %v1570_v34 = vpop.xlane.xlu0 %1569 }
 0xc82   :  { %v1574_v35 = vsub.f32 %v1566_v27, %v1570_v34  ;;  %v2097_v34 = vld [vmem:[%s11402_s22 + $0x10] sm:$0xff] }
 0xc84   :  { %v1576_v36 = vmul.f32 1.442695, %v1574_v35  ;;  %v2098_v35 = vld [vmem:[%s11402_s22 + $0x18] sm:$0xff] }
 0xc85   :  { %v1573_v37 = vpop.xlane.xlu1 %1572 }
 0xc86   :  { %9165 = vpow2.f32 %v1576_v36  ;;  %v1575_v42 = vsub.f32 %v1567_v31, %v1573_v37  ;;  %v2095_v31 = vld [vmem:[%s11402_s22] sm:$0xff]  ;;  %v8807_v37 = vpack.c.bf16 %v2098_v35, %v2097_v34  ;;  %s11416_s22 = sld [smem:[#allocation49_spill]] }
 0xc87   :  { %v8804_v33 = vpack.c.bf16 %v2096_v32, %v2095_v31 }
 0xc88   :  { %v1578_v43 = vmul.f32 1.442695, %v1575_v42 }
 0xc89   :  { %v1668_v38 = vpop.permute.xlu1 %1667 }
 0xc8a   :  { %9167 = vpow2.f32 %v1578_v43 }
 0xc8d   :  { %v1755_v39 = vpop.permute.xlu1 %1754 }
 0xc8e   :  { %8378 = vmatpush3.xpose.msk.msra.mxu0 %vm731_vm5, %v1755_v39 }
 0xc8f   :  { %8387 = vmatprep.subr.mxu0 %v9578_v56 }
 0xc90   :  { %v9166_v40 = vpop.eup %9165 }
 0xc91   :  { %v1580_v41 = vsel %vm884_vm6, %v9166_v40, 0.0  ;;  %v1833_v54 = vpop.permute.xlu1 %1832 }
 0xc92   :  { %1581 = vadd.xlane.f32.xlu0 %v1580_v41 }
 0xc94   :  { %v9168_v45 = vpop.eup %9167 }
 0xc95   :  { %v1583_v46 = vsel %vm884_vm6, %v9168_v45, 0.0  ;;  %v1831_v57 = vpop.permute.xlu1 %1830 }
 0xca8   :  { %1590 = vrot.lane.b32.xlu0 %v10035_v7, %s11313_s2 }
 0xcc7   :  { %1584 = vadd.xlane.f32.xlu0 %v1583_v46 }
 0xcdd   :  { %1752 = vrot.lane.b32.xlu0 %v10035_v7, %s11309_s6 }
 0xd1f   :  { %v1582_v47 = vpop.xlane.xlu0 %1581 }
 0xd20   :  { %9169 = vrcp.f32 %v1582_v47 }
 0xd23   :  { %v1591_v48 = vpop.permute.xlu0 %1590 }
 0xd24   :  { %8368 = vmatpush3.msk.msra.mxu1 %vm913_vm7, %v1591_v48 }
 0xd25   :  { %8372 = vmatprep.subr.mxu1 %v9578_v56 }
 0xd2a   :  { %v9170_v49 = vpop.eup %9169 }
 0xd2b   :  { %v1587_v50 = vmul.f32 %v9170_v49, %v9166_v40 }
 0xd2d   :  { %8370 = vmatmul.mubr.msk.f32.vlgmr.msra.gmra.mrb[22].mxu1 %vm909_vm8, %v1587_v50 }
 0xd2e   :  { %8373 = vmatpush3.msk.msra.mxu1 %vm913_vm7, %v1668_v38  ;;  %8374 = vmatprep.mubr.msk.f32.mxu1 %vm9577_vm4, %v9578_v56 }
 0xd2f   :  { %8382 = vmatprep.subr.mxu1 %v9578_v56 }
 0xd54   :  { %v1585_v51 = vpop.xlane.xlu0 %1584 }
 0xd55   :  { %9171 = vrcp.f32 %v1585_v51 }
 0xd58   :  { %v1753_v52 = vpop.permute.xlu0 %1752 }
 0xd59   :  { %8380 = vmatmul.mubr.msk.f32.vlgmr.msra.gmra.mrb[2].mxu0 %vm731_vm5, %v1753_v52 }
 0xd5a   :  { %8389 = vmatprep.mubr.msk.f32.mxu0 %vm9577_vm4, %v9578_v56 }
 0xd5f   :  { %v9172_v53 = vpop.eup %9171 }
 0xd60   :  { %v1589_v55 = vmul.f32 %v9172_v53, %v9168_v45  ;;  %v7799_v45 = vld [vmem:[%s11403_s23] ss:$0 sm:$0xff]  ;;  %s11417_s23 = sld [smem:[#allocation50_spill]] }
 0xd62   :  { %8375 = vmatmul.mubr.msk.f32.vlgmr.msra.gmra.mrb[24].mxu1 %vm909_vm8, %v1589_v55 }
 0xd63   :  { %8383 = vmatpush3.xpose.msk.msra.mxu1 %vm731_vm5, %v1833_v54  ;;  %8384 = vmatprep.mubr.msk.f32.mxu1 %vm9577_vm4, %v9578_v56 }
 0xd64   :  { %8392 = vmatprep.subr.mxu1 %v9578_v56 }
 0xd66   :  { %8385 = vmatmul.mubr.msk.f32.vlgmr.msra.gmra.mrb[26].mxu1 %vm731_vm5, %v1831_v57  ;;  %v2209_v57 = vld [vmem:[%s11404_s21] sm:$0xff] }
 0xd67   :  { %8394 = vmatprep.mubr.msk.f32.mxu1 %vm9577_vm4, %v9578_v56 }
 0xe00   :  { %v1663_v58 = vpop.f32.mrb[22].mxu1 }
 0xe01   :  { %v8371_v59 = vpop.f32.mrb[23].mxu1 }
 0xe2c   :  { %v1826_v60 = vpop.f32.mrb[2].mxu0 }
 0xe2d   :  { %v1908_v61 = vmul.f32 0.35355338, %v1826_v60  ;;  %v8381_v62 = vpop.f32.mrb[3].mxu0  ;;  %v2212_v60 = vld [vmem:[%s11404_s21 + $0x18] sm:$0xff] }
 0xe2f   :  { %v1910_v3 = vsel %vm884_vm6, %v1908_v61, -inf }
 0xe30   :  { %1911 = vmax.xlane.f32.xlu0 %v1910_v3 }
 0xe35   :  { %v1740_v4 = vpop.f32.mrb[24].mxu1 }
 0xe36   :  { %v1746_v5 = vcombine.low %v1663_v58, %v1740_v4  ;;  %v8376_v6 = vpop.f32.mrb[25].mxu1  ;;  %v2210_v58 = vld [vmem:[%s11404_s21 + $0x8] sm:$0xff] }
 0xe37   :  { %v8810_v59 = vpack.c.bf16 %v2210_v58, %v2209_v57  ;;  %v7801_v6 = vld [vmem:[%s11405_s25] ss:$0 sm:$0xff]  ;;  %s11419_s25 = sld [smem:[#allocation55_spill]] }
 0xe39   :  { %v1904_v9 = vpop.f32.mrb[26].mxu1 }
 0xe3a   :  { %v1909_v10 = vmul.f32 0.35355338, %v1904_v9  ;;  %v8386_v11 = vpop.f32.mrb[27].mxu1 }
 0xe3c   :  { %v1913_v12 = vsel %vm884_vm6, %v1909_v10, -inf }
 0xe3d   :  { %1914 = vmax.xlane.f32.xlu1 %v1913_v12 }
 0xe4e   :  { %2009 = vrot.lane.b32.xlu1 %v10039_v8, %s11307_s5 }
 0xe52   :  { %1405 = vrot.lane.b32.xlu1 %v1404_v24, %s11305_s9 }
 0xe56   :  { %1747 = vrot.lane.b32.xlu1 %v1746_v5, %s11303_s18 }
 0xebd   :  { %v1912_v0 = vpop.xlane.xlu0 %1911 }
 0xebe   :  { %v1916_v13 = vsub.f32 %v1908_v61, %v1912_v0  ;;  %v2320_v0 = vld [vmem:[%s11407_s3] sm:$0xff] }
 0xec0   :  { %v1918_v14 = vmul.f32 1.442695, %v1916_v13  ;;  %v2321_v13 = vld [vmem:[%s11407_s3 + $0x8] sm:$0xff] }
 0xec2   :  { %9173 = vpow2.f32 %v1918_v14  ;;  %v8816_v14 = vpack.c.bf16 %v2321_v13, %v2320_v0 }
 0xeca   :  { %v1915_v15 = vpop.xlane.xlu1 %1914 }
 0xecb   :  { %v1917_v16 = vsub.f32 %v1909_v10, %v1915_v15  ;;  %v7802_v10 = vld [vmem:[%s11406_s29] ss:$0 sm:$0xff]  ;;  %v2322_v15 = vld [vmem:[%s11407_s3 + $0x10] sm:$0xff]  ;;  %s11420_s29 = sld [smem:[#allocation52_spill]] }
 0xecc   :  { %v9174_v18 = vpop.eup %9173 }
 0xecd   :  { %v1920_v19 = vmul.f32 1.442695, %v1917_v16  ;;  %v1922_v20 = vsel %vm884_vm6, %v9174_v18, 0.0  ;;  %v2323_v16 = vld [vmem:[%s11407_s3 + $0x18] sm:$0xff] }
 0xece   :  { %1923 = vadd.xlane.f32.xlu0 %v1922_v20  ;;  %v2010_v8 = vpop.permute.xlu1 %2009  ;;  %v2325_v20 = vld [vmem:[%s11407_s3 + $0x28] sm:$0xff] }
 0xecf   :  { %9175 = vpow2.f32 %v1920_v19  ;;  %8393 = vmatpush3.msk.msra.mxu1 %vm913_vm7, %v2010_v8  ;;  %v2324_v19 = vld [vmem:[%s11407_s3 + $0x20] sm:$0xff] }
 0xed0   :  { %8809 = vmatprep.subr.bf16.mxu1 %v9576_v17  ;;  %v8822_v8 = vpack.c.bf16 %v2325_v20, %v2324_v19  ;;  %v7808_v19 = vld [vmem:[%s11412_s28] ss:$0 sm:$0xff]  ;;  %s10483_s28 = sld [smem:[#allocation8]] }
 0xed2   :  { %v1406_v21 = vpop.permute.xlu1 %1405 }
 0xed3   :  { %1409 = vst.msk [vmem:[#allocation5] sm:$0xff] %vm1408_vm9, %v1406_v21  ;;  %v2326_v21 = vld [vmem:[%s11407_s3 + $0x30] sm:$0xff] }
 0xed6   :  { %v1748_v22 = vpop.permute.xlu1 %1747 }
 0xed7   :  { %1751 = vst.msk [vmem:[#allocation5] sm:$0xff] %vm1750_vm10, %v1748_v22  ;;  %v2327_v22 = vld [vmem:[%s11407_s3 + $0x38] sm:$0xff]  ;;  %s11421_s3 = sld [smem:[#allocation54_spill]] }
 0xed9   :  { %v9176_v23 = vpop.eup %9175 }
 0xeda   :  { %v1925_v24 = vsel %vm884_vm6, %v9176_v23, 0.0 }
 0xedb   :  { %1926 = vadd.xlane.f32.xlu0 %v1925_v24  ;;  %v7803_v24 = vld [vmem:[%s11408_s19] ss:$0 sm:$0xff]  ;;  %s11422_s19 = sld [smem:[#allocation58_spill]] }
 0xef1   :  { %1932 = vrot.lane.b32.xlu0 %v10035_v7, %s11307_s5 }
 0xf5b   :  { %v1924_v25 = vpop.xlane.xlu0 %1923 }
 0xf5c   :  { %9177 = vrcp.f32 %v1924_v25 }
 0xf66   :  { %v9178_v27 = vpop.eup %9177 }
 0xf67   :  { %v1929_v29 = vmul.f32 %v9178_v27, %v9174_v18  ;;  %v8819_v18 = vpack.c.bf16 %v2323_v16, %v2322_v15  ;;  %v7807_v16 = vld [vmem:[%s11411_s12] ss:$0 sm:$0xff]  ;;  %s10481_s12 = sld [smem:[#allocation8 + $0x3]] }
 0xf68   :  { %v1927_v26 = vpop.xlane.xlu0 %1926 }
 0xf69   :  { %9179 = vrcp.f32 %v1927_v26 }
 0xf6c   :  { %v1933_v28 = vpop.permute.xlu0 %1932 }
 0xf6d   :  { %8388 = vmatpush3.msk.msra.mxu0 %vm913_vm7, %v1933_v28 }
 0xf6e   :  { %8390 = vmatmul.mubr.msk.f32.vlgmr.msra.gmra.mrb[4].mxu0 %vm909_vm8, %v1929_v29  ;;  %8803 = vmatprep.subr.bf16.mxu0 %v9576_v17 }
 0xf6f   :  { %8405 = vmatprep.mubr.msk.f32.mxu0 %vm9577_vm4, %v9578_v56  ;;  %8805 = vmatpush3.bf16.msra.mxu0 %v8804_v33 }
 0xf70   :  { %8806 = vmatprep.subr.bf16.mxu0 %v9576_v17 }
 0xf73   :  { %v9180_v7 = vpop.eup %9179  ;;  %8808 = vmatpush3.bf16.msra.mxu0 %v8807_v37 }
 0xf74   :  { %v1931_v30 = vmul.f32 %v9180_v7, %v9176_v23  ;;  %8815 = vmatprep.subr.bf16.mxu0 %v9576_v17  ;;  %v8825_v23 = vpack.c.bf16 %v2327_v22, %v2326_v21 }
 0xf76   :  { %8395 = vmatmul.mubr.msk.f32.vlgmr.msra.gmra.mrb[28].mxu1 %vm909_vm8, %v1931_v30 }
 0xf77   :  { %8416 = vmatprep.mubr.msk.f32.mxu1 %vm9577_vm4, %v9578_v56  ;;  %8811 = vmatpush3.bf16.msra.mxu1 %v8810_v59 }
 0xf78   :  { %8812 = vmatprep.subr.bf16.mxu1 %v9576_v17 }
0x1041   :  { %v2005_v36 = vpop.f32.mrb[4].mxu0 }
0x1042   :  { %v8391_v38 = vpop.f32.mrb[5].mxu0 }
0x1049   :  { %v2082_v39 = vpop.f32.mrb[28].mxu1 }
0x104a   :  { %v2088_v40 = vcombine.low %v2005_v36, %v2082_v39  ;;  %v8396_v41 = vpop.f32.mrb[29].mxu1 }
0x104c   :  { %2089 = vrot.lane.b32.xlu0 %v2088_v40, %s11301_s26 }
0x10be   :  { %v2090_v42 = vpop.permute.xlu0 %2089 }
0x10bf   :  { %2093 = vst.msk [vmem:[#allocation5] sm:$0xff] %vm2092_vm11, %v2090_v42 }
0x10c6   :  { %v2094_v43 = vld [vmem:[#allocation5] sm:$0xff] }
0x10c7   :  { %8406 = vmatmul.mubr.msk.f32.vlgmr.msra.gmra.mrb[6].mxu0 %vm590_vm2, %v2094_v43 }
0x10c8   :  { %8435 = vmatprep.mubr.msk.f32.mxu0 %vm9577_vm4, %v9578_v56  ;;  %8817 = vmatpush3.bf16.msra.mxu0 %v8816_v14 }
0x10c9   :  { %8818 = vmatprep.subr.bf16.mxu0 %v9576_v17 }
0x10cc   :  { %8820 = vmatpush3.bf16.msra.mxu0 %v8819_v18 }
0x10cd   :  { %8821 = vmatprep.subr.bf16.mxu0 %v9576_v17 }
0x10d0   :  { %8823 = vmatpush3.bf16.msra.mxu0 %v8822_v8 }
0x10d1   :  { %8824 = vmatprep.subr.bf16.mxu0 %v9576_v17 }
0x10d4   :  { %8826 = vmatpush3.bf16.msra.mxu0 %v8825_v23 }
0x10d5   :  { %8459 = vmatprep.subr.mxu0 %v9578_v56 }
0x119a   :  { %v2175_v46 = vpop.f32.mrb[6].mxu0 }
0x119b   :  { %v2176_v47 = vadd.f32 %v7799_v45, %v2175_v46  ;;  %v8407_v48 = vpop.f32.mrb[7].mxu0 }
0x119c   :  { %v9593_v48 = vmov -1.0  }
0x119d   :  { %v10210_v49 = vadd.f32 %v2176_v47, %v10013_v44  ;;  %v2211_v44 = vld [vmem:[%s11404_s21 + $0x10] sm:$0xff]  ;;  %s11418_s21 = sld [smem:[#allocation53_spill]] }
0x119e   :  { %v8813_v61 = vpack.c.bf16 %v2212_v60, %v2211_v44 }
0x119f   :  { %v2182_v50 = vsel %vm590_vm2, %v10210_v49, 0.0 }
0x11a0   :  { %2183 = vadd.xlane.f32.xlu1 %v2182_v50  ;;  %8814 = vmatpush3.bf16.msra.mxu1 %v8813_v61 }
0x11a1   :  { %8827 = vmatprep.subr.bf16.mxu1 %v9576_v17 }
0x122d   :  { %v2184_v51 = vpop.xlane.xlu1 %2183 }
0x122e   :  { %v2185_v52 = vmul.f32 0.03125, %v2184_v51 }
0x1230   :  { %v2186_v53 = vsub.f32 %v10210_v49, %v2185_v52 }
0x1232   :  { %v2187_v54 = vmul.f32 %v2186_v53, %v2186_v53 }
0x1234   :  { %v2188_v55 = vsel %vm590_vm2, %v2187_v54, 0.0 }
0x1235   :  { %2189 = vadd.xlane.f32.xlu0 %v2188_v55  ;;  %v7805_v55 = vld [vmem:[%s11409_s4] ss:$0 sm:$0xff]  ;;  %s10477_s4 = sld [smem:[#allocation8 + $0x1]] }
0x12c2   :  { %v2190_v62 = vpop.xlane.xlu0 %2189 }
0x12c3   :  { %v2191_v3 = vmul.f32 0.03125, %v2190_v62 }
0x12c5   :  { %v2192_v4 = vadd.f32 1e-05, %v2191_v3 }
0x12c7   :  { %9181 = vrsqrt.f32 %v2192_v4 }
0x12d1   :  { %v9182_v5 = vpop.eup %9181 }
0x12d2   :  { %v2194_v9 = vmul.f32 %v9182_v5, %v2186_v53 }
0x12d4   :  { %v2201_v11 = vmul.f32 %v7801_v6, %v2194_v9  ;;  %v2438_v6 = vld [vmem:[%s11410_s24] sm:$0xff]  ;;  %v2439_v9 = vld [vmem:[%s11410_s24 + $0x8] sm:$0xff] }
0x12d6   :  { %v2208_v12 = vadd.f32 %v7802_v10, %v2201_v11  ;;  %v8828_v10 = vpack.c.bf16 %v2439_v9, %v2438_v6  ;;  %v2441_v11 = vld [vmem:[%s11410_s24 + $0x18] sm:$0xff] }
0x12d8   :  { %8417 = vmatmul.mubr.msk.f32.vlgmr.msra.gmra.mrb[30].mxu1 %vm590_vm2, %v2208_v12 }
0x12d9   :  { %8446 = vmatprep.mubr.msk.f32.mxu1 %vm9577_vm4, %v9578_v56  ;;  %8829 = vmatpush3.bf16.msra.mxu1 %v8828_v10 }
0x12da   :  { %8830 = vmatprep.subr.bf16.mxu1 %v9576_v17 }
0x13ab   :  { %v2289_v25 = vpop.f32.mrb[30].mxu1 }
0x13ac   :  { %v2290_v26 = vadd.f32 %v7803_v24, %v2289_v25  ;;  %v8418_v27 = vpop.f32.mrb[31].mxu1 }
0x13ae   :  { %v2294_v28 = vmul.f32 0.70710677, %v2290_v26  ;;  %v2293_v52 = vmul.f32 0.5, %v2290_v26 }
0x13b0   :  { %v2297_v29 = vand.u32 2147483647, %v2294_v28  ;;  %vm2295_vm12 = vcmp.ge.f32.partialorder %v2294_v28, 0.0 }
0x13b1   :  { %v2296_v50 = vsel %vm2295_vm12, 1.0, %v9593_v48  ;;  %vm4569_vm12 = vcmask 195591  }
0x13b2   :  { %v2298_v7 = vmul.f32 0.3275911, %v2297_v29  ;;  %v2311_v31 = vsub.f32 0.0, %v2297_v29 }
0x13b4   :  { %v2299_v30 = vadd.f32 1.0, %v2298_v7  ;;  %v2312_v33 = vmul.f32 %v2311_v31, %v2297_v29 }
0x13b6   :  { %9183 = vrcp.f32 %v2299_v30  ;;  %v2313_v36 = vmul.f32 1.442695, %v2312_v33 }
0x13b8   :  { %9185 = vpow2.f32 %v2313_v36 }
0x13c0   :  { %v9184_v32 = vpop.eup %9183 }
0x13c1   :  { %v2302_v34 = vmul.f32 1.0614054, %v9184_v32 }
0x13c2   :  { %v9186_v45 = vpop.eup %9185 }
0x13c3   :  { %v2303_v35 = vadd.f32 -1.4531521, %v2302_v34 }
0x13c5   :  { %v2304_v37 = vmul.f32 %v9184_v32, %v2303_v35 }
0x13c7   :  { %v2305_v38 = vadd.f32 1.4214138, %v2304_v37 }
0x13c9   :  { %v2306_v39 = vmul.f32 %v9184_v32, %v2305_v38 }
0x13cb   :  { %v2307_v40 = vadd.f32 -0.28449672, %v2306_v39 }
0x13cd   :  { %v2308_v41 = vmul.f32 %v9184_v32, %v2307_v40 }
0x13cf   :  { %v2309_v42 = vadd.f32 0.2548296, %v2308_v41 }
0x13d1   :  { %v2310_v43 = vmul.f32 %v9184_v32, %v2309_v42 }
0x13d3   :  { %v2315_v46 = vmul.f32 %v9186_v45, %v2310_v43 }
0x13d5   :  { %v2316_v47 = vsub.f32 1.0, %v2315_v46 }
0x13d7   :  { %v2317_v51 = vmul.f32 %v2316_v47, %v2296_v50 }
0x13d9   :  { %v2318_v53 = vadd.f32 1.0, %v2317_v51 }
0x13db   :  { %v2319_v54 = vmul.f32 %v2318_v53, %v2293_v52 }
0x13dd   :  { %8436 = vmatmul.mubr.msk.f32.vlgmr.msra.gmra.mrb[8].mxu0 %vm438_vm1, %v2319_v54 }
0x13de   :  { %8461 = vmatprep.mubr.msk.f32.mxu0 %vm9577_vm4, %v9578_v56 }
0x14b0   :  { %v2404_v57 = vpop.f32.mrb[8].mxu0 }
0x14b1   :  { %v2405_v58 = vadd.f32 %v7805_v55, %v2404_v57  ;;  %v8437_v59 = vpop.f32.mrb[9].mxu0 }
0x14b3   :  { %v10246_v44 = vadd.f32 %v2405_v58, %v10210_v49  ;;  %v2440_v49 = vld [vmem:[%s11410_s24 + $0x10] sm:$0xff]  ;;  %s10479_s24 = sld [smem:[#allocation8 + $0x2]] }
0x14b4   :  { %v8831_v12 = vpack.c.bf16 %v2441_v11, %v2440_v49 }
0x14b5   :  { %v2411_v60 = vsel %vm590_vm2, %v10246_v44, 0.0 }
0x14b6   :  { %2412 = vadd.xlane.f32.xlu0 %v2411_v60  ;;  %8832 = vmatpush3.bf16.msra.mxu1 %v8831_v12 }
0x14b7   :  { %8449 = vmatprep.subr.mxu1 %v9578_v56 }
0x1543   :  { %v2413_v61 = vpop.xlane.xlu0 %2412 }
0x1544   :  { %v2414_v62 = vmul.f32 0.03125, %v2413_v61 }
0x1546   :  { %v2415_v3 = vsub.f32 %v10246_v44, %v2414_v62 }
0x1548   :  { %v2416_v4 = vmul.f32 %v2415_v3, %v2415_v3 }
0x154a   :  { %v2417_v5 = vsel %vm590_vm2, %v2416_v4, 0.0 }
0x154b   :  { %2418 = vadd.xlane.f32.xlu0 %v2417_v5 }
0x15d8   :  { %v2419_v0 = vpop.xlane.xlu0 %2418 }
0x15d9   :  { %v2420_v13 = vmul.f32 0.03125, %v2419_v0 }
0x15db   :  { %v2421_v14 = vadd.f32 1e-05, %v2420_v13 }
0x15dd   :  { %9187 = vrsqrt.f32 %v2421_v14 }
0x15e7   :  { %v9188_v15 = vpop.eup %9187 }
0x15e8   :  { %v2423_v18 = vmul.f32 %v9188_v15, %v2415_v3 }
0x15ea   :  { %v2430_v20 = vmul.f32 %v7807_v16, %v2423_v18 }
0x15ec   :  { %v2437_v8 = vadd.f32 %v7808_v19, %v2430_v20 }
0x15ee   :  { %8447 = vmatmul.mubr.msk.f32.vlgmr.msra.gmra.mrb[32].mxu1 %vm590_vm2, %v2437_v8 }
0x15ef   :  { %8451 = vmatprep.mubr.msk.f32.mxu1 %vm9577_vm4, %v9578_v56 }
0x16c1   :  { %v10263_v21 = vpop.f32.mrb[32].mxu1 }
0x16c2   :  { %v10267_v22 = vcombine.high %v10263_v21, %v10263_v21  ;;  %2517 = vrot.lane.b32.xlu1 %v10263_v21, %s11327_s10  ;;  %v8448_v23 = vpop.f32.mrb[33].mxu1 }
0x16c4   :  { %2593 = vrot.lane.b32.xlu0 %v10267_v22, %s11327_s10  ;;  %s10526_s10 = sld [smem:[#allocation12 + $0x8]] }
0x16ca   :  { %11431 = sst [smem:[#allocation72_spill]] %s10526_s10 }
0x1734   :  { %v2518_v24 = vpop.permute.xlu1 %2517 }
0x1735   :  { %8450 = vmatpush3.xpose.msk.msra.mxu1 %vm731_vm5, %v2518_v24 }
0x1736   :  { %8454 = vmatprep.subr.mxu1 %v9578_v56  ;;  %v2594_v25 = vpop.permute.xlu0 %2593 }
0x1738   :  { %8452 = vmatmul.mubr.msk.f32.vlgmr.msra.gmra.mrb[34].mxu1 %vm731_vm5, %v10263_v21 }
0x1739   :  { %8455 = vmatpush3.xpose.msk.msra.mxu1 %vm731_vm5, %v2594_v25  ;;  %8456 = vmatprep.mubr.msk.f32.mxu1 %vm9577_vm4, %v9578_v56 }
0x173a   :  { %8464 = vmatprep.subr.mxu1 %v9578_v56 }
0x173c   :  { %8457 = vmatmul.mubr.msk.f32.vlgmr.msra.gmra.mrb[36].mxu1 %vm731_vm5, %v10267_v22 }
0x173d   :  { %8466 = vmatprep.mubr.msk.f32.mxu1 %vm9577_vm4, %v9578_v56 }
0x180b   :  { %v2589_v26 = vpop.f32.mrb[34].mxu1 }
0x180c   :  { %v2669_v27 = vmul.f32 0.35355338, %v2589_v26  ;;  %v8453_v28 = vpop.f32.mrb[35].mxu1 }
0x180e   :  { %v2671_v29 = vsel %vm884_vm6, %v2669_v27, -inf }
0x180f   :  { %2672 = vmax.xlane.f32.xlu1 %v2671_v29  ;;  %v2665_v7 = vpop.f32.mrb[36].mxu1 }
0x1810   :  { %v2670_v30 = vmul.f32 0.35355338, %v2665_v7  ;;  %v8458_v31 = vpop.f32.mrb[37].mxu1 }
0x1812   :  { %v2674_v32 = vsel %vm884_vm6, %v2670_v30, -inf }
0x1813   :  { %2675 = vmax.xlane.f32.xlu0 %v2674_v32 }
0x1820   :  { %2693 = vrot.lane.b32.xlu1 %v10263_v21, %s11325_s11 }
0x1824   :  { %2854 = vrot.lane.b32.xlu1 %v10263_v21, %s11323_s15 }
0x1828   :  { %2932 = vrot.lane.b32.xlu1 %v10267_v22, %s11323_s15  ;;  %s10524_s15 = sld [smem:[#allocation12 + $0x7]] }
0x1829   :  { %2770 = vrot.lane.b32.xlu0 %v10267_v22, %s11325_s11  ;;  %s11430_s11 = sld [smem:[#allocation57_spill]] }
0x182e   :  { %11429 = sst [smem:[#allocation71_spill]] %s10524_s15 }
0x189c   :  { %v2673_v33 = vpop.xlane.xlu1 %2672 }
0x189d   :  { %v2677_v34 = vsub.f32 %v2669_v27, %v2673_v33 }
0x189f   :  { %v2679_v35 = vmul.f32 1.442695, %v2677_v34 }
0x18a0   :  { %v2694_v36 = vpop.permute.xlu1 %2693  ;;  %v2676_v37 = vpop.xlane.xlu0 %2675 }
0x18a1   :  { %9189 = vpow2.f32 %v2679_v35  ;;  %v2678_v38 = vsub.f32 %v2670_v30, %v2676_v37  ;;  %8460 = vmatpush3.msk.msra.mxu0 %vm913_vm7, %v2694_v36 }
0x18a2   :  { %8469 = vmatprep.subr.mxu0 %v9578_v56 }
0x18a3   :  { %v2681_v39 = vmul.f32 1.442695, %v2678_v38 }
0x18a4   :  { %v2771_v40 = vpop.permute.xlu0 %2770  ;;  %v2855_v46 = vpop.permute.xlu1 %2854 }
0x18a5   :  { %9191 = vpow2.f32 %v2681_v39  ;;  %8465 = vmatpush3.msk.msra.mxu1 %vm913_vm7, %v2771_v40 }
0x18a6   :  { %8474 = vmatprep.subr.mxu1 %v9578_v56 }
0x18a8   :  { %v2933_v47 = vpop.permute.xlu1 %2932 }
0x18ab   :  { %v9190_v41 = vpop.eup %9189 }
0x18ac   :  { %v2683_v42 = vsel %vm884_vm6, %v9190_v41, 0.0 }
0x18ad   :  { %2684 = vadd.xlane.f32.xlu1 %v2683_v42 }
0x18af   :  { %v9192_v43 = vpop.eup %9191 }
0x18b0   :  { %v2686_v45 = vsel %vm884_vm6, %v9192_v43, 0.0 }
0x18b1   :  { %2687 = vadd.xlane.f32.xlu0 %v2686_v45 }
0x18be   :  { %2852 = vrot.lane.b32.xlu1 %v10263_v21, %s11321_s16 }
0x18c7   :  { %2930 = vrot.lane.b32.xlu0 %v10267_v22, %s11321_s16  ;;  %s10522_s16 = sld [smem:[#allocation12 + $0x6]] }
0x18cd   :  { %11428 = sst [smem:[#allocation70_spill]] %s10522_s16 }
0x193a   :  { %v2685_v50 = vpop.xlane.xlu1 %2684 }
0x193b   :  { %9193 = vrcp.f32 %v2685_v50 }
0x193e   :  { %v2688_v51 = vpop.xlane.xlu0 %2687  ;;  %v2853_v57 = vpop.permute.xlu1 %2852 }
0x193f   :  { %9195 = vrcp.f32 %v2688_v51 }
0x1942   :  { %v2931_v58 = vpop.permute.xlu0 %2930 }
0x1945   :  { %v9194_v52 = vpop.eup %9193 }
0x1946   :  { %v2690_v53 = vmul.f32 %v9194_v52, %v9190_v41 }
0x1948   :  { %8462 = vmatmul.mubr.msk.f32.vlgmr.msra.gmra.mrb[10].mxu0 %vm909_vm8, %v2690_v53 }
0x1949   :  { %v9196_v54 = vpop.eup %9195  ;;  %8470 = vmatpush3.xpose.msk.msra.mxu0 %vm731_vm5, %v2855_v46  ;;  %8471 = vmatprep.mubr.msk.f32.mxu0 %vm9577_vm4, %v9578_v56 }
0x194a   :  { %v2692_v55 = vmul.f32 %v9196_v54, %v9192_v43  ;;  %8479 = vmatprep.subr.mxu0 %v9578_v56 }
0x194c   :  { %8467 = vmatmul.mubr.msk.f32.vlgmr.msra.gmra.mrb[38].mxu1 %vm909_vm8, %v2692_v55  ;;  %8472 = vmatmul.mubr.msk.f32.vlgmr.msra.gmra.mrb[12].mxu0 %vm731_vm5, %v2853_v57 }
0x194d   :  { %8475 = vmatpush3.xpose.msk.msra.mxu1 %vm731_vm5, %v2933_v47  ;;  %8476 = vmatprep.mubr.msk.f32.mxu1 %vm9577_vm4, %v9578_v56 }
0x194e   :  { %8484 = vmatprep.subr.mxu1 %v9578_v56  ;;  %8481 = vmatprep.mubr.msk.f32.mxu0 %vm9577_vm4, %v9578_v56 }
0x1950   :  { %8477 = vmatmul.mubr.msk.f32.vlgmr.msra.gmra.mrb[40].mxu1 %vm731_vm5, %v2931_v58 }
0x1951   :  { %8486 = vmatprep.mubr.msk.f32.mxu1 %vm9577_vm4, %v9578_v56 }
0x1a1b   :  { %v2766_v59 = vpop.f32.mrb[10].mxu0 }
0x1a1c   :  { %v8463_v60 = vpop.f32.mrb[11].mxu0 }
0x1a1f   :  { %v2843_v61 = vpop.f32.mrb[38].mxu1  ;;  %v2926_v62 = vpop.f32.mrb[12].mxu0 }
0x1a20   :  { %v2849_v3 = vcombine.low %v2766_v59, %v2843_v61  ;;  %v3008_v4 = vmul.f32 0.35355338, %v2926_v62  ;;  %v8468_v5 = vpop.f32.mrb[39].mxu1  ;;  %v8473_v6 = vpop.f32.mrb[13].mxu0 }
0x1a22   :  { %2851 = vst.msk [vmem:[#allocation5] sm:$0xff] %vm731_vm5, %v2849_v3  ;;  %v3010_v9 = vsel %vm884_vm6, %v3008_v4, -inf }
0x1a23   :  { %3011 = vmax.xlane.f32.xlu1 %v3010_v9  ;;  %v3004_v10 = vpop.f32.mrb[40].mxu1 }
0x1a24   :  { %v3009_v49 = vmul.f32 0.35355338, %v3004_v10  ;;  %v8478_v11 = vpop.f32.mrb[41].mxu1 }
0x1a26   :  { %v3013_v12 = vsel %vm884_vm6, %v3009_v49, -inf }
0x1a27   :  { %3014 = vmax.xlane.f32.xlu0 %v3013_v12 }
0x1a34   :  { %3032 = vrot.lane.b32.xlu1 %v10263_v21, %s11319_s0 }
0x1a38   :  { %3195 = vrot.lane.b32.xlu1 %v10263_v21, %s11317_s27 }
0x1a3c   :  { %3273 = vrot.lane.b32.xlu1 %v10267_v22, %s11317_s27  ;;  %s10517_s27 = sld [smem:[#allocation12 + $0x4]] }
0x1a3d   :  { %3109 = vrot.lane.b32.xlu0 %v10267_v22, %s11319_s0  ;;  %s10519_s0 = sld [smem:[#allocation12 + $0x5]] }
0x1a40   :  { %3193 = vrot.lane.b32.xlu1 %v10263_v21, %s11315_s1 }
0x1a42   :  { %11426 = sst [smem:[#allocation68_spill]] %s10517_s27 }
0x1a43   :  { %11427 = sst [smem:[#allocation69_spill]] %s10519_s0 }
0x1ab0   :  { %v3012_v0 = vpop.xlane.xlu1 %3011 }
0x1ab1   :  { %v3016_v13 = vsub.f32 %v3008_v4, %v3012_v0 }
0x1ab3   :  { %v3018_v14 = vmul.f32 1.442695, %v3016_v13 }
0x1ab4   :  { %v3033_v15 = vpop.permute.xlu1 %3032  ;;  %v3015_v16 = vpop.xlane.xlu0 %3014 }
0x1ab5   :  { %9197 = vpow2.f32 %v3018_v14  ;;  %v3017_v18 = vsub.f32 %v3009_v49, %v3015_v16  ;;  %8480 = vmatpush3.msk.msra.mxu0 %vm913_vm7, %v3033_v15 }
0x1ab6   :  { %8489 = vmatprep.subr.mxu0 %v9578_v56 }
0x1ab7   :  { %v3020_v19 = vmul.f32 1.442695, %v3017_v18 }
0x1ab8   :  { %v3110_v20 = vpop.permute.xlu0 %3109  ;;  %v3196_v28 = vpop.permute.xlu1 %3195 }
0x1ab9   :  { %9199 = vpow2.f32 %v3020_v19  ;;  %8485 = vmatpush3.msk.msra.mxu1 %vm913_vm7, %v3110_v20 }
0x1aba   :  { %8494 = vmatprep.subr.mxu1 %v9578_v56 }
0x1abc   :  { %v3274_v7 = vpop.permute.xlu1 %3273 }
0x1abf   :  { %v9198_v8 = vpop.eup %9197 }
0x1ac0   :  { %v3022_v23 = vsel %vm884_vm6, %v9198_v8, 0.0  ;;  %v3194_v33 = vpop.permute.xlu1 %3193 }
0x1ac1   :  { %3023 = vadd.xlane.f32.xlu0 %v3022_v23 }
0x1ac3   :  { %v9200_v24 = vpop.eup %9199 }
0x1ac4   :  { %v3025_v25 = vsel %vm884_vm6, %v9200_v24, 0.0 }
0x1ac5   :  { %3026 = vadd.xlane.f32.xlu0 %v3025_v25 }
0x1adb   :  { %3271 = vrot.lane.b32.xlu0 %v10267_v22, %s11315_s1  ;;  %s10515_s1 = sld [smem:[#allocation12 + $0x3]] }
0x1ae1   :  { %11425 = sst [smem:[#allocation67_spill]] %s10515_s1 }
0x1b4e   :  { %v3024_v26 = vpop.xlane.xlu0 %3023 }
0x1b4f   :  { %9201 = vrcp.f32 %v3024_v26 }
0x1b52   :  { %v3027_v27 = vpop.xlane.xlu0 %3026 }
0x1b53   :  { %9203 = vrcp.f32 %v3027_v27 }
0x1b56   :  { %v3272_v34 = vpop.permute.xlu0 %3271 }
0x1b59   :  { %v9202_v29 = vpop.eup %9201 }
0x1b5a   :  { %v3029_v30 = vmul.f32 %v9202_v29, %v9198_v8 }
0x1b5c   :  { %8482 = vmatmul.mubr.msk.f32.vlgmr.msra.gmra.mrb[14].mxu0 %vm909_vm8, %v3029_v30 }
0x1b5d   :  { %v9204_v31 = vpop.eup %9203  ;;  %8490 = vmatpush3.xpose.msk.msra.mxu0 %vm731_vm5, %v3196_v28  ;;  %8491 = vmatprep.mubr.msk.f32.mxu0 %vm9577_vm4, %v9578_v56 }
0x1b5e   :  { %v3031_v32 = vmul.f32 %v9204_v31, %v9200_v24  ;;  %8499 = vmatprep.subr.mxu0 %v9578_v56 }
0x1b60   :  { %8487 = vmatmul.mubr.msk.f32.vlgmr.msra.gmra.mrb[42].mxu1 %vm909_vm8, %v3031_v32  ;;  %8492 = vmatmul.mubr.msk.f32.vlgmr.msra.gmra.mrb[16].mxu0 %vm731_vm5, %v3194_v33 }
0x1b61   :  { %8495 = vmatpush3.xpose.msk.msra.mxu1 %vm731_vm5, %v3274_v7  ;;  %8496 = vmatprep.mubr.msk.f32.mxu1 %vm9577_vm4, %v9578_v56 }
0x1b62   :  { %8504 = vmatprep.subr.mxu1 %v9578_v56  ;;  %8501 = vmatprep.mubr.msk.f32.mxu0 %vm9577_vm4, %v9578_v56 }
0x1b64   :  { %8497 = vmatmul.mubr.msk.f32.vlgmr.msra.gmra.mrb[44].mxu1 %vm731_vm5, %v3272_v34 }
0x1b65   :  { %8506 = vmatprep.mubr.msk.f32.mxu1 %vm9577_vm4, %v9578_v56 }
0x1c2f   :  { %v10358_v35 = vpop.f32.mrb[14].mxu0 }
0x1c30   :  { %v8483_v36 = vpop.f32.mrb[15].mxu0 }
0x1c33   :  { %v10360_v37 = vpop.f32.mrb[42].mxu1  ;;  %v3267_v38 = vpop.f32.mrb[16].mxu0 }
0x1c34   :  { %v3188_v39 = vcombine.low %v10358_v35, %v10360_v37  ;;  %v3349_v40 = vmul.f32 0.35355338, %v3267_v38  ;;  %v8488_v41 = vpop.f32.mrb[43].mxu1  ;;  %v8493_v42 = vpop.f32.mrb[17].mxu0 }
0x1c36   :  { %v3351_v43 = vsel %vm884_vm6, %v3349_v40, -inf }
0x1c37   :  { %3352 = vmax.xlane.f32.xlu1 %v3351_v43  ;;  %v3345_v45 = vpop.f32.mrb[44].mxu1 }
0x1c38   :  { %v3350_v46 = vmul.f32 0.35355338, %v3345_v45  ;;  %v8498_v47 = vpop.f32.mrb[45].mxu1 }
0x1c39   :  { %v3876_v47 = vld [vmem:[%s11413_s30] sm:$0xff] }
0x1c3a   :  { %v3354_v50 = vsel %vm884_vm6, %v3350_v46, -inf }
0x1c3b   :  { %3355 = vmax.xlane.f32.xlu0 %v3354_v50  ;;  %v3877_v50 = vld [vmem:[%s11413_s30 + $0x8] sm:$0xff] }
0x1c48   :  { %3373 = vrot.lane.b32.xlu1 %v10263_v21, %s11313_s2 }
0x1c4c   :  { %3536 = vrot.lane.b32.xlu1 %v10263_v21, %s11311_s7 }
0x1c50   :  { %3614 = vrot.lane.b32.xlu1 %v10267_v22, %s11311_s7  ;;  %s10511_s7 = sld [smem:[#allocation12 + $0x1]] }
0x1c51   :  { %3450 = vrot.lane.b32.xlu0 %v10267_v22, %s11313_s2  ;;  %s10513_s2 = sld [smem:[#allocation12 + $0x2]] }
0x1c54   :  { %3534 = vrot.lane.b32.xlu1 %v10263_v21, %s11309_s6 }
0x1c57   :  { %11424 = sst [smem:[#allocation66_spill]] %s10513_s2 }
0x1cc4   :  { %v3353_v51 = vpop.xlane.xlu1 %3352 }
0x1cc5   :  { %v3357_v52 = vsub.f32 %v3349_v40, %v3353_v51  ;;  %v8834_v51 = vpack.c.bf16 %v3877_v50, %v3876_v47 }
0x1cc7   :  { %v3359_v53 = vmul.f32 1.442695, %v3357_v52  ;;  %v3878_v52 = vld [vmem:[%s11413_s30 + $0x10] sm:$0xff] }
0x1cc8   :  { %v3374_v54 = vpop.permute.xlu1 %3373  ;;  %v3356_v55 = vpop.xlane.xlu0 %3355 }
0x1cc9   :  { %9205 = vpow2.f32 %v3359_v53  ;;  %v3358_v57 = vsub.f32 %v3350_v46, %v3356_v55  ;;  %8500 = vmatpush3.msk.msra.mxu0 %vm913_vm7, %v3374_v54  ;;  %v3879_v53 = vld [vmem:[%s11413_s30 + $0x18] sm:$0xff]  ;;  %s10485_s30 = sld [smem:[#allocation8 + $0x80]] }
0x1cca   :  { %8509 = vmatprep.subr.mxu0 %v9578_v56  ;;  %v8837_v54 = vpack.c.bf16 %v3879_v53, %v3878_v52 }
0x1ccb   :  { %v3361_v58 = vmul.f32 1.442695, %v3358_v57 }
0x1ccc   :  { %v3451_v59 = vpop.permute.xlu0 %3450  ;;  %v3537_v6 = vpop.permute.xlu1 %3536 }
0x1ccd   :  { %9207 = vpow2.f32 %v3361_v58  ;;  %8505 = vmatpush3.msk.msra.mxu1 %vm913_vm7, %v3451_v59 }
0x1cce   :  { %8514 = vmatprep.subr.mxu1 %v9578_v56 }
0x1cd0   :  { %v3615_v10 = vpop.permute.xlu1 %3614 }
0x1cd3   :  { %v9206_v60 = vpop.eup %9205 }
0x1cd4   :  { %v3363_v61 = vsel %vm884_vm6, %v9206_v60, 0.0  ;;  %v3535_v0 = vpop.permute.xlu1 %3534 }
0x1cd5   :  { %3364 = vadd.xlane.f32.xlu0 %v3363_v61 }
0x1cd7   :  { %v9208_v62 = vpop.eup %9207 }
0x1cd8   :  { %v3366_v3 = vsel %vm884_vm6, %v9208_v62, 0.0 }
0x1cd9   :  { %3367 = vadd.xlane.f32.xlu0 %v3366_v3  ;;  %v7842_v3 = vld [vmem:[%s11414_s17] ss:$0 sm:$0xff]  ;;  %s10487_s17 = sld [smem:[#allocation8 + $0x81]] }
0x1cef   :  { %3612 = vrot.lane.b32.xlu0 %v10267_v22, %s11309_s6  ;;  %s10509_s6 = sld [smem:[#allocation12]] }
0x1d62   :  { %v3365_v4 = vpop.xlane.xlu0 %3364 }
0x1d63   :  { %9209 = vrcp.f32 %v3365_v4 }
0x1d66   :  { %v3368_v5 = vpop.xlane.xlu0 %3367 }
0x1d67   :  { %9211 = vrcp.f32 %v3368_v5 }
0x1d6a   :  { %v3613_v13 = vpop.permute.xlu0 %3612 }
0x1d6d   :  { %v9210_v9 = vpop.eup %9209 }
0x1d6e   :  { %v3370_v49 = vmul.f32 %v9210_v9, %v9206_v60 }
0x1d70   :  { %8502 = vmatmul.mubr.msk.f32.vlgmr.msra.gmra.mrb[18].mxu0 %vm909_vm8, %v3370_v49 }
0x1d71   :  { %v9212_v11 = vpop.eup %9211  ;;  %8510 = vmatpush3.xpose.msk.msra.mxu0 %vm731_vm5, %v3537_v6  ;;  %8511 = vmatprep.mubr.msk.f32.mxu0 %vm9577_vm4, %v9578_v56 }
0x1d72   :  { %v3372_v12 = vmul.f32 %v9212_v11, %v9208_v62  ;;  %8519 = vmatprep.subr.mxu0 %v9578_v56 }
0x1d74   :  { %8507 = vmatmul.mubr.msk.f32.vlgmr.msra.gmra.mrb[46].mxu1 %vm909_vm8, %v3372_v12  ;;  %8512 = vmatmul.mubr.msk.f32.vlgmr.msra.gmra.mrb[20].mxu0 %vm731_vm5, %v3535_v0 }
0x1d75   :  { %8515 = vmatpush3.xpose.msk.msra.mxu1 %vm731_vm5, %v3615_v10  ;;  %8516 = vmatprep.mubr.msk.f32.mxu1 %vm9577_vm4, %v9578_v56 }
0x1d76   :  { %8524 = vmatprep.subr.mxu1 %v9578_v56  ;;  %8521 = vmatprep.mubr.msk.f32.mxu0 %vm9577_vm4, %v9578_v56 }
0x1d78   :  { %8517 = vmatmul.mubr.msk.f32.vlgmr.msra.gmra.mrb[48].mxu1 %vm731_vm5, %v3613_v13 }
0x1d79   :  { %8526 = vmatprep.mubr.msk.f32.mxu1 %vm9577_vm4, %v9578_v56 }
0x1e43   :  { %v3446_v14 = vpop.f32.mrb[18].mxu0 }
0x1e44   :  { %v8503_v15 = vpop.f32.mrb[19].mxu0 }
0x1e45   :  { %v3991_v15 = vld [vmem:[%s11415_s8 + $0x8] sm:$0xff] }
0x1e47   :  { %v3523_v16 = vpop.f32.mrb[46].mxu1  ;;  %v3608_v18 = vpop.f32.mrb[20].mxu0 }
0x1e48   :  { %v3529_v19 = vcombine.low %v3446_v14, %v3523_v16  ;;  %v3690_v20 = vmul.f32 0.35355338, %v3608_v18  ;;  %v8508_v8 = vpop.f32.mrb[47].mxu1  ;;  %v8513_v23 = vpop.f32.mrb[21].mxu0  ;;  %v3990_v14 = vld [vmem:[%s11415_s8] sm:$0xff]  ;;  %v3993_v18 = vld [vmem:[%s11415_s8 + $0x18] sm:$0xff] }
0x1e49   :  { %v8840_v16 = vpack.c.bf16 %v3991_v15, %v3990_v14  ;;  %v4192_v15 = vld [vmem:[%s11419_s25 + $0x10] sm:$0xff] }
0x1e4a   :  { %v3692_v24 = vsel %vm884_vm6, %v3690_v20, -inf }
0x1e4b   :  { %3693 = vmax.xlane.f32.xlu1 %v3692_v24  ;;  %v3686_v25 = vpop.f32.mrb[48].mxu1 }
0x1e4c   :  { %v3691_v26 = vmul.f32 0.35355338, %v3686_v25  ;;  %v8518_v27 = vpop.f32.mrb[49].mxu1  ;;  %v7844_v25 = vld [vmem:[%s11416_s22] ss:$0 sm:$0xff]  ;;  %s11423_s22 = sld [smem:[#allocation56_spill]] }
0x1e4d   :  { %v7845_v27 = vld [vmem:[%s11417_s23] ss:$0 sm:$0xff]  ;;  %s10491_s23 = sld [smem:[#allocation8 + $0x83]] }
0x1e4e   :  { %v3695_v28 = vsel %vm884_vm6, %v3691_v26, -inf }
0x1e4f   :  { %3696 = vmax.xlane.f32.xlu0 %v3695_v28 }
0x1e5c   :  { %3714 = vrot.lane.b32.xlu1 %v10263_v21, %s11307_s5 }
0x1e60   :  { %3189 = vrot.lane.b32.xlu1 %v3188_v39, %s11305_s9  ;;  %s10530_s9 = sld [smem:[#allocation12 + $0xa]] }
0x1e64   :  { %3530 = vrot.lane.b32.xlu1 %v3529_v19, %s11303_s18  ;;  %s10532_s18 = sld [smem:[#allocation12 + $0xb]] }
0x1e66   :  { %11433 = sst [smem:[#allocation74_spill]] %s10530_s9 }
0x1e6a   :  { %11434 = sst [smem:[#allocation75_spill]] %s10532_s18 }
0x1ed8   :  { %v3694_v29 = vpop.xlane.xlu1 %3693 }
0x1ed9   :  { %v3698_v7 = vsub.f32 %v3690_v20, %v3694_v29 }
0x1edb   :  { %v3700_v30 = vmul.f32 1.442695, %v3698_v7  ;;  %v4101_v7 = vld [vmem:[%s11418_s21] sm:$0xff] }
0x1edc   :  { %v3715_v31 = vpop.permute.xlu1 %3714  ;;  %v3697_v32 = vpop.xlane.xlu0 %3696 }
0x1edd   :  { %9213 = vpow2.f32 %v3700_v30  ;;  %v3699_v33 = vsub.f32 %v3691_v26, %v3697_v32  ;;  %8520 = vmatpush3.msk.msra.mxu0 %vm913_vm7, %v3715_v31  ;;  %v4102_v30 = vld [vmem:[%s11418_s21 + $0x8] sm:$0xff]  ;;  %v4103_v32 = vld [vmem:[%s11418_s21 + $0x10] sm:$0xff] }
0x1ede   :  { %8833 = vmatprep.subr.bf16.mxu0 %v9576_v17  ;;  %v8846_v31 = vpack.c.bf16 %v4102_v30, %v4101_v7 }
0x1edf   :  { %v3702_v34 = vmul.f32 1.442695, %v3699_v33  ;;  %v4104_v33 = vld [vmem:[%s11418_s21 + $0x18] sm:$0xff] }
0x1ee0   :  { %v3190_v21 = vpop.permute.xlu1 %3189 }
0x1ee1   :  { %9215 = vpow2.f32 %v3702_v34  ;;  %3192 = vst.msk [vmem:[#allocation5] sm:$0xff] %vm1408_vm9, %v3190_v21  ;;  %v8849_v34 = vpack.c.bf16 %v4104_v33, %v4103_v32  ;;  %v4105_v21 = vld [vmem:[%s11418_s21 + $0x20] sm:$0xff] }
0x1ee2   :  { %v10543_v33 = vld [vmem:[%s11430_s11] sm:$0x1]  ;;  %s4402_s11 = scalar_lea.vmem %s11422_s19, %s10519_s0 }
0x1ee4   :  { %v3531_v35 = vpop.permute.xlu1 %3530 }
0x1ee5   :  { %3533 = vst.msk [vmem:[#allocation5] sm:$0xff] %vm1750_vm10, %v3531_v35  ;;  %v4106_v35 = vld [vmem:[%s11418_s21 + $0x28] sm:$0xff] }
0x1ee7   :  { %v9214_v36 = vpop.eup %9213 }
0x1ee8   :  { %v3704_v37 = vsel %vm884_vm6, %v9214_v36, 0.0 }
0x1ee9   :  { %3705 = vadd.xlane.f32.xlu0 %v3704_v37  ;;  %v4107_v37 = vld [vmem:[%s11418_s21 + $0x30] sm:$0xff] }
0x1eeb   :  { %v9216_v38 = vpop.eup %9215 }
0x1eec   :  { %v3707_v39 = vsel %vm884_vm6, %v9216_v38, 0.0  ;;  %vm4536_vm6 = vcmask 192516  }
0x1eed   :  { %3708 = vadd.xlane.f32.xlu0 %v3707_v39 }
0x1f03   :  { %3791 = vrot.lane.b32.xlu0 %v10267_v22, %s11307_s5  ;;  %s10528_s5 = sld [smem:[#allocation12 + $0x9]] }
0x1f09   :  { %11432 = sst [smem:[#allocation73_spill]] %s10528_s5 }
0x1f76   :  { %v3706_v40 = vpop.xlane.xlu0 %3705 }
0x1f77   :  { %9217 = vrcp.f32 %v3706_v40  ;;  %v4190_v40 = vld [vmem:[%s11419_s25] sm:$0xff] }
0x1f7a   :  { %v3709_v41 = vpop.xlane.xlu0 %3708 }
0x1f7b   :  { %9219 = vrcp.f32 %v3709_v41  ;;  %v4191_v41 = vld [vmem:[%s11419_s25 + $0x8] sm:$0xff] }
0x1f7e   :  { %v3792_v42 = vpop.permute.xlu0 %3791 }
0x1f7f   :  { %8525 = vmatpush3.msk.msra.mxu1 %vm913_vm7, %v3792_v42  ;;  %v8858_v42 = vpack.c.bf16 %v4191_v41, %v4190_v40  ;;  %vm4547_vm7 = vcmask 193541  }
0x1f80   :  { %8839 = vmatprep.subr.bf16.mxu1 %v9576_v17 }
0x1f81   :  { %v9218_v43 = vpop.eup %9217 }
0x1f82   :  { %v3711_v45 = vmul.f32 %v9218_v43, %v9214_v36  ;;  %v8852_v36 = vpack.c.bf16 %v4106_v35, %v4105_v21  ;;  %v7846_v43 = vld [vmem:[%s11420_s29] ss:$0 sm:$0xff]  ;;  %s4303_s29 = scalar_lea.vmem %s11422_s19, %s10481_s12 }
0x1f84   :  { %8522 = vmatmul.mubr.msk.f32.vlgmr.msra.gmra.mrb[22].mxu0 %vm909_vm8, %v3711_v45 }
0x1f85   :  { %v9220_v46 = vpop.eup %9219  ;;  %8537 = vmatprep.mubr.msk.f32.mxu0 %vm9577_vm4, %v9578_v56  ;;  %8835 = vmatpush3.bf16.msra.mxu0 %v8834_v51 }
0x1f86   :  { %v3713_v22 = vmul.f32 %v9220_v46, %v9216_v38  ;;  %8836 = vmatprep.subr.bf16.mxu0 %v9576_v17  ;;  %v4108_v38 = vld [vmem:[%s11418_s21 + $0x38] sm:$0xff]  ;;  %s4283_s21 = scalar_lea.vmem %s11422_s19, %s10477_s4 }
0x1f87   :  { %v8855_v39 = vpack.c.bf16 %v4108_v38, %v4107_v37 }
0x1f88   :  { %8527 = vmatmul.mubr.msk.f32.vlgmr.msra.gmra.mrb[50].mxu1 %vm909_vm8, %v3713_v22  ;;  %vm4558_vm8 = vcmask 194566  }
0x1f89   :  { %8548 = vmatprep.mubr.msk.f32.mxu1 %vm9577_vm4, %v9578_v56  ;;  %8838 = vmatpush3.bf16.msra.mxu0 %v8837_v54 }
0x1f8a   :  { %8845 = vmatprep.subr.bf16.mxu0 %v9576_v17  ;;  %8841 = vmatpush3.bf16.msra.mxu1 %v8840_v16  ;;  %v4193_v16 = vld [vmem:[%s11419_s25 + $0x18] sm:$0xff]  ;;  %s4293_s25 = scalar_lea.vmem %s11422_s19, %s10479_s24 }
0x1f8b   :  { %8842 = vmatprep.subr.bf16.mxu1 %v9576_v17 }
0x2057   :  { %v3787_v55 = vpop.f32.mrb[22].mxu0 }
0x2058   :  { %v8523_v57 = vpop.f32.mrb[23].mxu0 }
0x205b   :  { %v3864_v58 = vpop.f32.mrb[50].mxu1 }
0x205c   :  { %v3870_v59 = vcombine.low %v3787_v55, %v3864_v58  ;;  %v8528_v60 = vpop.f32.mrb[51].mxu1 }
0x205e   :  { %3871 = vrot.lane.b32.xlu1 %v3870_v59, %s11301_s26  ;;  %s4289_s26 = scalar_lea.vmem [#allocation6], %s10477_s4  ;;  %s4474_s4 = scalar_lea.vmem %s11422_s19, %s10528_s5 }
0x20d0   :  { %v3872_v61 = vpop.permute.xlu1 %3871 }
0x20d1   :  { %3874 = vst.msk [vmem:[#allocation5] sm:$0xff] %vm2092_vm11, %v3872_v61 }
0x20d8   :  { %v3875_v62 = vld [vmem:[#allocation5] sm:$0xff] }
0x20d9   :  { %8538 = vmatmul.mubr.msk.f32.vlgmr.msra.gmra.mrb[24].mxu0 %vm590_vm2, %v3875_v62 }
0x20da   :  { %8567 = vmatprep.mubr.msk.f32.mxu0 %vm9577_vm4, %v9578_v56  ;;  %8847 = vmatpush3.bf16.msra.mxu0 %v8846_v31 }
0x20db   :  { %8848 = vmatprep.subr.bf16.mxu0 %v9576_v17 }
0x20de   :  { %8850 = vmatpush3.bf16.msra.mxu0 %v8849_v34 }
0x20df   :  { %8851 = vmatprep.subr.bf16.mxu0 %v9576_v17 }
0x20e2   :  { %8853 = vmatpush3.bf16.msra.mxu0 %v8852_v36 }
0x20e3   :  { %8854 = vmatprep.subr.bf16.mxu0 %v9576_v17 }
0x20e6   :  { %8856 = vmatpush3.bf16.msra.mxu0 %v8855_v39 }
0x21ac   :  { %v3956_v4 = vpop.f32.mrb[24].mxu0 }
0x21ad   :  { %v3957_v5 = vadd.f32 %v7842_v3, %v3956_v4  ;;  %v8539_v6 = vpop.f32.mrb[25].mxu0 }
0x21af   :  { %v10438_v9 = vadd.f32 %v3957_v5, %v10246_v44  ;;  %v3992_v44 = vld [vmem:[%s11415_s8 + $0x10] sm:$0xff]  ;;  %s10489_s8 = sld [smem:[#allocation8 + $0x82]] }
0x21b0   :  { %v8843_v19 = vpack.c.bf16 %v3993_v18, %v3992_v44  ;;  %v8861_v44 = vpack.c.bf16 %v4193_v16, %v4192_v15  ;;  %v7848_v18 = vld [vmem:[%s11421_s3] ss:$0 sm:$0xff]  ;;  %s4276_s3 = scalar_lea.vmem %s11422_s19, %s10483_s28 }
0x21b1   :  { %v3963_v10 = vsel %vm590_vm2, %v10438_v9, 0.0 }
0x21b2   :  { %3964 = vadd.xlane.f32.xlu0 %v3963_v10  ;;  %8844 = vmatpush3.bf16.msra.mxu1 %v8843_v19 }
0x21b3   :  { %8857 = vmatprep.subr.bf16.mxu1 %v9576_v17 }
0x223f   :  { %v3965_v49 = vpop.xlane.xlu0 %3964 }
0x2240   :  { %v3966_v11 = vmul.f32 0.03125, %v3965_v49 }
0x2242   :  { %v3967_v12 = vsub.f32 %v10438_v9, %v3966_v11 }
0x2244   :  { %v3968_v0 = vmul.f32 %v3967_v12, %v3967_v12 }
0x2246   :  { %v3969_v13 = vsel %vm590_vm2, %v3968_v0, 0.0 }
0x2247   :  { %3970 = vadd.xlane.f32.xlu1 %v3969_v13 }
0x22d4   :  { %v3971_v20 = vpop.xlane.xlu1 %3970 }
0x22d5   :  { %v3972_v8 = vmul.f32 0.03125, %v3971_v20 }
0x22d7   :  { %v3973_v23 = vadd.f32 1e-05, %v3972_v8 }
0x22d9   :  { %9221 = vrsqrt.f32 %v3973_v23 }
0x22e3   :  { %v9222_v24 = vpop.eup %9221 }
0x22e4   :  { %v3975_v26 = vmul.f32 %v9222_v24, %v3967_v12  ;;  %v4284_v24 = vld [vmem:[%s4283_s21] sm:$0x1]  ;;  %s4330_s21 = scalar_lea.vmem %s11422_s19, %s10511_s7 }
0x22e5   :  { %v4331_v36 = vld [vmem:[%s4330_s21] sm:$0x1]  ;;  %s4420_s21 = scalar_lea.vmem %s11422_s19, %s10522_s16 }
0x22e6   :  { %v3982_v28 = vmul.f32 %v7844_v25, %v3975_v26  ;;  %v4294_v25 = vld [vmem:[%s4293_s25] sm:$0x1]  ;;  %s4348_s25 = scalar_lea.vmem %s11422_s19, %s10513_s2 }
0x22e7   :  { %v4304_v26 = vld [vmem:[%s4303_s29] sm:$0x1]  ;;  %v4296_v30 = vrot.slane %v4294_v25, 6  ;;  %s4366_s29 = scalar_lea.vmem %s11422_s19, %s10515_s1 }
0x22e8   :  { %v3989_v29 = vadd.f32 %v7845_v27, %v3982_v28  ;;  %v4286_v27 = vrot.slane %v4284_v24, 7  ;;  %v4306_v31 = vrot.slane %v4304_v26, 5  ;;  %v4349_v37 = vld [vmem:[%s4348_s25] sm:$0x1]  ;;  %s4299_s25 = scalar_lea.vmem [#allocation6], %s10479_s24  ;;  %s10576_s24 = sld [smem:[#allocation12 + $0x81]] }
0x22e9   :  { %v4367_v40 = vld [vmem:[%s4366_s29] sm:$0x1]  ;;  %s4456_s29 = scalar_lea.vmem %s11422_s19, %s10526_s10 }
0x22ea   :  { %8549 = vmatmul.mubr.msk.f32.vlgmr.msra.gmra.mrb[52].mxu1 %vm590_vm2, %v3989_v29  ;;  %v4277_v29 = vld [vmem:[%s4276_s3] sm:$0x1]  ;;  %s4384_s3 = scalar_lea.vmem %s11422_s19, %s10517_s27 }
0x22eb   :  { %8578 = vmatprep.mubr.msk.f32.mxu1 %vm9577_vm4, %v9578_v56  ;;  %8859 = vmatpush3.bf16.msra.mxu1 %v8858_v42  ;;  %vm4310_vm4 = vcmask 191491   ;;  %v4332_v42 = vadd.f32 %v4331_v36, %v10543_v33 }
0x22ec   :  { %8860 = vmatprep.subr.bf16.mxu1 %v9576_v17 }
0x22ef   :  { %8862 = vmatpush3.bf16.msra.mxu1 %v8861_v44 }
0x23bd   :  { %v4070_v45 = vpop.f32.mrb[52].mxu1 }
0x23be   :  { %v4071_v46 = vadd.f32 %v7846_v43, %v4070_v45  ;;  %v8550_v22 = vpop.f32.mrb[53].mxu1  ;;  %v4385_v43 = vld [vmem:[%s4384_s3] sm:$0x1]  ;;  %v4350_v45 = vadd.f32 %v4349_v37, %v10543_v33  ;;  %s4316_s3 = scalar_lea.vmem [#allocation6], %s10509_s6 }
0x23bf   :  { %v4368_v22 = vadd.f32 %v4367_v40, %v10543_v33 }
0x23c0   :  { %v4075_v47 = vmul.f32 0.70710677, %v4071_v46  ;;  %v4074_v0 = vmul.f32 0.5, %v4071_v46  ;;  %v4403_v46 = vld [vmem:[%s4402_s11] sm:$0x1]  ;;  %s10583_s11 = sld [smem:[#allocation12 + $0x82]] }
0x23c2   :  { %v4078_v50 = vand.u32 2147483647, %v4075_v47  ;;  %vm4076_vm13 = vcmp.ge.f32.partialorder %v4075_v47, 0.0  ;;  %v4421_v47 = vld [vmem:[%s4420_s21] sm:$0x1]  ;;  %s4510_s21 = scalar_lea.vmem %s11422_s19, %s10532_s18 }
0x23c3   :  { %v4077_v11 = vsel %vm4076_vm13, 1.0, %v9593_v48  ;;  %vm4805_vm13 = vcmask 195584  }
0x23c4   :  { %v4079_v51 = vmul.f32 0.3275911, %v4078_v50  ;;  %v4092_v53 = vsub.f32 0.0, %v4078_v50 }
0x23c6   :  { %v4080_v52 = vadd.f32 1.0, %v4079_v51  ;;  %v4093_v55 = vmul.f32 %v4092_v53, %v4078_v50  ;;  %v4386_v50 = vadd.f32 %v4385_v43, %v10543_v33  ;;  %11435 = sst [smem:[#allocation76_spill]] %s10583_s11  ;;  %v4404_v53 = vadd.f32 %v4403_v46, %v10543_v33 }
0x23c8   :  { %9223 = vrcp.f32 %v4080_v52  ;;  %v4094_v59 = vmul.f32 1.442695, %v4093_v55 }
0x23ca   :  { %9225 = vpow2.f32 %v4094_v59 }
0x23d2   :  { %v9224_v54 = vpop.eup %9223 }
0x23d3   :  { %v4083_v57 = vmul.f32 1.0614054, %v9224_v54 }
0x23d4   :  { %v9226_v6 = vpop.eup %9225 }
0x23d5   :  { %v4084_v58 = vadd.f32 -1.4531521, %v4083_v57  ;;  %v4422_v57 = vadd.f32 %v4421_v47, %v10543_v33 }
0x23d7   :  { %v4085_v60 = vmul.f32 %v9224_v54, %v4084_v58  ;;  %v4475_v58 = vld [vmem:[%s4474_s4] sm:$0x1]  ;;  %s10611_s4 = sld [smem:[#allocation12 + $0x86]] }
0x23d9   :  { %v4086_v61 = vadd.f32 1.4214138, %v4085_v60 }
0x23db   :  { %v4087_v17 = vmul.f32 %v9224_v54, %v4086_v61 }
0x23dd   :  { %v4088_v62 = vadd.f32 -0.28449672, %v4087_v17  ;;  %v4511_v17 = vld [vmem:[%s4510_s21] sm:$0x1]  ;;  %11441 = sst [smem:[#allocation80_spill]] %s10611_s4  ;;  %s4423_s21 = scalar_lea.vmem [#allocation6], %s10522_s16 }
0x23de   :  { %s4610_s16 = scalar_lea.vmem %s11422_s19, %s10583_s11 }
0x23df   :  { %v4089_v3 = vmul.f32 %v9224_v54, %v4088_v62  ;;  %v4611_v16 = vld [vmem:[%s4610_s16] sm:$0x1]  ;;  %s7572_s16 = scalar_lea.vmem [#allocation6], %s10487_s17 }
0x23e1   :  { %v4090_v4 = vadd.f32 0.2548296, %v4089_v3  ;;  %v4476_v3 = vadd.f32 %v4475_v58, %v10543_v33 }
0x23e3   :  { %v4091_v5 = vmul.f32 %v9224_v54, %v4090_v4  ;;  %v4457_v54 = vld [vmem:[%s4456_s29] sm:$0x1]  ;;  %s10606_s29 = sld [smem:[#allocation12 + $0x85]] }
0x23e4   :  { %v4458_v61 = vadd.f32 %v4457_v54, %v10543_v33 }
0x23e5   :  { %v4096_v10 = vmul.f32 %v9226_v6, %v4091_v5 }
0x23e7   :  { %v4097_v49 = vsub.f32 1.0, %v4096_v10 }
0x23e9   :  { %v4098_v12 = vmul.f32 %v4097_v49, %v4077_v11  ;;  %11440 = sst [smem:[#allocation79_spill]] %s10606_s29  ;;  %v4512_v49 = vadd.f32 %v4511_v17, %v10543_v33 }
0x23eb   :  { %v4099_v13 = vadd.f32 1.0, %v4098_v12 }
0x23ed   :  { %v4100_v14 = vmul.f32 %v4099_v13, %v4074_v0 }
0x23ef   :  { %8568 = vmatmul.mubr.msk.f32.vlgmr.msra.gmra.mrb[26].mxu0 %vm438_vm1, %v4100_v14 }
0x24c2   :  { %v4185_v19 = vpop.f32.mrb[26].mxu0 }
0x24c3   :  { %v4186_v20 = vadd.f32 %v7848_v18, %v4185_v19  ;;  %v8569_v8 = vpop.f32.mrb[27].mxu0 }
0x24c5   :  { %v4189_v23 = vadd.f32 %v4186_v20, %v10438_v9  ;;  %v7850_v9 = vld [vmem:[%s11423_s22] ss:$0 sm:$0xff]  ;;  %s4313_s22 = scalar_lea.vmem %s11422_s19, %s10509_s6 }
0x24c6   :  { %v4314_v34 = vld [vmem:[%s4313_s22] sm:$0x1]  ;;  %s4279_s22 = scalar_lea.vmem [#allocation6], %s10483_s28  ;;  %s4438_s28 = scalar_lea.vmem %s11422_s19, %s10524_s15 }
0x24c7   :  { %8579 = vmatmul.mubr.msk.f32.vlgmr.msra.gmra.mrb[54].mxu1 %vm590_vm2, %v4189_v23  ;;  %v4315_v39 = vadd.f32 %v4314_v34, %v10543_v33  ;;  %v4439_v51 = vld [vmem:[%s4438_s28] sm:$0x1]  ;;  %s4351_s28 = scalar_lea.vmem [#allocation6], %s10513_s2  ;;  %s10648_s2 = sld [smem:[#allocation12 + $0x8b]] }
0x24c8   :  { %v4440_v59 = vadd.f32 %v4439_v51, %v10543_v33 }
0x24cd   :  { %11448 = sst [smem:[#allocation85_spill]] %s10648_s2 }
0x259a   :  { %v4270_v28 = vpop.f32.mrb[54].mxu1 }
0x259b   :  { %v10538_v7 = vadd.f32 %v7850_v9, %v4270_v28  ;;  %v8580_v32 = vpop.f32.mrb[55].mxu1  ;;  %v4612_v9 = vadd.f32 %v4611_v16, %v10543_v33 }
0x259d   :  { %v4278_v21 = vadd.f32 %v4277_v29, %v10538_v7  ;;  %v4288_v35 = vadd.f32 %v4286_v27, %v10538_v7  ;;  %v4298_v38 = vadd.f32 %v4296_v30, %v10538_v7  ;;  %v4308_v41 = vadd.f32 %v4306_v31, %v10538_v7 }
0x259f   :  { %4281 = vst.msk [vmem:[%s4279_s22] sm:$0x1] %vm4280_vm14, %v4278_v21  ;;  %s10569_s22 = sld [smem:[#allocation12 + $0x80]] }
0x25a0   :  { %4291 = vst.msk [vmem:[%s4289_s26 - $0x1] sm:$0x2] %vm4290_vm15, %v4288_v35  ;;  %s4309_s26 = scalar_lea.vmem [#allocation6], %s10481_s12  ;;  %s4492_s12 = scalar_lea.vmem %s11422_s19, %s10530_s9  ;;  %vm10760_vm15 = vmpackc.low %vm731_vm5, %vm731_vm5 }
0x25a1   :  { %4301 = vst.msk [vmem:[%s4299_s25 - $0x2] sm:$0x4] %vm4300_vm3, %v4298_v38  ;;  %s11436_s25 = scalar_lea.vmem %s11422_s19, %s10485_s30  ;;  %v4493_v60 = vld [vmem:[%s4492_s12] sm:$0x1]  ;;  %s10619_s12 = sld [smem:[#allocation12 + $0x87]]  ;;  %vm5161_vm3 = vcmask 130048  }
0x25a2   :  { %4311 = vst.msk [vmem:[%s4309_s26 - $0x3] sm:$0x8] %vm4310_vm4, %v4308_v41  ;;  %v4529_v52 = vld [vmem:[%s11436_s25] sm:$0x1]  ;;  %s4333_s26 = scalar_lea.vmem [#allocation6], %s10511_s7  ;;  %s10601_s25 = sld [smem:[#allocation12 + $0x84]]  ;;  %v4494_v6 = vadd.f32 %v4493_v60, %v10543_v33 }
0x25a3   :  { %4317 = vst.msk [vmem:[%s4316_s3] sm:$0x1] %vm4280_vm14, %v4315_v39  ;;  %s11438_s3 = scalar_lea.vmem %s11422_s19, %s10487_s17  ;;  %v4531_v4 = vrot.slane %v4529_v52, 4  ;;  %s7578_s17 = scalar_lea.vmem [#allocation6], %s10491_s23 }
0x25a4   :  { %4334 = vst.msk [vmem:[%s4333_s26] sm:$0x1] %vm4280_vm14, %v4332_v42  ;;  %v4540_v55 = vld [vmem:[%s11438_s3] sm:$0x1]  ;;  %s4369_s26 = scalar_lea.vmem [#allocation6], %s10515_s1  ;;  %s4387_s3 = scalar_lea.vmem [#allocation6], %s10517_s27 }
0x25a5   :  { %4352 = vst.msk [vmem:[%s4351_s28] sm:$0x1] %vm4280_vm14, %v4350_v45  ;;  %s11442_s28 = scalar_lea.vmem %s11422_s19, %s10489_s8  ;;  %v4542_v10 = vrot.slane %v4540_v55, 3  ;;  %s4591_s27 = scalar_lea.vmem %s11422_s19, %s10576_s24  ;;  %v4533_v13 = vadd.f32 %v4531_v4, %v10538_v7 }
0x25a6   :  { %4370 = vst.msk [vmem:[%s4369_s26] sm:$0x1] %vm4280_vm14, %v4368_v22  ;;  %v4551_v62 = vld [vmem:[%s11442_s28] sm:$0x1]  ;;  %s4405_s26 = scalar_lea.vmem [#allocation6], %s10519_s0  ;;  %s4572_s28 = scalar_lea.vmem %s11422_s19, %s10569_s22 }
0x25a7   :  { %4388 = vst.msk [vmem:[%s4387_s3] sm:$0x1] %vm4280_vm14, %v4386_v50  ;;  %11443 = sst [smem:[#allocation81_spill]] %s10619_s12  ;;  %s11444_s3 = scalar_lea.vmem %s11422_s19, %s10491_s23  ;;  %v4553_v11 = vrot.slane %v4551_v62, 2  ;;  %v4573_v0 = vld [vmem:[%s4572_s28] sm:$0x1]  ;;  %v4544_v15 = vadd.f32 %v4542_v10, %v10538_v7 }
0x25a8   :  { %11439 = sst [smem:[#allocation78_spill]] %s10601_s25  ;;  %4406 = vst.msk [vmem:[%s4405_s26] sm:$0x1] %vm4280_vm14, %v4404_v53  ;;  %v4562_v5 = vld [vmem:[%s11444_s3] sm:$0x1]  ;;  %s10629_s0 = sld [smem:[#allocation12 + $0x88]]  ;;  %v4574_v18 = vadd.f32 %v4573_v0, %v10543_v33 }
0x25a9   :  { %4424 = vst.msk [vmem:[%s4423_s21] sm:$0x1] %vm4280_vm14, %v4422_v57  ;;  %s4441_s26 = scalar_lea.vmem [#allocation6], %s10524_s15  ;;  %s10636_s3 = sld [smem:[#allocation12 + $0x89]]  ;;  %v4564_v12 = vrot.slane %v4562_v5, 1  ;;  %v4555_v44 = vadd.f32 %v4553_v11, %v10538_v7 }
0x25aa   :  { %4442 = vst.msk [vmem:[%s4441_s26] sm:$0x1] %vm4280_vm14, %v4440_v59  ;;  %s4459_s21 = scalar_lea.vmem [#allocation6], %s10526_s10  ;;  %s10642_s1 = sld [smem:[#allocation12 + $0x8a]]  ;;  %v4592_v14 = vld [vmem:[%s4591_s27] sm:$0x1] }
0x25ab   :  { %4460 = vst.msk [vmem:[%s4459_s21] sm:$0x1] %vm4280_vm14, %v4458_v61  ;;  %s4477_s15 = scalar_lea.vmem [#allocation6], %s10528_s5  ;;  %s4629_s26 = scalar_lea.vmem %s11422_s19, %s10593_s14  ;;  %v4566_v20 = vadd.f32 %v4564_v12, %v10538_v7  ;;  %v4593_v8 = vadd.f32 %v4592_v14, %v10543_v33 }
0x25ac   :  { %4478 = vst.msk [vmem:[%s4477_s15] sm:$0x1] %vm4280_vm14, %v4476_v3  ;;  %s4495_s10 = scalar_lea.vmem [#allocation6], %s10530_s9  ;;  %s4648_s21 = scalar_lea.vmem %s11422_s19, %s10601_s25  ;;  %v4630_v19 = vld [vmem:[%s4629_s26] sm:$0x1] }
0x25ad   :  { %4496 = vst.msk [vmem:[%s4495_s10] sm:$0x1] %vm4280_vm14, %v4494_v6  ;;  %s4513_s15 = scalar_lea.vmem [#allocation6], %s10532_s18  ;;  %s4667_s28 = scalar_lea.vmem %s11422_s19, %s10606_s29  ;;  %v4649_v23 = vld [vmem:[%s4648_s21] sm:$0x1]  ;;  %v4631_v25 = vadd.f32 %v4630_v19, %v10543_v33 }
0x25ae   :  { %11445 = sst [smem:[#allocation82_spill]] %s10629_s0  ;;  %4514 = vst.msk [vmem:[%s4513_s15] sm:$0x1] %vm4280_vm14, %v4512_v49  ;;  %s7569_s10 = scalar_lea.vmem [#allocation6], %s10485_s30  ;;  %v4668_v24 = vld [vmem:[%s4667_s28] sm:$0x1]  ;;  %v4650_v27 = vadd.f32 %v4649_v23, %v10543_v33 }
0x25af   :  { %11446 = sst [smem:[#allocation83_spill]] %s10636_s3  ;;  %7891 = vst.msk [vmem:[%s7569_s10 + $0xc] sm:$0x10] %vm4536_vm6, %v4533_v13  ;;  %s4686_s27 = scalar_lea.vmem %s11422_s19, %s10611_s4  ;;  %v4669_v29 = vadd.f32 %v4668_v24, %v10543_v33 }
0x25b0   :  { %11447 = sst [smem:[#allocation84_spill]] %s10642_s1  ;;  %7893 = vst.msk [vmem:[%s7572_s16 + $0xb] sm:$0x20] %vm4547_vm7, %v4544_v15  ;;  %s4705_s30 = scalar_lea.vmem %s11422_s19, %s10619_s12  ;;  %v4687_v26 = vld [vmem:[%s4686_s27] sm:$0x1] }
0x25b1   :  { %s7575_s15 = scalar_lea.vmem [#allocation6], %s10489_s8  ;;  %s4724_s26 = scalar_lea.vmem %s11422_s19, %s10629_s0  ;;  %v4706_v28 = vld [vmem:[%s4705_s30] sm:$0x1]  ;;  %v4688_v30 = vadd.f32 %v4687_v26, %v10543_v33 }
0x25b2   :  { %7895 = vst.msk [vmem:[%s7575_s15 + $0xa] sm:$0x40] %vm4558_vm8, %v4555_v44  ;;  %s4743_s21 = scalar_lea.vmem %s11422_s19, %s10636_s3  ;;  %s7581_s10 = scalar_lea.vmem [#allocation6], %s10569_s22  ;;  %v4725_v7 = vld [vmem:[%s4724_s26] sm:$0x1]  ;;  %v4707_v32 = vadd.f32 %v4706_v28, %v10543_v33 }
0x25b3   :  { %7897 = vst.msk [vmem:[%s7578_s17 + $0x9] sm:$0x80] %vm4569_vm12, %v4566_v20  ;;  %s4762_s8 = scalar_lea.vmem %s11422_s19, %s10642_s1  ;;  %s7587_s28 = scalar_lea.vmem [#allocation6], %s10576_s24  ;;  %v4744_v31 = vld [vmem:[%s4743_s21] sm:$0x1]  ;;  %v4726_v21 = vadd.f32 %v4725_v7, %v10543_v33 }
0x25b4   :  { %7899 = vst.msk [vmem:[%s7581_s10 + $0x10] sm:$0x1] %vm4280_vm14, %v4574_v18  ;;  %s4781_s23 = scalar_lea.vmem %s11422_s19, %s10648_s2  ;;  %s7593_s27 = scalar_lea.vmem [#allocation6], %s10583_s11  ;;  %v4763_v34 = vld [vmem:[%s4762_s8] sm:$0x1]  ;;  %v4745_v36 = vadd.f32 %v4744_v31, %v10543_v33 }
0x25b5   :  { %7903 = vst.msk [vmem:[%s7587_s28 + $0x10] sm:$0x1] %vm4280_vm14, %v4593_v8  ;;  %s7599_s16 = scalar_lea.vmem [#allocation6], %s10593_s14  ;;  %s7605_s30 = scalar_lea.vmem [#allocation6], %s10601_s25  ;;  %v4782_v35 = vld [vmem:[%s4781_s23] sm:$0x1]  ;;  %v4764_v37 = vadd.f32 %v4763_v34, %v10543_v33 }
0x25b6   :  { %7907 = vst.msk [vmem:[%s7593_s27 + $0x10] sm:$0x1] %vm4280_vm14, %v4612_v9  ;;  %s7611_s19 = scalar_lea.vmem [#allocation6], %s10606_s29  ;;  %s7617_s15 = scalar_lea.vmem [#allocation6], %s10611_s4  ;;  %v4783_v38 = vadd.f32 %v4782_v35, %v10543_v33  ;;  %v7947_v28 = vld [vmem:[#allocation14] ss:$0 sm:$0xff] }
0x25b7   :  { %7911 = vst.msk [vmem:[%s7599_s16 + $0x10] sm:$0x1] %vm4280_vm14, %v4631_v25  ;;  %s7623_s26 = scalar_lea.vmem [#allocation6], %s10619_s12  ;;  %s7629_s17 = scalar_lea.vmem [#allocation6], %s10629_s0 }
0x25b8   :  { %7915 = vst.msk [vmem:[%s7605_s30 + $0x10] sm:$0x1] %vm4280_vm14, %v4650_v27  ;;  %s7635_s21 = scalar_lea.vmem [#allocation6], %s10636_s3  ;;  %s7641_s10 = scalar_lea.vmem [#allocation6], %s10642_s1 }
0x25b9   :  { %7919 = vst.msk [vmem:[%s7611_s19 + $0x10] sm:$0x1] %vm4280_vm14, %v4669_v29  ;;  %s7647_s8 = scalar_lea.vmem [#allocation6], %s10648_s2  ;;  %s11449_s28 = sld [smem:[#allocation60_spill]] }
0x25ba   :  { %7923 = vst.msk [vmem:[%s7617_s15 + $0x10] sm:$0x1] %vm4280_vm14, %v4688_v30  ;;  %s11450_s23 = sld [smem:[#allocation59_spill]]  ;;  %s11451_s27 = smov 96  }
0x25bb   :  { %7927 = vst.msk [vmem:[%s7623_s26 + $0x10] sm:$0x1] %vm4280_vm14, %v4707_v32  ;;  %s11454_s16 = smov 64   ;;  %s11455_s30 = smov 88  }
0x25bc   :  { %7931 = vst.msk [vmem:[%s7629_s17 + $0x10] sm:$0x1] %vm4280_vm14, %v4726_v21  ;;  %s11456_s19 = smov 120   ;;  %s11457_s15 = smov 56  }
0x25bd   :  { %7935 = vst.msk [vmem:[%s7635_s21 + $0x10] sm:$0x1] %vm4280_vm14, %v4745_v36  ;;  %s11458_s26 = smov 80   ;;  %s11459_s17 = smov 112  }
0x25be   :  { %7939 = vst.msk [vmem:[%s7641_s10 + $0x10] sm:$0x1] %vm4280_vm14, %v4764_v37  ;;  %s11460_s21 = smov 48   ;;  %s11461_s10 = smov 72  }
0x25bf   :  { %7943 = vst.msk [vmem:[%s7647_s8 + $0x10] sm:$0x1] %vm4280_vm14, %v4783_v38  ;;  %v4879_v49 = vld [vmem:[%s11449_s28] sm:$0xff]  ;;  %v4880_v11 = vld [vmem:[%s11449_s28 + $0x8] sm:$0xff]  ;;  %v4881_v0 = vld [vmem:[%s11449_s28 + $0x10] sm:$0xff]  ;;  %s11462_s8 = smov 104  }
0x25c0   :  { %v8863_v12 = vpack.c.bf16 %v4880_v11, %v4879_v49  ;;  %v7946_v26 = vld [vmem:[%s11450_s23] ss:$0 sm:$0xff]  ;;  %s11463_s28 = smov 40   ;;  %s11464_s23 = smov 8  }
0x25c1   :  { %s11130_s0 = sld [smem:[#allocation12 + $0x86]]  ;;  %s11132_s12 = sld [smem:[#allocation12 + $0x87]] }
0x25c2   :  { %8864 = vmatprep.subr.bf16.mxu1 %v8863_v12  ;;  %s11135_s4 = sld [smem:[#allocation12 + $0x88]]  ;;  %s11137_s29 = sld [smem:[#allocation12 + $0x89]] }
0x25c3   :  { %8866 = vmatpush3.bf16.msra.mxu1 %v8863_v12  ;;  %s11140_s25 = sld [smem:[#allocation12 + $0x8a]]  ;;  %s11142_s14 = sld [smem:[#allocation12 + $0x8b]] }
0x25c4   :  { %8585 = vmatprep.subr.mxu1 %v4881_v0 }
0x25c6   :  { %v4802_v39 = vld [vmem:[#allocation6 + $0x18] sm:$0xff]  ;;  %v4799_v40 = vld [vmem:[#allocation6] sm:$0xff]  ;;  %v4800_v33 = vld [vmem:[#allocation6 + $0x8] sm:$0xff] }
0x25c7   :  { %v4815_v41 = vsel %vm4805_vm13, %v4802_v39, 0.0  ;;  %v4806_v42 = vsel %vm4805_vm13, %v4799_v40, 0.0  ;;  %v4809_v43 = vsel %vm4805_vm13, %v4800_v33, 0.0  ;;  %v4801_v45 = vld [vmem:[#allocation6 + $0x10] sm:$0xff]  ;;  %8586 = vmatpush3.msra.mxu1 %v4881_v0 }
0x25c8   :  { %4816 = vadd.xlane.f32.xlu1 %v4815_v41  ;;  %4807 = vadd.xlane.f32.xlu0 %v4806_v42  ;;  %v4812_v46 = vsel %vm4805_vm13, %v4801_v45, 0.0 }
0x25cc   :  { %4810 = vadd.xlane.f32.xlu0 %v4809_v43 }
0x25d0   :  { %4813 = vadd.xlane.f32.xlu0 %v4812_v46 }
0x2655   :  { %v4817_v22 = vpop.xlane.xlu1 %4816  ;;  %v4808_v47 = vpop.xlane.xlu0 %4807 }
0x2656   :  { %v4819_v50 = vmul.f32 0.041666668, %v4808_v47  ;;  %v4822_v51 = vmul.f32 0.041666668, %v4817_v22 }
0x2658   :  { %v4823_v52 = vsub.f32 %v4799_v40, %v4819_v50  ;;  %v4826_v57 = vsub.f32 %v4802_v39, %v4822_v51 }
0x2659   :  { %v4811_v53 = vpop.xlane.xlu0 %4810 }
0x265a   :  { %v4820_v54 = vmul.f32 0.041666668, %v4811_v53  ;;  %v4827_v55 = vmul.f32 %v4823_v52, %v4823_v52  ;;  %v4830_v4 = vmul.f32 %v4826_v57, %v4826_v57 }
0x265c   :  { %v4824_v58 = vsub.f32 %v4800_v33, %v4820_v54  ;;  %v4831_v59 = vsel %vm4805_vm13, %v4827_v55, 0.0  ;;  %v4840_v6 = vsel %vm4805_vm13, %v4830_v4, 0.0 }
0x265d   :  { %4832 = vadd.xlane.f32.xlu0 %v4831_v59  ;;  %v4814_v60 = vpop.xlane.xlu0 %4813 }
0x265e   :  { %v4821_v61 = vmul.f32 0.041666668, %v4814_v60  ;;  %v4828_v17 = vmul.f32 %v4824_v58, %v4824_v58 }
0x2660   :  { %v4825_v62 = vsub.f32 %v4801_v45, %v4821_v61  ;;  %v4834_v3 = vsel %vm4805_vm13, %v4828_v17, 0.0 }
0x2661   :  { %4835 = vadd.xlane.f32.xlu1 %v4834_v3 }
0x2662   :  { %v4829_v5 = vmul.f32 %v4825_v62, %v4825_v62 }
0x2664   :  { %v4837_v10 = vsel %vm4805_vm13, %v4829_v5, 0.0 }
0x2665   :  { %4841 = vadd.xlane.f32.xlu1 %v4840_v6  ;;  %4838 = vadd.xlane.f32.xlu0 %v4837_v10 }
0x26ea   :  { %v4833_v13 = vpop.xlane.xlu0 %4832 }
0x26eb   :  { %v4843_v14 = vmul.f32 0.041666668, %v4833_v13 }
0x26ed   :  { %v4847_v15 = vadd.f32 1e-05, %v4843_v14 }
0x26ee   :  { %v4836_v16 = vpop.xlane.xlu1 %4835 }
0x26ef   :  { %9227 = vrsqrt.f32 %v4847_v15  ;;  %v4844_v44 = vmul.f32 0.041666668, %v4836_v16 }
0x26f1   :  { %v4848_v18 = vadd.f32 1e-05, %v4844_v44 }
0x26f2   :  { %v4842_v19 = vpop.xlane.xlu1 %4841  ;;  %v4839_v20 = vpop.xlane.xlu0 %4838 }
0x26f3   :  { %9229 = vrsqrt.f32 %v4848_v18  ;;  %v4846_v8 = vmul.f32 0.041666668, %v4842_v19  ;;  %v4845_v23 = vmul.f32 0.041666668, %v4839_v20 }
0x26f5   :  { %v4850_v9 = vadd.f32 1e-05, %v4846_v8  ;;  %v4849_v24 = vadd.f32 1e-05, %v4845_v23 }
0x26f7   :  { %9231 = vrsqrt.f32 %v4850_v9 }
0x26f8   :  { %9233 = vrsqrt.f32 %v4849_v24 }
0x26f9   :  { %v9228_v25 = vpop.eup %9227 }
0x26fa   :  { %v4855_v27 = vmul.f32 %v9228_v25, %v4823_v52 }
0x26fc   :  { %v4865_v29 = vmul.f32 %v7946_v26, %v4855_v27 }
0x26fd   :  { %v9230_v7 = vpop.eup %9229 }
0x26fe   :  { %v4856_v30 = vmul.f32 %v9230_v7, %v4824_v58  ;;  %v4875_v31 = vadd.f32 %v7947_v28, %v4865_v29 }
0x2700   :  { %8587 = vmatprep.mubr.msk.f32.mxu1 %vm4805_vm13, %v4875_v31  ;;  %v4866_v32 = vmul.f32 %v7946_v26, %v4856_v30 }
0x2701   :  { %v9232_v34 = vpop.eup %9231 }
0x2702   :  { %v9234_v21 = vpop.eup %9233  ;;  %v4876_v35 = vadd.f32 %v7947_v28, %v4866_v32  ;;  %v4858_v36 = vmul.f32 %v9232_v34, %v4826_v57 }
0x2703   :  { %v4857_v37 = vmul.f32 %v9234_v21, %v4825_v62 }
0x2704   :  { %8588 = vmatmul.mubr.msk.f32.vlgmr.msra.gmra.mrb[56].mxu1 %vm4805_vm13, %v4876_v35  ;;  %v4868_v38 = vmul.f32 %v7946_v26, %v4858_v36 }
0x2705   :  { %v4867_v39 = vmul.f32 %v7946_v26, %v4857_v37 }
0x2706   :  { %v4878_v40 = vadd.f32 %v7947_v28, %v4868_v38 }
0x2707   :  { %v4877_v41 = vadd.f32 %v7947_v28, %v4867_v39 }
0x2709   :  { %8590 = vmatprep.mubr.msk.f32.mxu1 %vm4805_vm13, %v4877_v41 }
0x270a   :  { %8591 = vmatmul.mubr.msk.f32.gmra.mrb[58].mxu1 %vm4805_vm13, %v4878_v40 }
0x27d7   :  { %v10734_v42 = vpop.f32.mrb[56].mxu1 }
0x27d8   :  { %v10736_v33 = vpop.f32.mrb[57].mxu1 }
0x27d9   :  { %8597 = vmatprep.mubr.msk.f32.mxu1 %vm731_vm5, %v10736_v33  ;;  %v10742_v43 = vpack.i.bf16 %v10734_v42, %v10736_v33 }
0x27db   :  { %9064 = vrot.lane.b32.xlu0 %v10742_v43, %s11451_s27 }
0x27dd   :  { %v10746_v45 = vpop.f32.mrb[58].mxu1 }
0x27de   :  { %v10748_v46 = vpop.f32.mrb[59].mxu1 }
0x27df   :  { %8604 = vmatprep.mubr.msk.f32.mxu0 %vm731_vm5, %v10748_v46  ;;  %v10754_v22 = vpack.i.bf16 %v10746_v45, %v10748_v46 }
0x27e1   :  { %9069 = vrot.lane.b32.xlu1 %v10754_v22, %s11451_s27  ;;  %s11465_s27 = smov 16  }
0x284d   :  { %v9065_v47 = vpop.permute.xlu0 %9064 }
0x284e   :  { %v9067_v50 = vunpack.i.h.bf16 %v9065_v47  ;;  %v9066_v51 = vunpack.i.l.bf16 %v9065_v47 }
0x2850   :  { %v8867_v53 = vpack.c.bf16 %v9067_v50, %v9066_v51 }
0x2852   :  { %8869 = vmatprep.subr.msk.bf16.mxu1 %vm10760_vm15, %v8867_v53 }
0x2853   :  { %v9070_v54 = vpop.permute.xlu1 %9069  ;;  %8872 = vmatpush3.bf16.xpose.msk.msra.mxu1 %vm10760_vm15, %v8867_v53 }
0x2854   :  { %v9072_v55 = vunpack.i.h.bf16 %v9070_v54  ;;  %v9071_v57 = vunpack.i.l.bf16 %v9070_v54 }
0x2856   :  { %v8873_v58 = vpack.c.bf16 %v9072_v55, %v9071_v57 }
0x2858   :  { %8875 = vmatprep.subr.msk.bf16.mxu0 %vm10760_vm15, %v8873_v58 }
0x2859   :  { %8878 = vmatpush3.bf16.xpose.msk.msra.mxu0 %vm10760_vm15, %v8873_v58 }
0x285a   :  { %8598 = vmatmul.mubr.msk.f32.vlgmr.msra.gmra.mrb[60].mxu1 %vm731_vm5, %v10734_v42 }
0x2860   :  { %8605 = vmatmul.mubr.msk.f32.vlgmr.msra.gmra.mrb[28].mxu0 %vm731_vm5, %v10746_v45 }
0x292d   :  { %v8599_v59 = vpop.f32.mrb[60].mxu1 }
0x292e   :  { %v5158_v60 = vmul.f32 0.35355338, %v8599_v59  ;;  %v5059_v61 = vpop.f32.mrb[61].mxu1 }
0x292f   :  { %v5157_v17 = vmul.f32 0.35355338, %v5059_v61 }
0x2930   :  { %v5165_v62 = vsel %vm5161_vm3, %v5158_v60, -inf }
0x2931   :  { %5166 = vmax.xlane.f32.xlu0 %v5165_v62  ;;  %v5162_v3 = vsel %vm5161_vm3, %v5157_v17, -inf }
0x2932   :  { %5163 = vmax.xlane.f32.xlu1 %v5162_v3 }
0x2933   :  { %v8606_v4 = vpop.f32.mrb[28].mxu0 }
0x2934   :  { %v5160_v5 = vmul.f32 0.35355338, %v8606_v4  ;;  %v5148_v6 = vpop.f32.mrb[29].mxu0 }
0x2935   :  { %v5159_v10 = vmul.f32 0.35355338, %v5148_v6 }
0x2936   :  { %v5171_v49 = vsel %vm5161_vm3, %v5160_v5, -inf }
0x2937   :  { %5172 = vmax.xlane.f32.xlu1 %v5171_v49  ;;  %v5168_v11 = vsel %vm5161_vm3, %v5159_v10, -inf }
0x2938   :  { %5169 = vmax.xlane.f32.xlu0 %v5168_v11 }
0x2948   :  { %9079 = vrot.lane.b32.xlu1 %v10754_v22, %s11454_s16 }
0x294c   :  { %9084 = vrot.lane.b32.xlu1 %v10742_v43, %s11455_s30 }
0x294e   :  { %9074 = vrot.lane.b32.xlu0 %v10742_v43, %s11454_s16  ;;  %s11466_s16 = sld [smem:[#allocation61_spill]] }
0x2950   :  { %9089 = vrot.lane.b32.xlu1 %v10754_v22, %s11455_s30  ;;  %s11467_s30 = smov 24  }
0x29be   :  { %v5167_v12 = vpop.xlane.xlu0 %5166 }
0x29bf   :  { %v5175_v0 = vsub.f32 %v5158_v60, %v5167_v12  ;;  %v5164_v13 = vpop.xlane.xlu1 %5163 }
0x29c0   :  { %v5174_v14 = vsub.f32 %v5157_v17, %v5164_v13 }
0x29c1   :  { %v5180_v15 = vmul.f32 1.442695, %v5175_v0 }
0x29c2   :  { %v5178_v16 = vmul.f32 1.442695, %v5174_v14 }
0x29c3   :  { %9235 = vpow2.f32 %v5180_v15 }
0x29c4   :  { %9237 = vpow2.f32 %v5178_v16  ;;  %v5173_v44 = vpop.xlane.xlu1 %5172 }
0x29c5   :  { %v5177_v18 = vsub.f32 %v5160_v5, %v5173_v44  ;;  %v5170_v19 = vpop.xlane.xlu0 %5169 }
0x29c6   :  { %v5176_v20 = vsub.f32 %v5159_v10, %v5170_v19 }
0x29c7   :  { %v5184_v8 = vmul.f32 1.442695, %v5177_v18 }
0x29c8   :  { %v5182_v23 = vmul.f32 1.442695, %v5176_v20  ;;  %v9080_v9 = vpop.permute.xlu1 %9079 }
0x29c9   :  { %9239 = vpow2.f32 %v5184_v8  ;;  %v9082_v24 = vunpack.i.h.bf16 %v9080_v9  ;;  %v9081_v25 = vunpack.i.l.bf16 %v9080_v9  ;;  %v9075_v26 = vpop.permute.xlu0 %9074 }
0x29ca   :  { %9241 = vpow2.f32 %v5182_v23  ;;  %v9077_v27 = vunpack.i.h.bf16 %v9075_v26  ;;  %v9076_v28 = vunpack.i.l.bf16 %v9075_v26 }
0x29cb   :  { %v8883_v29 = vpack.c.bf16 %v9082_v24, %v9081_v25 }
0x29cc   :  { %v8879_v7 = vpack.c.bf16 %v9077_v27, %v9076_v28  ;;  %v9085_v30 = vpop.permute.xlu1 %9084 }
0x29cd   :  { %v9236_v31 = vpop.eup %9235  ;;  %v9087_v32 = vunpack.i.h.bf16 %v9085_v30  ;;  %v9086_v34 = vunpack.i.l.bf16 %v9085_v30  ;;  %8884 = vmatprep.subr.bf16.mxu0 %v8883_v29 }
0x29ce   :  { %v9238_v21 = vpop.eup %9237  ;;  %8880 = vmatprep.subr.bf16.mxu1 %v8879_v7  ;;  %8886 = vmatpush3.bf16.msra.mxu0 %v8883_v29  ;;  %v5189_v35 = vsel %vm5161_vm3, %v9236_v31, 0.0 }
0x29cf   :  { %v8887_v36 = vpack.c.bf16 %v9087_v32, %v9086_v34  ;;  %8882 = vmatpush3.bf16.msra.mxu1 %v8879_v7  ;;  %5190 = vadd.xlane.f32.xlu1 %v5189_v35  ;;  %v5186_v37 = vsel %vm5161_vm3, %v9238_v21, 0.0 }
0x29d0   :  { %v9090_v38 = vpop.permute.xlu1 %9089  ;;  %5187 = vadd.xlane.f32.xlu0 %v5186_v37 }
0x29d1   :  { %v9092_v39 = vunpack.i.h.bf16 %v9090_v38  ;;  %v9091_v40 = vunpack.i.l.bf16 %v9090_v38  ;;  %8889 = vmatprep.subr.msk.bf16.mxu1 %vm10760_vm15, %v8887_v36 }
0x29d3   :  { %v9240_v41 = vpop.eup %9239  ;;  %v8893_v47 = vpack.c.bf16 %v9092_v39, %v9091_v40 }
0x29d4   :  { %v9242_v50 = vpop.eup %9241  ;;  %v5195_v51 = vsel %vm5161_vm3, %v9240_v41, 0.0 }
0x29d5   :  { %5196 = vadd.xlane.f32.xlu1 %v5195_v51  ;;  %8895 = vmatprep.subr.msk.bf16.mxu0 %vm10760_vm15, %v8893_v47  ;;  %v5192_v53 = vsel %vm5161_vm3, %v9242_v50, 0.0 }
0x29d6   :  { %5193 = vadd.xlane.f32.xlu0 %v5192_v53 }
0x29e6   :  { %5386 = vrot.lane.b32.xlu1 %v10734_v42, %s11456_s19 }
0x29ea   :  { %5477 = vrot.lane.b32.xlu1 %v10746_v45, %s11456_s19 }
0x29ec   :  { %5384 = vrot.lane.b32.xlu0 %v10736_v33, %s11456_s19 }
0x29f0   :  { %5475 = vrot.lane.b32.xlu0 %v10748_v46, %s11456_s19  ;;  %s11468_s19 = sld [smem:[#allocation62_spill]] }
0x2a5c   :  { %v5191_v54 = vpop.xlane.xlu1 %5190 }
0x2a5d   :  { %9243 = vrcp.f32 %v5191_v54  ;;  %v5188_v55 = vpop.xlane.xlu0 %5187 }
0x2a5e   :  { %9245 = vrcp.f32 %v5188_v55 }
0x2a62   :  { %v5197_v57 = vpop.xlane.xlu1 %5196 }
0x2a63   :  { %9247 = vrcp.f32 %v5197_v57  ;;  %v5194_v58 = vpop.xlane.xlu0 %5193 }
0x2a64   :  { %9249 = vrcp.f32 %v5194_v58 }
0x2a66   :  { %v5387_v49 = vpop.permute.xlu1 %5386 }
0x2a67   :  { %v9244_v59 = vpop.eup %9243  ;;  %v5385_v62 = vpop.permute.xlu0 %5384 }
0x2a68   :  { %v9246_v60 = vpop.eup %9245  ;;  %v5201_v17 = vmul.f32 %v9244_v59, %v9236_v31 }
0x2a69   :  { %v5199_v61 = vmul.f32 %v9246_v60, %v9238_v21 }
0x2a6a   :  { %v5478_v11 = vpop.permute.xlu1 %5477 }
0x2a6b   :  { %8611 = vmatprep.mubr.msk.f32.mxu1 %vm5161_vm3, %v5199_v61  ;;  %v5476_v10 = vpop.permute.xlu0 %5475 }
0x2a6c   :  { %8612 = vmatmul.mubr.msk.f32.vlgmr.msra.gmra.mrb[62].mxu1 %vm5161_vm3, %v5201_v17 }
0x2a6d   :  { %v9248_v3 = vpop.eup %9247  ;;  %8892 = vmatpush3.bf16.xpose.msk.msra.mxu1 %vm10760_vm15, %v8887_v36  ;;  %8625 = vmatprep.mubr.msk.f32.mxu1 %vm731_vm5, %v5385_v62 }
0x2a6e   :  { %v9250_v4 = vpop.eup %9249  ;;  %v5205_v6 = vmul.f32 %v9248_v3, %v9240_v41 }
0x2a6f   :  { %v5203_v5 = vmul.f32 %v9250_v4, %v9242_v50 }
0x2a71   :  { %8618 = vmatprep.mubr.msk.f32.mxu0 %vm5161_vm3, %v5203_v5 }
0x2a72   :  { %8619 = vmatmul.mubr.msk.f32.vlgmr.msra.gmra.mrb[30].mxu0 %vm5161_vm3, %v5205_v6 }
0x2a73   :  { %8898 = vmatpush3.bf16.xpose.msk.msra.mxu0 %vm10760_vm15, %v8893_v47  ;;  %8632 = vmatprep.mubr.msk.f32.mxu0 %vm731_vm5, %v5476_v10 }
0x2a74   :  { %8626 = vmatmul.mubr.msk.f32.vlgmr.msra.gmra.mrb[64].mxu1 %vm731_vm5, %v5387_v49 }
0x2a7a   :  { %8633 = vmatmul.mubr.msk.f32.vlgmr.msra.gmra.mrb[32].mxu0 %vm731_vm5, %v5478_v11 }
0x2b3f   :  { %v8613_v12 = vpop.f32.mrb[62].mxu1 }
0x2b40   :  { %5381 = vst.msk [vmem:[#allocation5 + $0x8] sm:$0xff] %vm731_vm5, %v8613_v12  ;;  %v5284_v0 = vpop.f32.mrb[63].mxu1 }
0x2b41   :  { %5380 = vst.msk [vmem:[#allocation5] sm:$0xff] %vm731_vm5, %v5284_v0 }
0x2b45   :  { %v8620_v13 = vpop.f32.mrb[30].mxu0 }
0x2b46   :  { %5383 = vst.msk [vmem:[#allocation5 + $0x18] sm:$0xff] %vm731_vm5, %v8620_v13  ;;  %v5371_v14 = vpop.f32.mrb[31].mxu0 }
0x2b47   :  { %5382 = vst.msk [vmem:[#allocation5 + $0x10] sm:$0xff] %vm731_vm5, %v5371_v14  ;;  %v8627_v15 = vpop.f32.mrb[64].mxu1 }
0x2b48   :  { %v5567_v16 = vmul.f32 0.35355338, %v8627_v15  ;;  %v5466_v44 = vpop.f32.mrb[65].mxu1 }
0x2b49   :  { %v5566_v18 = vmul.f32 0.35355338, %v5466_v44 }
0x2b4a   :  { %v5573_v19 = vsel %vm5161_vm3, %v5567_v16, -inf }
0x2b4b   :  { %5574 = vmax.xlane.f32.xlu1 %v5573_v19  ;;  %v5570_v20 = vsel %vm5161_vm3, %v5566_v18, -inf }
0x2b4c   :  { %5571 = vmax.xlane.f32.xlu0 %v5570_v20 }
0x2b4d   :  { %v8634_v8 = vpop.f32.mrb[32].mxu0 }
0x2b4e   :  { %v5557_v23 = vpop.f32.mrb[33].mxu0  ;;  %v5569_v24 = vmul.f32 0.35355338, %v8634_v8 }
0x2b4f   :  { %v5568_v9 = vmul.f32 0.35355338, %v5557_v23 }
0x2b50   :  { %v5579_v26 = vsel %vm5161_vm3, %v5569_v24, -inf }
0x2b51   :  { %v5576_v25 = vsel %vm5161_vm3, %v5568_v9, -inf }
0x2b52   :  { %5577 = vmax.xlane.f32.xlu0 %v5576_v25 }
0x2b56   :  { %5580 = vmax.xlane.f32.xlu0 %v5579_v26 }
0x2b5c   :  { %9099 = vrot.lane.b32.xlu1 %v10754_v22, %s11457_s15 }
0x2b60   :  { %9104 = vrot.lane.b32.xlu1 %v10742_v43, %s11458_s26 }
0x2b64   :  { %9109 = vrot.lane.b32.xlu1 %v10754_v22, %s11458_s26  ;;  %s11470_s26 = sld [smem:[#allocation66_spill]] }
0x2b6a   :  { %s4353_s2 = sshra.s32 %s11470_s26, 3  ;;  %s4356_s1 = sand.u32 7, %s11470_s26 }
0x2b6c   :  { %9094 = vrot.lane.b32.xlu0 %v10742_v43, %s11457_s15  ;;  %s11469_s15 = sld [smem:[#allocation63_spill]] }
0x2bd8   :  { %v5575_v27 = vpop.xlane.xlu1 %5574 }
0x2bd9   :  { %v5583_v28 = vsub.f32 %v5567_v16, %v5575_v27  ;;  %v5572_v29 = vpop.xlane.xlu0 %5571 }
0x2bda   :  { %v5582_v7 = vsub.f32 %v5566_v18, %v5572_v29 }
0x2bdb   :  { %v5588_v30 = vmul.f32 1.442695, %v5583_v28 }
0x2bdc   :  { %v5586_v31 = vmul.f32 1.442695, %v5582_v7  ;;  %v9100_v32 = vpop.permute.xlu1 %9099 }
0x2bdd   :  { %9251 = vpow2.f32 %v5588_v30  ;;  %v9102_v34 = vunpack.i.h.bf16 %v9100_v32  ;;  %v9101_v21 = vunpack.i.l.bf16 %v9100_v32 }
0x2bde   :  { %9253 = vpow2.f32 %v5586_v31 }
0x2bdf   :  { %v8903_v35 = vpack.c.bf16 %v9102_v34, %v9101_v21  ;;  %v5578_v36 = vpop.xlane.xlu0 %5577 }
0x2be0   :  { %v5584_v37 = vsub.f32 %v5568_v9, %v5578_v36  ;;  %v9105_v38 = vpop.permute.xlu1 %9104 }
0x2be1   :  { %8904 = vmatprep.subr.bf16.mxu0 %v8903_v35  ;;  %v9107_v55 = vunpack.i.h.bf16 %v9105_v38  ;;  %v9106_v57 = vunpack.i.l.bf16 %v9105_v38 }
0x2be2   :  { %v5590_v39 = vmul.f32 1.442695, %v5584_v37  ;;  %8906 = vmatpush3.bf16.msra.mxu0 %v8903_v35 }
0x2be3   :  { %v5581_v40 = vpop.xlane.xlu0 %5580  ;;  %v8907_v5 = vpack.c.bf16 %v9107_v55, %v9106_v57 }
0x2be4   :  { %9255 = vpow2.f32 %v5590_v39  ;;  %v5585_v41 = vsub.f32 %v5569_v24, %v5581_v40  ;;  %v9110_v47 = vpop.permute.xlu1 %9109 }
0x2be5   :  { %v9112_v50 = vunpack.i.h.bf16 %v9110_v47  ;;  %v9111_v51 = vunpack.i.l.bf16 %v9110_v47 }
0x2be6   :  { %v5592_v53 = vmul.f32 1.442695, %v5585_v41 }
0x2be7   :  { %v9252_v54 = vpop.eup %9251  ;;  %v8913_v58 = vpack.c.bf16 %v9112_v50, %v9111_v51  ;;  %v9095_v59 = vpop.permute.xlu0 %9094 }
0x2be8   :  { %v9254_v60 = vpop.eup %9253  ;;  %9257 = vpow2.f32 %v5592_v53  ;;  %v9097_v61 = vunpack.i.h.bf16 %v9095_v59  ;;  %v9096_v17 = vunpack.i.l.bf16 %v9095_v59  ;;  %v5597_v62 = vsel %vm5161_vm3, %v9252_v54, 0.0 }
0x2be9   :  { %5598 = vadd.xlane.f32.xlu1 %v5597_v62  ;;  %8915 = vmatprep.subr.msk.bf16.mxu0 %vm10760_vm15, %v8913_v58  ;;  %v5594_v3 = vsel %vm5161_vm3, %v9254_v60, 0.0 }
0x2bea   :  { %v8899_v4 = vpack.c.bf16 %v9097_v61, %v9096_v17  ;;  %5595 = vadd.xlane.f32.xlu0 %v5594_v3 }
0x2bec   :  { %8900 = vmatprep.subr.bf16.mxu1 %v8899_v4 }
0x2bed   :  { %8902 = vmatpush3.bf16.msra.mxu1 %v8899_v4 }
0x2bee   :  { %v9256_v6 = vpop.eup %9255  ;;  %8909 = vmatprep.subr.msk.bf16.mxu1 %vm10760_vm15, %v8907_v5 }
0x2bef   :  { %v5600_v10 = vsel %vm5161_vm3, %v9256_v6, 0.0 }
0x2bf0   :  { %5601 = vadd.xlane.f32.xlu0 %v5600_v10 }
0x2bf2   :  { %v9258_v49 = vpop.eup %9257 }
0x2bf3   :  { %v5603_v11 = vsel %vm5161_vm3, %v9258_v49, 0.0 }
0x2bf4   :  { %5604 = vadd.xlane.f32.xlu1 %v5603_v11 }
0x2c05   :  { %5810 = vrot.lane.b32.xlu1 %v10734_v42, %s11459_s17 }
0x2c06   :  { %5808 = vrot.lane.b32.xlu0 %v10736_v33, %s11459_s17 }
0x2c09   :  { %5901 = vrot.lane.b32.xlu1 %v10746_v45, %s11459_s17 }
0x2c0a   :  { %5899 = vrot.lane.b32.xlu0 %v10748_v46, %s11459_s17  ;;  %s4318_s17 = sshra.s32 %s10509_s6, 3 }
0x2c76   :  { %v5599_v12 = vpop.xlane.xlu1 %5598 }
0x2c77   :  { %9259 = vrcp.f32 %v5599_v12  ;;  %v5596_v0 = vpop.xlane.xlu0 %5595 }
0x2c78   :  { %9261 = vrcp.f32 %v5596_v0 }
0x2c7d   :  { %v5602_v13 = vpop.xlane.xlu0 %5601 }
0x2c7e   :  { %9263 = vrcp.f32 %v5602_v13 }
0x2c81   :  { %v9260_v14 = vpop.eup %9259  ;;  %v5605_v15 = vpop.xlane.xlu1 %5604 }
0x2c82   :  { %v9262_v16 = vpop.eup %9261  ;;  %9265 = vrcp.f32 %v5605_v15  ;;  %v5609_v18 = vmul.f32 %v9260_v14, %v9252_v54  ;;  %v5809_v19 = vpop.permute.xlu0 %5808 }
0x2c83   :  { %v5607_v44 = vmul.f32 %v9262_v16, %v9254_v60 }
0x2c85   :  { %8639 = vmatprep.mubr.msk.f32.mxu1 %vm5161_vm3, %v5607_v44  ;;  %v5811_v24 = vpop.permute.xlu1 %5810 }
0x2c86   :  { %8640 = vmatmul.mubr.msk.f32.vlgmr.msra.gmra.mrb[66].mxu1 %vm5161_vm3, %v5609_v18  ;;  %v5900_v25 = vpop.permute.xlu0 %5899 }
0x2c87   :  { %8912 = vmatpush3.bf16.xpose.msk.msra.mxu1 %vm10760_vm15, %v8907_v5  ;;  %8653 = vmatprep.mubr.msk.f32.mxu1 %vm731_vm5, %v5809_v19 }
0x2c88   :  { %v9264_v20 = vpop.eup %9263 }
0x2c89   :  { %v5611_v8 = vmul.f32 %v9264_v20, %v9256_v6  ;;  %v5902_v26 = vpop.permute.xlu1 %5901 }
0x2c8b   :  { %8646 = vmatprep.mubr.msk.f32.mxu0 %vm5161_vm3, %v5611_v8 }
0x2c8c   :  { %v9266_v23 = vpop.eup %9265 }
0x2c8d   :  { %v5613_v9 = vmul.f32 %v9266_v23, %v9258_v49 }
0x2c8e   :  { %8654 = vmatmul.mubr.msk.f32.vlgmr.msra.gmra.mrb[68].mxu1 %vm731_vm5, %v5811_v24 }
0x2c8f   :  { %8647 = vmatmul.mubr.msk.f32.vlgmr.msra.gmra.mrb[34].mxu0 %vm5161_vm3, %v5613_v9 }
0x2c90   :  { %8918 = vmatpush3.bf16.xpose.msk.msra.mxu0 %vm10760_vm15, %v8913_v58  ;;  %8660 = vmatprep.mubr.msk.f32.mxu0 %vm731_vm5, %v5900_v25 }
0x2c97   :  { %8661 = vmatmul.mubr.msk.f32.vlgmr.msra.gmra.mrb[36].mxu0 %vm731_vm5, %v5902_v26 }
0x2d59   :  { %v10860_v27 = vpop.f32.mrb[66].mxu1 }
0x2d5a   :  { %v10862_v28 = vpop.f32.mrb[67].mxu1 }
0x2d61   :  { %v8655_v29 = vpop.f32.mrb[68].mxu1 }
0x2d62   :  { %v5991_v7 = vmul.f32 0.35355338, %v8655_v29  ;;  %v10864_v30 = vpop.f32.mrb[34].mxu0  ;;  %v5890_v31 = vpop.f32.mrb[69].mxu1 }
0x2d63   :  { %v5990_v32 = vmul.f32 0.35355338, %v5890_v31  ;;  %v10866_v34 = vpop.f32.mrb[35].mxu0 }
0x2d64   :  { %v5997_v21 = vsel %vm5161_vm3, %v5991_v7, -inf }
0x2d65   :  { %5998 = vmax.xlane.f32.xlu1 %v5997_v21  ;;  %v5994_v35 = vsel %vm5161_vm3, %v5990_v32, -inf }
0x2d66   :  { %5995 = vmax.xlane.f32.xlu0 %v5994_v35 }
0x2d6a   :  { %v8662_v36 = vpop.f32.mrb[36].mxu0 }
0x2d6b   :  { %v5981_v37 = vpop.f32.mrb[37].mxu0  ;;  %v5993_v39 = vmul.f32 0.35355338, %v8662_v36 }
0x2d6c   :  { %v5992_v38 = vmul.f32 0.35355338, %v5981_v37 }
0x2d6d   :  { %v6003_v41 = vsel %vm5161_vm3, %v5993_v39, -inf }
0x2d6e   :  { %v6000_v40 = vsel %vm5161_vm3, %v5992_v38, -inf }
0x2d6f   :  { %6001 = vmax.xlane.f32.xlu0 %v6000_v40 }
0x2d73   :  { %6004 = vmax.xlane.f32.xlu0 %v6003_v41 }
0x2d76   :  { %9119 = vrot.lane.b32.xlu1 %v10754_v22, %s11460_s21 }
0x2d7a   :  { %9124 = vrot.lane.b32.xlu1 %v10742_v43, %s11461_s10 }
0x2d7e   :  { %9129 = vrot.lane.b32.xlu1 %v10754_v22, %s11461_s10  ;;  %s4321_s10 = sand.u32 7, %s10509_s6  ;;  %s11473_s6 = sld [smem:[#allocation69_spill]] }
0x2d89   :  { %9114 = vrot.lane.b32.xlu0 %v10742_v43, %s11460_s21  ;;  %s11471_s21 = sld [smem:[#allocation67_spill]] }
0x2d8f   :  { %s4371_s3 = sshra.s32 %s11471_s21, 3 }
0x2df2   :  { %v5999_v47 = vpop.xlane.xlu1 %5998 }
0x2df3   :  { %v6007_v50 = vsub.f32 %v5991_v7, %v5999_v47  ;;  %v5996_v51 = vpop.xlane.xlu0 %5995 }
0x2df4   :  { %v6006_v53 = vsub.f32 %v5990_v32, %v5996_v51 }
0x2df5   :  { %v6012_v54 = vmul.f32 1.442695, %v6007_v50 }
0x2df6   :  { %v6010_v55 = vmul.f32 1.442695, %v6006_v53  ;;  %v9120_v57 = vpop.permute.xlu1 %9119 }
0x2df7   :  { %9267 = vpow2.f32 %v6012_v54  ;;  %v9122_v58 = vunpack.i.h.bf16 %v9120_v57  ;;  %v9121_v59 = vunpack.i.l.bf16 %v9120_v57 }
0x2df8   :  { %9269 = vpow2.f32 %v6010_v55 }
0x2df9   :  { %v8923_v60 = vpack.c.bf16 %v9122_v58, %v9121_v59 }
0x2dfa   :  { %v9125_v61 = vpop.permute.xlu1 %9124 }
0x2dfb   :  { %8924 = vmatprep.subr.bf16.mxu0 %v8923_v60  ;;  %v9127_v16 = vunpack.i.h.bf16 %v9125_v61  ;;  %v9126_v18 = vunpack.i.l.bf16 %v9125_v61 }
0x2dfc   :  { %v6002_v17 = vpop.xlane.xlu0 %6001  ;;  %8926 = vmatpush3.bf16.msra.mxu0 %v8923_v60 }
0x2dfd   :  { %v6008_v62 = vsub.f32 %v5992_v38, %v6002_v17  ;;  %v8927_v23 = vpack.c.bf16 %v9127_v16, %v9126_v18 }
0x2dfe   :  { %v9130_v3 = vpop.permute.xlu1 %9129 }
0x2dff   :  { %v6014_v4 = vmul.f32 1.442695, %v6008_v62  ;;  %v9132_v5 = vunpack.i.h.bf16 %v9130_v3  ;;  %v9131_v6 = vunpack.i.l.bf16 %v9130_v3 }
0x2e00   :  { %v6005_v10 = vpop.xlane.xlu0 %6004 }
0x2e01   :  { %v9268_v49 = vpop.eup %9267  ;;  %9271 = vpow2.f32 %v6014_v4  ;;  %v8933_v11 = vpack.c.bf16 %v9132_v5, %v9131_v6  ;;  %v6009_v12 = vsub.f32 %v5993_v39, %v6005_v10 }
0x2e02   :  { %v9270_v0 = vpop.eup %9269  ;;  %v6021_v13 = vsel %vm5161_vm3, %v9268_v49, 0.0 }
0x2e03   :  { %v6016_v14 = vmul.f32 1.442695, %v6009_v12  ;;  %6022 = vadd.xlane.f32.xlu1 %v6021_v13  ;;  %8935 = vmatprep.subr.msk.bf16.mxu0 %vm10760_vm15, %v8933_v11  ;;  %v6018_v15 = vsel %vm5161_vm3, %v9270_v0, 0.0 }
0x2e04   :  { %v9115_v44 = vpop.permute.xlu0 %9114  ;;  %6019 = vadd.xlane.f32.xlu0 %v6018_v15 }
0x2e05   :  { %9273 = vpow2.f32 %v6016_v14  ;;  %v9117_v19 = vunpack.i.h.bf16 %v9115_v44  ;;  %v9116_v20 = vunpack.i.l.bf16 %v9115_v44 }
0x2e07   :  { %v8919_v8 = vpack.c.bf16 %v9117_v19, %v9116_v20 }
0x2e09   :  { %8920 = vmatprep.subr.bf16.mxu1 %v8919_v8 }
0x2e0a   :  { %8922 = vmatpush3.bf16.msra.mxu1 %v8919_v8 }
0x2e0b   :  { %v9272_v9 = vpop.eup %9271  ;;  %8929 = vmatprep.subr.msk.bf16.mxu1 %vm10760_vm15, %v8927_v23 }
0x2e0c   :  { %v6024_v24 = vsel %vm5161_vm3, %v9272_v9, 0.0 }
0x2e0d   :  { %6025 = vadd.xlane.f32.xlu0 %v6024_v24 }
0x2e0f   :  { %v9274_v25 = vpop.eup %9273 }
0x2e10   :  { %v6027_v26 = vsel %vm5161_vm3, %v9274_v25, 0.0 }
0x2e11   :  { %6028 = vadd.xlane.f32.xlu1 %v6027_v26 }
0x2e22   :  { %6234 = vrot.lane.b32.xlu1 %v10734_v42, %s11462_s8 }
0x2e23   :  { %6232 = vrot.lane.b32.xlu0 %v10736_v33, %s11462_s8 }
0x2e26   :  { %6325 = vrot.lane.b32.xlu1 %v10746_v45, %s11462_s8 }
0x2e27   :  { %6323 = vrot.lane.b32.xlu0 %v10748_v46, %s11462_s8  ;;  %s8063_s8 = sshll.u32 %s4318_s17, 4  ;;  %s8065_s17 = sshll.u32 %s4353_s2, 4 }
0x2e90   :  { %v6023_v29 = vpop.xlane.xlu1 %6022 }
0x2e91   :  { %9275 = vrcp.f32 %v6023_v29  ;;  %v6020_v7 = vpop.xlane.xlu0 %6019 }
0x2e92   :  { %9277 = vrcp.f32 %v6020_v7 }
0x2e9a   :  { %v6026_v31 = vpop.xlane.xlu0 %6025 }
0x2e9b   :  { %v9276_v32 = vpop.eup %9275  ;;  %9279 = vrcp.f32 %v6026_v31 }
0x2e9c   :  { %v9278_v21 = vpop.eup %9277  ;;  %v6033_v36 = vmul.f32 %v9276_v32, %v9268_v49 }
0x2e9d   :  { %v6031_v35 = vmul.f32 %v9278_v21, %v9270_v0 }
0x2e9e   :  { %v6029_v42 = vpop.xlane.xlu1 %6028  ;;  %v6233_v33 = vpop.permute.xlu0 %6232 }
0x2e9f   :  { %9281 = vrcp.f32 %v6029_v42  ;;  %8667 = vmatprep.mubr.msk.f32.mxu1 %vm5161_vm3, %v6031_v35 }
0x2ea0   :  { %8668 = vmatmul.mubr.msk.f32.vlgmr.msra.gmra.mrb[70].mxu1 %vm5161_vm3, %v6033_v36 }
0x2ea1   :  { %8932 = vmatpush3.bf16.xpose.msk.msra.mxu1 %vm10760_vm15, %v8927_v23  ;;  %8681 = vmatprep.mubr.msk.f32.mxu1 %vm731_vm5, %v6233_v33 }
0x2ea2   :  { %v6235_v37 = vpop.permute.xlu1 %6234  ;;  %v6324_v40 = vpop.permute.xlu0 %6323 }
0x2ea5   :  { %v9280_v45 = vpop.eup %9279 }
0x2ea6   :  { %v6035_v46 = vmul.f32 %v9280_v45, %v9272_v9  ;;  %v6326_v41 = vpop.permute.xlu1 %6325 }
0x2ea8   :  { %8674 = vmatprep.mubr.msk.f32.mxu0 %vm5161_vm3, %v6035_v46  ;;  %8682 = vmatmul.mubr.msk.f32.vlgmr.msra.gmra.mrb[72].mxu1 %vm731_vm5, %v6235_v37 }
0x2ea9   :  { %v9282_v38 = vpop.eup %9281 }
0x2eaa   :  { %v6037_v39 = vmul.f32 %v9282_v38, %v9274_v25 }
0x2eac   :  { %8675 = vmatmul.mubr.msk.f32.vlgmr.msra.gmra.mrb[38].mxu0 %vm5161_vm3, %v6037_v39 }
0x2ead   :  { %8938 = vmatpush3.bf16.xpose.msk.msra.mxu0 %vm10760_vm15, %v8933_v11  ;;  %8688 = vmatprep.mubr.msk.f32.mxu0 %vm731_vm5, %v6324_v40 }
0x2eb4   :  { %8689 = vmatmul.mubr.msk.f32.vlgmr.msra.gmra.mrb[40].mxu0 %vm731_vm5, %v6326_v41 }
0x2f73   :  { %v8669_v47 = vpop.f32.mrb[70].mxu1 }
0x2f74   :  { %v6116_v50 = vpop.f32.mrb[71].mxu1 }
0x2f7b   :  { %v8683_v51 = vpop.f32.mrb[72].mxu1 }
0x2f7c   :  { %v6415_v53 = vmul.f32 0.35355338, %v8683_v51  ;;  %v6314_v54 = vpop.f32.mrb[73].mxu1 }
0x2f7d   :  { %v6414_v55 = vmul.f32 0.35355338, %v6314_v54 }
0x2f7e   :  { %v6421_v57 = vsel %vm5161_vm3, %v6415_v53, -inf }
0x2f7f   :  { %v8676_v58 = vpop.f32.mrb[38].mxu0  ;;  %6422 = vmax.xlane.f32.xlu1 %v6421_v57  ;;  %v6418_v59 = vsel %vm5161_vm3, %v6414_v55, -inf  ;;  %v6661_v57 = vld [vmem:[%s11466_s16 + $0x8] sm:$0xff] }
0x2f80   :  { %v6203_v60 = vpop.f32.mrb[39].mxu0  ;;  %6419 = vmax.xlane.f32.xlu0 %v6418_v59  ;;  %v6662_v59 = vld [vmem:[%s11466_s16 + $0x10] sm:$0xff] }
0x2f87   :  { %v8690_v52 = vpop.f32.mrb[40].mxu0 }
0x2f88   :  { %v6405_v61 = vpop.f32.mrb[41].mxu0  ;;  %v6417_v62 = vmul.f32 0.35355338, %v8690_v52 }
0x2f89   :  { %v6416_v17 = vmul.f32 0.35355338, %v6405_v61 }
0x2f8a   :  { %v6427_v4 = vsel %vm5161_vm3, %v6417_v62, -inf }
0x2f8b   :  { %v6424_v3 = vsel %vm5161_vm3, %v6416_v17, -inf }
0x2f8c   :  { %6425 = vmax.xlane.f32.xlu0 %v6424_v3 }
0x2f90   :  { %6428 = vmax.xlane.f32.xlu0 %v6427_v4 }
0x300c   :  { %v6423_v5 = vpop.xlane.xlu1 %6422 }
0x300d   :  { %v6431_v6 = vsub.f32 %v6415_v53, %v6423_v5  ;;  %v6420_v10 = vpop.xlane.xlu0 %6419 }
0x300e   :  { %v6430_v49 = vsub.f32 %v6414_v55, %v6420_v10  ;;  %v6660_v55 = vld [vmem:[%s11466_s16] sm:$0xff] }
0x300f   :  { %v6436_v11 = vmul.f32 1.442695, %v6431_v6 }
0x3010   :  { %v6434_v12 = vmul.f32 1.442695, %v6430_v49 }
0x3011   :  { %9283 = vpow2.f32 %v6436_v11 }
0x3012   :  { %9285 = vpow2.f32 %v6434_v12 }
0x3019   :  { %v6426_v0 = vpop.xlane.xlu0 %6425 }
0x301a   :  { %v6432_v13 = vsub.f32 %v6416_v17, %v6426_v0 }
0x301b   :  { %v9284_v14 = vpop.eup %9283 }
0x301c   :  { %v9286_v15 = vpop.eup %9285  ;;  %v6438_v16 = vmul.f32 1.442695, %v6432_v13  ;;  %v6445_v44 = vsel %vm5161_vm3, %v9284_v14, 0.0  ;;  %v8000_v13 = vld [vmem:[#allocation15] ss:$0 sm:$0xff] }
0x301d   :  { %v6429_v18 = vpop.xlane.xlu0 %6428  ;;  %6446 = vadd.xlane.f32.xlu1 %v6445_v44  ;;  %v6442_v19 = vsel %vm5161_vm3, %v9286_v15, 0.0 }
0x301e   :  { %9287 = vpow2.f32 %v6438_v16  ;;  %v6433_v20 = vsub.f32 %v6417_v62, %v6429_v18  ;;  %6443 = vadd.xlane.f32.xlu0 %v6442_v19  ;;  %v9323_v18 = vld [vmem:[#allocation6 + $0x8] sm:$0xff] }
0x3020   :  { %v6440_v8 = vmul.f32 1.442695, %v6433_v20  ;;  %v9324_v20 = vld [vmem:[#allocation6] sm:$0xff] }
0x3022   :  { %9289 = vpow2.f32 %v6440_v8 }
0x3028   :  { %v9288_v23 = vpop.eup %9287 }
0x3029   :  { %v6448_v9 = vsel %vm5161_vm3, %v9288_v23, 0.0 }
0x302a   :  { %6449 = vadd.xlane.f32.xlu0 %v6448_v9 }
0x302c   :  { %v9290_v24 = vpop.eup %9289 }
0x302d   :  { %v6451_v25 = vsel %vm5161_vm3, %v9290_v24, 0.0 }
0x302e   :  { %6452 = vadd.xlane.f32.xlu1 %v6451_v25 }
0x303f   :  { %9139 = vrot.lane.b32.xlu1 %v10754_v22, %s11463_s28 }
0x3040   :  { %9134 = vrot.lane.b32.xlu0 %v10742_v43, %s11463_s28  ;;  %s4335_s28 = sshra.s32 %s10511_s7, 3 }
0x3043   :  { %5792 = vrot.lane.b32.xlu1 %v10862_v28, %s11464_s23 }
0x3044   :  { %6216 = vrot.lane.b32.xlu0 %v6116_v50, %s11465_s27 }
0x3047   :  { %5794 = vrot.lane.b32.xlu1 %v10860_v27, %s11464_s23 }
0x3048   :  { %5796 = vrot.lane.b32.xlu0 %v10866_v34, %s11464_s23 }
0x304b   :  { %6218 = vrot.lane.b32.xlu1 %v8669_v47, %s11465_s27 }
0x304c   :  { %6220 = vrot.lane.b32.xlu0 %v6203_v60, %s11465_s27  ;;  %v6663_v60 = vld [vmem:[%s11466_s16 + $0x18] sm:$0xff] }
0x304d   :  { %v8951_v52 = vpack.c.bf16 %v6663_v60, %v6662_v59  ;;  %v6848_v59 = vld [vmem:[%s11468_s19 + $0x10] sm:$0xff] }
0x304f   :  { %5798 = vrot.lane.b32.xlu1 %v10864_v30, %s11464_s23  ;;  %s4324_s23 = sadd.s32 %s8063_s8, %s4321_s10  ;;  %s4374_s10 = sand.u32 7, %s11471_s21 }
0x3050   :  { %s4325_s16 = scalar_lea.vmem %s9613_s13, %s4324_s23  ;;  %s11474_s23 = sld [smem:[#allocation70_spill]] }
0x3053   :  { %6222 = vrot.lane.b32.xlu1 %v8676_v58, %s11465_s27  ;;  %v8947_v58 = vpack.c.bf16 %v6661_v57, %v6660_v55  ;;  %v6846_v55 = vld [vmem:[%s11468_s19] sm:$0xff]  ;;  %v6847_v57 = vld [vmem:[%s11468_s19 + $0x8] sm:$0xff]  ;;  %s4338_s27 = sand.u32 7, %s10511_s7  ;;  %s11472_s19 = sld [smem:[#allocation68_spill]] }
0x3054   :  { %s4359_s7 = sadd.s32 %s8065_s17, %s4356_s1 }
0x3055   :  { %s4360_s8 = scalar_lea.vmem %s9613_s13, %s4359_s7 }
0x3059   :  { %s4392_s26 = sand.u32 7, %s11472_s19 }
0x30aa   :  { %v6447_v22 = vpop.xlane.xlu1 %6446 }
0x30ab   :  { %v6444_v43 = vpop.xlane.xlu0 %6443 }
0x30ac   :  { %9291 = vrcp.f32 %v6444_v43 }
0x30ad   :  { %9293 = vrcp.f32 %v6447_v22 }
0x30b6   :  { %v9292_v28 = vpop.eup %9291 }
0x30b7   :  { %v6450_v26 = vpop.xlane.xlu0 %6449  ;;  %v6455_v29 = vmul.f32 %v9292_v28, %v9286_v15  ;;  %v9294_v21 = vpop.eup %9293  ;;  %v9325_v28 = vld [vmem:[#allocation6 + $0x10] sm:$0xff] }
0x30b8   :  { %9295 = vrcp.f32 %v6450_v26  ;;  %v6457_v45 = vmul.f32 %v9294_v21, %v9284_v14 }
0x30b9   :  { %8695 = vmatprep.mubr.msk.f32.mxu1 %vm5161_vm3, %v6455_v29  ;;  %v9326_v29 = vld [vmem:[#allocation6 + $0x18] sm:$0xff] }
0x30bb   :  { %v6453_v27 = vpop.xlane.xlu1 %6452  ;;  %v9135_v34 = vpop.permute.xlu0 %9134 }
0x30bc   :  { %9297 = vrcp.f32 %v6453_v27  ;;  %v9137_v7 = vunpack.i.h.bf16 %v9135_v34  ;;  %v9136_v31 = vunpack.i.l.bf16 %v9135_v34 }
0x30be   :  { %v8939_v32 = vpack.c.bf16 %v9137_v7, %v9136_v31 }
0x30bf   :  { %v9140_v30 = vpop.permute.xlu1 %9139  ;;  %v6217_v35 = vpop.permute.xlu0 %6216 }
0x30c0   :  { %v9142_v36 = vunpack.i.h.bf16 %v9140_v30  ;;  %v9141_v42 = vunpack.i.l.bf16 %v9140_v30  ;;  %8940 = vmatprep.subr.bf16.mxu1 %v8939_v32 }
0x30c1   :  { %8942 = vmatpush3.bf16.msra.mxu1 %v8939_v32 }
0x30c2   :  { %v9296_v33 = vpop.eup %9295  ;;  %v8943_v46 = vpack.c.bf16 %v9142_v36, %v9141_v42  ;;  %8948 = vmatprep.subr.bf16.mxu1 %v8947_v58 }
0x30c3   :  { %v5793_v37 = vpop.permute.xlu1 %5792  ;;  %v5797_v38 = vpop.permute.xlu0 %5796  ;;  %v6459_v39 = vmul.f32 %v9296_v33, %v9288_v23 }
0x30c4   :  { %5804 = vst.msk [vmem:[#allocation5] sm:$0xff] %vm1408_vm9, %v5793_v37  ;;  %5806 = vst.msk [vmem:[#allocation5 + $0x10] sm:$0xff] %vm1408_vm9, %v5797_v38  ;;  %8696 = vmatmul.mubr.msk.f32.vlgmr.msra.gmra.mrb[74].mxu1 %vm5161_vm3, %v6457_v45  ;;  %8944 = vmatprep.subr.bf16.mxu0 %v8943_v46 }
0x30c5   :  { %6228 = vst.msk [vmem:[#allocation5] sm:$0xff] %vm1750_vm10, %v6217_v35  ;;  %8946 = vmatpush3.bf16.msra.mxu0 %v8943_v46  ;;  %8702 = vmatprep.mubr.msk.f32.mxu0 %vm5161_vm3, %v6459_v39 }
0x30c6   :  { %v9298_v40 = vpop.eup %9297  ;;  %8950 = vmatpush3.bf16.msra.mxu1 %v8947_v58  ;;  %v8955_v58 = vpack.c.bf16 %v6847_v57, %v6846_v55 }
0x30c7   :  { %v6461_v41 = vmul.f32 %v9298_v40, %v9290_v24  ;;  %v5795_v47 = vpop.permute.xlu1 %5794  ;;  %v6221_v50 = vpop.permute.xlu0 %6220  ;;  %8952 = vmatprep.subr.bf16.mxu1 %v8951_v52 }
0x30c8   :  { %5805 = vst.msk [vmem:[#allocation5 + $0x8] sm:$0xff] %vm1408_vm9, %v5795_v47  ;;  %8956 = vmatprep.subr.bf16.mxu0 %v8955_v58 }
0x30c9   :  { %6230 = vst.msk [vmem:[#allocation5 + $0x10] sm:$0xff] %vm1750_vm10, %v6221_v50  ;;  %8703 = vmatmul.mubr.msk.f32.vlgmr.msra.gmra.mrb[42].mxu0 %vm5161_vm3, %v6461_v41 }
0x30ca   :  { %8954 = vmatpush3.bf16.msra.mxu1 %v8951_v52  ;;  %8958 = vmatpush3.bf16.msra.mxu0 %v8955_v58 }
0x30cb   :  { %v6219_v51 = vpop.permute.xlu1 %6218  ;;  %8723 = vmatprep.subr.mxu0 %v6848_v59 }
0x30cc   :  { %6229 = vst.msk [vmem:[#allocation5 + $0x8] sm:$0xff] %vm1750_vm10, %v6219_v51 }
0x30ce   :  { %8724 = vmatpush3.msra.mxu0 %v6848_v59 }
0x30cf   :  { %v5799_v53 = vpop.permute.xlu1 %5798 }
0x30d0   :  { %5807 = vst.msk [vmem:[#allocation5 + $0x18] sm:$0xff] %vm1408_vm9, %v5799_v53 }
0x30d3   :  { %v6223_v54 = vpop.permute.xlu1 %6222 }
0x30d4   :  { %6231 = vst.msk [vmem:[#allocation5 + $0x18] sm:$0xff] %vm1750_vm10, %v6223_v54  ;;  %vm7080_vm10 = vcmask 785408  }
0x3197   :  { %v8697_v61 = vpop.f32.mrb[74].mxu1 }
0x3198   :  { %6642 = vrot.lane.b32.xlu1 %v8697_v61, %s11467_s30  ;;  %v6540_v17 = vpop.f32.mrb[75].mxu1 }
0x3199   :  { %6640 = vrot.lane.b32.xlu0 %v6540_v17, %s11467_s30 }
0x319c   :  { %v8704_v62 = vpop.f32.mrb[42].mxu0 }
0x319d   :  { %v6627_v3 = vpop.f32.mrb[43].mxu0  ;;  %6646 = vrot.lane.b32.xlu1 %v8704_v62, %s11467_s30 }
0x319e   :  { %6644 = vrot.lane.b32.xlu0 %v6627_v3, %s11467_s30  ;;  %s8064_s30 = sshll.u32 %s4335_s28, 4  ;;  %s8066_s28 = sshll.u32 %s4371_s3, 4 }
0x319f   :  { %s4410_s3 = sand.u32 7, %s11473_s6 }
0x320a   :  { %v6643_v4 = vpop.permute.xlu1 %6642 }
0x320b   :  { %6653 = vst.msk [vmem:[#allocation5 + $0x8] sm:$0xff] %vm2092_vm11, %v6643_v4  ;;  %v6641_v5 = vpop.permute.xlu0 %6640 }
0x320c   :  { %6652 = vst.msk [vmem:[#allocation5] sm:$0xff] %vm2092_vm11, %v6641_v5 }
0x320f   :  { %v6647_v6 = vpop.permute.xlu1 %6646 }
0x3210   :  { %6655 = vst.msk [vmem:[#allocation5 + $0x18] sm:$0xff] %vm2092_vm11, %v6647_v6  ;;  %v6645_v10 = vpop.permute.xlu0 %6644 }
0x3211   :  { %6654 = vst.msk [vmem:[#allocation5 + $0x10] sm:$0xff] %vm2092_vm11, %v6645_v10 }
0x3212   :  { %v6657_v11 = vld [vmem:[#allocation5 + $0x8] sm:$0xff] }
0x3213   :  { %v6656_v49 = vld [vmem:[#allocation5] sm:$0xff] }
0x3214   :  { %8713 = vmatprep.mubr.msk.f32.mxu1 %vm590_vm2, %v6656_v49 }
0x3215   :  { %8714 = vmatmul.mubr.msk.f32.vlgmr.msra.gmra.mrb[76].mxu1 %vm590_vm2, %v6657_v11 }
0x3217   :  { %v6659_v0 = vld [vmem:[#allocation5 + $0x18] sm:$0xff] }
0x3218   :  { %v6658_v12 = vld [vmem:[#allocation5 + $0x10] sm:$0xff] }
0x3219   :  { %8716 = vmatprep.mubr.msk.f32.mxu1 %vm590_vm2, %v6658_v12 }
0x321a   :  { %8717 = vmatmul.mubr.msk.f32.gmra.mrb[78].mxu1 %vm590_vm2, %v6659_v0  ;;  %v8005_v0 = vld [vmem:[#allocation17] ss:$0 sm:$0xff] }
0x321b   :  { %7388 = vmatprep.mubr.f32.mxu1 %v9578_v56 }
0x32e8   :  { %v8715_v14 = vpop.f32.mrb[76].mxu1 }
0x32e9   :  { %v6755_v15 = vadd.f32 %v8715_v14, %v8000_v13  ;;  %v6749_v16 = vpop.f32.mrb[77].mxu1 }
0x32ea   :  { %v6750_v44 = vadd.f32 %v8000_v13, %v6749_v16  ;;  %v8006_v16 = vld [vmem:[#allocation18] ss:$0 sm:$0xff] }
0x32eb   :  { %v10961_v19 = vadd.f32 %v9323_v18, %v6755_v15 }
0x32ec   :  { %v10963_v8 = vadd.f32 %v9324_v20, %v6750_v44 }
0x32ed   :  { %v8718_v23 = vpop.f32.mrb[78].mxu1  ;;  %v6777_v9 = vsel %vm4805_vm13, %v10961_v19, 0.0 }
0x32ee   :  { %6778 = vadd.xlane.f32.xlu1 %v6777_v9  ;;  %v6759_v24 = vpop.f32.mrb[79].mxu1  ;;  %v6774_v25 = vsel %vm4805_vm13, %v10963_v8, 0.0  ;;  %v6765_v43 = vadd.f32 %v8718_v23, %v8000_v13 }
0x32ef   :  { %v6760_v22 = vadd.f32 %v8000_v13, %v6759_v24  ;;  %6775 = vadd.xlane.f32.xlu0 %v6774_v25 }
0x32f0   :  { %v10971_v27 = vadd.f32 %v9326_v29, %v6765_v43 }
0x32f1   :  { %v10969_v26 = vadd.f32 %v9325_v28, %v6760_v22 }
0x32f2   :  { %v6783_v7 = vsel %vm4805_vm13, %v10971_v27, 0.0 }
0x32f3   :  { %v6780_v34 = vsel %vm4805_vm13, %v10969_v26, 0.0 }
0x32f4   :  { %6781 = vadd.xlane.f32.xlu0 %v6780_v34 }
0x32f8   :  { %6784 = vadd.xlane.f32.xlu0 %v6783_v7  ;;  %v7061_v7 = vld [vmem:[%s11469_s15] sm:$0xff] }
0x337b   :  { %v6779_v31 = vpop.xlane.xlu1 %6778 }
0x337c   :  { %v6787_v32 = vmul.f32 0.041666668, %v6779_v31  ;;  %v6776_v21 = vpop.xlane.xlu0 %6775  ;;  %v7062_v31 = vld [vmem:[%s11469_s15 + $0x8] sm:$0xff] }
0x337d   :  { %v6786_v30 = vmul.f32 0.041666668, %v6776_v21  ;;  %v7063_v21 = vld [vmem:[%s11469_s15 + $0x10] sm:$0xff] }
0x337e   :  { %v6791_v35 = vsub.f32 %v10961_v19, %v6787_v32  ;;  %v8959_v32 = vpack.c.bf16 %v7062_v31, %v7061_v7 }
0x337f   :  { %v6790_v36 = vsub.f32 %v10963_v8, %v6786_v30  ;;  %v7064_v30 = vld [vmem:[%s11469_s15 + $0x18] sm:$0xff] }
0x3380   :  { %v6795_v42 = vmul.f32 %v6791_v35, %v6791_v35  ;;  %8960 = vmatprep.subr.bf16.mxu0 %v8959_v32 }
0x3381   :  { %v6782_v33 = vpop.xlane.xlu0 %6781  ;;  %v6794_v45 = vmul.f32 %v6790_v36, %v6790_v36 }
0x3382   :  { %v6788_v46 = vmul.f32 0.041666668, %v6782_v33  ;;  %v6801_v37 = vsel %vm4805_vm13, %v6795_v42, 0.0  ;;  %v7066_v42 = vld [vmem:[%s11469_s15 + $0x28] sm:$0xff] }
0x3383   :  { %6802 = vadd.xlane.f32.xlu1 %v6801_v37  ;;  %v6798_v38 = vsel %vm4805_vm13, %v6794_v45, 0.0  ;;  %v7067_v45 = vld [vmem:[%s11469_s15 + $0x30] sm:$0xff] }
0x3384   :  { %v6792_v39 = vsub.f32 %v10969_v26, %v6788_v46  ;;  %6799 = vadd.xlane.f32.xlu0 %v6798_v38  ;;  %v7068_v46 = vld [vmem:[%s11469_s15 + $0x38] sm:$0xff]  ;;  %v7069_v38 = vld [vmem:[%s11469_s15 + $0x40] sm:$0xff] }
0x3385   :  { %v6785_v40 = vpop.xlane.xlu0 %6784  ;;  %v8971_v37 = vpack.c.bf16 %v7068_v46, %v7067_v45 }
0x3386   :  { %v6789_v41 = vmul.f32 0.041666668, %v6785_v40  ;;  %v6796_v47 = vmul.f32 %v6792_v39, %v6792_v39 }
0x3388   :  { %v6793_v50 = vsub.f32 %v10971_v27, %v6789_v41  ;;  %v6804_v51 = vsel %vm4805_vm13, %v6796_v47, 0.0  ;;  %v7071_v41 = vld [vmem:[%s11469_s15 + $0x50] sm:$0xff]  ;;  %v7072_v47 = vld [vmem:[%s11469_s15 + $0x58] sm:$0xff] }
0x3389   :  { %6805 = vadd.xlane.f32.xlu0 %v6804_v51  ;;  %v8007_v51 = vld [vmem:[#allocation20] ss:$0 sm:$0xff] }
0x338a   :  { %v6797_v53 = vmul.f32 %v6793_v50, %v6793_v50 }
0x338c   :  { %v6807_v54 = vsel %vm4805_vm13, %v6797_v53, 0.0 }
0x338d   :  { %6808 = vadd.xlane.f32.xlu1 %v6807_v54 }
0x3410   :  { %v6803_v60 = vpop.xlane.xlu1 %6802 }
0x3411   :  { %v6811_v52 = vmul.f32 0.041666668, %v6803_v60  ;;  %v6800_v61 = vpop.xlane.xlu0 %6799 }
0x3412   :  { %v6810_v17 = vmul.f32 0.041666668, %v6800_v61 }
0x3413   :  { %v6815_v62 = vadd.f32 1e-05, %v6811_v52 }
0x3414   :  { %v6814_v3 = vadd.f32 1e-05, %v6810_v17 }
0x3415   :  { %9299 = vrsqrt.f32 %v6815_v62 }
0x3416   :  { %9301 = vrsqrt.f32 %v6814_v3  ;;  %v6806_v4 = vpop.xlane.xlu0 %6805 }
0x3417   :  { %v6812_v5 = vmul.f32 0.041666668, %v6806_v4 }
0x3419   :  { %v6816_v6 = vadd.f32 1e-05, %v6812_v5 }
0x341a   :  { %v6809_v10 = vpop.xlane.xlu1 %6808 }
0x341b   :  { %9303 = vrsqrt.f32 %v6816_v6  ;;  %v6813_v49 = vmul.f32 0.041666668, %v6809_v10 }
0x341d   :  { %v6817_v11 = vadd.f32 1e-05, %v6813_v49 }
0x341f   :  { %v9300_v12 = vpop.eup %9299  ;;  %9305 = vrsqrt.f32 %v6817_v11 }
0x3420   :  { %v9302_v13 = vpop.eup %9301  ;;  %v6823_v14 = vmul.f32 %v9300_v12, %v6791_v35  ;;  %v8963_v35 = vpack.c.bf16 %v7064_v30, %v7063_v21 }
0x3421   :  { %v6822_v15 = vmul.f32 %v9302_v13, %v6790_v36  ;;  %v7065_v36 = vld [vmem:[%s11469_s15 + $0x20] sm:$0xff] }
0x3422   :  { %v6833_v44 = vmul.f32 %v8005_v0, %v6823_v14  ;;  %v8967_v33 = vpack.c.bf16 %v7066_v42, %v7065_v36 }
0x3423   :  { %v6832_v18 = vmul.f32 %v8005_v0, %v6822_v15 }
0x3424   :  { %v6843_v9 = vadd.f32 %v8006_v16, %v6833_v44 }
0x3425   :  { %v9304_v20 = vpop.eup %9303  ;;  %v6842_v23 = vadd.f32 %v8006_v16, %v6832_v18 }
0x3426   :  { %v6824_v24 = vmul.f32 %v9304_v20, %v6792_v39  ;;  %v7070_v39 = vld [vmem:[%s11469_s15 + $0x48] sm:$0xff]  ;;  %s4341_s15 = sadd.s32 %s8064_s30, %s4338_s27  ;;  %s4377_s27 = sadd.s32 %s8066_s28, %s4374_s10 }
0x3427   :  { %8725 = vmatprep.mubr.msk.f32.mxu0 %vm4805_vm13, %v6842_v23  ;;  %v8975_v40 = vpack.c.bf16 %v7070_v39, %v7069_v38  ;;  %s4378_s2 = scalar_lea.vmem %s9613_s13, %s4377_s27  ;;  %s11475_s30 = sld [smem:[#allocation71_spill]] }
0x3428   :  { %8726 = vmatmul.mubr.msk.f32.vlgmr.msra.gmra.mrb[44].mxu0 %vm4805_vm13, %v6843_v9  ;;  %v6834_v25 = vmul.f32 %v8005_v0, %v6824_v24  ;;  %s4425_s10 = sshra.s32 %s11474_s23, 3 }
0x3429   :  { %v9306_v43 = vpop.eup %9305  ;;  %8962 = vmatpush3.bf16.msra.mxu0 %v8959_v32  ;;  %s8069_s28 = sshll.u32 %s4425_s10, 4  ;;  %s11104_s10 = sld [smem:[#allocation12 + $0x7]] }
0x342a   :  { %v6844_v22 = vadd.f32 %v8006_v16, %v6834_v25  ;;  %v6825_v28 = vmul.f32 %v9306_v43, %v6793_v50  ;;  %8964 = vmatprep.subr.bf16.mxu0 %v8963_v35  ;;  %v8979_v50 = vpack.c.bf16 %v7072_v47, %v7071_v41 }
0x342c   :  { %8728 = vmatprep.mubr.msk.f32.mxu0 %vm4805_vm13, %v6844_v22  ;;  %v6835_v29 = vmul.f32 %v8005_v0, %v6825_v28 }
0x342d   :  { %8966 = vmatpush3.bf16.msra.mxu0 %v8963_v35  ;;  %s4443_s27 = sshra.s32 %s11475_s30, 3 }
0x342e   :  { %v6845_v34 = vadd.f32 %v8006_v16, %v6835_v29  ;;  %8968 = vmatprep.subr.bf16.mxu0 %v8967_v33 }
0x3430   :  { %8729 = vmatmul.mubr.msk.f32.gmra.mrb[46].mxu0 %vm4805_vm13, %v6845_v34 }
0x3431   :  { %8970 = vmatpush3.bf16.msra.mxu0 %v8967_v33 }
0x3432   :  { %8972 = vmatprep.subr.bf16.mxu0 %v8971_v37 }
0x3435   :  { %8974 = vmatpush3.bf16.msra.mxu0 %v8971_v37 }
0x3436   :  { %8976 = vmatprep.subr.bf16.mxu0 %v8975_v40 }
0x3439   :  { %8978 = vmatpush3.bf16.msra.mxu0 %v8975_v40 }
0x343a   :  { %8980 = vmatprep.subr.bf16.mxu0 %v8979_v50 }
0x343d   :  { %8982 = vmatpush3.bf16.msra.mxu0 %v8979_v50 }
0x34fb   :  { %v8727_v53 = vpop.f32.mrb[44].mxu0 }
0x34fc   :  { %v11004_v54 = vadd.f32 %v8727_v53, %v8007_v51  ;;  %v6934_v55 = vpop.f32.mrb[45].mxu0 }
0x34fd   :  { %v11006_v57 = vadd.f32 %v8007_v51, %v6934_v55 }
0x34fe   :  { %v11009_v58 = vmul.f32 0.70710677, %v11004_v54 }
0x34ff   :  { %v11012_v59 = vmul.f32 0.70710677, %v11006_v57 }
0x3500   :  { %v6970_v60 = vand.u32 2147483647, %v11009_v58  ;;  %vm6962_vm2 = vcmp.ge.f32.partialorder %v11009_v58, 0.0 }
0x3501   :  { %v6969_v52 = vand.u32 2147483647, %v11012_v59  ;;  %vm6961_vm5 = vcmp.ge.f32.partialorder %v11012_v59, 0.0 }
0x3502   :  { %v6974_v61 = vmul.f32 0.3275911, %v6970_v60  ;;  %v7026_v15 = vsub.f32 0.0, %v6970_v60 }
0x3503   :  { %v6973_v17 = vmul.f32 0.3275911, %v6969_v52  ;;  %v8730_v62 = vpop.f32.mrb[46].mxu0  ;;  %v7025_v44 = vsub.f32 0.0, %v6969_v52 }
0x3504   :  { %v6978_v3 = vadd.f32 1.0, %v6974_v61  ;;  %v11016_v4 = vadd.f32 %v8730_v62, %v8007_v51  ;;  %v6944_v5 = vpop.f32.mrb[47].mxu0  ;;  %v7030_v23 = vmul.f32 %v7026_v15, %v6970_v60 }
0x3505   :  { %v6977_v6 = vadd.f32 1.0, %v6973_v17  ;;  %v11018_v10 = vadd.f32 %v8007_v51, %v6944_v5  ;;  %v7029_v25 = vmul.f32 %v7025_v44, %v6969_v52 }
0x3506   :  { %9307 = vrcp.f32 %v6978_v3  ;;  %v11021_v49 = vmul.f32 0.70710677, %v11016_v4  ;;  %v7035_v28 = vmul.f32 1.442695, %v7030_v23 }
0x3507   :  { %9309 = vrcp.f32 %v6977_v6  ;;  %v11024_v11 = vmul.f32 0.70710677, %v11018_v10  ;;  %v7033_v31 = vmul.f32 1.442695, %v7029_v25 }
0x3508   :  { %v6972_v12 = vand.u32 2147483647, %v11021_v49  ;;  %vm6964_vm9 = vcmp.ge.f32.partialorder %v11021_v49, 0.0 }
0x3509   :  { %v6971_v0 = vand.u32 2147483647, %v11024_v11  ;;  %vm6963_vm11 = vcmp.ge.f32.partialorder %v11024_v11, 0.0 }
0x350a   :  { %v6976_v13 = vmul.f32 0.3275911, %v6972_v12  ;;  %v7028_v34 = vsub.f32 0.0, %v6972_v12 }
0x350b   :  { %v6975_v14 = vmul.f32 0.3275911, %v6971_v0  ;;  %v7027_v32 = vsub.f32 0.0, %v6971_v0 }
0x350c   :  { %v6980_v16 = vadd.f32 1.0, %v6976_v13  ;;  %v7032_v42 = vmul.f32 %v7028_v34, %v6972_v12 }
0x350d   :  { %v6979_v18 = vadd.f32 1.0, %v6975_v14  ;;  %v7031_v37 = vmul.f32 %v7027_v32, %v6971_v0 }
0x350e   :  { %9311 = vrcp.f32 %v6980_v16  ;;  %v7039_v50 = vmul.f32 1.442695, %v7032_v42  ;;  %v6954_v42 = vmul.f32 0.5, %v11004_v54  ;;  %v6967_v54 = vsel %vm6963_vm11, 1.0, %v9593_v48 }
0x350f   :  { %9313 = vrcp.f32 %v6979_v18  ;;  %v7037_v60 = vmul.f32 1.442695, %v7031_v37 }
0x3510   :  { %v9308_v20 = vpop.eup %9307  ;;  %9315 = vpow2.f32 %v7035_v28 }
0x3511   :  { %v9310_v9 = vpop.eup %9309  ;;  %v6990_v24 = vmul.f32 1.0614054, %v9308_v20  ;;  %9317 = vpow2.f32 %v7033_v31 }
0x3512   :  { %v6989_v43 = vmul.f32 1.0614054, %v9310_v9  ;;  %9319 = vpow2.f32 %v7039_v50 }
0x3513   :  { %v6994_v22 = vadd.f32 -1.4531521, %v6990_v24  ;;  %9321 = vpow2.f32 %v7037_v60 }
0x3514   :  { %v6993_v29 = vadd.f32 -1.4531521, %v6989_v43  ;;  %v6966_v43 = vsel %vm6962_vm2, 1.0, %v9593_v48 }
0x3515   :  { %v6998_v7 = vmul.f32 %v9308_v20, %v6994_v22 }
0x3516   :  { %v6997_v21 = vmul.f32 %v9310_v9, %v6993_v29  ;;  %v6965_v29 = vsel %vm6961_vm5, 1.0, %v9593_v48 }
0x3517   :  { %v7002_v30 = vadd.f32 1.4214138, %v6998_v7 }
0x3518   :  { %v9312_v35 = vpop.eup %9311  ;;  %v7001_v36 = vadd.f32 1.4214138, %v6997_v21  ;;  %v6953_v21 = vmul.f32 0.5, %v11006_v57 }
0x3519   :  { %v9314_v33 = vpop.eup %9313  ;;  %v7006_v45 = vmul.f32 %v9308_v20, %v7002_v30  ;;  %v6992_v46 = vmul.f32 1.0614054, %v9312_v35 }
0x351a   :  { %v7005_v38 = vmul.f32 %v9310_v9, %v7001_v36  ;;  %v6991_v39 = vmul.f32 1.0614054, %v9314_v33  ;;  %v9316_v0 = vpop.eup %9315 }
0x351b   :  { %v7010_v40 = vadd.f32 -0.28449672, %v7006_v45  ;;  %v6996_v41 = vadd.f32 -1.4531521, %v6992_v46  ;;  %v9318_v15 = vpop.eup %9317 }
0x351c   :  { %v7009_v47 = vadd.f32 -0.28449672, %v7005_v38  ;;  %v6995_v51 = vadd.f32 -1.4531521, %v6991_v39  ;;  %v9320_v32 = vpop.eup %9319 }
0x351d   :  { %v7014_v53 = vmul.f32 %v9308_v20, %v7010_v40  ;;  %v7000_v55 = vmul.f32 %v9312_v35, %v6996_v41  ;;  %v9322_v36 = vpop.eup %9321  ;;  %v6955_v40 = vmul.f32 0.5, %v11018_v10  ;;  %v7299_v10 = vld [vmem:[%s9838_s20 + $0x10] sm:$0xff] }
0x351e   :  { %v7013_v52 = vmul.f32 %v9310_v9, %v7009_v47  ;;  %v6999_v61 = vmul.f32 %v9314_v33, %v6995_v51  ;;  %v6956_v47 = vmul.f32 0.5, %v11016_v4  ;;  %v7301_v4 = vld [vmem:[%s9838_s20 + $0x20] sm:$0xff] }
0x351f   :  { %v7018_v17 = vadd.f32 0.2548296, %v7014_v53  ;;  %v7004_v62 = vadd.f32 1.4214138, %v7000_v55  ;;  %v7300_v53 = vld [vmem:[%s9838_s20 + $0x18] sm:$0xff]  ;;  %v7297_v55 = vld [vmem:[%s9838_s20] sm:$0xff] }
0x3520   :  { %v7017_v3 = vadd.f32 0.2548296, %v7013_v52  ;;  %v7003_v5 = vadd.f32 1.4214138, %v6999_v61  ;;  %v8985_v52 = vpack.c.bf16 %v7299_v10, %v7297_v55  ;;  %v7302_v61 = vld [vmem:[%s9838_s20 + $0x28] sm:$0xff] }
0x3521   :  { %v7022_v6 = vmul.f32 %v9308_v20, %v7018_v17  ;;  %v7008_v12 = vmul.f32 %v9312_v35, %v7004_v62  ;;  %v4326_v17 = vld [vmem:[%s4325_s16] ss:$8 sm:$0x3]  ;;  %s4389_s16 = sshra.s32 %s11472_s19, 3 }
0x3522   :  { %v7021_v13 = vmul.f32 %v9310_v9, %v7017_v3  ;;  %v7007_v14 = vmul.f32 %v9314_v33, %v7003_v5  ;;  %4327 = vst.msk [vmem:[#allocation4] ss:$8 sm:$0x3] %vm9896_vm0, %v4326_v17  ;;  %v4361_v3 = vld [vmem:[%s4360_s8] ss:$8 sm:$0x3] }
0x3523   :  { %v7042_v16 = vmul.f32 %v9316_v0, %v7022_v6  ;;  %v7012_v44 = vadd.f32 -0.28449672, %v7008_v12  ;;  %4363 = vst.msk [vmem:[#allocation4 + $0x2] ss:$8 sm:$0x3] %vm9896_vm0, %v4361_v3  ;;  %s4428_s8 = sand.u32 7, %s11474_s23 }
0x3524   :  { %v7041_v18 = vmul.f32 %v9318_v15, %v7021_v13  ;;  %v7011_v23 = vadd.f32 -0.28449672, %v7007_v14  ;;  %v4379_v5 = vld [vmem:[%s4378_s2] ss:$8 sm:$0x3]  ;;  %s4446_s2 = sand.u32 7, %s11475_s30 }
0x3525   :  { %v7046_v24 = vsub.f32 1.0, %v7042_v16  ;;  %v7016_v25 = vmul.f32 %v9312_v35, %v7012_v44  ;;  %4381 = vst.msk [vmem:[#allocation4 + $0x3] ss:$8 sm:$0x3] %vm9896_vm0, %v4379_v5  ;;  %s11090_s23 = sld [smem:[#allocation12]]  ;;  %s11098_s30 = sld [smem:[#allocation12 + $0x4]] }
0x3526   :  { %v7045_v22 = vsub.f32 1.0, %v7041_v18  ;;  %v7015_v20 = vmul.f32 %v9314_v33, %v7011_v23  ;;  %v8012_v14 = vld [vmem:[#allocation21] ss:$0 sm:$0xff] }
0x3527   :  { %v7050_v28 = vmul.f32 %v7046_v24, %v6966_v43  ;;  %v7020_v9 = vadd.f32 0.2548296, %v7016_v25 }
0x3528   :  { %v7049_v34 = vmul.f32 %v7045_v22, %v6965_v29  ;;  %v7019_v7 = vadd.f32 0.2548296, %v7015_v20 }
0x3529   :  { %v7054_v31 = vadd.f32 1.0, %v7050_v28  ;;  %v7024_v58 = vmul.f32 %v9312_v35, %v7020_v9  ;;  %v6968_v35 = vsel %vm6964_vm9, 1.0, %v9593_v48  ;;  %v7298_v48 = vld [vmem:[%s9838_s20 + $0x8] sm:$0xff]  ;;  %s4342_s20 = scalar_lea.vmem %s9613_s13, %s4341_s15  ;;  %s8067_s15 = sshll.u32 %s4389_s16, 4 }
0x352a   :  { %v7053_v59 = vadd.f32 1.0, %v7049_v34  ;;  %v7023_v30 = vmul.f32 %v9314_v33, %v7019_v7  ;;  %v8983_v60 = vpack.c.bf16 %v7300_v53, %v7298_v48  ;;  %v4343_v62 = vld [vmem:[%s4342_s20] ss:$8 sm:$0x3]  ;;  %s4407_s20 = sshra.s32 %s11473_s6, 3  ;;  %s4395_s1 = sadd.s32 %s8067_s15, %s4392_s26 }
0x352b   :  { %v7044_v45 = vmul.f32 %v9320_v32, %v7024_v58  ;;  %v7058_v38 = vmul.f32 %v7054_v31, %v6954_v42  ;;  %4345 = vst.msk [vmem:[#allocation4 + $0x1] ss:$8 sm:$0x3] %vm9896_vm0, %v4343_v62  ;;  %s4396_s21 = scalar_lea.vmem %s9613_s13, %s4395_s1  ;;  %s8068_s17 = sshll.u32 %s4407_s20, 4 }
0x352c   :  { %v7057_v46 = vmul.f32 %v7053_v59, %v6953_v21  ;;  %v7043_v37 = vmul.f32 %v9322_v36, %v7023_v30  ;;  %8984 = vmatprep.subr.bf16.mxu1 %v8983_v60  ;;  %v4397_v6 = vld [vmem:[%s4396_s21] ss:$8 sm:$0x3]  ;;  %s4413_s7 = sadd.s32 %s8068_s17, %s4410_s3  ;;  %s4431_s16 = sadd.s32 %s8069_s28, %s4428_s8 }
0x352d   :  { %v7048_v39 = vsub.f32 1.0, %v7044_v45  ;;  %8986 = vmatpush1.bf16.msra.mxu1 %v8985_v52  ;;  %4399 = vst.msk [vmem:[#allocation4 + $0x4] ss:$8 sm:$0x3] %vm9896_vm0, %v4397_v6  ;;  %s4414_s19 = scalar_lea.vmem %s9613_s13, %s4413_s7  ;;  %s4432_s6 = scalar_lea.vmem %s9613_s13, %s4431_s16 }
0x352e   :  { %v7047_v57 = vsub.f32 1.0, %v7043_v37  ;;  %8755 = vmatprep.mubr.msk.f32.mxu0 %vm7080_vm10, %v7057_v46  ;;  %7328 = vmatprep.subr.mxu1 %v7302_v61  ;;  %v4415_v12 = vld [vmem:[%s4414_s19] ss:$8 sm:$0x3]  ;;  %s8070_s26 = sshll.u32 %s4443_s27, 4  ;;  %s11092_s1 = sld [smem:[#allocation12 + $0x1]] }
0x352f   :  { %v7052_v33 = vmul.f32 %v7048_v39, %v6968_v35  ;;  %8756 = vmatmul.mubr.msk.f32.vlgmr.msra.gmra.mrb[48].mxu0 %vm7080_vm10, %v7058_v38  ;;  %4417 = vst.msk [vmem:[#allocation4 + $0x5] ss:$8 sm:$0x3] %vm9896_vm0, %v4415_v12  ;;  %v4433_v0 = vld [vmem:[%s4432_s6] ss:$8 sm:$0x3]  ;;  %s4449_s15 = sadd.s32 %s8070_s26, %s4446_s2 }
0x3530   :  { %v7051_v49 = vmul.f32 %v7047_v57, %v6967_v54  ;;  %4435 = vst.msk [vmem:[#allocation4 + $0x6] ss:$8 sm:$0x3] %vm9896_vm0, %v4433_v0  ;;  %s4450_s20 = scalar_lea.vmem %s9613_s13, %s4449_s15  ;;  %s11094_s3 = sld [smem:[#allocation12 + $0x2]] }
0x3531   :  { %v7056_v11 = vadd.f32 1.0, %v7052_v33  ;;  %7329 = vmatpush1.msra.mxu1 %v7301_v4  ;;  %v4451_v13 = vld [vmem:[%s4450_s20] ss:$8 sm:$0x3]  ;;  %s11096_s21 = sld [smem:[#allocation12 + $0x3]]  ;;  %s11100_s17 = sld [smem:[#allocation12 + $0x5]] }
0x3532   :  { %v7055_v41 = vadd.f32 1.0, %v7051_v49  ;;  %4453 = vst.msk [vmem:[#allocation4 + $0x7] ss:$8 sm:$0x3] %vm9896_vm0, %v4451_v13  ;;  %s11102_s7 = sld [smem:[#allocation12 + $0x6]]  ;;  %s11106_s19 = sld [smem:[#allocation12 + $0x8]] }
0x3533   :  { %v7060_v51 = vmul.f32 %v7056_v11, %v6956_v47  ;;  %s11108_s8 = sld [smem:[#allocation12 + $0x9]]  ;;  %s11110_s28 = sld [smem:[#allocation12 + $0xa]] }
0x3534   :  { %v7059_v50 = vmul.f32 %v7055_v41, %v6955_v40  ;;  %s11113_s27 = sld [smem:[#allocation12 + $0xb]]  ;;  %s11118_s16 = sld [smem:[#allocation12 + $0x80]] }
0x3535   :  { %s11120_s2 = sld [smem:[#allocation12 + $0x81]]  ;;  %s11122_s6 = sld [smem:[#allocation12 + $0x82]] }
0x3536   :  { %8758 = vmatprep.mubr.msk.f32.mxu0 %vm7080_vm10, %v7059_v50  ;;  %s11124_s26 = sld [smem:[#allocation12 + $0x83]]  ;;  %s11126_s15 = sld [smem:[#allocation12 + $0x84]] }
0x3537   :  { %8759 = vmatmul.mubr.msk.f32.gmra.mrb[50].mxu0 %vm7080_vm10, %v7060_v51  ;;  %s11128_s20 = sld [smem:[#allocation12 + $0x85]]  ;;  %s7187_s11 = scalar_lea.vmem [#allocation6], %s11090_s23 }
0x3538   :  { %s7191_s18 = scalar_lea.vmem [#allocation6], %s11092_s1  ;;  %s7195_s9 = scalar_lea.vmem [#allocation6], %s11094_s3 }
0x3539   :  { %s7199_s13 = scalar_lea.vmem [#allocation6], %s11096_s21  ;;  %s7203_s5 = scalar_lea.vmem [#allocation6], %s11098_s30  ;;  %v7407_v13 = vld [vmem:[#allocation4] sm:$0xff] }
0x353a   :  { %s7207_s23 = scalar_lea.vmem [#allocation6], %s11100_s17  ;;  %s7231_s1 = scalar_lea.vmem [#allocation6], %s11113_s27 }
0x353b   :  { %s7664_s3 = scalar_lea.vmem [#allocation6], %s11118_s16  ;;  %s7666_s21 = scalar_lea.vmem [#allocation6], %s11120_s2 }
0x353c   :  { %s7668_s30 = scalar_lea.vmem [#allocation6], %s11122_s6  ;;  %s7670_s17 = scalar_lea.vmem [#allocation6], %s11124_s26 }
0x353d   :  { %s7682_s27 = scalar_lea.vmem [#allocation6], %s11137_s29  ;;  %s7684_s16 = scalar_lea.vmem [#allocation6], %s11140_s25 }
0x353e   :  { %s11476_s2 = sld [smem:[#allocation72_spill]]  ;;  %s7686_s6 = scalar_lea.vmem [#allocation6], %s11142_s14 }
0x353f   :  { %s11478_s29 = sld [smem:[#allocation31_spill]]  ;;  %s11479_s14 = sld [smem:[#allocation74_spill]] }
0x3540   :  { %s4575_s25 = sadd.s32 16, %s10569_s22  ;;  %s11480_s26 = sld [smem:[#allocation75_spill]] }
0x3541   :  { %s11483_s22 = sld [smem:[#allocation78_spill]] }
0x3602   :  { %v8757_v15 = vpop.f32.mrb[48].mxu0 }
0x3603   :  { %v7165_v16 = vadd.f32 %v8757_v15, %v8012_v14  ;;  %v7159_v44 = vpop.f32.mrb[49].mxu0 }
0x3604   :  { %v7160_v18 = vadd.f32 %v8012_v14, %v7159_v44 }
0x3605   :  { %v7179_v23 = vadd.f32 %v7165_v16, %v10961_v19  ;;  %v7408_v16 = vld [vmem:[#allocation4 + $0x8] sm:$0xff] }
0x3606   :  { %v7178_v24 = vadd.f32 %v7160_v18, %v10963_v8 }
0x3607   :  { %7183 = vst.msk [vmem:[#allocation6 + $0x8] sm:$0xff] %vm4805_vm13, %v7179_v23 }
0x3608   :  { %7182 = vst.msk [vmem:[#allocation6] sm:$0xff] %vm4805_vm13, %v7178_v24 }
0x360a   :  { %v8760_v25 = vpop.f32.mrb[50].mxu0 }
0x360b   :  { %v7175_v43 = vadd.f32 %v8760_v25, %v8012_v14  ;;  %v7169_v19 = vpop.f32.mrb[51].mxu0 }
0x360c   :  { %v7170_v8 = vadd.f32 %v8012_v14, %v7169_v19 }
0x360d   :  { %v7181_v22 = vadd.f32 %v7175_v43, %v10971_v27 }
0x360e   :  { %v7180_v20 = vadd.f32 %v7170_v8, %v10969_v26 }
0x360f   :  { %7185 = vst.msk [vmem:[#allocation6 + $0x18] sm:$0xff] %vm4805_vm13, %v7181_v22 }
0x3610   :  { %7184 = vst.msk [vmem:[#allocation6 + $0x10] sm:$0xff] %vm4805_vm13, %v7180_v20 }
0x3617   :  { %v7188_v28 = vld [vmem:[%s7187_s11] sm:$0x1]  ;;  %s7219_s11 = scalar_lea.vmem [#allocation6], %s11106_s19  ;;  %v8029_v30 = vld [vmem:[%s7664_s3 + $0x10] sm:$0x1]  ;;  %s7676_s19 = scalar_lea.vmem [#allocation6], %s11130_s0 }
0x3618   :  { %v7192_v27 = vld [vmem:[%s7191_s18] sm:$0x1]  ;;  %7189 = vst.msk [vmem:[#allocation7] sm:$0x1] %vm4280_vm14, %v7188_v28  ;;  %s7215_s18 = scalar_lea.vmem [#allocation6], %s11104_s10  ;;  %s7674_s10 = scalar_lea.vmem [#allocation6], %s11128_s20 }
0x3619   :  { %v7196_v29 = vld [vmem:[%s7195_s9] sm:$0x1]  ;;  %7193 = vst.msk [vmem:[#allocation7 + $0x1] sm:$0x1] %vm4280_vm14, %v7192_v27  ;;  %s7211_s9 = scalar_lea.vmem [#allocation6], %s11102_s7  ;;  %s7672_s7 = scalar_lea.vmem [#allocation6], %s11126_s15 }
0x361a   :  { %7197 = vst.msk [vmem:[#allocation7 + $0x2] sm:$0x1] %vm4280_vm14, %v7196_v29  ;;  %v7200_v26 = vld [vmem:[%s7199_s13] sm:$0x1]  ;;  %s7223_s13 = scalar_lea.vmem [#allocation6], %s11108_s8  ;;  %s7678_s8 = scalar_lea.vmem [#allocation6], %s11132_s12 }
0x361b   :  { %v7204_v9 = vld [vmem:[%s7203_s5] sm:$0x1]  ;;  %7201 = vst.msk [vmem:[#allocation7 + $0x3] sm:$0x1] %vm4280_vm14, %v7200_v26  ;;  %s7227_s5 = scalar_lea.vmem [#allocation6], %s11110_s28  ;;  %s7680_s28 = scalar_lea.vmem [#allocation6], %s11135_s4 }
0x361c   :  { %v7208_v34 = vld [vmem:[%s7207_s23] sm:$0x1]  ;;  %7205 = vst.msk [vmem:[#allocation7 + $0x4] sm:$0x1] %vm4280_vm14, %v7204_v9  ;;  %v8031_v36 = vld [vmem:[%s7666_s21 + $0x10] sm:$0x1] }
0x361d   :  { %7209 = vst.msk [vmem:[#allocation7 + $0x5] sm:$0x1] %vm4280_vm14, %v7208_v34  ;;  %v7212_v7 = vld [vmem:[%s7211_s9] sm:$0x1]  ;;  %v8033_v42 = vld [vmem:[%s7668_s30 + $0x10] sm:$0x1] }
0x361e   :  { %v7216_v31 = vld [vmem:[%s7215_s18] sm:$0x1]  ;;  %7213 = vst.msk [vmem:[#allocation7 + $0x6] sm:$0x1] %vm4280_vm14, %v7212_v7  ;;  %7238 = vst.msk [vmem:[#allocation7 + $0xc] sm:$0x1] %vm4280_vm14, %v8029_v30 }
0x361f   :  { %v7220_v58 = vld [vmem:[%s7219_s11] sm:$0x1]  ;;  %7217 = vst.msk [vmem:[#allocation7 + $0x7] sm:$0x1] %vm4280_vm14, %v7216_v31  ;;  %7243 = vst.msk [vmem:[#allocation7 + $0xd] sm:$0x1] %vm4280_vm14, %v8031_v36 }
0x3620   :  { %7221 = vst.msk [vmem:[#allocation7 + $0x8] sm:$0x1] %vm4280_vm14, %v7220_v58  ;;  %v7224_v32 = vld [vmem:[%s7223_s13] sm:$0x1]  ;;  %7248 = vst.msk [vmem:[#allocation7 + $0xe] sm:$0x1] %vm4280_vm14, %v8033_v42 }
0x3621   :  { %v7228_v21 = vld [vmem:[%s7227_s5] sm:$0x1]  ;;  %7225 = vst.msk [vmem:[#allocation7 + $0x9] sm:$0x1] %vm4280_vm14, %v7224_v32  ;;  %v8035_v45 = vld [vmem:[%s7670_s17 + $0x10] sm:$0x1] }
0x3622   :  { %v7232_v59 = vld [vmem:[%s7231_s1] sm:$0x1]  ;;  %7229 = vst.msk [vmem:[#allocation7 + $0xa] sm:$0x1] %vm4280_vm14, %v7228_v21  ;;  %v8037_v46 = vld [vmem:[%s7672_s7 + $0x10] sm:$0x1] }
0x3623   :  { %7233 = vst.msk [vmem:[#allocation7 + $0xb] sm:$0x1] %vm4280_vm14, %v7232_v59  ;;  %v8039_v37 = vld [vmem:[%s7674_s10 + $0x10] sm:$0x1]  ;;  %7253 = vst.msk [vmem:[#allocation7 + $0xf] sm:$0x1] %vm4280_vm14, %v8035_v45 }
0x3624   :  { %7258 = vst.msk [vmem:[#allocation7 + $0x10] sm:$0x1] %vm4280_vm14, %v8037_v46  ;;  %7263 = vst.msk [vmem:[#allocation7 + $0x11] sm:$0x1] %vm4280_vm14, %v8039_v37  ;;  %v8041_v38 = vld [vmem:[%s7676_s19 + $0x10] sm:$0x1] }
0x3625   :  { %v8043_v39 = vld [vmem:[%s7678_s8 + $0x10] sm:$0x1]  ;;  %7268 = vst.msk [vmem:[#allocation7 + $0x12] sm:$0x1] %vm4280_vm14, %v8041_v38  ;;  %s11477_s0 = sld [smem:[#allocation73_spill]]  ;;  %s4594_s4 = sadd.s32 16, %s10576_s24 }
0x3626   :  { %v8045_v35 = vld [vmem:[%s7680_s28 + $0x10] sm:$0x1]  ;;  %7273 = vst.msk [vmem:[#allocation7 + $0x13] sm:$0x1] %vm4280_vm14, %v8043_v39  ;;  %v7294_v49 = vld [vmem:[#allocation7] sm:$0xff]  ;;  %s4461_s12 = sshra.s32 %s11476_s2, 3 }
0x3627   :  { %7278 = vst.msk [vmem:[#allocation7 + $0x14] sm:$0x1] %vm4280_vm14, %v8045_v35  ;;  %v8047_v57 = vld [vmem:[%s7682_s27 + $0x10] sm:$0x1]  ;;  %8052 = vmatmul.mubr.msk.f32.vlgmr.msra.gmra.mrb[80].mxu1 %vm4805_vm13, %v7294_v49  ;;  %s4464_s20 = sand.u32 7, %s11476_s2  ;;  %s8071_s23 = sshll.u32 %s4461_s12, 4 }
0x3628   :  { %v8049_v33 = vld [vmem:[%s7684_s16 + $0x10] sm:$0x1]  ;;  %7283 = vst.msk [vmem:[#allocation7 + $0x15] sm:$0x1] %vm4280_vm14, %v8047_v57  ;;  %7394 = vmatprep.mubr.f32.mxu1 %v9578_v56  ;;  %s4467_s9 = sadd.s32 %s8071_s23, %s4464_s20  ;;  %s4497_s1 = sshra.s32 %s11479_s14, 3 }
0x3629   :  { %v8051_v54 = vld [vmem:[%s7686_s6 + $0x10] sm:$0x1]  ;;  %7288 = vst.msk [vmem:[#allocation7 + $0x16] sm:$0x1] %vm4280_vm14, %v8049_v33  ;;  %s4468_s11 = scalar_lea.vmem %s11478_s29, %s4467_s9  ;;  %s4500_s21 = sand.u32 7, %s11479_s14 }
0x362a   :  { %7293 = vst.msk [vmem:[#allocation7 + $0x17] sm:$0x1] %vm4280_vm14, %v8051_v54  ;;  %v7295_v11 = vld [vmem:[#allocation7 + $0x8] sm:$0xff]  ;;  %v4469_v41 = vld [vmem:[%s4468_s11] ss:$8 sm:$0x3] }
0x362b   :  { %8053 = vmatmul.mubr.msk.f32.gmra.mrb[82].mxu1 %vm4805_vm13, %v7295_v11  ;;  %s4479_s15 = sshra.s32 %s11477_s0, 3  ;;  %s4482_s18 = sand.u32 7, %s11477_s0  ;;  %4471 = vst.msk [vmem:[#allocation4 + $0x10] ss:$8 sm:$0x3] %vm9896_vm0, %v4469_v41 }
0x362c   :  { %7400 = vmatprep.mubr.f32.mxu1 %v9578_v56  ;;  %s8072_s13 = sshll.u32 %s4479_s15, 4  ;;  %s8073_s30 = sshll.u32 %s4497_s1, 4 }
0x362d   :  { %s4485_s5 = sadd.s32 %s8072_s13, %s4482_s18  ;;  %s4515_s17 = sshra.s32 %s11480_s26, 3 }
0x362e   :  { %s4486_s3 = scalar_lea.vmem %s11478_s29, %s4485_s5  ;;  %s4503_s7 = sadd.s32 %s8073_s30, %s4500_s21 }
0x362f   :  { %v4487_v56 = vld [vmem:[%s4486_s3] ss:$8 sm:$0x3]  ;;  %s4518_s10 = sand.u32 7, %s11480_s26  ;;  %s4504_s19 = scalar_lea.vmem %s11478_s29, %s4503_s7 }
0x3630   :  { %4489 = vst.msk [vmem:[#allocation4 + $0x11] ss:$8 sm:$0x3] %vm9896_vm0, %v4487_v56  ;;  %s8074_s8 = sshll.u32 %s4515_s17, 4  ;;  %s11481_s28 = sld [smem:[#allocation76_spill]] }
0x3631   :  { %v7296_v40 = vld [vmem:[#allocation7 + $0x10] sm:$0xff]  ;;  %v4505_v47 = vld [vmem:[%s4504_s19] ss:$8 sm:$0x3]  ;;  %s4521_s27 = sadd.s32 %s8074_s8, %s4518_s10  ;;  %s4578_s16 = sshra.s32 %s4575_s25, 3 }
0x3632   :  { %8054 = vmatmul.mubr.msk.f32.gmra.mrb[84].mxu1 %vm4805_vm13, %v7296_v40  ;;  %4507 = vst.msk [vmem:[#allocation4 + $0x12] ss:$8 sm:$0x3] %vm9896_vm0, %v4505_v47  ;;  %s4522_s2 = scalar_lea.vmem %s11478_s29, %s4521_s27  ;;  %s4581_s6 = sand.u32 7, %s4575_s25 }
0x3633   :  { %v4523_v50 = vld [vmem:[%s4522_s2] ss:$8 sm:$0x3]  ;;  %s8075_s0 = sshll.u32 %s4578_s16, 4  ;;  %s4597_s14 = sshra.s32 %s4594_s4, 3 }
0x3634   :  { %4525 = vst.msk [vmem:[#allocation4 + $0x13] ss:$8 sm:$0x3] %vm9896_vm0, %v4523_v50  ;;  %s11482_s12 = sld [smem:[#allocation77_spill]]  ;;  %s4584_s26 = sadd.s32 %s8075_s0, %s4581_s6 }
0x3635   :  { %s4600_s15 = sand.u32 7, %s4594_s4  ;;  %s4585_s20 = scalar_lea.vmem %s11478_s29, %s4584_s26 }
0x3636   :  { %s8076_s23 = sshll.u32 %s4597_s14, 4  ;;  %v4586_v51 = vld [vmem:[%s4585_s20] ss:$8 sm:$0x3]  ;;  %s4613_s18 = sadd.s32 16, %s11481_s28 }
0x3637   :  { %s4603_s9 = sadd.s32 %s8076_s23, %s4600_s15  ;;  %4588 = vst.msk [vmem:[#allocation4 + $0x14] ss:$8 sm:$0x3] %vm9896_vm0, %v4586_v51  ;;  %s4616_s11 = sshra.s32 %s4613_s18, 3 }
0x3638   :  { %s4604_s25 = scalar_lea.vmem %s11478_s29, %s4603_s9  ;;  %s4619_s13 = sand.u32 7, %s4613_s18 }
0x3639   :  { %v4605_v48 = vld [vmem:[%s4604_s25] ss:$8 sm:$0x3]  ;;  %s8077_s5 = sshll.u32 %s4616_s11, 4  ;;  %s11484_s1 = sld [smem:[#allocation79_spill]] }
0x363a   :  { %4607 = vst.msk [vmem:[#allocation4 + $0x15] ss:$8 sm:$0x3] %vm9896_vm0, %v4605_v48  ;;  %s4622_s24 = sadd.s32 %s8077_s5, %s4619_s13  ;;  %s4632_s4 = sadd.s32 16, %s11482_s12 }
0x363b   :  { %s4623_s3 = scalar_lea.vmem %s11478_s29, %s4622_s24  ;;  %s4635_s21 = sshra.s32 %s4632_s4, 3 }
0x363c   :  { %v4624_v53 = vld [vmem:[%s4623_s3] ss:$8 sm:$0x3]  ;;  %s4638_s30 = sand.u32 7, %s4632_s4  ;;  %s8078_s17 = sshll.u32 %s4635_s21, 4 }
0x363d   :  { %4626 = vst.msk [vmem:[#allocation4 + $0x16] ss:$8 sm:$0x3] %vm9896_vm0, %v4624_v53  ;;  %s4641_s7 = sadd.s32 %s8078_s17, %s4638_s30  ;;  %s4651_s10 = sadd.s32 16, %s11483_s22 }
0x363e   :  { %s11485_s19 = sld [smem:[#allocation80_spill]]  ;;  %s4642_s8 = scalar_lea.vmem %s11478_s29, %s4641_s7 }
0x363f   :  { %s4654_s28 = sshra.s32 %s4651_s10, 3  ;;  %v4643_v55 = vld [vmem:[%s4642_s8] ss:$8 sm:$0x3]  ;;  %s4657_s27 = sand.u32 7, %s4651_s10 }
0x3640   :  { %s8079_s16 = sshll.u32 %s4654_s28, 4  ;;  %4645 = vst.msk [vmem:[#allocation4 + $0x17] ss:$8 sm:$0x3] %vm9896_vm0, %v4643_v55  ;;  %s4670_s6 = sadd.s32 16, %s11484_s1 }
0x3641   :  { %s4660_s2 = sadd.s32 %s8079_s16, %s4657_s27  ;;  %s11486_s0 = sld [smem:[#allocation81_spill]] }
0x3642   :  { %s4661_s14 = scalar_lea.vmem %s11478_s29, %s4660_s2  ;;  %s4673_s12 = sshra.s32 %s4670_s6, 3 }
0x3643   :  { %v4662_v60 = vld [vmem:[%s4661_s14] ss:$8 sm:$0x3]  ;;  %s4676_s26 = sand.u32 7, %s4670_s6  ;;  %s8080_s15 = sshll.u32 %s4673_s12, 4 }
0x3644   :  { %4664 = vst.msk [vmem:[#allocation4 + $0x20] ss:$8 sm:$0x3] %vm9896_vm0, %v4662_v60  ;;  %s4679_s20 = sadd.s32 %s8080_s15, %s4676_s26  ;;  %s4689_s23 = sadd.s32 16, %s11485_s19 }
0x3645   :  { %s11487_s9 = sld [smem:[#allocation82_spill]]  ;;  %s4680_s18 = scalar_lea.vmem %s11478_s29, %s4679_s20 }
0x3646   :  { %s4692_s22 = sshra.s32 %s4689_s23, 3  ;;  %v4681_v10 = vld [vmem:[%s4680_s18] ss:$8 sm:$0x3]  ;;  %s4695_s25 = sand.u32 7, %s4689_s23 }
0x3647   :  { %s8081_s11 = sshll.u32 %s4692_s22, 4  ;;  %4683 = vst.msk [vmem:[#allocation4 + $0x21] ss:$8 sm:$0x3] %vm9896_vm0, %v4681_v10  ;;  %s4708_s5 = sadd.s32 16, %s11486_s0  ;;  %v7409_v25 = vld [vmem:[#allocation4 + $0x10] sm:$0xff] }
0x3648   :  { %s4698_s13 = sadd.s32 %s8081_s11, %s4695_s25  ;;  %s11488_s24 = sld [smem:[#allocation83_spill]]  ;;  %v7410_v8 = vld [vmem:[#allocation4 + $0x18] sm:$0xff] }
0x3649   :  { %s4699_s4 = scalar_lea.vmem %s11478_s29, %s4698_s13  ;;  %s4711_s1 = sshra.s32 %s4708_s5, 3 }
0x364a   :  { %v4700_v52 = vld [vmem:[%s4699_s4] ss:$8 sm:$0x3]  ;;  %s4714_s3 = sand.u32 7, %s4708_s5  ;;  %s8082_s21 = sshll.u32 %s4711_s1, 4 }
0x364b   :  { %4702 = vst.msk [vmem:[#allocation4 + $0x22] ss:$8 sm:$0x3] %vm9896_vm0, %v4700_v52  ;;  %s4717_s30 = sadd.s32 %s8082_s21, %s4714_s3  ;;  %s4727_s17 = sadd.s32 16, %s11487_s9 }
0x364c   :  { %s11489_s7 = sld [smem:[#allocation84_spill]]  ;;  %s4718_s10 = scalar_lea.vmem %s11478_s29, %s4717_s30 }
0x364d   :  { %s4730_s19 = sshra.s32 %s4727_s17, 3  ;;  %v4719_v61 = vld [vmem:[%s4718_s10] ss:$8 sm:$0x3]  ;;  %s4733_s8 = sand.u32 7, %s4727_s17 }
0x364e   :  { %s8083_s28 = sshll.u32 %s4730_s19, 4  ;;  %4721 = vst.msk [vmem:[#allocation4 + $0x23] ss:$8 sm:$0x3] %vm9896_vm0, %v4719_v61  ;;  %s4746_s16 = sadd.s32 16, %s11488_s24 }
0x364f   :  { %s4736_s27 = sadd.s32 %s8083_s28, %s4733_s8  ;;  %s11490_s2 = sld [smem:[#allocation85_spill]] }
0x3650   :  { %s4737_s6 = scalar_lea.vmem %s11478_s29, %s4736_s27  ;;  %s4749_s0 = sshra.s32 %s4746_s16, 3 }
0x3651   :  { %v4738_v4 = vld [vmem:[%s4737_s6] ss:$8 sm:$0x3]  ;;  %s4752_s14 = sand.u32 7, %s4746_s16  ;;  %s8084_s12 = sshll.u32 %s4749_s0, 4 }
0x3652   :  { %4740 = vst.msk [vmem:[#allocation4 + $0x24] ss:$8 sm:$0x3] %vm9896_vm0, %v4738_v4  ;;  %s4755_s26 = sadd.s32 %s8084_s12, %s4752_s14  ;;  %s4765_s15 = sadd.s32 16, %s11489_s7 }
0x3653   :  { %s4756_s20 = scalar_lea.vmem %s11478_s29, %s4755_s26  ;;  %s4768_s23 = sshra.s32 %s4765_s15, 3 }
0x3654   :  { %v4757_v17 = vld [vmem:[%s4756_s20] ss:$8 sm:$0x3]  ;;  %s11491_s9 = sld [smem:[#allocation64_spill]]  ;;  %s4771_s18 = sand.u32 7, %s4765_s15 }
0x3655   :  { %s8085_s22 = sshll.u32 %s4768_s23, 4  ;;  %4759 = vst.msk [vmem:[#allocation4 + $0x25] ss:$8 sm:$0x3] %vm9896_vm0, %v4757_v17  ;;  %s4784_s11 = sadd.s32 16, %s11490_s2 }
0x3656   :  { %s4774_s25 = sadd.s32 %s8085_s22, %s4771_s18  ;;  %s4787_s5 = sshra.s32 %s4784_s11, 3 }
0x3657   :  { %s4775_s13 = scalar_lea.vmem %s11478_s29, %s4774_s25  ;;  %s4790_s24 = sand.u32 7, %s4784_s11 }
0x3658   :  { %v4776_v62 = vld [vmem:[%s4775_s13] ss:$8 sm:$0x3]  ;;  %s8086_s4 = sshll.u32 %s4787_s5, 4 }
0x3659   :  { %4778 = vst.msk [vmem:[#allocation4 + $0x26] ss:$8 sm:$0x3] %vm9896_vm0, %v4776_v62  ;;  %s4793_s1 = sadd.s32 %s8086_s4, %s4790_s24 }
0x365a   :  { %s4794_s3 = scalar_lea.vmem %s11478_s29, %s4793_s1  ;;  %v7303_v5 = vld [vmem:[%s11491_s9] sm:$0x3]  ;;  %s9594_s29 = smov [#allocation23]  }
0x365b   :  { %v4795_v3 = vld [vmem:[%s4794_s3] ss:$8 sm:$0x3]  ;;  %v7308_v6 = vrot.slane %v7303_v5, %v9973_v63  ;;  %v7312_v12 = vrot.slane %v7303_v5, %v9975_v2  ;;  %s7454_s21 = sshll.u32 %s9594_s29, 4  ;;  %s7455_s21 = int_to_ptr.vmem [resolvable:$true] %s7454_s21 }
0x365c   :  { %4797 = vst.msk [vmem:[#allocation4 + $0x27] ss:$8 sm:$0x3] %vm9896_vm0, %v4795_v3  ;;  %vm7446_vm0 = vcmask 0   ;;  %s9483_s30 = scalar_lea.vmem %s7455_s21, 16  ;;  %s9487_s17 = scalar_lea.vmem %s7455_s21, 32 }
0x365d   :  { %p9484_p2 = scmp.ne.s32.totalorder %s7455_s21, %s9483_s30  ;;  %p9488_p3 = scmp.lt.s32.totalorder %s7455_s21, %s7455_s21 }
0x365e   :  { %p9489_p4 = scmp.lt.s32.totalorder %s9487_s17, %s9483_s30 }
0x3660   :  { %p9490_p5 = por %p9489_p4, %p9488_p3 }
0x3662   :  { %p9491_p6 = pnand %p9490_p5, %p9484_p2 }
0x3663   :  { %v7411_v2 = vld [vmem:[#allocation4 + $0x20] sm:$0xff]  ;;  %v7412_v34 = vld [vmem:[#allocation4 + $0x28] sm:$0xff] }
0x36fa   :  { %v7390_v0 = vpop.f32.mrb[80].mxu1 }
0x36fb   :  { %v7391_v14 = vadd.f32 %v7390_v0, %v7308_v6  ;;  %v7392_v15 = vpop.f32.mrb[81].mxu1 }
0x36fc   :  { %v7393_v44 = vadd.f32 %v7392_v15, %v7312_v12 }
0x36fd   :  { %v7413_v18 = vsub.f32 %v7391_v14, %v7407_v13 }
0x36fe   :  { %v7414_v23 = vsub.f32 %v7393_v44, %v7408_v16  ;;  %v7396_v24 = vpop.f32.mrb[82].mxu1 }
0x36ff   :  { %v7397_v43 = vadd.f32 %v7396_v24, %v7308_v6  ;;  %v7398_v19 = vpop.f32.mrb[83].mxu1  ;;  %v7419_v20 = vmul.f32 %v7413_v18, %v7413_v18 }
0x3700   :  { %v7420_v1 = vmul.f32 %v7414_v23, %v7414_v23  ;;  %v7399_v22 = vadd.f32 %v7398_v19, %v7312_v12 }
0x3701   :  { %v7415_v28 = vsub.f32 %v7397_v43, %v7409_v25 }
0x3702   :  { %v7416_v63 = vsub.f32 %v7399_v22, %v7410_v8  ;;  %v7425_v29 = vsel %vm438_vm1, %v7420_v1, 0.0 }
0x3703   :  { %v7426_v7 = vadd.f32 %v7425_v29, %v7419_v20  ;;  %v7421_v32 = vmul.f32 %v7415_v28, %v7415_v28 }
0x3704   :  { %v7422_v31 = vmul.f32 %v7416_v63, %v7416_v63 }
0x3705   :  { %v7402_v27 = vpop.f32.mrb[84].mxu1  ;;  %7427 = vadd.xlane.f32.xlu0 %v7426_v7 }
0x3706   :  { %v7403_v26 = vadd.f32 %v7402_v27, %v7308_v6  ;;  %v7404_v9 = vpop.f32.mrb[85].mxu1  ;;  %v7429_v30 = vsel %vm438_vm1, %v7422_v31, 0.0 }
0x3707   :  { %v7405_v58 = vadd.f32 %v7404_v9, %v7312_v12  ;;  %v7430_v36 = vadd.f32 %v7429_v30, %v7421_v32 }
0x3708   :  { %v7417_v21 = vsub.f32 %v7403_v26, %v7411_v2 }
0x3709   :  { %v7418_v59 = vsub.f32 %v7405_v58, %v7412_v34  ;;  %7431 = vadd.xlane.f32.xlu1 %v7430_v36 }
0x370a   :  { %v7423_v45 = vmul.f32 %v7417_v21, %v7417_v21 }
0x370b   :  { %v7424_v42 = vmul.f32 %v7418_v59, %v7418_v59 }
0x370d   :  { %v7433_v46 = vsel %vm438_vm1, %v7424_v42, 0.0 }
0x370e   :  { %v7434_v37 = vadd.f32 %v7433_v46, %v7423_v45 }
0x3710   :  { %7435 = vadd.xlane.f32.xlu0 %v7434_v37 }
0x3792   :  { %v7428_v38 = vpop.xlane.xlu0 %7427 }
0x3796   :  { %v7432_v39 = vpop.xlane.xlu1 %7431 }
0x3797   :  { %v7437_v35 = vadd.f32 %v7432_v39, %v7428_v38 }
0x379d   :  { %v7436_v57 = vpop.xlane.xlu0 %7435 }
0x379e   :  { %v7438_v33 = vadd.f32 %v7437_v35, %v7436_v57 }
0x37a0   :  { %v7439_v54 = vrot.slane %v7438_v33, 4 }
0x37a2   :  { %v7440_v49 = vadd.f32 %v7439_v54, %v7438_v33 }
0x37a4   :  { %v7441_v11 = vrot.slane %v7440_v49, 2 }
0x37a6   :  { %v7442_v40 = vadd.f32 %v7441_v11, %v7440_v49 }
0x37a8   :  { %v7443_v41 = vrot.slane %v7442_v40, 1 }
0x37aa   :  { %v7444_v56 = vadd.f32 %v7443_v41, %v7442_v40 }
0x37ac   :  { %v7445_v47 = vmul.f32 0.00021701389, %v7444_v56 }
0x37ae   :  { %7447 = vst.msk [vmem:[#allocation23] sm:$0x1] %vm7446_vm0, %v7445_v47 }
0x37af   :  { %9494 = shalt.err (!%p9491_p6)
}
0x37b0   :  { %s11492_s7 = sld [smem:[#allocation65_spill]] }
0x37b6   :  { %s9495_s10 = scalar_lea.hbm %s11492_s7, 16 }
0x37b7   :  { %p9496_p7 = scmp.ne.s32.totalorder %s11492_s7, %s9495_s10  ;;  %p9499_p8 = scmp.lt.u32.totalorder %s9495_s10, %s11492_s7 }
0x37b9   :  { %p9501_p9 = pnand %p9499_p8, %p9496_p7 }
0x37bb   :  { %9504 = shalt.err (!%p9501_p9)
}
0x37bc   :  { %7457 = dma.vmem_to_hbm [thread:$0]  %s7455_s21, 16, %s11492_s7, [#allocation10]  }
0x37bd   :  { %9517 = dma.done.wait [#allocation10], 16  }
0x37be   :  { %9518 = vsyncadd [#allocation10], 4294967280 }
0x37bf   :  { %7461 = vsyncpa [#allocation9], 1 }
0x37c0   :  { %7462 = vsyncpa [#allocation16], 1 }
0x37c1   :  { %7463 = vsyncpa [#allocation19], 1 }
0x37c2   :  { %7464 = vsyncpa [#allocation22], 1 }
0x37c3   :  { %7465 = vsyncpa [#allocation10], 1 }
0x37c4   :  { %7466 = vsyncpa [#allocation11], 1 }
0x37c5   :  { %7467 = vsyncpa [#allocation13], 1 }

</bundles_post_ra>
